<compile_context>
chip_gen: v7x
topology: tpu7x:2x2x1
jax: 0.10.0
libtpu: 0.0.40
codegen_flags: <defaults>
</compile_context>

<pallas_src>
import functools

import jax
import jax.numpy as jnp
from jax.experimental import pallas as pl
from jax.experimental.pallas import tpu as pltpu


def _round_up(x, m):
    return (x + m - 1) // m * m


# --------------------------- Pallas kernels ---------------------------------

def _matmul_bias_act_kernel(x_ref, w_ref, b_ref, o_ref, *, act, sig_lo, sig_hi):
    y = jnp.dot(x_ref[...], w_ref[...], preferred_element_type=jnp.float32)
    y = y + b_ref[...]
    if act == "elu":            # ELU(alpha=1): x if x>0 else exp(x)-1
        y = jnp.where(y > 0.0, y, jnp.exp(jnp.minimum(y, 0.0)) - 1.0)
    elif act == "relu":
        y = jnp.maximum(y, 0.0)
    elif act == "sigmoid":
        y = 1.0 / (1.0 + jnp.exp(-y))
    elif act == "sigmoid_slice":    # sigmoid only on columns [sig_lo, sig_hi)
        col = jax.lax.broadcasted_iota(jnp.int32, y.shape, dimension=1)
        sig = 1.0 / (1.0 + jnp.exp(-y))
        y = jnp.where((col >= sig_lo) & (col < sig_hi), sig, y)
    o_ref[...] = y.astype(o_ref.dtype)


def matmul_bias_act(x, w, b, act="none", out_dtype=jnp.float32, sig_lo=0, sig_hi=0):
    """y = act(x @ w + b) via a Pallas TPU kernel.  x:(M,K) w:(K,N) b:(N,)."""
    M, K = x.shape
    K2, N = w.shape
    assert K == K2
    # Big M-tile for HBM-roofline; keep >=2 grid steps on mid-size layers so the
    # grid shards across both v7x TensorCores.  16-row multiples cover bf16 tiling.
    tm = min(1024, _round_up(M, 16))
    if M > 256 and _round_up(M, tm) // tm < 2:
        tm = _round_up((M + 1) // 2, 16)
    Mp = _round_up(M, tm)
    if Mp != M:
        x = jnp.pad(x, ((0, Mp - M), (0, 0)))
    b2 = b.reshape(1, N).astype(jnp.float32)
    out = pl.pallas_call(
        functools.partial(_matmul_bias_act_kernel, act=act, sig_lo=sig_lo, sig_hi=sig_hi),
        out_shape=jax.ShapeDtypeStruct((Mp, N), out_dtype),
        grid_spec=pltpu.PrefetchScalarGridSpec(
            num_scalar_prefetch=0,
            grid=(Mp // tm,),
            in_specs=[
                pl.BlockSpec((tm, K), lambda i: (i, 0)),
                pl.BlockSpec((K, N), lambda i: (0, 0)),
                pl.BlockSpec((1, N), lambda i: (0, 0)),
            ],
            out_specs=pl.BlockSpec((tm, N), lambda i: (i, 0)),
        ),
        compiler_params=pltpu.CompilerParams(dimension_semantics=("parallel",)),
    )(x, w, b2)
    return out[:M]


def _maxpool3_kernel(x_ref, o_ref):
    # x_ref block: (tn, 3, Wp, 3*C)  ->  o_ref block: (tn, Wp, C)
    v = x_ref[...]
    v = jnp.maximum(jnp.maximum(v[:, 0], v[:, 1]), v[:, 2])          # 3 window rows
    C = o_ref.shape[-1]
    v = jnp.maximum(jnp.maximum(v[..., 0:C], v[..., C:2 * C]), v[..., 2 * C:3 * C])
    o_ref[...] = v.astype(o_ref.dtype)


def maxpool2d_3x3(x):
    """MaxPool2d(kernel=3, stride=3), floor mode, NHWC, no XLA transpose."""
    B, H, W, C = x.shape
    Hp, Wp = H // 3, W // 3
    xc = x[:, : Hp * 3, : Wp * 3, :]
    # Pure (bitcast) reshape: element (b, 3hp+i, 3wp+j, c) -> (b*Hp+hp, i, wp, j*C+c)
    xr = xc.reshape(B * Hp, 3, Wp, 3 * C)
    N = B * Hp
    tn = min(32, _round_up(N, 8))
    Np = _round_up(N, tn)
    if Np != N:
        xr = jnp.pad(xr, ((0, Np - N), (0, 0), (0, 0), (0, 0)))
    out = pl.pallas_call(
        _maxpool3_kernel,
        out_shape=jax.ShapeDtypeStruct((Np, Wp, C), x.dtype),
        grid_spec=pltpu.PrefetchScalarGridSpec(
            num_scalar_prefetch=0,
            grid=(Np // tn,),
            in_specs=[pl.BlockSpec((tn, 3, Wp, 3 * C), lambda i: (i, 0, 0, 0))],
            out_specs=pl.BlockSpec((tn, Wp, C), lambda i: (i, 0, 0)),
        ),
        compiler_params=pltpu.CompilerParams(dimension_semantics=("parallel",)),
    )(xr)
    return out[:N].reshape(B, Hp, Wp, C)


# --------------------------- JAX glue (layout only) --------------------------

def conv2d_elu(x, w_mat, b, kh, kw, stride):
    """Valid Conv2d + ELU.  x:(B,H,W,Cin) NHWC, w_mat:(kh*kw*Cin, Cout)."""
    B, H, W, Cin = x.shape
    Ho = (H - kh) // stride + 1
    Wo = (W - kw) // stride + 1
    xb = x.astype(jnp.bfloat16)          # bf16 patches: half the HBM traffic
    slices = []
    for ih in range(kh):
        for iw in range(kw):
            slices.append(
                jax.lax.slice(
                    xb,
                    (0, ih, iw, 0),
                    (B, ih + stride * (Ho - 1) + 1, iw + stride * (Wo - 1) + 1, Cin),
                    (1, stride, stride, 1),
                )
            )
    patches = jnp.stack(slices, axis=3)                 # (B,Ho,Wo,kh*kw,Cin) bf16
    patches = patches.reshape(B * Ho * Wo, kh * kw * Cin)
    y = matmul_bias_act(patches, w_mat.astype(jnp.bfloat16), b,
                        act="elu", out_dtype=jnp.bfloat16)
    return y.reshape(B, Ho, Wo, w_mat.shape[1])


# --------------------------- model ------------------------------------------

def _conv_out(n, k, s):
    return (n - k) // s + 1


def init_params(key, state_dim, action_dim, option_dim, hidden_size):
    cin, H, W = state_dim
    assert cin == 4
    keys = jax.random.split(key, 8)

    def dense(k, fan_in, fan_out):
        s = 1.0 / jnp.sqrt(jnp.float32(fan_in))
        w = jax.random.uniform(k, (fan_in, fan_out), jnp.float32, -s, s)
        return w, jnp.zeros((fan_out,), jnp.float32)

    def conv(k, kh, kw, ci, co):
        fan_in = kh * kw * ci
        s = 1.0 / jnp.sqrt(jnp.float32(fan_in))
        w = jax.random.uniform(k, (kh, kw, ci, co), jnp.float32, -s, s)
        return w.reshape(fan_in, co), jnp.zeros((co,), jnp.float32)

    p = {}
    p["c1_w"], p["c1_b"] = conv(keys[0], 8, 8, 4, 32)
    p["c2_w"], p["c2_b"] = conv(keys[1], 4, 4, 32, 64)
    p["c3_w"], p["c3_b"] = conv(keys[2], 3, 3, 64, 64)

    # replicate the PyTorch "probe with zeros" size computation analytically
    h, w = H, W
    h, w = _conv_out(h, 8, 2), _conv_out(w, 8, 2); h, w = h // 3, w // 3
    h, w = _conv_out(h, 4, 2), _conv_out(w, 4, 2); h, w = h // 3, w // 3
    h, w = _conv_out(h, 3, 1), _conv_out(w, 3, 1); h, w = h // 3, w // 3
    size = 64 * h * w

    ab_w, ab_b = dense(keys[3], size, hidden_size)
    al_w, al_b = dense(keys[4], hidden_size, action_dim * option_dim)
    bl_w, bl_b = dense(keys[5], hidden_size, option_dim)
    v1_w, v1_b = dense(keys[6], size, hidden_size)
    v2_w, v2_b = dense(keys[7], hidden_size, option_dim)

    # Merged heads (identical math, fewer pallas_calls):
    #   stage 1: x @ [ab_w | v1_w] + [ab_b ; v1_b], ReLU  -> h = [actor | v_hidden]
    #   stage 2: h @ block-diag([al_w | bl_w ; v2_w])     -> [logits | beta_pre | values]
    hs, AO, O = hidden_size, action_dim * option_dim, option_dim
    p["h1_w"] = jnp.concatenate([ab_w, v1_w], axis=1)          # (size, 2*hidden)
    p["h1_b"] = jnp.concatenate([ab_b, v1_b])
    w2 = jnp.zeros((2 * hs, AO + 2 * O), jnp.float32)
    w2 = w2.at[:hs, :AO].set(al_w)
    w2 = w2.at[:hs, AO:AO + O].set(bl_w)
    w2 = w2.at[hs:, AO + O:].set(v2_w)
    p["h2_w"] = w2
    p["h2_b"] = jnp.concatenate([al_b, bl_b, v2_b])
    return p


def forward(params, x_nchw, *, action_dim, option_dim):
    # NCHW (PyTorch convention) -> NHWC for the TPU pipeline
    x = jnp.transpose(x_nchw, (0, 2, 3, 1)).astype(jnp.float32)

    x = conv2d_elu(x, params["c1_w"], params["c1_b"], 8, 8, 2)
    x = maxpool2d_3x3(x)
    x = conv2d_elu(x, params["c2_w"], params["c2_b"], 4, 4, 2)
    x = maxpool2d_3x3(x)
    x = conv2d_elu(x, params["c3_w"], params["c3_b"], 3, 3, 1)
    x = maxpool2d_3x3(x)

    # Flatten matching PyTorch's NCHW flatten order
    B = x.shape[0]
    x = jnp.transpose(x, (0, 3, 1, 2)).reshape(B, -1).astype(jnp.float32)

    AO = action_dim * option_dim
    O = option_dim
    h = matmul_bias_act(x, params["h1_w"], params["h1_b"], act="relu")   # [actor | v_hidden]
    out2 = matmul_bias_act(h, params["h2_w"], params["h2_b"],
                           act="sigmoid_slice", sig_lo=AO, sig_hi=AO + O)
    policy_logits = out2[:, :AO].reshape(-1, option_dim, action_dim)
    betas = out2[:, AO:AO + O]
    values = out2[:, AO + O:]
    return policy_logits, betas, values


if __name__ == "__main__":
    # 198 is the smallest spatial extent that survives this conv/pool stack.
    state_dim = (4, 198, 198)
    action_dim, option_dim, hidden_size = 6, 4, 128
    batch = 2

    key = jax.random.PRNGKey(0)
    kp, kx = jax.random.split(key)
    params = init_params(kp, state_dim, action_dim, option_dim, hidden_size)
    x = jax.random.normal(kx, (batch,) + state_dim, dtype=jnp.float32)

    fwd = jax.jit(functools.partial(forward, action_dim=action_dim, option_dim=option_dim))
    policy_logits, betas, values = fwd(params, x)
    (policy_logits, betas, values) = jax.block_until_ready((policy_logits, betas, values))

    assert policy_logits.shape == (batch, option_dim, action_dim)
    assert betas.shape == (batch, option_dim)
    assert values.shape == (batch, option_dim)
    assert bool(jnp.all(jnp.isfinite(policy_logits)))
    assert bool(jnp.all((betas >= 0.0) & (betas <= 1.0)))
    print("KERNEL_OK")
</pallas_src>

<mosaic_0001>
module attributes {stable_mosaic.version = 11 : i64} {
  func.func @_matmul_bias_act_kernel(%arg0: i32, %arg1: memref<1024x256xbf16, #tpu.memory_space<vmem>>, %arg2: memref<256x32xbf16, #tpu.memory_space<vmem>>, %arg3: memref<1x32xf32, #tpu.memory_space<vmem>>, %arg4: memref<1024x32xbf16, #tpu.memory_space<vmem>>) attributes {dimension_semantics = [#tpu.dimension_semantics<parallel>], iteration_bounds = array<i64: 18>, scalar_prefetch = 0 : i64, scratch_operands = 0 : i64, tpu.core_type = #tpu.core_type<tc>, window_params = [{transform_indices = @transform_0, window_bounds = array<i64: 1024, 256>}, {pipeline_mode = #tpu.pipeline_mode<synchronous>, transform_indices = @transform_1, window_bounds = array<i64: 256, 32>}, {pipeline_mode = #tpu.pipeline_mode<synchronous>, transform_indices = @transform_2, window_bounds = array<i64: 1, 32>}, {transform_indices = @transform_3, window_bounds = array<i64: 1024, 32>}]} {
    %c0 = arith.constant 0 : index
    %c0_0 = arith.constant 0 : index
    %0 = vector.load %arg1[%c0, %c0_0] : memref<1024x256xbf16, #tpu.memory_space<vmem>>, vector<1024x256xbf16>
    %c0_1 = arith.constant 0 : index
    %c0_2 = arith.constant 0 : index
    %1 = vector.load %arg2[%c0_1, %c0_2] : memref<256x32xbf16, #tpu.memory_space<vmem>>, vector<256x32xbf16>
    %cst = arith.constant dense<0.000000e+00> : vector<1024x32xf32>
    %2 = tpu.matmul %0, %1, %cst {dimension_numbers = #tpu.dot_dimension_numbers<[1], [0], [0], [1], [0, 0, 1, 1], [], []>} : vector<1024x256xbf16>, vector<256x32xbf16>, vector<1024x32xf32> -> vector<1024x32xf32>
    %c0_3 = arith.constant 0 : index
    %c0_4 = arith.constant 0 : index
    %3 = vector.load %arg3[%c0_3, %c0_4] : memref<1x32xf32, #tpu.memory_space<vmem>>, vector<1x32xf32>
    %4 = vector.broadcast %3 : vector<1x32xf32> to vector<1024x32xf32>
    %5 = arith.addf %2, %4 : vector<1024x32xf32>
    %cst_5 = arith.constant 0.000000e+00 : f32
    %6 = vector.broadcast %cst_5 : f32 to vector<1024x32xf32>
    %7 = arith.cmpf ogt, %5, %6 : vector<1024x32xf32>
    %cst_6 = arith.constant 0.000000e+00 : f32
    %8 = vector.broadcast %cst_6 : f32 to vector<1024x32xf32>
    %9 = arith.minimumf %5, %8 : vector<1024x32xf32>
    %10 = math.exp %9 : vector<1024x32xf32>
    %cst_7 = arith.constant 1.000000e+00 : f32
    %11 = vector.broadcast %cst_7 : f32 to vector<1024x32xf32>
    %12 = arith.subf %10, %11 : vector<1024x32xf32>
    %13 = arith.select %7, %5, %12 : vector<1024x32xi1>, vector<1024x32xf32>
    %14 = arith.truncf %13 : vector<1024x32xf32> to vector<1024x32xbf16>
    %c0_8 = arith.constant 0 : index
    %c0_9 = arith.constant 0 : index
    %15 = vector.load %arg4[%c0_8, %c0_9] : memref<1024x32xbf16, #tpu.memory_space<vmem>>, vector<1024x32xbf16>
    tpu.vector_store %arg4[%c0_8, %c0_9], %14 {strides = array<i32>} : memref<1024x32xbf16, #tpu.memory_space<vmem>>, vector<1024x32xbf16>,
    return
  }
  func.func @transform_0(%arg0: i32) -> (i32, i32) {
    %c0_i32 = arith.constant 0 : i32
    %c0_i32_0 = arith.constant 0 : i32
    return %arg0, %c0_i32 : i32, i32
  }
  func.func @transform_1(%arg0: i32) -> (i32, i32) {
    %c0_i32 = arith.constant 0 : i32
    %c0_i32_0 = arith.constant 0 : i32
    %c0_i32_1 = arith.constant 0 : i32
    return %c0_i32, %c0_i32_0 : i32, i32
  }
  func.func @transform_2(%arg0: i32) -> (i32, i32) {
    %c0_i32 = arith.constant 0 : i32
    %c0_i32_0 = arith.constant 0 : i32
    %c0_i32_1 = arith.constant 0 : i32
    return %c0_i32, %c0_i32_0 : i32, i32
  }
  func.func @transform_3(%arg0: i32) -> (i32, i32) {
    %c0_i32 = arith.constant 0 : i32
    %c0_i32_0 = arith.constant 0 : i32
    return %arg0, %c0_i32 : i32, i32
  }
}

module attributes {stable_mosaic.version = 11 : i64} {
  func.func @_maxpool3_kernel(%arg0: i32, %arg1: memref<32x3x32x96xbf16, #tpu.memory_space<vmem>>, %arg2: memref<32x32x32xbf16, #tpu.memory_space<vmem>>) attributes {dimension_semantics = [#tpu.dimension_semantics<parallel>], iteration_bounds = array<i64: 2>, scalar_prefetch = 0 : i64, scratch_operands = 0 : i64, tpu.core_type = #tpu.core_type<tc>, window_params = [{transform_indices = @transform_0, window_bounds = array<i64: 32, 3, 32, 96>}, {transform_indices = @transform_1, window_bounds = array<i64: 32, 32, 32>}]} {
    %c0 = arith.constant 0 : index
    %c0_0 = arith.constant 0 : index
    %c0_1 = arith.constant 0 : index
    %c0_2 = arith.constant 0 : index
    %0 = vector.load %arg1[%c0, %c0_0, %c0_1, %c0_2] : memref<32x3x32x96xbf16, #tpu.memory_space<vmem>>, vector<32x3x32x96xbf16>
    %1 = vector.extract_strided_slice %0 {offsets = [0, 0, 0, 0], sizes = [32, 1, 32, 96], strides = [1, 1, 1, 1]} : vector<32x3x32x96xbf16> to vector<32x1x32x96xbf16>
    %2 = vector.shape_cast %1 : vector<32x1x32x96xbf16> to vector<32x32x96xbf16>
    %3 = vector.extract_strided_slice %0 {offsets = [0, 1, 0, 0], sizes = [32, 1, 32, 96], strides = [1, 1, 1, 1]} : vector<32x3x32x96xbf16> to vector<32x1x32x96xbf16>
    %4 = vector.shape_cast %3 : vector<32x1x32x96xbf16> to vector<32x32x96xbf16>
    %5 = arith.maximumf %2, %4 : vector<32x32x96xbf16>
    %6 = vector.extract_strided_slice %0 {offsets = [0, 2, 0, 0], sizes = [32, 1, 32, 96], strides = [1, 1, 1, 1]} : vector<32x3x32x96xbf16> to vector<32x1x32x96xbf16>
    %7 = vector.shape_cast %6 : vector<32x1x32x96xbf16> to vector<32x32x96xbf16>
    %8 = arith.maximumf %5, %7 : vector<32x32x96xbf16>
    %9 = vector.extract_strided_slice %8 {offsets = [0, 0, 0], sizes = [32, 32, 32], strides = [1, 1, 1]} : vector<32x32x96xbf16> to vector<32x32x32xbf16>
    %10 = vector.extract_strided_slice %8 {offsets = [0, 0, 32], sizes = [32, 32, 32], strides = [1, 1, 1]} : vector<32x32x96xbf16> to vector<32x32x32xbf16>
    %11 = arith.maximumf %9, %10 : vector<32x32x32xbf16>
    %12 = vector.extract_strided_slice %8 {offsets = [0, 0, 64], sizes = [32, 32, 32], strides = [1, 1, 1]} : vector<32x32x96xbf16> to vector<32x32x32xbf16>
    %13 = arith.maximumf %11, %12 : vector<32x32x32xbf16>
    %c0_3 = arith.constant 0 : index
    %c0_4 = arith.constant 0 : index
    %c0_5 = arith.constant 0 : index
    %14 = vector.load %arg2[%c0_3, %c0_4, %c0_5] : memref<32x32x32xbf16, #tpu.memory_space<vmem>>, vector<32x32x32xbf16>
    tpu.vector_store %arg2[%c0_3, %c0_4, %c0_5], %13 {strides = array<i32>} : memref<32x32x32xbf16, #tpu.memory_space<vmem>>, vector<32x32x32xbf16>,
    return
  }
  func.func @transform_0(%arg0: i32) -> (i32, i32, i32, i32) {
    %c0_i32 = arith.constant 0 : i32
    %c0_i32_0 = arith.constant 0 : i32
    %c0_i32_1 = arith.constant 0 : i32
    %c0_i32_2 = arith.constant 0 : i32
    return %arg0, %c0_i32, %c0_i32_0, %c0_i32_1 : i32, i32, i32, i32
  }
  func.func @transform_1(%arg0: i32) -> (i32, i32, i32) {
    %c0_i32 = arith.constant 0 : i32
    %c0_i32_0 = arith.constant 0 : i32
    %c0_i32_1 = arith.constant 0 : i32
    return %arg0, %c0_i32, %c0_i32_0 : i32, i32, i32
  }
}

module attributes {stable_mosaic.version = 11 : i64} {
  func.func @_matmul_bias_act_kernel(%arg0: i32, %arg1: memref<240x512xbf16, #tpu.memory_space<vmem>>, %arg2: memref<512x64xbf16, #tpu.memory_space<vmem>>, %arg3: memref<1x64xf32, #tpu.memory_space<vmem>>, %arg4: memref<240x64xbf16, #tpu.memory_space<vmem>>) attributes {dimension_semantics = [#tpu.dimension_semantics<parallel>], iteration_bounds = array<i64: 2>, scalar_prefetch = 0 : i64, scratch_operands = 0 : i64, tpu.core_type = #tpu.core_type<tc>, window_params = [{transform_indices = @transform_0, window_bounds = array<i64: 240, 512>}, {pipeline_mode = #tpu.pipeline_mode<synchronous>, transform_indices = @transform_1, window_bounds = array<i64: 512, 64>}, {pipeline_mode = #tpu.pipeline_mode<synchronous>, transform_indices = @transform_2, window_bounds = array<i64: 1, 64>}, {transform_indices = @transform_3, window_bounds = array<i64: 240, 64>}]} {
    %c0 = arith.constant 0 : index
    %c0_0 = arith.constant 0 : index
    %0 = vector.load %arg1[%c0, %c0_0] : memref<240x512xbf16, #tpu.memory_space<vmem>>, vector<240x512xbf16>
    %c0_1 = arith.constant 0 : index
    %c0_2 = arith.constant 0 : index
    %1 = vector.load %arg2[%c0_1, %c0_2] : memref<512x64xbf16, #tpu.memory_space<vmem>>, vector<512x64xbf16>
    %cst = arith.constant dense<0.000000e+00> : vector<240x64xf32>
    %2 = tpu.matmul %0, %1, %cst {dimension_numbers = #tpu.dot_dimension_numbers<[1], [0], [0], [1], [0, 0, 1, 1], [], []>} : vector<240x512xbf16>, vector<512x64xbf16>, vector<240x64xf32> -> vector<240x64xf32>
    %c0_3 = arith.constant 0 : index
    %c0_4 = arith.constant 0 : index
    %3 = vector.load %arg3[%c0_3, %c0_4] : memref<1x64xf32, #tpu.memory_space<vmem>>, vector<1x64xf32>
    %4 = vector.broadcast %3 : vector<1x64xf32> to vector<240x64xf32>
    %5 = arith.addf %2, %4 : vector<240x64xf32>
    %cst_5 = arith.constant 0.000000e+00 : f32
    %6 = vector.broadcast %cst_5 : f32 to vector<240x64xf32>
    %7 = arith.cmpf ogt, %5, %6 : vector<240x64xf32>
    %cst_6 = arith.constant 0.000000e+00 : f32
    %8 = vector.broadcast %cst_6 : f32 to vector<240x64xf32>
    %9 = arith.minimumf %5, %8 : vector<240x64xf32>
    %10 = math.exp %9 : vector<240x64xf32>
    %cst_7 = arith.constant 1.000000e+00 : f32
    %11 = vector.broadcast %cst_7 : f32 to vector<240x64xf32>
    %12 = arith.subf %10, %11 : vector<240x64xf32>
    %13 = arith.select %7, %5, %12 : vector<240x64xi1>, vector<240x64xf32>
    %14 = arith.truncf %13 : vector<240x64xf32> to vector<240x64xbf16>
    %c0_8 = arith.constant 0 : index
    %c0_9 = arith.constant 0 : index
    %15 = vector.load %arg4[%c0_8, %c0_9] : memref<240x64xbf16, #tpu.memory_space<vmem>>, vector<240x64xbf16>
    tpu.vector_store %arg4[%c0_8, %c0_9], %14 {strides = array<i32>} : memref<240x64xbf16, #tpu.memory_space<vmem>>, vector<240x64xbf16>,
    return
  }
  func.func @transform_0(%arg0: i32) -> (i32, i32) {
    %c0_i32 = arith.constant 0 : i32
    %c0_i32_0 = arith.constant 0 : i32
    return %arg0, %c0_i32 : i32, i32
  }
  func.func @transform_1(%arg0: i32) -> (i32, i32) {
    %c0_i32 = arith.constant 0 : i32
    %c0_i32_0 = arith.constant 0 : i32
    %c0_i32_1 = arith.constant 0 : i32
    return %c0_i32, %c0_i32_0 : i32, i32
  }
  func.func @transform_2(%arg0: i32) -> (i32, i32) {
    %c0_i32 = arith.constant 0 : i32
    %c0_i32_0 = arith.constant 0 : i32
    %c0_i32_1 = arith.constant 0 : i32
    return %c0_i32, %c0_i32_0 : i32, i32
  }
  func.func @transform_3(%arg0: i32) -> (i32, i32) {
    %c0_i32 = arith.constant 0 : i32
    %c0_i32_0 = arith.constant 0 : i32
    return %arg0, %c0_i32 : i32, i32
  }
}

module attributes {stable_mosaic.version = 11 : i64} {
  func.func @_maxpool3_kernel(%arg0: i32, %arg1: memref<16x3x5x192xbf16, #tpu.memory_space<vmem>>, %arg2: memref<16x5x64xbf16, #tpu.memory_space<vmem>>) attributes {dimension_semantics = [#tpu.dimension_semantics<parallel>], iteration_bounds = array<i64: 1>, scalar_prefetch = 0 : i64, scratch_operands = 0 : i64, tpu.core_type = #tpu.core_type<tc>, window_params = [{transform_indices = @transform_0, window_bounds = array<i64: 16, 3, 5, 192>}, {transform_indices = @transform_1, window_bounds = array<i64: 16, 5, 64>}]} {
    %c0 = arith.constant 0 : index
    %c0_0 = arith.constant 0 : index
    %c0_1 = arith.constant 0 : index
    %c0_2 = arith.constant 0 : index
    %0 = vector.load %arg1[%c0, %c0_0, %c0_1, %c0_2] : memref<16x3x5x192xbf16, #tpu.memory_space<vmem>>, vector<16x3x5x192xbf16>
    %1 = vector.extract_strided_slice %0 {offsets = [0, 0, 0, 0], sizes = [16, 1, 5, 192], strides = [1, 1, 1, 1]} : vector<16x3x5x192xbf16> to vector<16x1x5x192xbf16>
    %2 = vector.shape_cast %1 : vector<16x1x5x192xbf16> to vector<16x5x192xbf16>
    %3 = vector.extract_strided_slice %0 {offsets = [0, 1, 0, 0], sizes = [16, 1, 5, 192], strides = [1, 1, 1, 1]} : vector<16x3x5x192xbf16> to vector<16x1x5x192xbf16>
    %4 = vector.shape_cast %3 : vector<16x1x5x192xbf16> to vector<16x5x192xbf16>
    %5 = arith.maximumf %2, %4 : vector<16x5x192xbf16>
    %6 = vector.extract_strided_slice %0 {offsets = [0, 2, 0, 0], sizes = [16, 1, 5, 192], strides = [1, 1, 1, 1]} : vector<16x3x5x192xbf16> to vector<16x1x5x192xbf16>
    %7 = vector.shape_cast %6 : vector<16x1x5x192xbf16> to vector<16x5x192xbf16>
    %8 = arith.maximumf %5, %7 : vector<16x5x192xbf16>
    %9 = vector.extract_strided_slice %8 {offsets = [0, 0, 0], sizes = [16, 5, 64], strides = [1, 1, 1]} : vector<16x5x192xbf16> to vector<16x5x64xbf16>
    %10 = vector.extract_strided_slice %8 {offsets = [0, 0, 64], sizes = [16, 5, 64], strides = [1, 1, 1]} : vector<16x5x192xbf16> to vector<16x5x64xbf16>
    %11 = arith.maximumf %9, %10 : vector<16x5x64xbf16>
    %12 = vector.extract_strided_slice %8 {offsets = [0, 0, 128], sizes = [16, 5, 64], strides = [1, 1, 1]} : vector<16x5x192xbf16> to vector<16x5x64xbf16>
    %13 = arith.maximumf %11, %12 : vector<16x5x64xbf16>
    %c0_3 = arith.constant 0 : index
    %c0_4 = arith.constant 0 : index
    %c0_5 = arith.constant 0 : index
    %14 = vector.load %arg2[%c0_3, %c0_4, %c0_5] : memref<16x5x64xbf16, #tpu.memory_space<vmem>>, vector<16x5x64xbf16>
    tpu.vector_store %arg2[%c0_3, %c0_4, %c0_5], %13 {strides = array<i32>} : memref<16x5x64xbf16, #tpu.memory_space<vmem>>, vector<16x5x64xbf16>,
    return
  }
  func.func @transform_0(%arg0: i32) -> (i32, i32, i32, i32) {
    %c0_i32 = arith.constant 0 : i32
    %c0_i32_0 = arith.constant 0 : i32
    %c0_i32_1 = arith.constant 0 : i32
    %c0_i32_2 = arith.constant 0 : i32
    return %arg0, %c0_i32, %c0_i32_0, %c0_i32_1 : i32, i32, i32, i32
  }
  func.func @transform_1(%arg0: i32) -> (i32, i32, i32) {
    %c0_i32 = arith.constant 0 : i32
    %c0_i32_0 = arith.constant 0 : i32
    %c0_i32_1 = arith.constant 0 : i32
    return %arg0, %c0_i32, %c0_i32_0 : i32, i32, i32
  }
}

module attributes {stable_mosaic.version = 11 : i64} {
  func.func @_matmul_bias_act_kernel(%arg0: i32, %arg1: memref<32x576xbf16, #tpu.memory_space<vmem>>, %arg2: memref<576x64xbf16, #tpu.memory_space<vmem>>, %arg3: memref<1x64xf32, #tpu.memory_space<vmem>>, %arg4: memref<32x64xbf16, #tpu.memory_space<vmem>>) attributes {dimension_semantics = [#tpu.dimension_semantics<parallel>], iteration_bounds = array<i64: 1>, scalar_prefetch = 0 : i64, scratch_operands = 0 : i64, tpu.core_type = #tpu.core_type<tc>, window_params = [{transform_indices = @transform_0, window_bounds = array<i64: 32, 576>}, {pipeline_mode = #tpu.pipeline_mode<synchronous>, transform_indices = @transform_1, window_bounds = array<i64: 576, 64>}, {pipeline_mode = #tpu.pipeline_mode<synchronous>, transform_indices = @transform_2, window_bounds = array<i64: 1, 64>}, {transform_indices = @transform_3, window_bounds = array<i64: 32, 64>}]} {
    %c0 = arith.constant 0 : index
    %c0_0 = arith.constant 0 : index
    %0 = vector.load %arg1[%c0, %c0_0] : memref<32x576xbf16, #tpu.memory_space<vmem>>, vector<32x576xbf16>
    %c0_1 = arith.constant 0 : index
    %c0_2 = arith.constant 0 : index
    %1 = vector.load %arg2[%c0_1, %c0_2] : memref<576x64xbf16, #tpu.memory_space<vmem>>, vector<576x64xbf16>
    %cst = arith.constant dense<0.000000e+00> : vector<32x64xf32>
    %2 = tpu.matmul %0, %1, %cst {dimension_numbers = #tpu.dot_dimension_numbers<[1], [0], [0], [1], [0, 0, 1, 1], [], []>} : vector<32x576xbf16>, vector<576x64xbf16>, vector<32x64xf32> -> vector<32x64xf32>
    %c0_3 = arith.constant 0 : index
    %c0_4 = arith.constant 0 : index
    %3 = vector.load %arg3[%c0_3, %c0_4] : memref<1x64xf32, #tpu.memory_space<vmem>>, vector<1x64xf32>
    %4 = vector.broadcast %3 : vector<1x64xf32> to vector<32x64xf32>
    %5 = arith.addf %2, %4 : vector<32x64xf32>
    %cst_5 = arith.constant 0.000000e+00 : f32
    %6 = vector.broadcast %cst_5 : f32 to vector<32x64xf32>
    %7 = arith.cmpf ogt, %5, %6 : vector<32x64xf32>
    %cst_6 = arith.constant 0.000000e+00 : f32
    %8 = vector.broadcast %cst_6 : f32 to vector<32x64xf32>
    %9 = arith.minimumf %5, %8 : vector<32x64xf32>
    %10 = math.exp %9 : vector<32x64xf32>
    %cst_7 = arith.constant 1.000000e+00 : f32
    %11 = vector.broadcast %cst_7 : f32 to vector<32x64xf32>
    %12 = arith.subf %10, %11 : vector<32x64xf32>
    %13 = arith.select %7, %5, %12 : vector<32x64xi1>, vector<32x64xf32>
    %14 = arith.truncf %13 : vector<32x64xf32> to vector<32x64xbf16>
    %c0_8 = arith.constant 0 : index
    %c0_9 = arith.constant 0 : index
    %15 = vector.load %arg4[%c0_8, %c0_9] : memref<32x64xbf16, #tpu.memory_space<vmem>>, vector<32x64xbf16>
    tpu.vector_store %arg4[%c0_8, %c0_9], %14 {strides = array<i32>} : memref<32x64xbf16, #tpu.memory_space<vmem>>, vector<32x64xbf16>,
    return
  }
  func.func @transform_0(%arg0: i32) -> (i32, i32) {
    %c0_i32 = arith.constant 0 : i32
    %c0_i32_0 = arith.constant 0 : i32
    return %arg0, %c0_i32 : i32, i32
  }
  func.func @transform_1(%arg0: i32) -> (i32, i32) {
    %c0_i32 = arith.constant 0 : i32
    %c0_i32_0 = arith.constant 0 : i32
    %c0_i32_1 = arith.constant 0 : i32
    return %c0_i32, %c0_i32_0 : i32, i32
  }
  func.func @transform_2(%arg0: i32) -> (i32, i32) {
    %c0_i32 = arith.constant 0 : i32
    %c0_i32_0 = arith.constant 0 : i32
    %c0_i32_1 = arith.constant 0 : i32
    return %c0_i32, %c0_i32_0 : i32, i32
  }
  func.func @transform_3(%arg0: i32) -> (i32, i32) {
    %c0_i32 = arith.constant 0 : i32
    %c0_i32_0 = arith.constant 0 : i32
    return %arg0, %c0_i32 : i32, i32
  }
}

module attributes {stable_mosaic.version = 11 : i64} {
  func.func @_maxpool3_kernel(%arg0: i32, %arg1: memref<8x3x1x192xbf16, #tpu.memory_space<vmem>>, %arg2: memref<8x1x64xbf16, #tpu.memory_space<vmem>>) attributes {dimension_semantics = [#tpu.dimension_semantics<parallel>], iteration_bounds = array<i64: 1>, scalar_prefetch = 0 : i64, scratch_operands = 0 : i64, tpu.core_type = #tpu.core_type<tc>, window_params = [{transform_indices = @transform_0, window_bounds = array<i64: 8, 3, 1, 192>}, {transform_indices = @transform_1, window_bounds = array<i64: 8, 1, 64>}]} {
    %c0 = arith.constant 0 : index
    %c0_0 = arith.constant 0 : index
    %c0_1 = arith.constant 0 : index
    %c0_2 = arith.constant 0 : index
    %0 = vector.load %arg1[%c0, %c0_0, %c0_1, %c0_2] : memref<8x3x1x192xbf16, #tpu.memory_space<vmem>>, vector<8x3x1x192xbf16>
    %1 = vector.extract_strided_slice %0 {offsets = [0, 0, 0, 0], sizes = [8, 1, 1, 192], strides = [1, 1, 1, 1]} : vector<8x3x1x192xbf16> to vector<8x1x1x192xbf16>
    %2 = vector.shape_cast %1 : vector<8x1x1x192xbf16> to vector<8x1x192xbf16>
    %3 = vector.extract_strided_slice %0 {offsets = [0, 1, 0, 0], sizes = [8, 1, 1, 192], strides = [1, 1, 1, 1]} : vector<8x3x1x192xbf16> to vector<8x1x1x192xbf16>
    %4 = vector.shape_cast %3 : vector<8x1x1x192xbf16> to vector<8x1x192xbf16>
    %5 = arith.maximumf %2, %4 : vector<8x1x192xbf16>
    %6 = vector.extract_strided_slice %0 {offsets = [0, 2, 0, 0], sizes = [8, 1, 1, 192], strides = [1, 1, 1, 1]} : vector<8x3x1x192xbf16> to vector<8x1x1x192xbf16>
    %7 = vector.shape_cast %6 : vector<8x1x1x192xbf16> to vector<8x1x192xbf16>
    %8 = arith.maximumf %5, %7 : vector<8x1x192xbf16>
    %9 = vector.extract_strided_slice %8 {offsets = [0, 0, 0], sizes = [8, 1, 64], strides = [1, 1, 1]} : vector<8x1x192xbf16> to vector<8x1x64xbf16>
    %10 = vector.extract_strided_slice %8 {offsets = [0, 0, 64], sizes = [8, 1, 64], strides = [1, 1, 1]} : vector<8x1x192xbf16> to vector<8x1x64xbf16>
    %11 = arith.maximumf %9, %10 : vector<8x1x64xbf16>
    %12 = vector.extract_strided_slice %8 {offsets = [0, 0, 128], sizes = [8, 1, 64], strides = [1, 1, 1]} : vector<8x1x192xbf16> to vector<8x1x64xbf16>
    %13 = arith.maximumf %11, %12 : vector<8x1x64xbf16>
    %c0_3 = arith.constant 0 : index
    %c0_4 = arith.constant 0 : index
    %c0_5 = arith.constant 0 : index
    %14 = vector.load %arg2[%c0_3, %c0_4, %c0_5] : memref<8x1x64xbf16, #tpu.memory_space<vmem>>, vector<8x1x64xbf16>
    tpu.vector_store %arg2[%c0_3, %c0_4, %c0_5], %13 {strides = array<i32>} : memref<8x1x64xbf16, #tpu.memory_space<vmem>>, vector<8x1x64xbf16>,
    return
  }
  func.func @transform_0(%arg0: i32) -> (i32, i32, i32, i32) {
    %c0_i32 = arith.constant 0 : i32
    %c0_i32_0 = arith.constant 0 : i32
    %c0_i32_1 = arith.constant 0 : i32
    %c0_i32_2 = arith.constant 0 : i32
    return %arg0, %c0_i32, %c0_i32_0, %c0_i32_1 : i32, i32, i32, i32
  }
  func.func @transform_1(%arg0: i32) -> (i32, i32, i32) {
    %c0_i32 = arith.constant 0 : i32
    %c0_i32_0 = arith.constant 0 : i32
    %c0_i32_1 = arith.constant 0 : i32
    return %arg0, %c0_i32, %c0_i32_0 : i32, i32, i32
  }
}

module attributes {stable_mosaic.version = 11 : i64} {
  func.func @_matmul_bias_act_kernel(%arg0: i32, %arg1: memref<16x64xf32, #tpu.memory_space<vmem>>, %arg2: memref<64x256xf32, #tpu.memory_space<vmem>>, %arg3: memref<1x256xf32, #tpu.memory_space<vmem>>, %arg4: memref<16x256xf32, #tpu.memory_space<vmem>>) attributes {dimension_semantics = [#tpu.dimension_semantics<parallel>], iteration_bounds = array<i64: 1>, scalar_prefetch = 0 : i64, scratch_operands = 0 : i64, tpu.core_type = #tpu.core_type<tc>, window_params = [{transform_indices = @transform_0, window_bounds = array<i64: 16, 64>}, {pipeline_mode = #tpu.pipeline_mode<synchronous>, transform_indices = @transform_1, window_bounds = array<i64: 64, 256>}, {pipeline_mode = #tpu.pipeline_mode<synchronous>, transform_indices = @transform_2, window_bounds = array<i64: 1, 256>}, {transform_indices = @transform_3, window_bounds = array<i64: 16, 256>}]} {
    %c0 = arith.constant 0 : index
    %c0_0 = arith.constant 0 : index
    %0 = vector.load %arg1[%c0, %c0_0] : memref<16x64xf32, #tpu.memory_space<vmem>>, vector<16x64xf32>
    %c0_1 = arith.constant 0 : index
    %c0_2 = arith.constant 0 : index
    %1 = vector.load %arg2[%c0_1, %c0_2] : memref<64x256xf32, #tpu.memory_space<vmem>>, vector<64x256xf32>
    %cst = arith.constant dense<0.000000e+00> : vector<16x256xf32>
    %2 = tpu.matmul %0, %1, %cst {dimension_numbers = #tpu.dot_dimension_numbers<[1], [0], [0], [1], [0, 0, 1, 1], [], []>} : vector<16x64xf32>, vector<64x256xf32>, vector<16x256xf32> -> vector<16x256xf32>
    %c0_3 = arith.constant 0 : index
    %c0_4 = arith.constant 0 : index
    %3 = vector.load %arg3[%c0_3, %c0_4] : memref<1x256xf32, #tpu.memory_space<vmem>>, vector<1x256xf32>
    %4 = vector.broadcast %3 : vector<1x256xf32> to vector<16x256xf32>
    %5 = arith.addf %2, %4 : vector<16x256xf32>
    %cst_5 = arith.constant 0.000000e+00 : f32
    %6 = vector.broadcast %cst_5 : f32 to vector<16x256xf32>
    %7 = arith.maximumf %5, %6 : vector<16x256xf32>
    %c0_6 = arith.constant 0 : index
    %c0_7 = arith.constant 0 : index
    %8 = vector.load %arg4[%c0_6, %c0_7] : memref<16x256xf32, #tpu.memory_space<vmem>>, vector<16x256xf32>
    tpu.vector_store %arg4[%c0_6, %c0_7], %7 {strides = array<i32>} : memref<16x256xf32, #tpu.memory_space<vmem>>, vector<16x256xf32>,
    return
  }
  func.func @transform_0(%arg0: i32) -> (i32, i32) {
    %c0_i32 = arith.constant 0 : i32
    %c0_i32_0 = arith.constant 0 : i32
    return %arg0, %c0_i32 : i32, i32
  }
  func.func @transform_1(%arg0: i32) -> (i32, i32) {
    %c0_i32 = arith.constant 0 : i32
    %c0_i32_0 = arith.constant 0 : i32
    %c0_i32_1 = arith.constant 0 : i32
    return %c0_i32, %c0_i32_0 : i32, i32
  }
  func.func @transform_2(%arg0: i32) -> (i32, i32) {
    %c0_i32 = arith.constant 0 : i32
    %c0_i32_0 = arith.constant 0 : i32
    %c0_i32_1 = arith.constant 0 : i32
    return %c0_i32, %c0_i32_0 : i32, i32
  }
  func.func @transform_3(%arg0: i32) -> (i32, i32) {
    %c0_i32 = arith.constant 0 : i32
    %c0_i32_0 = arith.constant 0 : i32
    return %arg0, %c0_i32 : i32, i32
  }
}

module attributes {stable_mosaic.version = 11 : i64} {
  func.func @_matmul_bias_act_kernel(%arg0: i32, %arg1: memref<16x256xf32, #tpu.memory_space<vmem>>, %arg2: memref<256x32xf32, #tpu.memory_space<vmem>>, %arg3: memref<1x32xf32, #tpu.memory_space<vmem>>, %arg4: memref<16x32xf32, #tpu.memory_space<vmem>>) attributes {dimension_semantics = [#tpu.dimension_semantics<parallel>], iteration_bounds = array<i64: 1>, scalar_prefetch = 0 : i64, scratch_operands = 0 : i64, tpu.core_type = #tpu.core_type<tc>, window_params = [{transform_indices = @transform_0, window_bounds = array<i64: 16, 256>}, {pipeline_mode = #tpu.pipeline_mode<synchronous>, transform_indices = @transform_1, window_bounds = array<i64: 256, 32>}, {pipeline_mode = #tpu.pipeline_mode<synchronous>, transform_indices = @transform_2, window_bounds = array<i64: 1, 32>}, {transform_indices = @transform_3, window_bounds = array<i64: 16, 32>}]} {
    %c0 = arith.constant 0 : index
    %c0_0 = arith.constant 0 : index
    %0 = vector.load %arg1[%c0, %c0_0] : memref<16x256xf32, #tpu.memory_space<vmem>>, vector<16x256xf32>
    %c0_1 = arith.constant 0 : index
    %c0_2 = arith.constant 0 : index
    %1 = vector.load %arg2[%c0_1, %c0_2] : memref<256x32xf32, #tpu.memory_space<vmem>>, vector<256x32xf32>
    %cst = arith.constant dense<0.000000e+00> : vector<16x32xf32>
    %2 = tpu.matmul %0, %1, %cst {dimension_numbers = #tpu.dot_dimension_numbers<[1], [0], [0], [1], [0, 0, 1, 1], [], []>} : vector<16x256xf32>, vector<256x32xf32>, vector<16x32xf32> -> vector<16x32xf32>
    %c0_3 = arith.constant 0 : index
    %c0_4 = arith.constant 0 : index
    %3 = vector.load %arg3[%c0_3, %c0_4] : memref<1x32xf32, #tpu.memory_space<vmem>>, vector<1x32xf32>
    %4 = vector.broadcast %3 : vector<1x32xf32> to vector<16x32xf32>
    %5 = arith.addf %2, %4 : vector<16x32xf32>
    %6 = tpu.iota {dimensions = array<i32: 1>} : vector<16x32xi32>
    %cst_5 = arith.constant 0.000000e+00 : f32
    %7 = vector.broadcast %cst_5 : f32 to vector<16x32xf32>
    %8 = arith.subf %7, %5 : vector<16x32xf32>
    %9 = math.exp %8 : vector<16x32xf32>
    %cst_6 = arith.constant 1.000000e+00 : f32
    %10 = vector.broadcast %cst_6 : f32 to vector<16x32xf32>
    %11 = arith.addf %10, %9 : vector<16x32xf32>
    %cst_7 = arith.constant 1.000000e+00 : f32
    %12 = vector.broadcast %cst_7 : f32 to vector<16x32xf32>
    %13 = arith.divf %12, %11 : vector<16x32xf32>
    %c24_i32 = arith.constant 24 : i32
    %14 = vector.broadcast %c24_i32 : i32 to vector<16x32xi32>
    %15 = arith.cmpi sge, %6, %14 : vector<16x32xi32>
    %c28_i32 = arith.constant 28 : i32
    %16 = vector.broadcast %c28_i32 : i32 to vector<16x32xi32>
    %17 = arith.cmpi slt, %6, %16 : vector<16x32xi32>
    %18 = arith.andi %15, %17 : vector<16x32xi1>
    %19 = arith.select %18, %13, %5 : vector<16x32xi1>, vector<16x32xf32>
    %c0_8 = arith.constant 0 : index
    %c0_9 = arith.constant 0 : index
    %20 = vector.load %arg4[%c0_8, %c0_9] : memref<16x32xf32, #tpu.memory_space<vmem>>, vector<16x32xf32>
    tpu.vector_store %arg4[%c0_8, %c0_9], %19 {strides = array<i32>} : memref<16x32xf32, #tpu.memory_space<vmem>>, vector<16x32xf32>,
    return
  }
  func.func @transform_0(%arg0: i32) -> (i32, i32) {
    %c0_i32 = arith.constant 0 : i32
    %c0_i32_0 = arith.constant 0 : i32
    return %arg0, %c0_i32 : i32, i32
  }
  func.func @transform_1(%arg0: i32) -> (i32, i32) {
    %c0_i32 = arith.constant 0 : i32
    %c0_i32_0 = arith.constant 0 : i32
    %c0_i32_1 = arith.constant 0 : i32
    return %c0_i32, %c0_i32_0 : i32, i32
  }
  func.func @transform_2(%arg0: i32) -> (i32, i32) {
    %c0_i32 = arith.constant 0 : i32
    %c0_i32_0 = arith.constant 0 : i32
    %c0_i32_1 = arith.constant 0 : i32
    return %c0_i32, %c0_i32_0 : i32, i32
  }
  func.func @transform_3(%arg0: i32) -> (i32, i32) {
    %c0_i32 = arith.constant 0 : i32
    %c0_i32_0 = arith.constant 0 : i32
    return %arg0, %c0_i32 : i32, i32
  }
}

</mosaic_0001>

<bundles_post_ra>
// kernel: forward.8
= control target key start
LH: loop header
LB: loop body
LE: loop exit
PB: predicated region body
PF: predicated region fallthrough
CT: control target
= control target key end

     0   :  { %s4169_s12 = smov 0   ;;  %s5505_s0 = inlined_call_operand.vmem [shape: bf16[18432,256], index: 0, kind: input, shape index: {}]   ;;  %s5506_s1 = inlined_call_operand.vmem [shape: bf16[256,32], index: 1, kind: input, shape index: {}]   ;;  %s5507_s2 = inlined_call_operand.vmem [shape: f32[1,32], index: 2, kind: input, shape index: {}]   ;;  %s5508_s3 = inlined_call_operand.vmem [shape: bf16[18432,32], index: 3, kind: output, shape index: {}]  }
   0x1 LB: > { %s3091_s13 = sadd.s32 4294967295, %s4146_s12   ;;  %p3095_p0 = scmp.ge.s32.totalorder %s4146_s12, 1  ;;  %s4146_s12 = sphi %s4169_s12, %s13_s12  }
   0x2   : > { %p139_p1 = scmp.lt.s32.totalorder %s4146_s12, 19 }
   0x4   : > { %p140_p2 = pnand %p3095_p0, %p139_p1 }
   0x5   : > { %v3674_v0 = vld [vmem:[%s5506_s1] sm:$0xff] (!%p140_p2)   ;;  %v4148_v1 = vmov (!%p140_p2), 0   ;;  %s3096_s16 = sshll.u32 (!%p140_p2), %s3091_s13, 7  ;;  %v3675_v2 = vld [vmem:[%s5506_s1 + $0x8] sm:$0xff] (!%p140_p2)   ;;  %v3676_v3 = vld [vmem:[%s5506_s1 + $0x10] sm:$0xff] (!%p140_p2)   ;;  %vm2906_vm0 = vcmask (!%p140_p2), 257024  }
   0x6   : > { %143 = sbr.rel (%p140_p2) target bundleno = 561 (0x231), region = 32  ;;  %1081 = vmatprep.subr.bf16.mxu0 (!%p140_p2), %v4148_v1  ;;  %3633 = vmatprep.subr.bf16.mxu1 (!%p140_p2), %v4148_v1  ;;  %p165_p3 = scmp.lt.s32.totalorder (!%p140_p2), %s3096_s16, 2303  ;;  %v3677_v4 = vld [vmem:[%s5506_s1 + $0x18] sm:$0xff] (!%p140_p2)   ;;  %v3678_v5 = vld [vmem:[%s5506_s1 + $0x20] sm:$0xff] (!%p140_p2)   ;;  %v3679_v7 = vld [vmem:[%s5506_s1 + $0x28] sm:$0xff] (!%p140_p2)  }
   0x7   : > { %1082 = vmatpush1.bf16.msra.mxu0 (!%p140_p2), %v3674_v0  ;;  %3649 = vmatpush1.bf16.msra.mxu1 (!%p140_p2), %v3674_v0  ;;  %v3680_v9 = vld [vmem:[%s5506_s1 + $0x30] sm:$0xff] (!%p140_p2)   ;;  %v3681_v10 = vld [vmem:[%s5506_s1 + $0x38] sm:$0xff] (!%p140_p2)   ;;  %v3682_v11 = vld [vmem:[%s5506_s1 + $0x40] sm:$0xff] (!%p140_p2)  }
   0x8   : > { %1083 = vmatprep.subr.bf16.mxu0 (!%p140_p2), %v4148_v1  ;;  %3634 = vmatprep.subr.bf16.mxu1 (!%p140_p2), %v4148_v1  ;;  %v3683_v12 = vld [vmem:[%s5506_s1 + $0x48] sm:$0xff] (!%p140_p2)   ;;  %v3684_v13 = vld [vmem:[%s5506_s1 + $0x50] sm:$0xff] (!%p140_p2)   ;;  %v3685_v14 = vld [vmem:[%s5506_s1 + $0x58] sm:$0xff] (!%p140_p2)  }
   0x9   : > { %v3686_v15 = vld [vmem:[%s5506_s1 + $0x60] sm:$0xff] (!%p140_p2)   ;;  %v3687_v16 = vld [vmem:[%s5506_s1 + $0x68] sm:$0xff] (!%p140_p2)   ;;  %v3688_v17 = vld [vmem:[%s5506_s1 + $0x70] sm:$0xff] (!%p140_p2)  }
   0xa   : > { %v3689_v18 = vld [vmem:[%s5506_s1 + $0x78] sm:$0xff] (!%p140_p2)  }
   0xb   : > { %1084 = vmatpush1.bf16.msra.mxu0 (!%p140_p2), %v3675_v2  ;;  %3650 = vmatpush1.bf16.msra.mxu1 (!%p140_p2), %v3675_v2 }
   0xc   : > { %1085 = vmatprep.subr.bf16.mxu0 (!%p140_p2), %v4148_v1  ;;  %3635 = vmatprep.subr.bf16.mxu1 (!%p140_p2), %v4148_v1 }
   0xd   : > { %s5510_s16 = smov (!%p165_p3, %s3096_s16), 2303 }
   0xe   : > { %s3504_s23 = sshll.u32 %s5510_s16, 3  ;;  %s3100_s29 = sshll.u32 %s5510_s16, 2 }
   0xf   : > { %1086 = vmatpush1.bf16.msra.mxu0 %v3676_v3  ;;  %3651 = vmatpush1.bf16.msra.mxu1 %v3676_v3  ;;  %s4206_s28 = scalar_lea.vmem %s5505_s0, %s3504_s23  ;;  %s4439_s5 = scalar_lea.vmem %s5508_s3, %s3100_s29 }
  0x10   : > { %1087 = vmatprep.subr.bf16.mxu0 %v4148_v1  ;;  %3636 = vmatprep.subr.bf16.mxu1 %v4148_v1  ;;  %v3692_v6 = vld [vmem:[%s4206_s28 + $0x4] ss:$8 sps:$4 sm:$0xff]   ;;  %v3690_v19 = vld [vmem:[%s4206_s28] ss:$8 sps:$4 sm:$0xff]   ;;  %v3696_v21 = vld [vmem:[%s4206_s28 + $0x14] ss:$8 sps:$4 sm:$0xff]  }
  0x11   : > { %v3695_v8 = vld [vmem:[%s4206_s28 + $0x204] ss:$8 sps:$4 sm:$0xff]   ;;  %1113 = vmatprep.mubr.bf16.mxu0 %v3692_v6  ;;  %v3693_v20 = vld [vmem:[%s4206_s28 + $0x200] ss:$8 sps:$4 sm:$0xff]   ;;  %v3698_v22 = vld [vmem:[%s4206_s28 + $0x214] ss:$8 sps:$4 sm:$0xff]  }
  0x12   : > { %1369 = vmatprep.mubr.bf16.mxu1 %v3695_v8  ;;  %v3700_v23 = vld [vmem:[%s4206_s28 + $0x10] ss:$8 sps:$4 sm:$0xff]   ;;  %v3702_v25 = vld [vmem:[%s4206_s28 + $0x24] ss:$8 sps:$4 sm:$0xff]   ;;  %v3706_v27 = vld [vmem:[%s4206_s28 + $0x20] ss:$8 sps:$4 sm:$0xff]  }
  0x13   : > { %1088 = vmatpush1.bf16.msra.mxu0 %v3677_v4  ;;  %3652 = vmatpush1.bf16.msra.mxu1 %v3677_v4  ;;  %v3701_v24 = vld [vmem:[%s4206_s28 + $0x210] ss:$8 sps:$4 sm:$0xff]   ;;  %v3704_v26 = vld [vmem:[%s4206_s28 + $0x224] ss:$8 sps:$4 sm:$0xff]   ;;  %v3707_v28 = vld [vmem:[%s4206_s28 + $0x220] ss:$8 sps:$4 sm:$0xff]  }
  0x14   : > { %1089 = vmatprep.subr.bf16.mxu0 %v4148_v1  ;;  %3637 = vmatprep.subr.bf16.mxu1 %v4148_v1  ;;  %v3708_v29 = vld [vmem:[%s4206_s28 + $0x34] ss:$8 sps:$4 sm:$0xff]   ;;  %v3712_v31 = vld [vmem:[%s4206_s28 + $0x30] ss:$8 sps:$4 sm:$0xff]   ;;  %v3714_v33 = vld [vmem:[%s4206_s28 + $0x44] ss:$8 sps:$4 sm:$0xff]  }
  0x15   : > { %v3710_v30 = vld [vmem:[%s4206_s28 + $0x234] ss:$8 sps:$4 sm:$0xff]   ;;  %v3713_v32 = vld [vmem:[%s4206_s28 + $0x230] ss:$8 sps:$4 sm:$0xff]   ;;  %v3716_v34 = vld [vmem:[%s4206_s28 + $0x244] ss:$8 sps:$4 sm:$0xff]  }
  0x16   : > { %v3718_v35 = vld [vmem:[%s4206_s28 + $0x40] ss:$8 sps:$4 sm:$0xff]   ;;  %v3720_v37 = vld [vmem:[%s4206_s28 + $0x54] ss:$8 sps:$4 sm:$0xff]   ;;  %v3724_v39 = vld [vmem:[%s4206_s28 + $0x50] ss:$8 sps:$4 sm:$0xff]  }
  0x17   : > { %1090 = vmatpush1.bf16.msra.mxu0 %v3678_v5  ;;  %3653 = vmatpush1.bf16.msra.mxu1 %v3678_v5  ;;  %v3719_v36 = vld [vmem:[%s4206_s28 + $0x240] ss:$8 sps:$4 sm:$0xff]   ;;  %v3722_v38 = vld [vmem:[%s4206_s28 + $0x254] ss:$8 sps:$4 sm:$0xff]   ;;  %v3725_v40 = vld [vmem:[%s4206_s28 + $0x250] ss:$8 sps:$4 sm:$0xff]  }
  0x18   : > { %1091 = vmatprep.subr.bf16.mxu0 %v4148_v1  ;;  %3638 = vmatprep.subr.bf16.mxu1 %v4148_v1  ;;  %v3726_v41 = vld [vmem:[%s4206_s28 + $0x64] ss:$8 sps:$4 sm:$0xff]   ;;  %v3730_v43 = vld [vmem:[%s4206_s28 + $0x60] ss:$8 sps:$4 sm:$0xff]   ;;  %v3732_v45 = vld [vmem:[%s4206_s28 + $0x74] ss:$8 sps:$4 sm:$0xff]  }
  0x19   : > { %v3728_v42 = vld [vmem:[%s4206_s28 + $0x264] ss:$8 sps:$4 sm:$0xff]   ;;  %v3731_v44 = vld [vmem:[%s4206_s28 + $0x260] ss:$8 sps:$4 sm:$0xff]   ;;  %v3734_v46 = vld [vmem:[%s4206_s28 + $0x274] ss:$8 sps:$4 sm:$0xff]  }
  0x1a   : > { %v3736_v47 = vld [vmem:[%s4206_s28 + $0x70] ss:$8 sps:$4 sm:$0xff]   ;;  %v3738_v49 = vld [vmem:[%s4206_s28 + $0x84] ss:$8 sps:$4 sm:$0xff]   ;;  %v3742_v51 = vld [vmem:[%s4206_s28 + $0x80] ss:$8 sps:$4 sm:$0xff]  }
  0x1b   : > { %1092 = vmatpush1.bf16.msra.mxu0 %v3679_v7  ;;  %3654 = vmatpush1.bf16.msra.mxu1 %v3679_v7  ;;  %v3737_v48 = vld [vmem:[%s4206_s28 + $0x270] ss:$8 sps:$4 sm:$0xff]   ;;  %v3740_v50 = vld [vmem:[%s4206_s28 + $0x284] ss:$8 sps:$4 sm:$0xff]   ;;  %v3743_v52 = vld [vmem:[%s4206_s28 + $0x280] ss:$8 sps:$4 sm:$0xff]  }
  0x1c   : > { %1093 = vmatprep.subr.bf16.mxu0 %v4148_v1  ;;  %3639 = vmatprep.subr.bf16.mxu1 %v4148_v1  ;;  %v3744_v53 = vld [vmem:[%s4206_s28 + $0x94] ss:$8 sps:$4 sm:$0xff]   ;;  %v3748_v55 = vld [vmem:[%s4206_s28 + $0x90] ss:$8 sps:$4 sm:$0xff]   ;;  %v3750_v57 = vld [vmem:[%s4206_s28 + $0xa4] ss:$8 sps:$4 sm:$0xff]  }
  0x1d   : > { %v3746_v54 = vld [vmem:[%s4206_s28 + $0x294] ss:$8 sps:$4 sm:$0xff]   ;;  %v3749_v56 = vld [vmem:[%s4206_s28 + $0x290] ss:$8 sps:$4 sm:$0xff]   ;;  %v3752_v58 = vld [vmem:[%s4206_s28 + $0x2a4] ss:$8 sps:$4 sm:$0xff]  }
  0x1e   : > { %v3754_v59 = vld [vmem:[%s4206_s28 + $0xa0] ss:$8 sps:$4 sm:$0xff]   ;;  %v3756_v61 = vld [vmem:[%s4206_s28 + $0xb4] ss:$8 sps:$4 sm:$0xff]   ;;  %v3760_v63 = vld [vmem:[%s4206_s28 + $0xb0] ss:$8 sps:$4 sm:$0xff]  }
  0x1f   : > { %1094 = vmatpush1.bf16.msra.mxu0 %v3680_v9  ;;  %3655 = vmatpush1.bf16.msra.mxu1 %v3680_v9  ;;  %v3755_v60 = vld [vmem:[%s4206_s28 + $0x2a0] ss:$8 sps:$4 sm:$0xff]   ;;  %v3758_v62 = vld [vmem:[%s4206_s28 + $0x2b4] ss:$8 sps:$4 sm:$0xff]   ;;  %v3761_v0 = vld [vmem:[%s4206_s28 + $0x2b0] ss:$8 sps:$4 sm:$0xff]  }
  0x20   : > { %1095 = vmatprep.subr.bf16.mxu0 %v4148_v1  ;;  %3640 = vmatprep.subr.bf16.mxu1 %v4148_v1  ;;  %v3764_v2 = vld [vmem:[%s4206_s28 + $0x2c4] ss:$8 sps:$4 sm:$0xff]   ;;  %v3766_v3 = vld [vmem:[%s4206_s28 + $0xc0] ss:$8 sps:$4 sm:$0xff]   ;;  %v3768_v5 = vld [vmem:[%s4206_s28 + $0xd4] ss:$8 sps:$4 sm:$0xff]  }
  0x21   : > { %v3767_v4 = vld [vmem:[%s4206_s28 + $0x2c0] ss:$8 sps:$4 sm:$0xff]   ;;  %v3770_v6 = vld [vmem:[%s4206_s28 + $0x2d4] ss:$8 sps:$4 sm:$0xff]   ;;  %v3772_v7 = vld [vmem:[%s4206_s28 + $0xd0] ss:$8 sps:$4 sm:$0xff]  }
  0x22   : > { %v3773_v8 = vld [vmem:[%s4206_s28 + $0x2d0] ss:$8 sps:$4 sm:$0xff]   ;;  %v3774_v9 = vld [vmem:[%s4206_s28 + $0xe4] ss:$8 sps:$4 sm:$0xff]  }
  0x23   : > { %1096 = vmatpush1.bf16.msra.mxu0 %v3681_v10  ;;  %3656 = vmatpush1.bf16.msra.mxu1 %v3681_v10  ;;  %v3776_v10 = vld [vmem:[%s4206_s28 + $0x2e4] ss:$8 sps:$4 sm:$0xff]  }
  0x24   : > { %1097 = vmatprep.subr.bf16.mxu0 %v4148_v1  ;;  %3641 = vmatprep.subr.bf16.mxu1 %v4148_v1 }
  0x27   : > { %1098 = vmatpush1.bf16.msra.mxu0 %v3682_v11  ;;  %3657 = vmatpush1.bf16.msra.mxu1 %v3682_v11  ;;  %v3778_v11 = vld [vmem:[%s4206_s28 + $0xe0] ss:$8 sps:$4 sm:$0xff]  }
  0x28   : > { %1099 = vmatprep.subr.bf16.mxu0 %v4148_v1  ;;  %3642 = vmatprep.subr.bf16.mxu1 %v4148_v1 }
  0x2b   : > { %1100 = vmatpush1.bf16.msra.mxu0 %v3683_v12  ;;  %3658 = vmatpush1.bf16.msra.mxu1 %v3683_v12  ;;  %v3779_v12 = vld [vmem:[%s4206_s28 + $0x2e0] ss:$8 sps:$4 sm:$0xff]  }
  0x2c   : > { %1101 = vmatprep.subr.bf16.mxu0 %v4148_v1  ;;  %3643 = vmatprep.subr.bf16.mxu1 %v4148_v1 }
  0x2f   : > { %1102 = vmatpush1.bf16.msra.mxu0 %v3684_v13  ;;  %3659 = vmatpush1.bf16.msra.mxu1 %v3684_v13  ;;  %v3780_v13 = vld [vmem:[%s4206_s28 + $0xf4] ss:$8 sps:$4 sm:$0xff]  }
  0x30   : > { %1103 = vmatprep.subr.bf16.mxu0 %v4148_v1  ;;  %3644 = vmatprep.subr.bf16.mxu1 %v4148_v1 }
  0x33   : > { %1104 = vmatpush1.bf16.msra.mxu0 %v3685_v14  ;;  %3660 = vmatpush1.bf16.msra.mxu1 %v3685_v14  ;;  %v3782_v14 = vld [vmem:[%s4206_s28 + $0x2f4] ss:$8 sps:$4 sm:$0xff]  }
  0x34   : > { %1105 = vmatprep.subr.bf16.mxu0 %v4148_v1  ;;  %3645 = vmatprep.subr.bf16.mxu1 %v4148_v1 }
  0x37   : > { %1106 = vmatpush1.bf16.msra.mxu0 %v3686_v15  ;;  %3661 = vmatpush1.bf16.msra.mxu1 %v3686_v15  ;;  %v3784_v15 = vld [vmem:[%s4206_s28 + $0xf0] ss:$8 sps:$4 sm:$0xff]  }
  0x38   : > { %1107 = vmatprep.subr.bf16.mxu0 %v4148_v1  ;;  %3646 = vmatprep.subr.bf16.mxu1 %v4148_v1 }
  0x3b   : > { %1108 = vmatpush1.bf16.msra.mxu0 %v3687_v16  ;;  %3662 = vmatpush1.bf16.msra.mxu1 %v3687_v16  ;;  %v3785_v16 = vld [vmem:[%s4206_s28 + $0x2f0] ss:$8 sps:$4 sm:$0xff]  }
  0x3c   : > { %1109 = vmatprep.subr.bf16.mxu0 %v4148_v1  ;;  %3647 = vmatprep.subr.bf16.mxu1 %v4148_v1 }
  0x3f   : > { %1110 = vmatpush1.bf16.msra.mxu0 %v3688_v17  ;;  %3663 = vmatpush1.bf16.msra.mxu1 %v3688_v17  ;;  %v3786_v17 = vld [vmem:[%s4206_s28 + $0x104] ss:$8 sps:$4 sm:$0xff]  }
  0x40   : > { %1111 = vmatprep.subr.bf16.mxu0 %v4148_v1  ;;  %3648 = vmatprep.subr.bf16.mxu1 %v4148_v1  ;;  %v3762_v1 = vld [vmem:[%s4206_s28 + $0xc4] ss:$8 sps:$4 sm:$0xff]  }
  0x43   : > { %1112 = vmatpush1.bf16.msra.mxu0 %v3689_v18  ;;  %3664 = vmatpush1.bf16.msra.mxu1 %v3689_v18  ;;  %v3788_v18 = vld [vmem:[%s4206_s28 + $0x304] ss:$8 sps:$4 sm:$0xff]  }
  0x46   : > { %1114 = vmatmul.mubr.bf16.vlgmr.msra.gmra.mrb[0].mxu0 %v3690_v19  ;;  %1370 = vmatmul.mubr.bf16.vlgmr.msra.gmra.mrb[0].mxu1 %v3693_v20  ;;  %v3790_v19 = vld [vmem:[%s4206_s28 + $0x100] ss:$8 sps:$4 sm:$0xff]  }
  0x47   : > { %1121 = vmatprep.mubr.bf16.mxu0 %v3696_v21  ;;  %1377 = vmatprep.mubr.bf16.mxu1 %v3698_v22  ;;  %v3791_v20 = vld [vmem:[%s4206_s28 + $0x300] ss:$8 sps:$4 sm:$0xff]   ;;  %v3792_v21 = vld [vmem:[%s4206_s28 + $0x114] ss:$8 sps:$4 sm:$0xff]  }
  0x48   : > { %v3794_v22 = vld [vmem:[%s4206_s28 + $0x314] ss:$8 sps:$4 sm:$0xff]  }
  0x4e   : > { %1122 = vmatmul.mubr.bf16.gmra.mrb[4].mxu0 %v3700_v23  ;;  %1378 = vmatmul.mubr.bf16.gmra.mrb[4].mxu1 %v3701_v24  ;;  %v3796_v23 = vld [vmem:[%s4206_s28 + $0x110] ss:$8 sps:$4 sm:$0xff]  }
  0x4f   : > { %1129 = vmatprep.mubr.bf16.mxu0 %v3702_v25  ;;  %1385 = vmatprep.mubr.bf16.mxu1 %v3704_v26  ;;  %v3797_v24 = vld [vmem:[%s4206_s28 + $0x310] ss:$8 sps:$4 sm:$0xff]   ;;  %v3798_v25 = vld [vmem:[%s4206_s28 + $0x124] ss:$8 sps:$4 sm:$0xff]  }
  0x50   : > { %v3800_v26 = vld [vmem:[%s4206_s28 + $0x324] ss:$8 sps:$4 sm:$0xff]  }
  0x56   : > { %1130 = vmatmul.mubr.bf16.gmra.mrb[8].mxu0 %v3706_v27  ;;  %1386 = vmatmul.mubr.bf16.gmra.mrb[8].mxu1 %v3707_v28  ;;  %v3802_v27 = vld [vmem:[%s4206_s28 + $0x120] ss:$8 sps:$4 sm:$0xff]  }
  0x57   : > { %1137 = vmatprep.mubr.bf16.mxu0 %v3708_v29  ;;  %1393 = vmatprep.mubr.bf16.mxu1 %v3710_v30  ;;  %v3803_v28 = vld [vmem:[%s4206_s28 + $0x320] ss:$8 sps:$4 sm:$0xff]   ;;  %v3804_v29 = vld [vmem:[%s4206_s28 + $0x134] ss:$8 sps:$4 sm:$0xff]  }
  0x58   : > { %v3806_v30 = vld [vmem:[%s4206_s28 + $0x334] ss:$8 sps:$4 sm:$0xff]  }
  0x5e   : > { %1138 = vmatmul.mubr.bf16.gmra.mrb[12].mxu0 %v3712_v31  ;;  %1394 = vmatmul.mubr.bf16.gmra.mrb[12].mxu1 %v3713_v32  ;;  %v3808_v31 = vld [vmem:[%s4206_s28 + $0x130] ss:$8 sps:$4 sm:$0xff]  }
  0x5f   : > { %1145 = vmatprep.mubr.bf16.mxu0 %v3714_v33  ;;  %1401 = vmatprep.mubr.bf16.mxu1 %v3716_v34  ;;  %v3809_v32 = vld [vmem:[%s4206_s28 + $0x330] ss:$8 sps:$4 sm:$0xff]   ;;  %v3810_v33 = vld [vmem:[%s4206_s28 + $0x144] ss:$8 sps:$4 sm:$0xff]  }
  0x60   : > { %v3812_v34 = vld [vmem:[%s4206_s28 + $0x344] ss:$8 sps:$4 sm:$0xff]  }
  0x66   : > { %1146 = vmatmul.mubr.bf16.gmra.mrb[16].mxu0 %v3718_v35  ;;  %1402 = vmatmul.mubr.bf16.gmra.mrb[16].mxu1 %v3719_v36  ;;  %v3814_v35 = vld [vmem:[%s4206_s28 + $0x140] ss:$8 sps:$4 sm:$0xff]  }
  0x67   : > { %1153 = vmatprep.mubr.bf16.mxu0 %v3720_v37  ;;  %1409 = vmatprep.mubr.bf16.mxu1 %v3722_v38  ;;  %v3815_v36 = vld [vmem:[%s4206_s28 + $0x340] ss:$8 sps:$4 sm:$0xff]   ;;  %v3816_v37 = vld [vmem:[%s4206_s28 + $0x154] ss:$8 sps:$4 sm:$0xff]  }
  0x68   : > { %v3818_v38 = vld [vmem:[%s4206_s28 + $0x354] ss:$8 sps:$4 sm:$0xff]  }
  0x6e   : > { %1154 = vmatmul.mubr.bf16.gmra.mrb[20].mxu0 %v3724_v39  ;;  %1410 = vmatmul.mubr.bf16.gmra.mrb[20].mxu1 %v3725_v40  ;;  %v3820_v39 = vld [vmem:[%s4206_s28 + $0x150] ss:$8 sps:$4 sm:$0xff]  }
  0x6f   : > { %1161 = vmatprep.mubr.bf16.mxu0 %v3726_v41  ;;  %1417 = vmatprep.mubr.bf16.mxu1 %v3728_v42  ;;  %v3821_v40 = vld [vmem:[%s4206_s28 + $0x350] ss:$8 sps:$4 sm:$0xff]   ;;  %v3822_v41 = vld [vmem:[%s4206_s28 + $0x164] ss:$8 sps:$4 sm:$0xff]  }
  0x70   : > { %v3824_v42 = vld [vmem:[%s4206_s28 + $0x364] ss:$8 sps:$4 sm:$0xff]  }
  0x76   : > { %1162 = vmatmul.mubr.bf16.gmra.mrb[24].mxu0 %v3730_v43  ;;  %1418 = vmatmul.mubr.bf16.gmra.mrb[24].mxu1 %v3731_v44  ;;  %v3826_v43 = vld [vmem:[%s4206_s28 + $0x160] ss:$8 sps:$4 sm:$0xff]  }
  0x77   : > { %1169 = vmatprep.mubr.bf16.mxu0 %v3732_v45  ;;  %1425 = vmatprep.mubr.bf16.mxu1 %v3734_v46  ;;  %v3827_v44 = vld [vmem:[%s4206_s28 + $0x360] ss:$8 sps:$4 sm:$0xff]   ;;  %v3828_v45 = vld [vmem:[%s4206_s28 + $0x174] ss:$8 sps:$4 sm:$0xff]  }
  0x78   : > { %v3830_v46 = vld [vmem:[%s4206_s28 + $0x374] ss:$8 sps:$4 sm:$0xff]  }
  0x7e   : > { %1170 = vmatmul.mubr.bf16.gmra.mrb[28].mxu0 %v3736_v47  ;;  %1426 = vmatmul.mubr.bf16.gmra.mrb[28].mxu1 %v3737_v48  ;;  %v3832_v47 = vld [vmem:[%s4206_s28 + $0x170] ss:$8 sps:$4 sm:$0xff]  }
  0x7f   : > { %1177 = vmatprep.mubr.bf16.mxu0 %v3738_v49  ;;  %1433 = vmatprep.mubr.bf16.mxu1 %v3740_v50  ;;  %v3833_v48 = vld [vmem:[%s4206_s28 + $0x370] ss:$8 sps:$4 sm:$0xff]   ;;  %v3834_v49 = vld [vmem:[%s4206_s28 + $0x184] ss:$8 sps:$4 sm:$0xff]  }
  0x80   : > { %v3836_v50 = vld [vmem:[%s4206_s28 + $0x384] ss:$8 sps:$4 sm:$0xff]  }
  0x86   : > { %1178 = vmatmul.mubr.bf16.gmra.mrb[32].mxu0 %v3742_v51  ;;  %1434 = vmatmul.mubr.bf16.gmra.mrb[32].mxu1 %v3743_v52  ;;  %v3838_v51 = vld [vmem:[%s4206_s28 + $0x180] ss:$8 sps:$4 sm:$0xff]  }
  0x87   : > { %1185 = vmatprep.mubr.bf16.mxu0 %v3744_v53  ;;  %1441 = vmatprep.mubr.bf16.mxu1 %v3746_v54  ;;  %v3839_v52 = vld [vmem:[%s4206_s28 + $0x380] ss:$8 sps:$4 sm:$0xff]   ;;  %v3840_v53 = vld [vmem:[%s4206_s28 + $0x194] ss:$8 sps:$4 sm:$0xff]  }
  0x88   : > { %v3842_v54 = vld [vmem:[%s4206_s28 + $0x394] ss:$8 sps:$4 sm:$0xff]  }
  0x8e   : > { %1186 = vmatmul.mubr.bf16.gmra.mrb[36].mxu0 %v3748_v55  ;;  %1442 = vmatmul.mubr.bf16.gmra.mrb[36].mxu1 %v3749_v56  ;;  %v3844_v55 = vld [vmem:[%s4206_s28 + $0x190] ss:$8 sps:$4 sm:$0xff]  }
  0x8f   : > { %1193 = vmatprep.mubr.bf16.mxu0 %v3750_v57  ;;  %1449 = vmatprep.mubr.bf16.mxu1 %v3752_v58  ;;  %v3845_v56 = vld [vmem:[%s4206_s28 + $0x390] ss:$8 sps:$4 sm:$0xff]   ;;  %v3846_v57 = vld [vmem:[%s4206_s28 + $0x1a4] ss:$8 sps:$4 sm:$0xff]  }
  0x90   : > { %v3848_v58 = vld [vmem:[%s4206_s28 + $0x3a4] ss:$8 sps:$4 sm:$0xff]  }
  0x96   : > { %1194 = vmatmul.mubr.bf16.gmra.mrb[40].mxu0 %v3754_v59  ;;  %1450 = vmatmul.mubr.bf16.gmra.mrb[40].mxu1 %v3755_v60  ;;  %v3850_v59 = vld [vmem:[%s4206_s28 + $0x1a0] ss:$8 sps:$4 sm:$0xff]  }
  0x97   : > { %1201 = vmatprep.mubr.bf16.mxu0 %v3756_v61  ;;  %1457 = vmatprep.mubr.bf16.mxu1 %v3758_v62  ;;  %v3851_v60 = vld [vmem:[%s4206_s28 + $0x3a0] ss:$8 sps:$4 sm:$0xff]   ;;  %v3852_v61 = vld [vmem:[%s4206_s28 + $0x1b4] ss:$8 sps:$4 sm:$0xff]  }
  0x98   : > { %v3854_v62 = vld [vmem:[%s4206_s28 + $0x3b4] ss:$8 sps:$4 sm:$0xff]  }
  0x9e   : > { %1202 = vmatmul.mubr.bf16.gmra.mrb[44].mxu0 %v3760_v63  ;;  %1458 = vmatmul.mubr.bf16.gmra.mrb[44].mxu1 %v3761_v0  ;;  %v4378_v63 = vld [vmem:[%s5507_s2] ss:$0 sm:$0xff] }
  0x9f   : > { %1209 = vmatprep.mubr.bf16.mxu0 %v3762_v1  ;;  %1465 = vmatprep.mubr.bf16.mxu1 %v3764_v2 }
  0xa6   : > { %1210 = vmatmul.mubr.bf16.gmra.mrb[48].mxu0 %v3766_v3  ;;  %1466 = vmatmul.mubr.bf16.gmra.mrb[48].mxu1 %v3767_v4 }
  0xa7   : > { %1217 = vmatprep.mubr.bf16.mxu0 %v3768_v5  ;;  %1473 = vmatprep.mubr.bf16.mxu1 %v3770_v6  ;;  %v3856_v6 = vld [vmem:[%s4206_s28 + $0x1b0] ss:$8 sps:$4 sm:$0xff]  }
  0xae   : > { %1218 = vmatmul.mubr.bf16.gmra.mrb[52].mxu0 %v3772_v7  ;;  %1474 = vmatmul.mubr.bf16.gmra.mrb[52].mxu1 %v3773_v8  ;;  %v3857_v7 = vld [vmem:[%s4206_s28 + $0x3b0] ss:$8 sps:$4 sm:$0xff]  }
  0xaf   : > { %1225 = vmatprep.mubr.bf16.mxu0 %v3774_v9  ;;  %1481 = vmatprep.mubr.bf16.mxu1 %v3776_v10  ;;  %v3858_v10 = vld [vmem:[%s4206_s28 + $0x1c4] ss:$8 sps:$4 sm:$0xff]  }
  0xb6   : > { %1226 = vmatmul.mubr.bf16.gmra.mrb[56].mxu0 %v3778_v11  ;;  %1482 = vmatmul.mubr.bf16.gmra.mrb[56].mxu1 %v3779_v12  ;;  %v3860_v11 = vld [vmem:[%s4206_s28 + $0x3c4] ss:$8 sps:$4 sm:$0xff]  }
  0xb7   : > { %1233 = vmatprep.mubr.bf16.mxu0 %v3780_v13  ;;  %1489 = vmatprep.mubr.bf16.mxu1 %v3782_v14 }
  0xbe   : > { %1234 = vmatmul.mubr.bf16.gmra.mrb[60].mxu0 %v3784_v15  ;;  %1490 = vmatmul.mubr.bf16.gmra.mrb[60].mxu1 %v3785_v16 }
  0xbf   : > { %1241 = vmatprep.mubr.bf16.mxu0 %v3786_v17  ;;  %1497 = vmatprep.mubr.bf16.mxu1 %v3788_v18 }
  0xc6   : > { %1242 = vmatmul.mubr.bf16.gmra.mrb[64].mxu0 %v3790_v19  ;;  %1498 = vmatmul.mubr.bf16.gmra.mrb[64].mxu1 %v3791_v20 }
  0xc7   : > { %1249 = vmatprep.mubr.bf16.mxu0 %v3792_v21  ;;  %1505 = vmatprep.mubr.bf16.mxu1 %v3794_v22 }
  0xce   : > { %1250 = vmatmul.mubr.bf16.gmra.mrb[68].mxu0 %v3796_v23  ;;  %1506 = vmatmul.mubr.bf16.gmra.mrb[68].mxu1 %v3797_v24 }
  0xcf   : > { %1257 = vmatprep.mubr.bf16.mxu0 %v3798_v25  ;;  %1513 = vmatprep.mubr.bf16.mxu1 %v3800_v26 }
  0xd6   : > { %1258 = vmatmul.mubr.bf16.gmra.mrb[72].mxu0 %v3802_v27  ;;  %1514 = vmatmul.mubr.bf16.gmra.mrb[72].mxu1 %v3803_v28 }
  0xd7   : > { %1265 = vmatprep.mubr.bf16.mxu0 %v3804_v29  ;;  %1521 = vmatprep.mubr.bf16.mxu1 %v3806_v30  ;;  %v3862_v30 = vld [vmem:[%s4206_s28 + $0x1c0] ss:$8 sps:$4 sm:$0xff]  }
  0xde   : > { %1266 = vmatmul.mubr.bf16.gmra.mrb[76].mxu0 %v3808_v31  ;;  %1522 = vmatmul.mubr.bf16.gmra.mrb[76].mxu1 %v3809_v32  ;;  %v3863_v31 = vld [vmem:[%s4206_s28 + $0x3c0] ss:$8 sps:$4 sm:$0xff]  }
  0xdf   : > { %1273 = vmatprep.mubr.bf16.mxu0 %v3810_v33  ;;  %1529 = vmatprep.mubr.bf16.mxu1 %v3812_v34  ;;  %v3864_v34 = vld [vmem:[%s4206_s28 + $0x1d4] ss:$8 sps:$4 sm:$0xff]  }
  0xe6   : > { %1274 = vmatmul.mubr.bf16.gmra.mrb[80].mxu0 %v3814_v35  ;;  %1530 = vmatmul.mubr.bf16.gmra.mrb[80].mxu1 %v3815_v36  ;;  %v3866_v35 = vld [vmem:[%s4206_s28 + $0x3d4] ss:$8 sps:$4 sm:$0xff]  }
  0xe7   : > { %1281 = vmatprep.mubr.bf16.mxu0 %v3816_v37  ;;  %1537 = vmatprep.mubr.bf16.mxu1 %v3818_v38 }
  0xee   : > { %1282 = vmatmul.mubr.bf16.gmra.mrb[84].mxu0 %v3820_v39  ;;  %1538 = vmatmul.mubr.bf16.gmra.mrb[84].mxu1 %v3821_v40 }
  0xef   : > { %1289 = vmatprep.mubr.bf16.mxu0 %v3822_v41  ;;  %1545 = vmatprep.mubr.bf16.mxu1 %v3824_v42 }
  0xf6   : > { %1290 = vmatmul.mubr.bf16.gmra.mrb[88].mxu0 %v3826_v43  ;;  %1546 = vmatmul.mubr.bf16.gmra.mrb[88].mxu1 %v3827_v44 }
  0xf7   : > { %1297 = vmatprep.mubr.bf16.mxu0 %v3828_v45  ;;  %1553 = vmatprep.mubr.bf16.mxu1 %v3830_v46  ;;  %v3868_v46 = vld [vmem:[%s4206_s28 + $0x1d0] ss:$8 sps:$4 sm:$0xff]  }
  0xfe   : > { %1298 = vmatmul.mubr.bf16.gmra.mrb[92].mxu0 %v3832_v47  ;;  %1554 = vmatmul.mubr.bf16.gmra.mrb[92].mxu1 %v3833_v48 }
  0xff   : > { %1305 = vmatprep.mubr.bf16.mxu0 %v3834_v49  ;;  %1561 = vmatprep.mubr.bf16.mxu1 %v3836_v50  ;;  %v3869_v50 = vld [vmem:[%s4206_s28 + $0x3d0] ss:$8 sps:$4 sm:$0xff]  }
 0x106   : > { %1306 = vmatmul.mubr.bf16.gmra.mrb[96].mxu0 %v3838_v51  ;;  %1562 = vmatmul.mubr.bf16.gmra.mrb[96].mxu1 %v3839_v52 }
 0x107   : > { %1313 = vmatprep.mubr.bf16.mxu0 %v3840_v53  ;;  %1569 = vmatprep.mubr.bf16.mxu1 %v3842_v54 }
 0x10e   : > { %1314 = vmatmul.mubr.bf16.gmra.mrb[100].mxu0 %v3844_v55  ;;  %1570 = vmatmul.mubr.bf16.gmra.mrb[100].mxu1 %v3845_v56 }
 0x10f   : > { %1321 = vmatprep.mubr.bf16.mxu0 %v3846_v57  ;;  %1577 = vmatprep.mubr.bf16.mxu1 %v3848_v58  ;;  %v3870_v57 = vld [vmem:[%s4206_s28 + $0x1e4] ss:$8 sps:$4 sm:$0xff]  }
 0x116   : > { %1322 = vmatmul.mubr.bf16.gmra.mrb[104].mxu0 %v3850_v59  ;;  %1578 = vmatmul.mubr.bf16.gmra.mrb[104].mxu1 %v3851_v60 }
 0x117   : > { %1329 = vmatprep.mubr.bf16.mxu0 %v3852_v61  ;;  %1585 = vmatprep.mubr.bf16.mxu1 %v3854_v62  ;;  %v3872_v62 = vld [vmem:[%s4206_s28 + $0x3e4] ss:$8 sps:$4 sm:$0xff]  }
 0x119   : > { %v1115_v0 = vpop.f32.mrb[0].mxu0  ;;  %v1371_v1 = vpop.f32.mrb[0].mxu1 }
 0x11a   : > { %v4381_v2 = vadd.f32 %v4378_v63, %v1115_v0  ;;  %v4384_v3 = vadd.f32 %v4378_v63, %v1371_v1  ;;  %v1117_v4 = vpop.f32.mrb[1].mxu0  ;;  %v1373_v5 = vpop.f32.mrb[1].mxu1 }
 0x11b   : > { %v1118_v8 = vpop.f32.mrb[2].mxu0  ;;  %v1374_v9 = vpop.f32.mrb[2].mxu1 }
 0x11c   : > { %v1754_v12 = vmin.f32 %v4381_v2, 0.0  ;;  %v1818_v13 = vmin.f32 %v4384_v3, 0.0  ;;  %v1120_v14 = vpop.f32.mrb[3].mxu0  ;;  %v1376_v15 = vpop.f32.mrb[3].mxu1  ;;  %v4393_v16 = vadd.f32 %v4378_v63, %v1118_v8  ;;  %v4396_v17 = vadd.f32 %v4378_v63, %v1374_v9 }
 0x11d   : > { %vm1626_vm1 = vcmp.gt.f32.partialorder %v4381_v2, 0.0  ;;  %vm1690_vm2 = vcmp.gt.f32.partialorder %v4384_v3, 0.0 }
 0x11e   : > { %v1882_v18 = vmul.f32 1.442695, %v1754_v12  ;;  %v2010_v19 = vmul.f32 1.442695, %v1818_v13  ;;  %1330 = vmatmul.mubr.bf16.gmra.mrb[108].mxu0 %v3856_v6  ;;  %1586 = vmatmul.mubr.bf16.gmra.mrb[108].mxu1 %v3857_v7  ;;  %v1755_v20 = vmin.f32 %v4393_v16, 0.0  ;;  %v1819_v21 = vmin.f32 %v4396_v17, 0.0 }
 0x11f   : > { %1337 = vmatprep.mubr.bf16.mxu0 %v3858_v10  ;;  %1593 = vmatprep.mubr.bf16.mxu1 %v3860_v11  ;;  %vm1627_vm3 = vcmp.gt.f32.partialorder %v4393_v16, 0.0  ;;  %vm1691_vm4 = vcmp.gt.f32.partialorder %v4396_v17, 0.0 }
 0x120   : > { %3882 = vpow2.f32 %v1882_v18  ;;  %v1884_v22 = vmul.f32 1.442695, %v1755_v20  ;;  %v2012_v23 = vmul.f32 1.442695, %v1819_v21  ;;  %v3874_v21 = vld [vmem:[%s4206_s28 + $0x1e0] ss:$8 sps:$4 sm:$0xff]  }
 0x121   : > { %3884 = vpow2.f32 %v2010_v19  ;;  %v1123_v24 = vpop.f32.mrb[4].mxu0  ;;  %v1379_v25 = vpop.f32.mrb[4].mxu1 }
 0x122   : > { %v4401_v26 = vadd.f32 %v4378_v63, %v1123_v24  ;;  %v4404_v27 = vadd.f32 %v4378_v63, %v1379_v25  ;;  %v1125_v28 = vpop.f32.mrb[5].mxu0  ;;  %v1381_v29 = vpop.f32.mrb[5].mxu1  ;;  %3886 = vpow2.f32 %v1884_v22 }
 0x123   : > { %v1126_v32 = vpop.f32.mrb[6].mxu0  ;;  %v1382_v33 = vpop.f32.mrb[6].mxu1  ;;  %3888 = vpow2.f32 %v2012_v23  ;;  %v3875_v28 = vld [vmem:[%s4206_s28 + $0x3e0] ss:$8 sps:$4 sm:$0xff]   ;;  %v3876_v29 = vld [vmem:[%s4206_s28 + $0x1f4] ss:$8 sps:$4 sm:$0xff]  }
 0x124   : > { %v1756_v36 = vmin.f32 %v4401_v26, 0.0  ;;  %v1128_v37 = vpop.f32.mrb[7].mxu0  ;;  %v1384_v38 = vpop.f32.mrb[7].mxu1  ;;  %v1820_v39 = vmin.f32 %v4404_v27, 0.0  ;;  %v4413_v40 = vadd.f32 %v4378_v63, %v1126_v32  ;;  %v4416_v41 = vadd.f32 %v4378_v63, %v1382_v33 }
 0x125   : > { %vm1628_vm5 = vcmp.gt.f32.partialorder %v4401_v26, 0.0  ;;  %vm1692_vm6 = vcmp.gt.f32.partialorder %v4404_v27, 0.0 }
 0x126   : > { %v1886_v42 = vmul.f32 1.442695, %v1756_v36  ;;  %1338 = vmatmul.mubr.bf16.gmra.mrb[112].mxu0 %v3862_v30  ;;  %1594 = vmatmul.mubr.bf16.gmra.mrb[112].mxu1 %v3863_v31  ;;  %v2014_v43 = vmul.f32 1.442695, %v1820_v39  ;;  %v1757_v44 = vmin.f32 %v4413_v40, 0.0  ;;  %v1821_v45 = vmin.f32 %v4416_v41, 0.0 }
 0x127   : > { %1345 = vmatprep.mubr.bf16.mxu0 %v3864_v34  ;;  %1601 = vmatprep.mubr.bf16.mxu1 %v3866_v35  ;;  %vm1629_vm7 = vcmp.gt.f32.partialorder %v4413_v40, 0.0  ;;  %vm1693_vm8 = vcmp.gt.f32.partialorder %v4416_v41, 0.0 }
 0x128   : > { %3890 = vpow2.f32 %v1886_v42  ;;  %v1888_v47 = vmul.f32 1.442695, %v1757_v44  ;;  %v2016_v52 = vmul.f32 1.442695, %v1821_v45  ;;  %v3878_v42 = vld [vmem:[%s4206_s28 + $0x3f4] ss:$8 sps:$4 sm:$0xff]  }
 0x129   : > { %3892 = vpow2.f32 %v2014_v43  ;;  %v1131_v48 = vpop.f32.mrb[8].mxu0  ;;  %v1387_v49 = vpop.f32.mrb[8].mxu1 }
 0x12a   : > { %v3883_v51 = vpop.eup %3882  ;;  %v4424_v53 = vadd.f32 %v4378_v63, %v1131_v48  ;;  %v4427_v54 = vadd.f32 %v4378_v63, %v1387_v49  ;;  %v1133_v55 = vpop.f32.mrb[9].mxu0  ;;  %3894 = vpow2.f32 %v1888_v47 }
 0x12b   : > { %v1389_v56 = vpop.f32.mrb[9].mxu1  ;;  %v3885_v58 = vpop.eup %3884  ;;  %v3246_v59 = vadd.f32 -1.0, %v3883_v51  ;;  %3896 = vpow2.f32 %v2016_v52 }
 0x12c   : > { %v1134_v60 = vpop.f32.mrb[10].mxu0  ;;  %v1390_v61 = vpop.f32.mrb[10].mxu1  ;;  %v3310_v0 = vadd.f32 -1.0, %v3885_v58  ;;  %v1758_v1 = vmin.f32 %v4424_v53, 0.0  ;;  %v1822_v8 = vmin.f32 %v4427_v54, 0.0  ;;  %vm1630_vm9 = vcmp.gt.f32.partialorder %v4424_v53, 0.0 }
 0x12d   : > { %v1136_v4 = vpop.f32.mrb[11].mxu0  ;;  %v1392_v5 = vpop.f32.mrb[11].mxu1  ;;  %v2266_v7 = vsel %vm1626_vm1, %v4381_v2, %v3246_v59  ;;  %v4445_v9 = vadd.f32 %v4378_v63, %v1134_v60  ;;  %v4456_v20 = vadd.f32 %v4378_v63, %v1390_v61  ;;  %vm1694_vm10 = vcmp.gt.f32.partialorder %v4427_v54, 0.0 }
 0x12e   : > { %v3887_v6 = vpop.eup %3886  ;;  %v3505_v11 = vpack.c.bf16 %v2266_v7, %v2266_v7  ;;  %v2330_v12 = vsel %vm1690_vm2, %v4384_v3, %v3310_v0  ;;  %v1890_v14 = vmul.f32 1.442695, %v1758_v1  ;;  %1346 = vmatmul.mubr.bf16.gmra.mrb[116].mxu0 %v3868_v46  ;;  %1602 = vmatmul.mubr.bf16.gmra.mrb[116].mxu1 %v3869_v50  ;;  %v2018_v18 = vmul.f32 1.442695, %v1822_v8  ;;  %v3881_v7 = vld [vmem:[%s4206_s28 + $0x3f0] ss:$8 sps:$4 sm:$0xff]  }
 0x12f   : > { %v3889_v10 = vpop.eup %3888  ;;  %v3247_v13 = vadd.f32 -1.0, %v3887_v6  ;;  %v3569_v15 = vpack.c.bf16 %v2330_v12, %v2330_v12  ;;  %1353 = vmatprep.mubr.bf16.mxu0 %v3870_v57  ;;  %1609 = vmatprep.mubr.bf16.mxu1 %v3872_v62  ;;  %v1759_v19 = vmin.f32 %v4445_v9, 0.0  ;;  %v1823_v32 = vmin.f32 %v4456_v20, 0.0  ;;  %v3880_v62 = vld [vmem:[%s4206_s28 + $0x1f0] ss:$8 sps:$4 sm:$0xff]  }
 0x130   : > { %v3311_v2 = vadd.f32 -1.0, %v3889_v10  ;;  %2907 = vst.msk [vmem:[%s4439_s5] sm:$0xf] %vm2906_vm0, %v3505_v11  ;;  %3898 = vpow2.f32 %v1890_v14  ;;  %vm1631_vm11 = vcmp.gt.f32.partialorder %v4445_v9, 0.0  ;;  %vm1695_vm12 = vcmp.gt.f32.partialorder %v4456_v20, 0.0 }
 0x131   : > { %v2267_v3 = vsel %vm1627_vm3, %v4393_v16, %v3247_v13  ;;  %2971 = vst.msk [vmem:[%s4439_s5 + $0x100] sm:$0xf] %vm2906_vm0, %v3569_v15  ;;  %3900 = vpow2.f32 %v2018_v18  ;;  %v1139_v24 = vpop.f32.mrb[12].mxu0  ;;  %v1395_v25 = vpop.f32.mrb[12].mxu1  ;;  %v1892_v31 = vmul.f32 1.442695, %v1759_v19 }
 0x132   : > { %v3506_v22 = vpack.c.bf16 %v2267_v3, %v2267_v3  ;;  %v2331_v23 = vsel %vm1691_vm4, %v4396_v17, %v3311_v2  ;;  %v3891_v16 = vpop.eup %3890  ;;  %v1141_v33 = vpop.f32.mrb[13].mxu0  ;;  %v4469_v36 = vadd.f32 %v4378_v63, %v1139_v24  ;;  %v4472_v37 = vadd.f32 %v4378_v63, %v1395_v25 }
 0x133   : > { %v3570_v30 = vpack.c.bf16 %v2331_v23, %v2331_v23  ;;  %v1397_v34 = vpop.f32.mrb[13].mxu1  ;;  %v3893_v35 = vpop.eup %3892  ;;  %v3248_v17 = vadd.f32 -1.0, %v3891_v16  ;;  %3902 = vpow2.f32 %v1892_v31  ;;  %v2020_v44 = vmul.f32 1.442695, %v1823_v32 }
 0x134   : > { %2908 = vst.msk [vmem:[%s4439_s5 + $0x4] sm:$0xf] %vm2906_vm0, %v3506_v22  ;;  %v1142_v38 = vpop.f32.mrb[14].mxu0  ;;  %v1398_v39 = vpop.f32.mrb[14].mxu1  ;;  %v3312_v43 = vadd.f32 -1.0, %v3893_v35  ;;  %v1760_v50 = vmin.f32 %v4469_v36, 0.0 }
 0x135   : > { %2972 = vst.msk [vmem:[%s4439_s5 + $0x104] sm:$0xf] %vm2906_vm0, %v3570_v30  ;;  %v4478_v45 = vadd.f32 %v4378_v63, %v1142_v38  ;;  %v1144_v46 = vpop.f32.mrb[15].mxu0  ;;  %v1400_v47 = vpop.f32.mrb[15].mxu1  ;;  %v2268_v49 = vsel %vm1628_vm5, %v4401_v26, %v3248_v17  ;;  %3904 = vpow2.f32 %v2020_v44  ;;  %v1824_v59 = vmin.f32 %v4472_v37, 0.0 }
 0x136   : > { %v3895_v48 = vpop.eup %3894  ;;  %v3507_v52 = vpack.c.bf16 %v2268_v49, %v2268_v49  ;;  %v2332_v55 = vsel %vm1692_vm6, %v4404_v27, %v3312_v43  ;;  %1354 = vmatmul.mubr.bf16.gmra.mrb[120].mxu0 %v3874_v21  ;;  %1610 = vmatmul.mubr.bf16.gmra.mrb[120].mxu1 %v3875_v28  ;;  %v1894_v26 = vmul.f32 1.442695, %v1760_v50  ;;  %v4494_v61 = vadd.f32 %v4378_v63, %v1398_v39 }
 0x137   : > { %v3897_v51 = vpop.eup %3896  ;;  %v3249_v56 = vadd.f32 -1.0, %v3895_v48  ;;  %v3571_v57 = vpack.c.bf16 %v2332_v55, %v2332_v55  ;;  %1361 = vmatprep.mubr.bf16.mxu0 %v3876_v29  ;;  %1617 = vmatprep.mubr.bf16.mxu1 %v3878_v42  ;;  %v1761_v60 = vmin.f32 %v4478_v45, 0.0  ;;  %v2022_v4 = vmul.f32 1.442695, %v1824_v59 }
 0x138   : > { %v3313_v58 = vadd.f32 -1.0, %v3897_v51  ;;  %2909 = vst.msk [vmem:[%s4439_s5 + $0x8] sm:$0xf] %vm2906_vm0, %v3507_v52  ;;  %3906 = vpow2.f32 %v1894_v26  ;;  %v1825_v11 = vmin.f32 %v4494_v61, 0.0  ;;  %vm1632_vm13 = vcmp.gt.f32.partialorder %v4469_v36, 0.0 }
 0x139   : > { %v2269_v27 = vsel %vm1629_vm7, %v4413_v40, %v3249_v56  ;;  %2973 = vst.msk [vmem:[%s4439_s5 + $0x108] sm:$0xf] %vm2906_vm0, %v3571_v57  ;;  %v1147_v5 = vpop.f32.mrb[16].mxu0  ;;  %v1403_v6 = vpop.f32.mrb[16].mxu1  ;;  %v1896_v10 = vmul.f32 1.442695, %v1761_v60  ;;  %3908 = vpow2.f32 %v2022_v4 }
 0x13a   : > { %v3508_v0 = vpack.c.bf16 %v2269_v27, %v2269_v27  ;;  %v2333_v1 = vsel %vm1693_vm8, %v4416_v41, %v3313_v58  ;;  %v3899_v40 = vpop.eup %3898  ;;  %v1149_v12 = vpop.f32.mrb[17].mxu0  ;;  %v4506_v41 = vadd.f32 %v4378_v63, %v1147_v5  ;;  %v4509_v2 = vadd.f32 %v4378_v63, %v1403_v6 }
 0x13b   : > { %v3572_v8 = vpack.c.bf16 %v2333_v1, %v2333_v1  ;;  %v1405_v13 = vpop.f32.mrb[17].mxu1  ;;  %v3901_v14 = vpop.eup %3900  ;;  %v3250_v15 = vadd.f32 -1.0, %v3899_v40  ;;  %3910 = vpow2.f32 %v1896_v10  ;;  %v2024_v21 = vmul.f32 1.442695, %v1825_v11 }
 0x13c   : > { %2910 = vst.msk [vmem:[%s4439_s5 + $0xc] sm:$0xf] %vm2906_vm0, %v3508_v0  ;;  %v1150_v18 = vpop.f32.mrb[18].mxu0  ;;  %v1406_v3 = vpop.f32.mrb[18].mxu1  ;;  %v3314_v19 = vadd.f32 -1.0, %v3901_v14  ;;  %v1762_v28 = vmin.f32 %v4506_v41, 0.0 }
 0x13d   : > { %2974 = vst.msk [vmem:[%s4439_s5 + $0x10c] sm:$0xf] %vm2906_vm0, %v3572_v8  ;;  %v4514_v22 = vadd.f32 %v4378_v63, %v1150_v18  ;;  %v1152_v23 = vpop.f32.mrb[19].mxu0  ;;  %v1408_v24 = vpop.f32.mrb[19].mxu1  ;;  %v2270_v25 = vsel %vm1630_vm9, %v4424_v53, %v3250_v15  ;;  %3912 = vpow2.f32 %v2024_v21  ;;  %v1826_v31 = vmin.f32 %v4509_v2, 0.0 }
 0x13e   : > { %v3903_v29 = vpop.eup %3902  ;;  %v3509_v16 = vpack.c.bf16 %v2270_v25, %v2270_v25  ;;  %v2334_v30 = vsel %vm1694_vm10, %v4427_v54, %v3314_v19  ;;  %1362 = vmatmul.mubr.bf16.gmra.mrb[124].mxu0 %v3880_v62  ;;  %1618 = vmatmul.mubr.bf16.gmra.mrb[124].mxu1 %v3881_v7  ;;  %v1898_v34 = vmul.f32 1.442695, %v1762_v28  ;;  %v4528_v38 = vadd.f32 %v4378_v63, %v1406_v3 }
 0x13f   : > { %v3573_v32 = vpack.c.bf16 %v2334_v30, %v2334_v30  ;;  %v3251_v33 = vadd.f32 -1.0, %v3903_v29  ;;  %v3905_v35 = vpop.eup %3904  ;;  %v2026_v53 = vmul.f32 1.442695, %v1826_v31  ;;  %v1763_v17 = vmin.f32 %v4514_v22, 0.0 }
 0x140   : > { %2911 = vst.msk [vmem:[%s4439_s5 + $0x10] sm:$0xf] %vm2906_vm0, %v3509_v16  ;;  %v3315_v39 = vadd.f32 -1.0, %v3905_v35  ;;  %3914 = vpow2.f32 %v1898_v34  ;;  %v1827_v51 = vmin.f32 %v4528_v38, 0.0  ;;  %vm1696_vm14 = vcmp.gt.f32.partialorder %v4472_v37, 0.0 }
 0x141   : > { %2975 = vst.msk [vmem:[%s4439_s5 + $0x110] sm:$0xf] %vm2906_vm0, %v3573_v32  ;;  %v2271_v54 = vsel %vm1631_vm11, %v4445_v9, %v3251_v33  ;;  %v1155_v42 = vpop.f32.mrb[20].mxu0  ;;  %v1411_v43 = vpop.f32.mrb[20].mxu1  ;;  %3916 = vpow2.f32 %v2026_v53  ;;  %v1900_v46 = vmul.f32 1.442695, %v1763_v17 }
 0x142   : > { %v3510_v44 = vpack.c.bf16 %v2271_v54, %v2271_v54  ;;  %v1157_v47 = vpop.f32.mrb[21].mxu0  ;;  %v1413_v48 = vpop.f32.mrb[21].mxu1  ;;  %v2335_v50 = vsel %vm1695_vm12, %v4456_v20, %v3315_v39  ;;  %v4537_v52 = vadd.f32 %v4378_v63, %v1155_v42  ;;  %v4540_v9 = vadd.f32 %v4378_v63, %v1411_v43 }
 0x143   : > { %v3907_v49 = vpop.eup %3906  ;;  %v1158_v55 = vpop.f32.mrb[22].mxu0  ;;  %v3574_v57 = vpack.c.bf16 %v2335_v50, %v2335_v50  ;;  %3918 = vpow2.f32 %v1900_v46  ;;  %v2028_v60 = vmul.f32 1.442695, %v1827_v51  ;;  %vm1633_vm15 = vcmp.gt.f32.partialorder %v4478_v45, 0.0 }
 0x144   : > { %v1414_v56 = vpop.f32.mrb[22].mxu1  ;;  %2912 = vst.msk [vmem:[%s4439_s5 + $0x14] sm:$0xf] %vm2906_vm0, %v3510_v44  ;;  %v3252_v58 = vadd.f32 -1.0, %v3907_v49  ;;  %v4545_v26 = vadd.f32 %v4378_v63, %v1158_v55  ;;  %v1160_v20 = vpop.f32.mrb[23].mxu0  ;;  %v1764_v62 = vmin.f32 %v4537_v52, 0.0 }
 0x145   : > { %v1416_v59 = vpop.f32.mrb[23].mxu1  ;;  %v3909_v27 = vpop.eup %3908  ;;  %2976 = vst.msk [vmem:[%s4439_s5 + $0x114] sm:$0xf] %vm2906_vm0, %v3574_v57  ;;  %v1828_v5 = vmin.f32 %v4540_v9, 0.0  ;;  %3920 = vpow2.f32 %v2028_v60  ;;  %v4558_v13 = vadd.f32 %v4378_v63, %v1414_v56  ;;  %vm1697_vm1 = vcmp.gt.f32.partialorder %v4494_v61, 0.0 }
 0x146   : > { %v3911_v0 = vpop.eup %3910  ;;  %v2272_v1 = vsel %vm1632_vm13, %v4469_v36, %v3252_v58  ;;  %v3316_v4 = vadd.f32 -1.0, %v3909_v27  ;;  %v1902_v40 = vmul.f32 1.442695, %v1764_v62  ;;  %v1765_v12 = vmin.f32 %v4545_v26, 0.0 }
 0x147   : > { %v3511_v6 = vpack.c.bf16 %v2272_v1, %v2272_v1  ;;  %v3253_v7 = vadd.f32 -1.0, %v3911_v0  ;;  %v3913_v8 = vpop.eup %3912  ;;  %v2030_v11 = vmul.f32 1.442695, %v1828_v5  ;;  %v1829_v28 = vmin.f32 %v4558_v13, 0.0 }
 0x148   : > { %v2336_v10 = vsel %vm1696_vm14, %v4472_v37, %v3316_v4  ;;  %v3317_v15 = vadd.f32 -1.0, %v3913_v8  ;;  %3922 = vpow2.f32 %v1902_v40  ;;  %v1904_v37 = vmul.f32 1.442695, %v1765_v12 }
 0x149   : > { %2913 = vst.msk [vmem:[%s4439_s5 + $0x18] sm:$0xf] %vm2906_vm0, %v3511_v6  ;;  %v3575_v36 = vpack.c.bf16 %v2336_v10, %v2336_v10  ;;  %v2273_v14 = vsel %vm1633_vm15, %v4478_v45, %v3253_v7  ;;  %v1163_v18 = vpop.f32.mrb[24].mxu0  ;;  %v1419_v3 = vpop.f32.mrb[24].mxu1  ;;  %3924 = vpow2.f32 %v2030_v11  ;;  %vm1634_vm2 = vcmp.gt.f32.partialorder %v4506_v41, 0.0 }
 0x14a   : > { %v3512_v19 = vpack.c.bf16 %v2273_v14, %v2273_v14  ;;  %v1165_v21 = vpop.f32.mrb[25].mxu0  ;;  %v1421_v23 = vpop.f32.mrb[25].mxu1  ;;  %v2337_v25 = vsel %vm1697_vm1, %v4494_v61, %v3317_v15  ;;  %v4569_v45 = vadd.f32 %v4378_v63, %v1163_v18  ;;  %v4572_v29 = vadd.f32 %v4378_v63, %v1419_v3 }
 0x14b   : > { %v3915_v24 = vpop.eup %3914  ;;  %2977 = vst.msk [vmem:[%s4439_s5 + $0x118] sm:$0xf] %vm2906_vm0, %v3575_v36  ;;  %v1166_v16 = vpop.f32.mrb[26].mxu0  ;;  %v3576_v32 = vpack.c.bf16 %v2337_v25, %v2337_v25  ;;  %3926 = vpow2.f32 %v1904_v37  ;;  %v2032_v17 = vmul.f32 1.442695, %v1829_v28  ;;  %vm1698_vm3 = vcmp.gt.f32.partialorder %v4509_v2, 0.0 }
 0x14c   : > { %v1422_v30 = vpop.f32.mrb[26].mxu1  ;;  %v3917_v31 = vpop.eup %3916  ;;  %2914 = vst.msk [vmem:[%s4439_s5 + $0x1c] sm:$0xf] %vm2906_vm0, %v3512_v19  ;;  %v3254_v33 = vadd.f32 -1.0, %v3915_v24  ;;  %v4577_v34 = vadd.f32 %v4378_v63, %v1166_v16  ;;  %v1766_v54 = vmin.f32 %v4569_v45, 0.0  ;;  %vm1635_vm4 = vcmp.gt.f32.partialorder %v4514_v22, 0.0 }
 0x14d   : > { %v1168_v61 = vpop.f32.mrb[27].mxu0  ;;  %v1424_v35 = vpop.f32.mrb[27].mxu1  ;;  %v3318_v53 = vadd.f32 -1.0, %v3917_v31  ;;  %2978 = vst.msk [vmem:[%s4439_s5 + $0x11c] sm:$0xf] %vm2906_vm0, %v3576_v32  ;;  %v1830_v43 = vmin.f32 %v4572_v29, 0.0  ;;  %3928 = vpow2.f32 %v2032_v17  ;;  %v4594_v56 = vadd.f32 %v4378_v63, %v1422_v30 }
 0x14e   : > { %v3919_v39 = vpop.eup %3918  ;;  %v2274_v42 = vsel %vm1634_vm2, %v4506_v41, %v3254_v33  ;;  %v1906_v49 = vmul.f32 1.442695, %v1766_v54  ;;  %v1767_v51 = vmin.f32 %v4577_v34, 0.0  ;;  %vm1699_vm5 = vcmp.gt.f32.partialorder %v4528_v38, 0.0 }
 0x14f   : > { %v3513_v44 = vpack.c.bf16 %v2274_v42, %v2274_v42  ;;  %v2338_v46 = vsel %vm1698_vm3, %v4509_v2, %v3318_v53  ;;  %v3255_v47 = vadd.f32 -1.0, %v3919_v39  ;;  %v2034_v50 = vmul.f32 1.442695, %v1830_v43  ;;  %v3921_v55 = vpop.eup %3920 }
 0x150   : > { %v3577_v48 = vpack.c.bf16 %v2338_v46, %v2338_v46  ;;  %v3319_v20 = vadd.f32 -1.0, %v3921_v55  ;;  %3930 = vpow2.f32 %v1906_v49  ;;  %v1908_v59 = vmul.f32 1.442695, %v1767_v51 }
 0x151   : > { %2915 = vst.msk [vmem:[%s4439_s5 + $0x20] sm:$0xf] %vm2906_vm0, %v3513_v44  ;;  %v2275_v41 = vsel %vm1635_vm4, %v4514_v22, %v3255_v47  ;;  %v1171_v57 = vpop.f32.mrb[28].mxu0  ;;  %v1427_v58 = vpop.f32.mrb[28].mxu1  ;;  %vm1636_vm6 = vcmp.gt.f32.partialorder %v4537_v52, 0.0  ;;  %3932 = vpow2.f32 %v2034_v50  ;;  %v1831_v22 = vmin.f32 %v4594_v56, 0.0 }
 0x152   : > { %2979 = vst.msk [vmem:[%s4439_s5 + $0x120] sm:$0xf] %vm2906_vm0, %v3577_v48  ;;  %v3514_v2 = vpack.c.bf16 %v2275_v41, %v2275_v41  ;;  %v1173_v27 = vpop.f32.mrb[29].mxu0  ;;  %v1429_v60 = vpop.f32.mrb[29].mxu1  ;;  %v4601_v0 = vadd.f32 %v4378_v63, %v1171_v57  ;;  %v2339_v6 = vsel %vm1699_vm5, %v4528_v38, %v3319_v20  ;;  %3934 = vpow2.f32 %v1908_v59 }
 0x153   : > { %v3923_v62 = vpop.eup %3922  ;;  %v1174_v1 = vpop.f32.mrb[30].mxu0  ;;  %v4609_v40 = vadd.f32 %v4378_v63, %v1427_v58  ;;  %v3578_v11 = vpack.c.bf16 %v2339_v6, %v2339_v6  ;;  %vm1700_vm7 = vcmp.gt.f32.partialorder %v4540_v9, 0.0  ;;  %v2036_v36 = vmul.f32 1.442695, %v1831_v22 }
 0x154   : > { %v1430_v4 = vpop.f32.mrb[30].mxu1  ;;  %v3925_v5 = vpop.eup %3924  ;;  %2916 = vst.msk [vmem:[%s4439_s5 + $0x24] sm:$0xf] %vm2906_vm0, %v3514_v2  ;;  %v3256_v7 = vadd.f32 -1.0, %v3923_v62  ;;  %vm1637_vm8 = vcmp.gt.f32.partialorder %v4545_v26, 0.0  ;;  %v1768_v38 = vmin.f32 %v4601_v0, 0.0  ;;  %v4622_v25 = vadd.f32 %v4378_v63, %v1174_v1 }
 0x155   : > { %v1176_v8 = vpop.f32.mrb[31].mxu0  ;;  %v1432_v10 = vpop.f32.mrb[31].mxu1  ;;  %v3320_v12 = vadd.f32 -1.0, %v3925_v5  ;;  %v1832_v18 = vmin.f32 %v4609_v40, 0.0  ;;  %2980 = vst.msk [vmem:[%s4439_s5 + $0x124] sm:$0xf] %vm2906_vm0, %v3578_v11  ;;  %3936 = vpow2.f32 %v2036_v36  ;;  %v4628_v16 = vadd.f32 %v4378_v63, %v1430_v4 }
 0x156   : > { %v3927_v14 = vpop.eup %3926  ;;  %v2276_v15 = vsel %vm1636_vm6, %v4537_v52, %v3256_v7  ;;  %v1910_v23 = vmul.f32 1.442695, %v1768_v38  ;;  %vm1701_vm9 = vcmp.gt.f32.partialorder %v4558_v13, 0.0  ;;  %vm1638_vm10 = vcmp.gt.f32.partialorder %v4569_v45, 0.0 }
 0x157   : > { %v3515_v3 = vpack.c.bf16 %v2276_v15, %v2276_v15  ;;  %v2340_v19 = vsel %vm1700_vm7, %v4540_v9, %v3320_v12  ;;  %v3257_v37 = vadd.f32 -1.0, %v3927_v14  ;;  %v2038_v24 = vmul.f32 1.442695, %v1832_v18  ;;  %v3929_v52 = vpop.eup %3928 }
 0x158   : > { %v3579_v21 = vpack.c.bf16 %v2340_v19, %v2340_v19  ;;  %v3321_v32 = vadd.f32 -1.0, %v3929_v52  ;;  %3938 = vpow2.f32 %v1910_v23  ;;  %v1833_v35 = vmin.f32 %v4628_v16, 0.0 }
 0x159   : > { %2917 = vst.msk [vmem:[%s4439_s5 + $0x28] sm:$0xf] %vm2906_vm0, %v3515_v3  ;;  %v2277_v28 = vsel %vm1637_vm8, %v4545_v26, %v3257_v37  ;;  %v1179_v30 = vpop.f32.mrb[32].mxu0  ;;  %v1435_v31 = vpop.f32.mrb[32].mxu1  ;;  %3940 = vpow2.f32 %v2038_v24  ;;  %v1769_v26 = vmin.f32 %v4622_v25, 0.0  ;;  %vm1702_vm11 = vcmp.gt.f32.partialorder %v4572_v29, 0.0 }
 0x15a   : > { %2981 = vst.msk [vmem:[%s4439_s5 + $0x128] sm:$0xf] %vm2906_vm0, %v3579_v21  ;;  %v3516_v9 = vpack.c.bf16 %v2277_v28, %v2277_v28  ;;  %v1181_v33 = vpop.f32.mrb[33].mxu0  ;;  %v1437_v61 = vpop.f32.mrb[33].mxu1  ;;  %v2341_v39 = vsel %vm1701_vm9, %v4558_v13, %v3321_v32  ;;  %v4641_v42 = vadd.f32 %v4378_v63, %v1179_v30  ;;  %v4644_v43 = vadd.f32 %v4378_v63, %v1435_v31 }
 0x15b   : > { %v1182_v53 = vpop.f32.mrb[34].mxu0  ;;  %v1438_v17 = vpop.f32.mrb[34].mxu1  ;;  %v3580_v48 = vpack.c.bf16 %v2341_v39, %v2341_v39  ;;  %v1912_v50 = vmul.f32 1.442695, %v1769_v26  ;;  %v2040_v51 = vmul.f32 1.442695, %v1833_v35 }
 0x15c   : > { %v3931_v54 = vpop.eup %3930  ;;  %2918 = vst.msk [vmem:[%s4439_s5 + $0x2c] sm:$0xf] %vm2906_vm0, %v3516_v9  ;;  %v1184_v44 = vpop.f32.mrb[35].mxu0  ;;  %vm1639_vm12 = vcmp.gt.f32.partialorder %v4577_v34, 0.0  ;;  %v1770_v13 = vmin.f32 %v4641_v42, 0.0  ;;  %v4649_v57 = vadd.f32 %v4378_v63, %v1182_v53  ;;  %v1834_v20 = vmin.f32 %v4644_v43, 0.0 }
 0x15d   : > { %v1440_v46 = vpop.f32.mrb[35].mxu1  ;;  %v3933_v47 = vpop.eup %3932  ;;  %v3258_v49 = vadd.f32 -1.0, %v3931_v54  ;;  %2982 = vst.msk [vmem:[%s4439_s5 + $0x12c] sm:$0xf] %vm2906_vm0, %v3580_v48  ;;  %3942 = vpow2.f32 %v1912_v50  ;;  %vm1703_vm13 = vcmp.gt.f32.partialorder %v4594_v56, 0.0  ;;  %vm1640_vm14 = vcmp.gt.f32.partialorder %v4601_v0, 0.0 }
 0x15e   : > { %v3935_v55 = vpop.eup %3934  ;;  %v3322_v41 = vadd.f32 -1.0, %v3933_v47  ;;  %3944 = vpow2.f32 %v2040_v51  ;;  %v1914_v60 = vmul.f32 1.442695, %v1770_v13  ;;  %v2042_v4 = vmul.f32 1.442695, %v1834_v20 }
 0x15f   : > { %v2278_v58 = vsel %vm1638_vm10, %v4569_v45, %v3258_v49  ;;  %v3259_v2 = vadd.f32 -1.0, %v3935_v55  ;;  %v3937_v62 = vpop.eup %3936  ;;  %vm1704_vm15 = vcmp.gt.f32.partialorder %v4609_v40, 0.0  ;;  %vm1641_vm1 = vcmp.gt.f32.partialorder %v4622_v25, 0.0 }
 0x160   : > { %v3517_v59 = vpack.c.bf16 %v2278_v58, %v2278_v58  ;;  %v2342_v27 = vsel %vm1702_vm11, %v4572_v29, %v3322_v41  ;;  %v3323_v7 = vadd.f32 -1.0, %v3937_v62  ;;  %3946 = vpow2.f32 %v1914_v60 }
 0x161   : > { %v3581_v22 = vpack.c.bf16 %v2342_v27, %v2342_v27  ;;  %v2279_v1 = vsel %vm1639_vm12, %v4577_v34, %v3259_v2  ;;  %v1187_v45 = vpop.f32.mrb[36].mxu0  ;;  %v1443_v5 = vpop.f32.mrb[36].mxu1  ;;  %v1771_v29 = vmin.f32 %v4649_v57, 0.0  ;;  %3948 = vpow2.f32 %v2042_v4 }
 0x162   : > { %2919 = vst.msk [vmem:[%s4439_s5 + $0x30] sm:$0xf] %vm2906_vm0, %v3517_v59  ;;  %v3518_v6 = vpack.c.bf16 %v2279_v1, %v2279_v1  ;;  %v1189_v8 = vpop.f32.mrb[37].mxu0  ;;  %v1445_v10 = vpop.f32.mrb[37].mxu1  ;;  %v4668_v34 = vadd.f32 %v4378_v63, %v1438_v17  ;;  %v4671_v11 = vadd.f32 %v4378_v63, %v1187_v45  ;;  %v4674_v12 = vadd.f32 %v4378_v63, %v1443_v5 }
 0x163   : > { %2983 = vst.msk [vmem:[%s4439_s5 + $0x130] sm:$0xf] %vm2906_vm0, %v3581_v22  ;;  %v1190_v36 = vpop.f32.mrb[38].mxu0  ;;  %v1446_v14 = vpop.f32.mrb[38].mxu1  ;;  %v2343_v38 = vsel %vm1703_vm13, %v4594_v56, %v3323_v7  ;;  %v1916_v18 = vmul.f32 1.442695, %v1771_v29 }
 0x164   : > { %v3939_v15 = vpop.eup %3938  ;;  %2920 = vst.msk [vmem:[%s4439_s5 + $0x34] sm:$0xf] %vm2906_vm0, %v3518_v6  ;;  %v1192_v3 = vpop.f32.mrb[39].mxu0  ;;  %v3582_v21 = vpack.c.bf16 %v2343_v38, %v2343_v38  ;;  %v1835_v24 = vmin.f32 %v4668_v34, 0.0  ;;  %v4684_v52 = vadd.f32 %v4378_v63, %v1190_v36  ;;  %v1772_v30 = vmin.f32 %v4671_v11, 0.0 }
 0x165   : > { %v1448_v19 = vpop.f32.mrb[39].mxu1  ;;  %v3941_v37 = vpop.eup %3940  ;;  %v3260_v23 = vadd.f32 -1.0, %v3939_v15  ;;  %3950 = vpow2.f32 %v1916_v18  ;;  %v4688_v31 = vadd.f32 %v4378_v63, %v1446_v14  ;;  %v1836_v32 = vmin.f32 %v4674_v12, 0.0 }
 0x166   : > { %v3324_v28 = vadd.f32 -1.0, %v3941_v37  ;;  %2984 = vst.msk [vmem:[%s4439_s5 + $0x134] sm:$0xf] %vm2906_vm0, %v3582_v21  ;;  %v2044_v9 = vmul.f32 1.442695, %v1835_v24  ;;  %v1773_v54 = vmin.f32 %v4684_v52, 0.0 }
 0x167   : > { %v2280_v56 = vsel %vm1640_vm14, %v4601_v0, %v3260_v23  ;;  %v1918_v26 = vmul.f32 1.442695, %v1772_v30  ;;  %v3943_v35 = vpop.eup %3942  ;;  %v2046_v17 = vmul.f32 1.442695, %v1836_v32  ;;  %vm1705_vm2 = vcmp.gt.f32.partialorder %v4628_v16, 0.0 }
 0x168   : > { %v3519_v33 = vpack.c.bf16 %v2280_v56, %v2280_v56  ;;  %v2344_v61 = vsel %vm1704_vm15, %v4609_v40, %v3324_v28  ;;  %3952 = vpow2.f32 %v2044_v9  ;;  %v3945_v44 = vpop.eup %3944  ;;  %v3261_v46 = vadd.f32 -1.0, %v3943_v35  ;;  %v4749_v24 = vld [vmem:[%s5507_s2] ss:$0 sm:$0xff] }
 0x169   : > { %v3583_v53 = vpack.c.bf16 %v2344_v61, %v2344_v61  ;;  %v1195_v0 = vpop.f32.mrb[40].mxu0  ;;  %v1451_v39 = vpop.f32.mrb[40].mxu1  ;;  %3954 = vpow2.f32 %v1918_v26  ;;  %v1837_v40 = vmin.f32 %v4688_v31, 0.0  ;;  %v3325_v49 = vadd.f32 -1.0, %v3945_v44 }
 0x16a   : > { %2921 = vst.msk [vmem:[%s4439_s5 + $0x38] sm:$0xf] %vm2906_vm0, %v3519_v33  ;;  %v1197_v47 = vpop.f32.mrb[41].mxu0  ;;  %v1453_v48 = vpop.f32.mrb[41].mxu1  ;;  %3956 = vpow2.f32 %v2046_v17  ;;  %v1920_v50 = vmul.f32 1.442695, %v1773_v54  ;;  %v4705_v51 = vadd.f32 %v4378_v63, %v1195_v0  ;;  %v2281_v58 = vsel %vm1641_vm1, %v4622_v25, %v3261_v46 }
 0x16b   : > { %2985 = vst.msk [vmem:[%s4439_s5 + $0x138] sm:$0xf] %vm2906_vm0, %v3583_v53  ;;  %v1198_v55 = vpop.f32.mrb[42].mxu0  ;;  %v1454_v41 = vpop.f32.mrb[42].mxu1  ;;  %v2048_v2 = vmul.f32 1.442695, %v1837_v40  ;;  %v4711_v20 = vadd.f32 %v4378_v63, %v1451_v39  ;;  %v3520_v22 = vpack.c.bf16 %v2281_v58, %v2281_v58  ;;  %v2345_v1 = vsel %vm1705_vm2, %v4628_v16, %v3325_v49 }
 0x16c   : > { %v3947_v13 = vpop.eup %3946  ;;  %v4714_v59 = vadd.f32 %v4378_v63, %v1198_v55  ;;  %v1200_v27 = vpop.f32.mrb[43].mxu0  ;;  %3958 = vpow2.f32 %v1920_v50  ;;  %v3584_v45 = vpack.c.bf16 %v2345_v1, %v2345_v1  ;;  %vm1642_vm3 = vcmp.gt.f32.partialorder %v4641_v42, 0.0 }
 0x16d   : > { %v1456_v60 = vpop.f32.mrb[43].mxu1  ;;  %v3949_v62 = vpop.eup %3948  ;;  %v3262_v4 = vadd.f32 -1.0, %v3947_v13  ;;  %3960 = vpow2.f32 %v2048_v2  ;;  %2922 = vst.msk [vmem:[%s4439_s5 + $0x3c] sm:$0xf] %vm2906_vm0, %v3520_v22  ;;  %vm1706_vm4 = vcmp.gt.f32.partialorder %v4644_v43, 0.0  ;;  %v1774_v6 = vmin.f32 %v4705_v51, 0.0 }
 0x16e   : > { %v3326_v25 = vadd.f32 -1.0, %v3949_v62  ;;  %v1838_v7 = vmin.f32 %v4711_v20, 0.0  ;;  %2986 = vst.msk [vmem:[%s4439_s5 + $0x13c] sm:$0xf] %vm2906_vm0, %v3584_v45  ;;  %vm1643_vm5 = vcmp.gt.f32.partialorder %v4649_v57, 0.0  ;;  %v1775_v10 = vmin.f32 %v4714_v59, 0.0 }
 0x16f   : > { %v2282_v5 = vsel %vm1642_vm3, %v4641_v42, %v3262_v4  ;;  %v3951_v29 = vpop.eup %3950  ;;  %v1922_v42 = vmul.f32 1.442695, %v1774_v6  ;;  %vm1707_vm6 = vcmp.gt.f32.partialorder %v4668_v34, 0.0  ;;  %v4735_v3 = vadd.f32 %v4378_v63, %v1454_v41 }
 0x170   : > { %v3521_v16 = vpack.c.bf16 %v2282_v5, %v2282_v5  ;;  %v2346_v8 = vsel %vm1706_vm4, %v4644_v43, %v3326_v25  ;;  %v3263_v14 = vadd.f32 -1.0, %v3951_v29  ;;  %v2050_v15 = vmul.f32 1.442695, %v1838_v7 }
 0x171   : > { %v3585_v36 = vpack.c.bf16 %v2346_v8, %v2346_v8  ;;  %v1203_v38 = vpop.f32.mrb[44].mxu0  ;;  %v1924_v18 = vmul.f32 1.442695, %v1775_v10  ;;  %v1459_v19 = vpop.f32.mrb[44].mxu1  ;;  %vm1644_vm7 = vcmp.gt.f32.partialorder %v4671_v11, 0.0  ;;  %3962 = vpow2.f32 %v1922_v42 }
 0x172   : > { %2923 = vst.msk [vmem:[%s4439_s5 + $0x40] sm:$0xf] %vm2906_vm0, %v3521_v16  ;;  %v4738_v43 = vadd.f32 %v4378_v63, %v1203_v38  ;;  %v1205_v37 = vpop.f32.mrb[45].mxu0  ;;  %v3953_v21 = vpop.eup %3952  ;;  %v2283_v23 = vsel %vm1643_vm5, %v4649_v57, %v3263_v14  ;;  %v4752_v63 = vadd.f32 %v4749_v24, %v1459_v19  ;;  %vm1708_vm8 = vcmp.gt.f32.partialorder %v4674_v12, 0.0 }
 0x173   : > { %2987 = vst.msk [vmem:[%s4439_s5 + $0x140] sm:$0xf] %vm2906_vm0, %v3585_v36  ;;  %v1461_v28 = vpop.f32.mrb[45].mxu1  ;;  %v1206_v30 = vpop.f32.mrb[46].mxu0  ;;  %v3522_v9 = vpack.c.bf16 %v2283_v23, %v2283_v23  ;;  %v3327_v32 = vadd.f32 -1.0, %v3953_v21  ;;  %3964 = vpow2.f32 %v2050_v15  ;;  %vm1645_vm9 = vcmp.gt.f32.partialorder %v4684_v52, 0.0 }
 0x174   : > { %v3955_v56 = vpop.eup %3954  ;;  %v1462_v57 = vpop.f32.mrb[46].mxu1  ;;  %3966 = vpow2.f32 %v1924_v18  ;;  %v1839_v35 = vmin.f32 %v4735_v3, 0.0  ;;  %vm1709_vm10 = vcmp.gt.f32.partialorder %v4688_v31, 0.0  ;;  %v1776_v0 = vmin.f32 %v4738_v43, 0.0 }
 0x175   : > { %v1208_v33 = vpop.f32.mrb[47].mxu0  ;;  %v3957_v61 = vpop.eup %3956  ;;  %v3264_v26 = vadd.f32 -1.0, %v3955_v56  ;;  %2924 = vst.msk [vmem:[%s4439_s5 + $0x44] sm:$0xf] %vm2906_vm0, %v3522_v9  ;;  %v2347_v17 = vsel %vm1707_vm6, %v4668_v34, %v3327_v32  ;;  %v1840_v47 = vmin.f32 %v4752_v63, 0.0  ;;  %v4782_v60 = vadd.f32 %v4749_v24, %v1462_v57 }
 0x176   : > { %v1464_v53 = vpop.f32.mrb[47].mxu1  ;;  %v3328_v54 = vadd.f32 -1.0, %v3957_v61  ;;  %v3959_v39 = vpop.eup %3958  ;;  %v3586_v44 = vpack.c.bf16 %v2347_v17, %v2347_v17  ;;  %v2052_v40 = vmul.f32 1.442695, %v1839_v35  ;;  %v1926_v55 = vmul.f32 1.442695, %v1776_v0 }
 0x177   : > { %v2284_v46 = vsel %vm1644_vm7, %v4671_v11, %v3264_v26  ;;  %v3961_v48 = vpop.eup %3960  ;;  %v3265_v50 = vadd.f32 -1.0, %v3959_v39  ;;  %v2054_v58 = vmul.f32 1.442695, %v1840_v47  ;;  %vm1646_vm11 = vcmp.gt.f32.partialorder %v4705_v51, 0.0 }
 0x178   : > { %v3523_v49 = vpack.c.bf16 %v2284_v46, %v2284_v46  ;;  %v2348_v34 = vsel %vm1708_vm8, %v4674_v12, %v3328_v54  ;;  %2988 = vst.msk [vmem:[%s4439_s5 + $0x144] sm:$0xf] %vm2906_vm0, %v3586_v44  ;;  %v3329_v13 = vadd.f32 -1.0, %v3961_v48  ;;  %3968 = vpow2.f32 %v2052_v40 }
 0x179   : > { %v3587_v41 = vpack.c.bf16 %v2348_v34, %v2348_v34  ;;  %v1211_v2 = vpop.f32.mrb[48].mxu0  ;;  %v1467_v11 = vpop.f32.mrb[48].mxu1  ;;  %v2285_v27 = vsel %vm1645_vm9, %v4684_v52, %v3265_v50  ;;  %3970 = vpow2.f32 %v1926_v55  ;;  %v4779_v12 = vadd.f32 %v4749_v24, %v1206_v30 }
 0x17a   : > { %2925 = vst.msk [vmem:[%s4439_s5 + $0x48] sm:$0xf] %vm2906_vm0, %v3523_v49  ;;  %v1213_v62 = vpop.f32.mrb[49].mxu0  ;;  %v1469_v22 = vpop.f32.mrb[49].mxu1  ;;  %v3524_v1 = vpack.c.bf16 %v2285_v27, %v2285_v27  ;;  %v2349_v4 = vsel %vm1709_vm10, %v4688_v31, %v3329_v13  ;;  %3972 = vpow2.f32 %v2054_v58  ;;  %v4790_v52 = vadd.f32 %v4749_v24, %v1211_v2 }
 0x17b   : > { %2989 = vst.msk [vmem:[%s4439_s5 + $0x148] sm:$0xf] %vm2906_vm0, %v3587_v41  ;;  %v1214_v45 = vpop.f32.mrb[50].mxu0  ;;  %v1470_v25 = vpop.f32.mrb[50].mxu1  ;;  %v3588_v5 = vpack.c.bf16 %v2349_v4, %v2349_v4  ;;  %v1777_v6 = vmin.f32 %v4779_v12, 0.0  ;;  %vm1710_vm12 = vcmp.gt.f32.partialorder %v4711_v20, 0.0  ;;  %v4800_v10 = vadd.f32 %v4749_v24, %v1467_v11 }
 0x17c   : > { %v1216_v7 = vpop.f32.mrb[51].mxu0  ;;  %v1472_v29 = vpop.f32.mrb[51].mxu1  ;;  %2926 = vst.msk [vmem:[%s4439_s5 + $0x4c] sm:$0xf] %vm2906_vm0, %v3524_v1  ;;  %v1841_v31 = vmin.f32 %v4782_v60, 0.0  ;;  %v1778_v8 = vmin.f32 %v4790_v52, 0.0  ;;  %v4806_v15 = vadd.f32 %v4749_v24, %v1214_v45  ;;  %v4809_v21 = vadd.f32 %v4749_v24, %v1470_v25 }
 0x17d   : > { %v3963_v16 = vpop.eup %3962  ;;  %2990 = vst.msk [vmem:[%s4439_s5 + $0x14c] sm:$0xf] %vm2906_vm0, %v3588_v5  ;;  %vm1647_vm13 = vcmp.gt.f32.partialorder %v4714_v59, 0.0  ;;  %v1928_v42 = vmul.f32 1.442695, %v1777_v6  ;;  %v1842_v30 = vmin.f32 %v4800_v10, 0.0 }
 0x17e   : > { %v3965_v36 = vpop.eup %3964  ;;  %v3266_v14 = vadd.f32 -1.0, %v3963_v16  ;;  %v2056_v19 = vmul.f32 1.442695, %v1841_v31  ;;  %v1930_v37 = vmul.f32 1.442695, %v1778_v8  ;;  %vm1711_vm14 = vcmp.gt.f32.partialorder %v4735_v3, 0.0 }
 0x17f   : > { %v3967_v38 = vpop.eup %3966  ;;  %v3330_v18 = vadd.f32 -1.0, %v3965_v36  ;;  %3974 = vpow2.f32 %v1928_v42  ;;  %v2058_v61 = vmul.f32 1.442695, %v1842_v30  ;;  %vm1648_vm15 = vcmp.gt.f32.partialorder %v4738_v43, 0.0 }
 0x180   : > { %v2286_v23 = vsel %vm1646_vm11, %v4705_v51, %v3266_v14  ;;  %v3267_v28 = vadd.f32 -1.0, %v3967_v38  ;;  %3976 = vpow2.f32 %v2056_v19  ;;  %v1779_v17 = vmin.f32 %v4806_v15, 0.0 }
 0x181   : > { %v3525_v56 = vpack.c.bf16 %v2286_v23, %v2286_v23  ;;  %v2350_v9 = vsel %vm1710_vm12, %v4711_v20, %v3330_v18  ;;  %v1219_v32 = vpop.f32.mrb[52].mxu0  ;;  %v1475_v57 = vpop.f32.mrb[52].mxu1  ;;  %3978 = vpow2.f32 %v1930_v37  ;;  %v1843_v54 = vmin.f32 %v4809_v21, 0.0 }
 0x182   : > { %v3589_v33 = vpack.c.bf16 %v2350_v9, %v2350_v9  ;;  %v2287_v51 = vsel %vm1647_vm13, %v4714_v59, %v3267_v28  ;;  %v1221_v26 = vpop.f32.mrb[53].mxu0  ;;  %v1477_v35 = vpop.f32.mrb[53].mxu1  ;;  %3980 = vpow2.f32 %v2058_v61  ;;  %v4830_v46 = vadd.f32 %v4749_v24, %v1219_v32 }
 0x183   : > { %v3969_v53 = vpop.eup %3968  ;;  %2927 = vst.msk [vmem:[%s4439_s5 + $0x50] sm:$0xf] %vm2906_vm0, %v3525_v56  ;;  %v3526_v20 = vpack.c.bf16 %v2287_v51, %v2287_v51  ;;  %v1222_v0 = vpop.f32.mrb[54].mxu0  ;;  %v4833_v40 = vadd.f32 %v4749_v24, %v1475_v57  ;;  %v1932_v50 = vmul.f32 1.442695, %v1779_v17  ;;  %vm1712_vm1 = vcmp.gt.f32.partialorder %v4752_v63, 0.0 }
 0x184   : > { %v1478_v39 = vpop.f32.mrb[54].mxu1  ;;  %v3971_v44 = vpop.eup %3970  ;;  %2991 = vst.msk [vmem:[%s4439_s5 + $0x150] sm:$0xf] %vm2906_vm0, %v3589_v33  ;;  %v3331_v59 = vadd.f32 -1.0, %v3969_v53  ;;  %v2060_v55 = vmul.f32 1.442695, %v1843_v54  ;;  %v4838_v41 = vadd.f32 %v4749_v24, %v1222_v0 }
 0x185   : > { %v1224_v47 = vpop.f32.mrb[55].mxu0  ;;  %v1480_v48 = vpop.f32.mrb[55].mxu1  ;;  %2928 = vst.msk [vmem:[%s4439_s5 + $0x54] sm:$0xf] %vm2906_vm0, %v3526_v20  ;;  %v3268_v34 = vadd.f32 -1.0, %v3971_v44  ;;  %v1780_v2 = vmin.f32 %v4830_v46, 0.0  ;;  %3982 = vpow2.f32 %v1932_v50 }
 0x186   : > { %v3973_v49 = vpop.eup %3972  ;;  %v2351_v13 = vsel %vm1711_vm14, %v4735_v3, %v3331_v59  ;;  %vm1649_vm2 = vcmp.gt.f32.partialorder %v4779_v12, 0.0  ;;  %3984 = vpow2.f32 %v2060_v55  ;;  %vm1713_vm3 = vcmp.gt.f32.partialorder %v4782_v60, 0.0 }
 0x187   : > { %v3332_v58 = vadd.f32 -1.0, %v3973_v49  ;;  %v3590_v11 = vpack.c.bf16 %v2351_v13, %v2351_v13  ;;  %v2288_v27 = vsel %vm1648_vm15, %v4738_v43, %v3268_v34  ;;  %v1934_v1 = vmul.f32 1.442695, %v1780_v2 }
 0x188   : > { %v3527_v62 = vpack.c.bf16 %v2288_v27, %v2288_v27  ;;  %v1844_v4 = vmin.f32 %v4833_v40, 0.0  ;;  %v1781_v45 = vmin.f32 %v4838_v41, 0.0  ;;  %vm1650_vm4 = vcmp.gt.f32.partialorder %v4790_v52, 0.0 }
 0x189   : > { %v2352_v22 = vsel %vm1712_vm1, %v4752_v63, %v3332_v58  ;;  %2992 = vst.msk [vmem:[%s4439_s5 + $0x154] sm:$0xf] %vm2906_vm0, %v3590_v11  ;;  %v1227_v25 = vpop.f32.mrb[56].mxu0  ;;  %v1483_v43 = vpop.f32.mrb[56].mxu1  ;;  %3986 = vpow2.f32 %v1934_v1  ;;  %v4859_v63 = vadd.f32 %v4749_v24, %v1478_v39  ;;  %vm1714_vm5 = vcmp.gt.f32.partialorder %v4800_v10, 0.0 }
 0x18a   : > { %v3591_v3 = vpack.c.bf16 %v2352_v22, %v2352_v22  ;;  %v3975_v5 = vpop.eup %3974  ;;  %2929 = vst.msk [vmem:[%s4439_s5 + $0x58] sm:$0xf] %vm2906_vm0, %v3527_v62  ;;  %v4862_v6 = vadd.f32 %v4749_v24, %v1227_v25  ;;  %v1229_v7 = vpop.f32.mrb[57].mxu0  ;;  %v2062_v8 = vmul.f32 1.442695, %v1844_v4  ;;  %v4869_v19 = vadd.f32 %v4749_v24, %v1483_v43 }
 0x18b   : > { %v1485_v29 = vpop.f32.mrb[57].mxu1  ;;  %v3977_v16 = vpop.eup %3976  ;;  %v3269_v31 = vadd.f32 -1.0, %v3975_v5  ;;  %v1936_v36 = vmul.f32 1.442695, %v1781_v45  ;;  %v1845_v18 = vmin.f32 %v4859_v63, 0.0  ;;  %vm1651_vm6 = vcmp.gt.f32.partialorder %v4806_v15, 0.0 }
 0x18c   : > { %2993 = vst.msk [vmem:[%s4439_s5 + $0x158] sm:$0xf] %vm2906_vm0, %v3591_v3  ;;  %v1230_v14 = vpop.f32.mrb[58].mxu0  ;;  %v3979_v42 = vpop.eup %3978  ;;  %v3333_v38 = vadd.f32 -1.0, %v3977_v16  ;;  %3988 = vpow2.f32 %v2062_v8  ;;  %v1782_v56 = vmin.f32 %v4862_v6, 0.0  ;;  %v1846_v20 = vmin.f32 %v4869_v19, 0.0 }
 0x18d   : > { %v1486_v37 = vpop.f32.mrb[58].mxu1  ;;  %v1232_v23 = vpop.f32.mrb[59].mxu0  ;;  %v2289_v28 = vsel %vm1649_vm2, %v4779_v12, %v3269_v31  ;;  %v3270_v30 = vadd.f32 -1.0, %v3979_v42  ;;  %3990 = vpow2.f32 %v1936_v36  ;;  %v2064_v51 = vmul.f32 1.442695, %v1845_v18 }
 0x18e   : > { %v1488_v9 = vpop.f32.mrb[59].mxu1  ;;  %v3981_v32 = vpop.eup %3980  ;;  %v3528_v57 = vpack.c.bf16 %v2289_v28, %v2289_v28  ;;  %v2353_v33 = vsel %vm1713_vm3, %v4782_v60, %v3333_v38  ;;  %v1938_v35 = vmul.f32 1.442695, %v1782_v56  ;;  %v4894_v54 = vadd.f32 %v4749_v24, %v1486_v37 }
 0x18f   : > { %v3592_v61 = vpack.c.bf16 %v2353_v33, %v2353_v33  ;;  %v2290_v26 = vsel %vm1650_vm4, %v4790_v52, %v3270_v30  ;;  %v3334_v12 = vadd.f32 -1.0, %v3981_v32  ;;  %3992 = vpow2.f32 %v2064_v51  ;;  %v3983_v17 = vpop.eup %3982 }
 0x190   : > { %2930 = vst.msk [vmem:[%s4439_s5 + $0x5c] sm:$0xf] %vm2906_vm0, %v3528_v57  ;;  %v3529_v53 = vpack.c.bf16 %v2290_v26, %v2290_v26  ;;  %3994 = vpow2.f32 %v1938_v35  ;;  %v4891_v52 = vadd.f32 %v4749_v24, %v1230_v14  ;;  %v3985_v44 = vpop.eup %3984  ;;  %v3271_v47 = vadd.f32 -1.0, %v3983_v17 }
 0x191   : > { %2994 = vst.msk [vmem:[%s4439_s5 + $0x15c] sm:$0xf] %vm2906_vm0, %v3592_v61  ;;  %v2354_v60 = vsel %vm1714_vm5, %v4800_v10, %v3334_v12  ;;  %v1235_v0 = vpop.f32.mrb[60].mxu0  ;;  %v1491_v39 = vpop.f32.mrb[60].mxu1  ;;  %v2066_v48 = vmul.f32 1.442695, %v1846_v20 }
 0x192   : > { %2931 = vst.msk [vmem:[%s4439_s5 + $0x60] sm:$0xf] %vm2906_vm0, %v3529_v53  ;;  %v3593_v59 = vpack.c.bf16 %v2354_v60, %v2354_v60  ;;  %v4899_v49 = vadd.f32 %v4749_v24, %v1235_v0  ;;  %v1237_v10 = vpop.f32.mrb[61].mxu0  ;;  %v1493_v34 = vpop.f32.mrb[61].mxu1  ;;  %vm1715_vm7 = vcmp.gt.f32.partialorder %v4809_v21, 0.0  ;;  %v3335_v50 = vadd.f32 -1.0, %v3985_v44 }
 0x193   : > { %vm1652_vm8 = vcmp.gt.f32.partialorder %v4830_v46, 0.0  ;;  %v1783_v55 = vmin.f32 %v4891_v52, 0.0  ;;  %v1238_v13 = vpop.f32.mrb[62].mxu0  ;;  %v1494_v58 = vpop.f32.mrb[62].mxu1  ;;  %v2291_v11 = vsel %vm1651_vm6, %v4806_v15, %v3271_v47  ;;  %vm1716_vm9 = vcmp.gt.f32.partialorder %v4833_v40, 0.0 }
 0x194   : > { %v3987_v2 = vpop.eup %3986  ;;  %2995 = vst.msk [vmem:[%s4439_s5 + $0x160] sm:$0xf] %vm2906_vm0, %v3593_v59  ;;  %3996 = vpow2.f32 %v2066_v48  ;;  %v1847_v27 = vmin.f32 %v4894_v54, 0.0  ;;  %v1240_v62 = vpop.f32.mrb[63].mxu0  ;;  %v3530_v1 = vpack.c.bf16 %v2291_v11, %v2291_v11  ;;  %v2355_v3 = vsel %vm1715_vm7, %v4809_v21, %v3335_v50 }
 0x195   : > { %v1496_v22 = vpop.f32.mrb[63].mxu1  ;;  %v3272_v4 = vadd.f32 -1.0, %v3987_v2  ;;  %v1940_v45 = vmul.f32 1.442695, %v1783_v55  ;;  %v3594_v25 = vpack.c.bf16 %v2355_v3, %v2355_v3  ;;  %v1784_v5 = vmin.f32 %v4899_v49, 0.0 }
 0x196   : > { %v2068_v43 = vmul.f32 1.442695, %v1847_v27  ;;  %v4914_v7 = vadd.f32 %v4749_v24, %v1491_v39  ;;  %v3989_v15 = vpop.eup %3988  ;;  %2932 = vst.msk [vmem:[%s4439_s5 + $0x64] sm:$0xf] %vm2906_vm0, %v3530_v1  ;;  %v4922_v21 = vadd.f32 %v4749_v24, %v1238_v13  ;;  %v4925_v16 = vadd.f32 %v4749_v24, %v1494_v58 }
 0x197   : > { %v2292_v29 = vsel %vm1652_vm8, %v4830_v46, %v3272_v4  ;;  %3998 = vpow2.f32 %v1940_v45  ;;  %v3991_v31 = vpop.eup %3990  ;;  %2996 = vst.msk [vmem:[%s4439_s5 + $0x164] sm:$0xf] %vm2906_vm0, %v3594_v25  ;;  %v3336_v36 = vadd.f32 -1.0, %v3989_v15  ;;  %v1942_v14 = vmul.f32 1.442695, %v1784_v5 }
 0x198   : > { %v3531_v8 = vpack.c.bf16 %v2292_v29, %v2292_v29  ;;  %4000 = vpow2.f32 %v2068_v43  ;;  %vm1653_vm10 = vcmp.gt.f32.partialorder %v4838_v41, 0.0  ;;  %v3273_v42 = vadd.f32 -1.0, %v3991_v31 }
 0x199   : > { %vm1717_vm11 = vcmp.gt.f32.partialorder %v4859_v63, 0.0  ;;  %v1848_v46 = vmin.f32 %v4914_v7, 0.0  ;;  %v1243_v38 = vpop.f32.mrb[64].mxu0  ;;  %v1499_v18 = vpop.f32.mrb[64].mxu1  ;;  %v2356_v23 = vsel %vm1716_vm9, %v4833_v40, %v3336_v36  ;;  %vm1654_vm12 = vcmp.gt.f32.partialorder %v4862_v6, 0.0 }
 0x19a   : > { %v3993_v37 = vpop.eup %3992  ;;  %2933 = vst.msk [vmem:[%s4439_s5 + $0x68] sm:$0xf] %vm2906_vm0, %v3531_v8  ;;  %4002 = vpow2.f32 %v1942_v14  ;;  %v1785_v28 = vmin.f32 %v4922_v21, 0.0  ;;  %v1245_v30 = vpop.f32.mrb[65].mxu0  ;;  %v3595_v32 = vpack.c.bf16 %v2356_v23, %v2356_v23  ;;  %v2293_v57 = vsel %vm1653_vm10, %v4838_v41, %v3273_v42 }
 0x19b   : > { %v1501_v56 = vpop.f32.mrb[65].mxu1  ;;  %v3995_v9 = vpop.eup %3994  ;;  %v3337_v33 = vadd.f32 -1.0, %v3993_v37  ;;  %v2070_v51 = vmul.f32 1.442695, %v1848_v46  ;;  %v3532_v40 = vpack.c.bf16 %v2293_v57, %v2293_v57  ;;  %v1849_v53 = vmin.f32 %v4925_v16, 0.0 }
 0x19c   : > { %v1246_v61 = vpop.f32.mrb[66].mxu0  ;;  %v1502_v26 = vpop.f32.mrb[66].mxu1  ;;  %v3274_v12 = vadd.f32 -1.0, %v3995_v9  ;;  %v1944_v35 = vmul.f32 1.442695, %v1785_v28  ;;  %v4949_v41 = vadd.f32 %v4749_v24, %v1243_v38  ;;  %v4952_v0 = vadd.f32 %v4749_v24, %v1499_v18 }
 0x19d   : > { %v1248_v20 = vpop.f32.mrb[67].mxu0  ;;  %v1504_v17 = vpop.f32.mrb[67].mxu1  ;;  %2997 = vst.msk [vmem:[%s4439_s5 + $0x168] sm:$0xf] %vm2906_vm0, %v3595_v32  ;;  %v2357_v60 = vsel %vm1717_vm11, %v4859_v63, %v3337_v33  ;;  %4004 = vpow2.f32 %v2070_v51  ;;  %2934 = vst.msk [vmem:[%s4439_s5 + $0x6c] sm:$0xf] %vm2906_vm0, %v3532_v40  ;;  %v4965_v50 = vadd.f32 %v4749_v24, %v1246_v61  ;;  %v4971_v58 = vadd.f32 %v4749_v24, %v1502_v26 }
 0x19e   : > { %v3997_v39 = vpop.eup %3996  ;;  %v3596_v44 = vpack.c.bf16 %v2357_v60, %v2357_v60  ;;  %v2294_v59 = vsel %vm1654_vm12, %v4862_v6, %v3274_v12  ;;  %4006 = vpow2.f32 %v1944_v35  ;;  %v2072_v47 = vmul.f32 1.442695, %v1849_v53 }
 0x19f   : > { %v3533_v48 = vpack.c.bf16 %v2294_v59, %v2294_v59  ;;  %v3338_v63 = vadd.f32 -1.0, %v3997_v39  ;;  %v1786_v10 = vmin.f32 %v4949_v41, 0.0  ;;  %vm1718_vm13 = vcmp.gt.f32.partialorder %v4869_v19, 0.0 }
 0x1a0   : > { %2998 = vst.msk [vmem:[%s4439_s5 + $0x16c] sm:$0xf] %vm2906_vm0, %v3596_v44  ;;  %4008 = vpow2.f32 %v2072_v47  ;;  %v1850_v34 = vmin.f32 %v4952_v0, 0.0  ;;  %vm1655_vm14 = vcmp.gt.f32.partialorder %v4891_v52, 0.0  ;;  %vm1719_vm15 = vcmp.gt.f32.partialorder %v4894_v54, 0.0 }
 0x1a1   : > { %v3999_v55 = vpop.eup %3998  ;;  %2935 = vst.msk [vmem:[%s4439_s5 + $0x70] sm:$0xf] %vm2906_vm0, %v3533_v48  ;;  %v2358_v6 = vsel %vm1718_vm13, %v4869_v19, %v3338_v63  ;;  %v1946_v13 = vmul.f32 1.442695, %v1786_v10  ;;  %v1251_v2 = vpop.f32.mrb[68].mxu0  ;;  %v1787_v19 = vmin.f32 %v4965_v50, 0.0 }
 0x1a2   : > { %v1507_v11 = vpop.f32.mrb[68].mxu1  ;;  %v4001_v27 = vpop.eup %4000  ;;  %v3597_v62 = vpack.c.bf16 %v2358_v6, %v2358_v6  ;;  %v3275_v22 = vadd.f32 -1.0, %v3999_v55  ;;  %v2074_v1 = vmul.f32 1.442695, %v1850_v34  ;;  %v1851_v29 = vmin.f32 %v4971_v58, 0.0 }
 0x1a3   : > { %v1253_v3 = vpop.f32.mrb[69].mxu0  ;;  %v1509_v4 = vpop.f32.mrb[69].mxu1  ;;  %v3339_v45 = vadd.f32 -1.0, %v4001_v27  ;;  %4010 = vpow2.f32 %v1946_v13  ;;  %v4981_v31 = vadd.f32 %v4749_v24, %v1251_v2  ;;  %v1948_v38 = vmul.f32 1.442695, %v1787_v19 }
 0x1a4   : > { %v1254_v25 = vpop.f32.mrb[70].mxu0  ;;  %v1510_v43 = vpop.f32.mrb[70].mxu1  ;;  %2999 = vst.msk [vmem:[%s4439_s5 + $0x170] sm:$0xf] %vm2906_vm0, %v3597_v62  ;;  %v2295_v15 = vsel %vm1655_vm14, %v4891_v52, %v3275_v22  ;;  %4012 = vpow2.f32 %v2074_v1  ;;  %vm1656_vm1 = vcmp.gt.f32.partialorder %v4899_v49, 0.0  ;;  %v4990_v30 = vadd.f32 %v4749_v24, %v1507_v11 }
 0x1a5   : > { %v4003_v5 = vpop.eup %4002  ;;  %v1256_v8 = vpop.f32.mrb[71].mxu0  ;;  %v3534_v14 = vpack.c.bf16 %v2295_v15, %v2295_v15  ;;  %v2359_v42 = vsel %vm1719_vm15, %v4894_v54, %v3339_v45  ;;  %v2076_v37 = vmul.f32 1.442695, %v1851_v29  ;;  %v1788_v52 = vmin.f32 %v4981_v31, 0.0 }
 0x1a6   : > { %v1512_v36 = vpop.f32.mrb[71].mxu1  ;;  %v3276_v46 = vadd.f32 -1.0, %v4003_v5  ;;  %v3598_v18 = vpack.c.bf16 %v2359_v42, %v2359_v42  ;;  %4014 = vpow2.f32 %v1948_v38  ;;  %v4993_v54 = vadd.f32 %v4749_v24, %v1254_v25 }
 0x1a7   : > { %v4005_v23 = vpop.eup %4004  ;;  %2936 = vst.msk [vmem:[%s4439_s5 + $0x74] sm:$0xf] %vm2906_vm0, %v3534_v14  ;;  %4016 = vpow2.f32 %v2076_v37  ;;  %v1950_v57 = vmul.f32 1.442695, %v1788_v52  ;;  %vm1720_vm2 = vcmp.gt.f32.partialorder %v4914_v7, 0.0  ;;  %vm1657_vm3 = vcmp.gt.f32.partialorder %v4922_v21, 0.0 }
 0x1a8   : > { %v2296_v28 = vsel %vm1656_vm1, %v4899_v49, %v3276_v46  ;;  %v4007_v56 = vpop.eup %4006  ;;  %3000 = vst.msk [vmem:[%s4439_s5 + $0x174] sm:$0xf] %vm2906_vm0, %v3598_v18  ;;  %v3340_v32 = vadd.f32 -1.0, %v4005_v23  ;;  %v1852_v33 = vmin.f32 %v4990_v30, 0.0  ;;  %v1789_v12 = vmin.f32 %v4993_v54, 0.0 }
 0x1a9   : > { %v3535_v9 = vpack.c.bf16 %v2296_v28, %v2296_v28  ;;  %v3277_v49 = vadd.f32 -1.0, %v4007_v56  ;;  %v1259_v51 = vpop.f32.mrb[72].mxu0  ;;  %v1515_v61 = vpop.f32.mrb[72].mxu1  ;;  %4018 = vpow2.f32 %v1950_v57  ;;  %v5005_v35 = vadd.f32 %v4749_v24, %v1510_v43 }
 0x1aa   : > { %v4009_v26 = vpop.eup %4008  ;;  %v2360_v40 = vsel %vm1720_vm2, %v4914_v7, %v3340_v32  ;;  %v1261_v53 = vpop.f32.mrb[73].mxu0  ;;  %v2078_v44 = vmul.f32 1.442695, %v1852_v33  ;;  %vm1721_vm4 = vcmp.gt.f32.partialorder %v4925_v16, 0.0  ;;  %v1952_v7 = vmul.f32 1.442695, %v1789_v12 }
 0x1ab   : > { %2937 = vst.msk [vmem:[%s4439_s5 + $0x78] sm:$0xf] %vm2906_vm0, %v3535_v9  ;;  %v1517_v20 = vpop.f32.mrb[73].mxu1  ;;  %v3599_v17 = vpack.c.bf16 %v2360_v40, %v2360_v40  ;;  %v2297_v60 = vsel %vm1657_vm3, %v4922_v21, %v3277_v49  ;;  %v3341_v39 = vadd.f32 -1.0, %v4009_v26  ;;  %v1262_v59 = vpop.f32.mrb[74].mxu0  ;;  %v1853_v63 = vmin.f32 %v5005_v35, 0.0 }
 0x1ac   : > { %v1518_v47 = vpop.f32.mrb[74].mxu1  ;;  %v3536_v48 = vpack.c.bf16 %v2297_v60, %v2297_v60  ;;  %v1264_v10 = vpop.f32.mrb[75].mxu0  ;;  %4020 = vpow2.f32 %v2078_v44  ;;  %v5014_v21 = vadd.f32 %v4749_v24, %v1259_v51  ;;  %v5017_v13 = vadd.f32 %v4749_v24, %v1515_v61 }
 0x1ad   : > { %v1520_v34 = vpop.f32.mrb[75].mxu1  ;;  %v4011_v55 = vpop.eup %4010  ;;  %3001 = vst.msk [vmem:[%s4439_s5 + $0x178] sm:$0xf] %vm2906_vm0, %v3599_v17  ;;  %v2361_v6 = vsel %vm1721_vm4, %v4925_v16, %v3341_v39  ;;  %4022 = vpow2.f32 %v1952_v7  ;;  %v2080_v62 = vmul.f32 1.442695, %v1853_v63  ;;  %vm1658_vm5 = vcmp.gt.f32.partialorder %v4949_v41, 0.0 }
 0x1ae   : > { %v4013_v2 = vpop.eup %4012  ;;  %2938 = vst.msk [vmem:[%s4439_s5 + $0x7c] sm:$0xf] %vm2906_vm0, %v3536_v48  ;;  %v3600_v11 = vpack.c.bf16 %v2361_v6, %v2361_v6  ;;  %v3278_v27 = vadd.f32 -1.0, %v4011_v55  ;;  %vm1722_vm6 = vcmp.gt.f32.partialorder %v4952_v0, 0.0  ;;  %v1790_v16 = vmin.f32 %v5014_v21, 0.0 }
 0x1af   : > { %v3342_v22 = vadd.f32 -1.0, %v4013_v2  ;;  %4024 = vpow2.f32 %v2080_v62  ;;  %v1854_v3 = vmin.f32 %v5017_v13, 0.0  ;;  %v5029_v4 = vadd.f32 %v4749_v24, %v1262_v59 }
 0x1b0   : > { %3002 = vst.msk [vmem:[%s4439_s5 + $0x17c] sm:$0xf] %vm2906_vm0, %v3600_v11  ;;  %v2298_v1 = vsel %vm1658_vm5, %v4949_v41, %v3278_v27  ;;  %v4015_v45 = vpop.eup %4014  ;;  %v1954_v43 = vmul.f32 1.442695, %v1790_v16  ;;  %v5033_v5 = vadd.f32 %v4749_v24, %v1518_v47  ;;  %vm1659_vm7 = vcmp.gt.f32.partialorder %v4965_v50, 0.0 }
 0x1b1   : > { %v3537_v19 = vpack.c.bf16 %v2298_v1, %v2298_v1  ;;  %v2362_v25 = vsel %vm1722_vm6, %v4952_v0, %v3342_v22  ;;  %v1267_v15 = vpop.f32.mrb[76].mxu0  ;;  %v1523_v29 = vpop.f32.mrb[76].mxu1  ;;  %v3279_v36 = vadd.f32 -1.0, %v4015_v45  ;;  %v2082_v14 = vmul.f32 1.442695, %v1854_v3 }
 0x1b2   : > { %v4017_v8 = vpop.eup %4016  ;;  %v3601_v41 = vpack.c.bf16 %v2362_v25, %v2362_v25  ;;  %v1269_v42 = vpop.f32.mrb[77].mxu0  ;;  %vm1723_vm8 = vcmp.gt.f32.partialorder %v4971_v58, 0.0  ;;  %4026 = vpow2.f32 %v1954_v43  ;;  %v1791_v38 = vmin.f32 %v5029_v4, 0.0 }
 0x1b3   : > { %v1525_v46 = vpop.f32.mrb[77].mxu1  ;;  %2939 = vst.msk [vmem:[%s4439_s5 + $0x80] sm:$0xf] %vm2906_vm0, %v3537_v19  ;;  %v3343_v0 = vadd.f32 -1.0, %v4017_v8  ;;  %v1270_v18 = vpop.f32.mrb[78].mxu0  ;;  %v2299_v23 = vsel %vm1659_vm7, %v4965_v50, %v3279_v36  ;;  %4028 = vpow2.f32 %v2082_v14  ;;  %v1855_v28 = vmin.f32 %v5033_v5, 0.0 }
 0x1b4   : > { %v1526_v37 = vpop.f32.mrb[78].mxu1  ;;  %v4019_v52 = vpop.eup %4018  ;;  %3003 = vst.msk [vmem:[%s4439_s5 + $0x180] sm:$0xf] %vm2906_vm0, %v3601_v41  ;;  %v5045_v56 = vadd.f32 %v4749_v24, %v1267_v15  ;;  %v3538_v57 = vpack.c.bf16 %v2299_v23, %v2299_v23  ;;  %v1956_v51 = vmul.f32 1.442695, %v1791_v38  ;;  %vm1660_vm9 = vcmp.gt.f32.partialorder %v4981_v31, 0.0 }
 0x1b5   : > { %v1272_v9 = vpop.f32.mrb[79].mxu0  ;;  %v1528_v32 = vpop.f32.mrb[79].mxu1  ;;  %v2363_v49 = vsel %vm1723_vm8, %v4971_v58, %v3343_v0  ;;  %v3280_v33 = vadd.f32 -1.0, %v4019_v52  ;;  %v2084_v26 = vmul.f32 1.442695, %v1855_v28  ;;  %v5054_v53 = vadd.f32 %v4749_v24, %v1523_v29 }
 0x1b6   : > { %v3602_v61 = vpack.c.bf16 %v2363_v49, %v2363_v49  ;;  %v1792_v50 = vmin.f32 %v5045_v56, 0.0  ;;  %v4021_v40 = vpop.eup %4020  ;;  %2940 = vst.msk [vmem:[%s4439_s5 + $0x84] sm:$0xf] %vm2906_vm0, %v3538_v57  ;;  %4030 = vpow2.f32 %v1956_v51  ;;  %v5057_v58 = vadd.f32 %v4749_v24, %v1270_v18 }
 0x1b7   : > { %v2300_v12 = vsel %vm1660_vm9, %v4981_v31, %v3280_v33  ;;  %v4023_v20 = vpop.eup %4022  ;;  %v3344_v60 = vadd.f32 -1.0, %v4021_v40  ;;  %4032 = vpow2.f32 %v2084_v26  ;;  %vm1724_vm10 = vcmp.gt.f32.partialorder %v4990_v30, 0.0 }
 0x1b8   : > { %3004 = vst.msk [vmem:[%s4439_s5 + $0x184] sm:$0xf] %vm2906_vm0, %v3602_v61  ;;  %v3539_v17 = vpack.c.bf16 %v2300_v12, %v2300_v12  ;;  %v1958_v39 = vmul.f32 1.442695, %v1792_v50  ;;  %vm1661_vm11 = vcmp.gt.f32.partialorder %v4993_v54, 0.0  ;;  %v3281_v31 = vadd.f32 -1.0, %v4023_v20 }
 0x1b9   : > { %v1856_v44 = vmin.f32 %v5054_v53, 0.0  ;;  %v1275_v59 = vpop.f32.mrb[80].mxu0  ;;  %v1531_v47 = vpop.f32.mrb[80].mxu1  ;;  %v2364_v7 = vsel %vm1724_vm10, %v4990_v30, %v3344_v60  ;;  %v1793_v63 = vmin.f32 %v5057_v58, 0.0  ;;  %v5069_v10 = vadd.f32 %v4749_v24, %v1526_v37 }
 0x1ba   : > { %v4025_v48 = vpop.eup %4024  ;;  %2941 = vst.msk [vmem:[%s4439_s5 + $0x88] sm:$0xf] %vm2906_vm0, %v3539_v17  ;;  %4034 = vpow2.f32 %v1958_v39  ;;  %v1277_v34 = vpop.f32.mrb[81].mxu0  ;;  %v3603_v6 = vpack.c.bf16 %v2364_v7, %v2364_v7  ;;  %v2301_v2 = vsel %vm1661_vm11, %v4993_v54, %v3281_v31  ;;  %vm1725_vm12 = vcmp.gt.f32.partialorder %v5005_v35, 0.0 }
 0x1bb   : > { %v1533_v55 = vpop.f32.mrb[81].mxu1  ;;  %v3345_v11 = vadd.f32 -1.0, %v4025_v48  ;;  %v2086_v27 = vmul.f32 1.442695, %v1856_v44  ;;  %v1278_v62 = vpop.f32.mrb[82].mxu0  ;;  %v3540_v16 = vpack.c.bf16 %v2301_v2, %v2301_v2  ;;  %v1857_v1 = vmin.f32 %v5069_v10, 0.0 }
 0x1bc   : > { %v1534_v22 = vpop.f32.mrb[82].mxu1  ;;  %v1960_v30 = vmul.f32 1.442695, %v1793_v63  ;;  %v1280_v3 = vpop.f32.mrb[83].mxu0  ;;  %3005 = vst.msk [vmem:[%s4439_s5 + $0x188] sm:$0xf] %vm2906_vm0, %v3603_v6  ;;  %v5078_v54 = vadd.f32 %v4749_v24, %v1275_v59  ;;  %v5081_v43 = vadd.f32 %v4749_v24, %v1531_v47  ;;  %v5093_v46 = vadd.f32 %v4749_v24, %v1278_v62 }
 0x1bd   : > { %v1536_v45 = vpop.f32.mrb[83].mxu1  ;;  %v4027_v19 = vpop.eup %4026  ;;  %v2365_v25 = vsel %vm1725_vm12, %v5005_v35, %v3345_v11  ;;  %4036 = vpow2.f32 %v2086_v27  ;;  %2942 = vst.msk [vmem:[%s4439_s5 + $0x8c] sm:$0xf] %vm2906_vm0, %v3540_v16  ;;  %v2088_v41 = vmul.f32 1.442695, %v1857_v1  ;;  %vm1662_vm13 = vcmp.gt.f32.partialorder %v5014_v21, 0.0 }
 0x1be   : > { %v4029_v15 = vpop.eup %4028  ;;  %v3604_v29 = vpack.c.bf16 %v2365_v25, %v2365_v25  ;;  %v3282_v8 = vadd.f32 -1.0, %v4027_v19  ;;  %4038 = vpow2.f32 %v1960_v30  ;;  %vm1726_vm14 = vcmp.gt.f32.partialorder %v5017_v13, 0.0  ;;  %v5135_v1 = vld [vmem:[%s5507_s2] ss:$0 sm:$0xff] }
 0x1bf   : > { %v3346_v36 = vadd.f32 -1.0, %v4029_v15  ;;  %v1794_v35 = vmin.f32 %v5078_v54, 0.0  ;;  %4040 = vpow2.f32 %v2088_v41  ;;  %v1858_v42 = vmin.f32 %v5081_v43, 0.0 }
 0x1c0   : > { %3006 = vst.msk [vmem:[%s4439_s5 + $0x18c] sm:$0xf] %vm2906_vm0, %v3604_v29  ;;  %v2302_v14 = vsel %vm1662_vm13, %v5014_v21, %v3282_v8  ;;  %v4031_v0 = vpop.eup %4030  ;;  %v5097_v52 = vadd.f32 %v4749_v24, %v1534_v22  ;;  %vm1663_vm15 = vcmp.gt.f32.partialorder %v5029_v4, 0.0  ;;  %vm1727_vm1 = vcmp.gt.f32.partialorder %v5033_v5, 0.0 }
 0x1c1   : > { %v3541_v38 = vpack.c.bf16 %v2302_v14, %v2302_v14  ;;  %v2366_v18 = vsel %vm1726_vm14, %v5017_v13, %v3346_v36  ;;  %v1962_v37 = vmul.f32 1.442695, %v1794_v35  ;;  %v1283_v23 = vpop.f32.mrb[84].mxu0  ;;  %v1539_v28 = vpop.f32.mrb[84].mxu1  ;;  %v3283_v32 = vadd.f32 -1.0, %v4031_v0 }
 0x1c2   : > { %v4033_v9 = vpop.eup %4032  ;;  %v3605_v21 = vpack.c.bf16 %v2366_v18, %v2366_v18  ;;  %v2090_v57 = vmul.f32 1.442695, %v1858_v42  ;;  %v1285_v49 = vpop.f32.mrb[85].mxu0  ;;  %v1795_v51 = vmin.f32 %v5093_v46, 0.0  ;;  %v1859_v12 = vmin.f32 %v5097_v52, 0.0 }
 0x1c3   : > { %v1541_v33 = vpop.f32.mrb[85].mxu1  ;;  %2943 = vst.msk [vmem:[%s4439_s5 + $0x90] sm:$0xf] %vm2906_vm0, %v3541_v38  ;;  %v3347_v13 = vadd.f32 -1.0, %v4033_v9  ;;  %4042 = vpow2.f32 %v1962_v37  ;;  %v1286_v61 = vpop.f32.mrb[86].mxu0  ;;  %v2303_v40 = vsel %vm1663_vm15, %v5029_v4, %v3283_v32  ;;  %v5109_v20 = vadd.f32 %v4749_v24, %v1283_v23 }
 0x1c4   : > { %v1542_v26 = vpop.f32.mrb[86].mxu1  ;;  %v4035_v50 = vpop.eup %4034  ;;  %3007 = vst.msk [vmem:[%s4439_s5 + $0x190] sm:$0xf] %vm2906_vm0, %v3605_v21  ;;  %4044 = vpow2.f32 %v2090_v57  ;;  %v3542_v39 = vpack.c.bf16 %v2303_v40, %v2303_v40  ;;  %v1964_v59 = vmul.f32 1.442695, %v1795_v51  ;;  %vm1664_vm2 = vcmp.gt.f32.partialorder %v5045_v56, 0.0 }
 0x1c5   : > { %v1288_v17 = vpop.f32.mrb[87].mxu0  ;;  %v1544_v60 = vpop.f32.mrb[87].mxu1  ;;  %v2367_v31 = vsel %vm1727_vm1, %v5033_v5, %v3347_v13  ;;  %v3284_v44 = vadd.f32 -1.0, %v4035_v50  ;;  %v2092_v48 = vmul.f32 1.442695, %v1859_v12  ;;  %v1796_v4 = vmin.f32 %v5109_v20, 0.0 }
 0x1c6   : > { %v3606_v47 = vpack.c.bf16 %v2367_v31, %v2367_v31  ;;  %2944 = vst.msk [vmem:[%s4439_s5 + $0x94] sm:$0xf] %vm2906_vm0, %v3542_v39  ;;  %4046 = vpow2.f32 %v1964_v59  ;;  %v5118_v34 = vadd.f32 %v4749_v24, %v1539_v28  ;;  %v5121_v5 = vadd.f32 %v4749_v24, %v1286_v61 }
 0x1c7   : > { %v4037_v7 = vpop.eup %4036  ;;  %v2304_v63 = vsel %vm1664_vm2, %v5045_v56, %v3284_v44  ;;  %4048 = vpow2.f32 %v2092_v48  ;;  %v1966_v11 = vmul.f32 1.442695, %v1796_v4  ;;  %vm1728_vm3 = vcmp.gt.f32.partialorder %v5054_v53, 0.0 }
 0x1c8   : > { %v4039_v55 = vpop.eup %4038  ;;  %3008 = vst.msk [vmem:[%s4439_s5 + $0x194] sm:$0xf] %vm2906_vm0, %v3606_v47  ;;  %v3543_v6 = vpack.c.bf16 %v2304_v63, %v2304_v63  ;;  %v3348_v2 = vadd.f32 -1.0, %v4037_v7  ;;  %vm1665_vm4 = vcmp.gt.f32.partialorder %v5057_v58, 0.0  ;;  %v1860_v27 = vmin.f32 %v5118_v34, 0.0 }
 0x1c9   : > { %v3285_v56 = vadd.f32 -1.0, %v4039_v55  ;;  %v1291_v62 = vpop.f32.mrb[88].mxu0  ;;  %v1547_v22 = vpop.f32.mrb[88].mxu1  ;;  %4050 = vpow2.f32 %v1966_v11  ;;  %v1797_v30 = vmin.f32 %v5121_v5, 0.0  ;;  %v5138_v3 = vadd.f32 %v5135_v1, %v1542_v26 }
 0x1ca   : > { %v4041_v16 = vpop.eup %4040  ;;  %2945 = vst.msk [vmem:[%s4439_s5 + $0x98] sm:$0xf] %vm2906_vm0, %v3543_v6  ;;  %v2368_v24 = vsel %vm1728_vm3, %v5054_v53, %v3348_v2  ;;  %v1293_v45 = vpop.f32.mrb[89].mxu0  ;;  %v2094_v8 = vmul.f32 1.442695, %v1860_v27  ;;  %vm1729_vm5 = vcmp.gt.f32.partialorder %v5069_v10, 0.0  ;;  %v5150_v37 = vadd.f32 %v5135_v1, %v1547_v22 }
 0x1cb   : > { %v1549_v19 = vpop.f32.mrb[89].mxu1  ;;  %v3607_v25 = vpack.c.bf16 %v2368_v24, %v2368_v24  ;;  %v2305_v15 = vsel %vm1665_vm4, %v5057_v58, %v3285_v56  ;;  %v3349_v29 = vadd.f32 -1.0, %v4041_v16  ;;  %v1294_v53 = vpop.f32.mrb[90].mxu0  ;;  %v1968_v35 = vmul.f32 1.442695, %v1797_v30 }
 0x1cc   : > { %v1550_v41 = vpop.f32.mrb[90].mxu1  ;;  %v3544_v36 = vpack.c.bf16 %v2305_v15, %v2305_v15  ;;  %v1861_v14 = vmin.f32 %v5138_v3, 0.0  ;;  %v1296_v42 = vpop.f32.mrb[91].mxu0  ;;  %4052 = vpow2.f32 %v2094_v8  ;;  %v5147_v58 = vadd.f32 %v5135_v1, %v1291_v62 }
 0x1cd   : > { %v1552_v0 = vpop.f32.mrb[91].mxu1  ;;  %v4043_v38 = vpop.eup %4042  ;;  %3009 = vst.msk [vmem:[%s4439_s5 + $0x198] sm:$0xf] %vm2906_vm0, %v3607_v25  ;;  %v2369_v18 = vsel %vm1729_vm5, %v5069_v10, %v3349_v29  ;;  %4054 = vpow2.f32 %v1968_v35  ;;  %vm1666_vm6 = vcmp.gt.f32.partialorder %v5078_v54, 0.0  ;;  %vm1730_vm7 = vcmp.gt.f32.partialorder %v5081_v43, 0.0 }
 0x1ce   : > { %v4045_v23 = vpop.eup %4044  ;;  %2946 = vst.msk [vmem:[%s4439_s5 + $0x9c] sm:$0xf] %vm2906_vm0, %v3544_v36  ;;  %v3608_v28 = vpack.c.bf16 %v2369_v18, %v2369_v18  ;;  %v3286_v9 = vadd.f32 -1.0, %v4043_v38  ;;  %v2096_v21 = vmul.f32 1.442695, %v1861_v14  ;;  %v1798_v10 = vmin.f32 %v5147_v58, 0.0 }
 0x1cf   : > { %v3350_v32 = vadd.f32 -1.0, %v4045_v23  ;;  %v1862_v49 = vmin.f32 %v5150_v37, 0.0  ;;  %v5162_v33 = vadd.f32 %v5135_v1, %v1294_v53  ;;  %v5166_v50 = vadd.f32 %v5135_v1, %v1550_v41 }
 0x1d0   : > { %3010 = vst.msk [vmem:[%s4439_s5 + $0x19c] sm:$0xf] %vm2906_vm0, %v3608_v28  ;;  %v2306_v57 = vsel %vm1666_vm6, %v5078_v54, %v3286_v9  ;;  %4056 = vpow2.f32 %v2096_v21  ;;  %v4047_v13 = vpop.eup %4046  ;;  %v1970_v26 = vmul.f32 1.442695, %v1798_v10  ;;  %vm1667_vm8 = vcmp.gt.f32.partialorder %v5093_v46, 0.0 }
 0x1d1   : > { %v3545_v51 = vpack.c.bf16 %v2306_v57, %v2306_v57  ;;  %v2370_v61 = vsel %vm1730_vm7, %v5081_v43, %v3350_v32  ;;  %v1299_v40 = vpop.f32.mrb[92].mxu0  ;;  %v1555_v12 = vpop.f32.mrb[92].mxu1  ;;  %v3287_v60 = vadd.f32 -1.0, %v4047_v13  ;;  %v2098_v39 = vmul.f32 1.442695, %v1862_v49 }
 0x1d2   : > { %v4049_v17 = vpop.eup %4048  ;;  %v3609_v54 = vpack.c.bf16 %v2370_v61, %v2370_v61  ;;  %v1301_v31 = vpop.f32.mrb[93].mxu0  ;;  %vm1731_vm9 = vcmp.gt.f32.partialorder %v5097_v52, 0.0  ;;  %4058 = vpow2.f32 %v1970_v26  ;;  %v1799_v59 = vmin.f32 %v5162_v33, 0.0 }
 0x1d3   : > { %v1557_v44 = vpop.f32.mrb[93].mxu1  ;;  %2947 = vst.msk [vmem:[%s4439_s5 + $0xa0] sm:$0xf] %vm2906_vm0, %v3545_v51  ;;  %v3351_v43 = vadd.f32 -1.0, %v4049_v17  ;;  %v1302_v47 = vpop.f32.mrb[94].mxu0  ;;  %v2307_v7 = vsel %vm1667_vm8, %v5093_v46, %v3287_v60  ;;  %4060 = vpow2.f32 %v2098_v39  ;;  %v1863_v63 = vmin.f32 %v5166_v50, 0.0 }
 0x1d4   : > { %v1558_v48 = vpop.f32.mrb[94].mxu1  ;;  %v4051_v4 = vpop.eup %4050  ;;  %3011 = vst.msk [vmem:[%s4439_s5 + $0x1a0] sm:$0xf] %vm2906_vm0, %v3609_v54  ;;  %v5178_v55 = vadd.f32 %v5135_v1, %v1299_v40  ;;  %v3546_v11 = vpack.c.bf16 %v2307_v7, %v2307_v7  ;;  %v1972_v62 = vmul.f32 1.442695, %v1799_v59  ;;  %vm1668_vm10 = vcmp.gt.f32.partialorder %v5109_v20, 0.0 }
 0x1d5   : > { %v1304_v6 = vpop.f32.mrb[95].mxu0  ;;  %v1560_v2 = vpop.f32.mrb[95].mxu1  ;;  %v2371_v56 = vsel %vm1731_vm9, %v5097_v52, %v3351_v43  ;;  %v3288_v27 = vadd.f32 -1.0, %v4051_v4  ;;  %v2100_v16 = vmul.f32 1.442695, %v1863_v63  ;;  %v5187_v45 = vadd.f32 %v5135_v1, %v1555_v12 }
 0x1d6   : > { %v3610_v22 = vpack.c.bf16 %v2371_v56, %v2371_v56  ;;  %v1800_v46 = vmin.f32 %v5178_v55, 0.0  ;;  %v4053_v24 = vpop.eup %4052  ;;  %2948 = vst.msk [vmem:[%s4439_s5 + $0xa4] sm:$0xf] %vm2906_vm0, %v3546_v11  ;;  %4062 = vpow2.f32 %v1972_v62  ;;  %v5190_v52 = vadd.f32 %v5135_v1, %v1302_v47 }
 0x1d7   : > { %v2308_v30 = vsel %vm1668_vm10, %v5109_v20, %v3288_v27  ;;  %v4055_v19 = vpop.eup %4054  ;;  %v3352_v15 = vadd.f32 -1.0, %v4053_v24  ;;  %4064 = vpow2.f32 %v2100_v16  ;;  %vm1732_vm11 = vcmp.gt.f32.partialorder %v5118_v34, 0.0 }
 0x1d8   : > { %3012 = vst.msk [vmem:[%s4439_s5 + $0x1a4] sm:$0xf] %vm2906_vm0, %v3610_v22  ;;  %v3547_v25 = vpack.c.bf16 %v2308_v30, %v2308_v30  ;;  %v1974_v29 = vmul.f32 1.442695, %v1800_v46  ;;  %vm1669_vm12 = vcmp.gt.f32.partialorder %v5121_v5, 0.0  ;;  %v3289_v20 = vadd.f32 -1.0, %v4055_v19 }
 0x1d9   : > { %v1864_v8 = vmin.f32 %v5187_v45, 0.0  ;;  %v1307_v53 = vpop.f32.mrb[96].mxu0  ;;  %v1563_v41 = vpop.f32.mrb[96].mxu1  ;;  %v2372_v35 = vsel %vm1732_vm11, %v5118_v34, %v3352_v15  ;;  %v1801_v14 = vmin.f32 %v5190_v52, 0.0  ;;  %v5202_v42 = vadd.f32 %v5135_v1, %v1558_v48 }
 0x1da   : > { %v4057_v36 = vpop.eup %4056  ;;  %2949 = vst.msk [vmem:[%s4439_s5 + $0xa8] sm:$0xf] %vm2906_vm0, %v3547_v25  ;;  %4066 = vpow2.f32 %v1974_v29  ;;  %v1309_v0 = vpop.f32.mrb[97].mxu0  ;;  %v3611_v18 = vpack.c.bf16 %v2372_v35, %v2372_v35  ;;  %v2309_v23 = vsel %vm1669_vm12, %v5121_v5, %v3289_v20  ;;  %vm1733_vm13 = vcmp.gt.f32.partialorder %v5138_v3, 0.0 }
 0x1db   : > { %v1565_v38 = vpop.f32.mrb[97].mxu1  ;;  %v3353_v28 = vadd.f32 -1.0, %v4057_v36  ;;  %v2102_v9 = vmul.f32 1.442695, %v1864_v8  ;;  %v1310_v21 = vpop.f32.mrb[98].mxu0  ;;  %v3548_v10 = vpack.c.bf16 %v2309_v23, %v2309_v23  ;;  %v1865_v57 = vmin.f32 %v5202_v42, 0.0 }
 0x1dc   : > { %v1566_v32 = vpop.f32.mrb[98].mxu1  ;;  %v1976_v34 = vmul.f32 1.442695, %v1801_v14  ;;  %v1312_v49 = vpop.f32.mrb[99].mxu0  ;;  %3013 = vst.msk [vmem:[%s4439_s5 + $0x1a8] sm:$0xf] %vm2906_vm0, %v3611_v18  ;;  %v5211_v5 = vadd.f32 %v5135_v1, %v1307_v53  ;;  %v5214_v26 = vadd.f32 %v5135_v1, %v1563_v41  ;;  %v5226_v44 = vadd.f32 %v5135_v1, %v1310_v21 }
 0x1dd   : > { %v1568_v13 = vpop.f32.mrb[99].mxu1  ;;  %v4059_v51 = vpop.eup %4058  ;;  %v2373_v61 = vsel %vm1733_vm13, %v5138_v3, %v3353_v28  ;;  %4068 = vpow2.f32 %v2102_v9  ;;  %2950 = vst.msk [vmem:[%s4439_s5 + $0xac] sm:$0xf] %vm2906_vm0, %v3548_v10  ;;  %v2104_v54 = vmul.f32 1.442695, %v1865_v57  ;;  %vm1670_vm14 = vcmp.gt.f32.partialorder %v5147_v58, 0.0 }
 0x1de   : > { %v4061_v40 = vpop.eup %4060  ;;  %v3612_v12 = vpack.c.bf16 %v2373_v61, %v2373_v61  ;;  %v3290_v17 = vadd.f32 -1.0, %v4059_v51  ;;  %4070 = vpow2.f32 %v1976_v34  ;;  %vm1734_vm15 = vcmp.gt.f32.partialorder %v5150_v37, 0.0 }
 0x1df   : > { %v3354_v60 = vadd.f32 -1.0, %v4061_v40  ;;  %v1802_v3 = vmin.f32 %v5211_v5, 0.0  ;;  %4072 = vpow2.f32 %v2104_v54  ;;  %v1866_v31 = vmin.f32 %v5214_v26, 0.0 }
 0x1e0   : > { %3014 = vst.msk [vmem:[%s4439_s5 + $0x1ac] sm:$0xf] %vm2906_vm0, %v3612_v12  ;;  %v2310_v39 = vsel %vm1670_vm14, %v5147_v58, %v3290_v17  ;;  %v4063_v43 = vpop.eup %4062  ;;  %v5230_v4 = vadd.f32 %v5135_v1, %v1566_v32  ;;  %vm1671_vm1 = vcmp.gt.f32.partialorder %v5162_v33, 0.0  ;;  %vm1735_vm2 = vcmp.gt.f32.partialorder %v5166_v50, 0.0 }
 0x1e1   : > { %v3549_v59 = vpack.c.bf16 %v2310_v39, %v2310_v39  ;;  %v2374_v47 = vsel %vm1734_vm15, %v5150_v37, %v3354_v60  ;;  %v1978_v48 = vmul.f32 1.442695, %v1802_v3  ;;  %v1315_v7 = vpop.f32.mrb[100].mxu0  ;;  %v1571_v63 = vpop.f32.mrb[100].mxu1  ;;  %v3291_v2 = vadd.f32 -1.0, %v4063_v43 }
 0x1e2   : > { %v4065_v6 = vpop.eup %4064  ;;  %v3613_v58 = vpack.c.bf16 %v2374_v47, %v2374_v47  ;;  %v2106_v11 = vmul.f32 1.442695, %v1866_v31  ;;  %v1317_v56 = vpop.f32.mrb[101].mxu0  ;;  %v1803_v62 = vmin.f32 %v5226_v44, 0.0  ;;  %v1867_v30 = vmin.f32 %v5230_v4, 0.0 }
 0x1e3   : > { %v1573_v27 = vpop.f32.mrb[101].mxu1  ;;  %2951 = vst.msk [vmem:[%s4439_s5 + $0xb0] sm:$0xf] %vm2906_vm0, %v3549_v59  ;;  %v3355_v37 = vadd.f32 -1.0, %v4065_v6  ;;  %4074 = vpow2.f32 %v1978_v48  ;;  %v1318_v22 = vpop.f32.mrb[102].mxu0  ;;  %v2311_v24 = vsel %vm1671_vm1, %v5162_v33, %v3291_v2  ;;  %v5242_v19 = vadd.f32 %v5135_v1, %v1315_v7 }
 0x1e4   : > { %v1574_v16 = vpop.f32.mrb[102].mxu1  ;;  %v4067_v46 = vpop.eup %4066  ;;  %3015 = vst.msk [vmem:[%s4439_s5 + $0x1b0] sm:$0xf] %vm2906_vm0, %v3613_v58  ;;  %4076 = vpow2.f32 %v2106_v11  ;;  %v3550_v29 = vpack.c.bf16 %v2311_v24, %v2311_v24  ;;  %v1980_v53 = vmul.f32 1.442695, %v1803_v62  ;;  %vm1672_vm3 = vcmp.gt.f32.partialorder %v5178_v55, 0.0 }
 0x1e5   : > { %v1320_v25 = vpop.f32.mrb[103].mxu0  ;;  %v1576_v15 = vpop.f32.mrb[103].mxu1  ;;  %v2375_v20 = vsel %vm1735_vm2, %v5166_v50, %v3355_v37  ;;  %v3292_v8 = vadd.f32 -1.0, %v4067_v46  ;;  %v2108_v36 = vmul.f32 1.442695, %v1867_v30  ;;  %v1804_v33 = vmin.f32 %v5242_v19, 0.0 }
 0x1e6   : > { %v3614_v41 = vpack.c.bf16 %v2375_v20, %v2375_v20  ;;  %2952 = vst.msk [vmem:[%s4439_s5 + $0xb4] sm:$0xf] %vm2906_vm0, %v3550_v29  ;;  %4078 = vpow2.f32 %v1980_v53  ;;  %v5251_v0 = vadd.f32 %v5135_v1, %v1571_v63  ;;  %v5254_v50 = vadd.f32 %v5135_v1, %v1318_v22 }
 0x1e7   : > { %v4069_v35 = vpop.eup %4068  ;;  %v2312_v14 = vsel %vm1672_vm3, %v5178_v55, %v3292_v8  ;;  %4080 = vpow2.f32 %v2108_v36  ;;  %v1982_v28 = vmul.f32 1.442695, %v1804_v33  ;;  %vm1736_vm4 = vcmp.gt.f32.partialorder %v5187_v45, 0.0 }
 0x1e8   : > { %v4071_v38 = vpop.eup %4070  ;;  %3016 = vst.msk [vmem:[%s4439_s5 + $0x1b4] sm:$0xf] %vm2906_vm0, %v3614_v41  ;;  %v3551_v18 = vpack.c.bf16 %v2312_v14, %v2312_v14  ;;  %v3356_v23 = vadd.f32 -1.0, %v4069_v35  ;;  %vm1673_vm5 = vcmp.gt.f32.partialorder %v5190_v52, 0.0  ;;  %v1868_v9 = vmin.f32 %v5251_v0, 0.0 }
 0x1e9   : > { %v3293_v55 = vadd.f32 -1.0, %v4071_v38  ;;  %v1323_v21 = vpop.f32.mrb[104].mxu0  ;;  %v1579_v32 = vpop.f32.mrb[104].mxu1  ;;  %4082 = vpow2.f32 %v1982_v28  ;;  %v1805_v57 = vmin.f32 %v5254_v50, 0.0  ;;  %v5266_v49 = vadd.f32 %v5135_v1, %v1574_v16 }
 0x1ea   : > { %v4073_v10 = vpop.eup %4072  ;;  %2953 = vst.msk [vmem:[%s4439_s5 + $0xb8] sm:$0xf] %vm2906_vm0, %v3551_v18  ;;  %v2376_v34 = vsel %vm1736_vm4, %v5187_v45, %v3356_v23  ;;  %v1325_v13 = vpop.f32.mrb[105].mxu0  ;;  %v2110_v17 = vmul.f32 1.442695, %v1868_v9  ;;  %vm1737_vm6 = vcmp.gt.f32.partialorder %v5202_v42, 0.0  ;;  %v5278_v48 = vadd.f32 %v5135_v1, %v1579_v32 }
 0x1eb   : > { %v1581_v51 = vpop.f32.mrb[105].mxu1  ;;  %v3615_v61 = vpack.c.bf16 %v2376_v34, %v2376_v34  ;;  %v2313_v40 = vsel %vm1673_vm5, %v5190_v52, %v3293_v55  ;;  %v3357_v12 = vadd.f32 -1.0, %v4073_v10  ;;  %v1326_v54 = vpop.f32.mrb[106].mxu0  ;;  %v1984_v45 = vmul.f32 1.442695, %v1805_v57 }
 0x1ec   : > { %v1582_v60 = vpop.f32.mrb[106].mxu1  ;;  %v3552_v3 = vpack.c.bf16 %v2313_v40, %v2313_v40  ;;  %v1869_v39 = vmin.f32 %v5266_v49, 0.0  ;;  %v1328_v31 = vpop.f32.mrb[107].mxu0  ;;  %4084 = vpow2.f32 %v2110_v17  ;;  %v5275_v52 = vadd.f32 %v5135_v1, %v1323_v21 }
 0x1ed   : > { %v1584_v43 = vpop.f32.mrb[107].mxu1  ;;  %v4075_v59 = vpop.eup %4074  ;;  %3017 = vst.msk [vmem:[%s4439_s5 + $0x1b8] sm:$0xf] %vm2906_vm0, %v3615_v61  ;;  %v2377_v47 = vsel %vm1737_vm6, %v5202_v42, %v3357_v12  ;;  %4086 = vpow2.f32 %v1984_v45  ;;  %vm1674_vm7 = vcmp.gt.f32.partialorder %v5211_v5, 0.0  ;;  %vm1738_vm8 = vcmp.gt.f32.partialorder %v5214_v26, 0.0 }
 0x1ee   : > { %v4077_v7 = vpop.eup %4076  ;;  %2954 = vst.msk [vmem:[%s4439_s5 + $0xbc] sm:$0xf] %vm2906_vm0, %v3552_v3  ;;  %v3616_v63 = vpack.c.bf16 %v2377_v47, %v2377_v47  ;;  %v3294_v6 = vadd.f32 -1.0, %v4075_v59  ;;  %v2112_v58 = vmul.f32 1.442695, %v1869_v39  ;;  %v1806_v42 = vmin.f32 %v5275_v52, 0.0 }
 0x1ef   : > { %v3358_v2 = vadd.f32 -1.0, %v4077_v7  ;;  %v1870_v56 = vmin.f32 %v5278_v48, 0.0  ;;  %v5290_v27 = vadd.f32 %v5135_v1, %v1326_v54  ;;  %v5294_v46 = vadd.f32 %v5135_v1, %v1582_v60 }
 0x1f0   : > { %3018 = vst.msk [vmem:[%s4439_s5 + $0x1bc] sm:$0xf] %vm2906_vm0, %v3616_v63  ;;  %v2314_v11 = vsel %vm1674_vm7, %v5211_v5, %v3294_v6  ;;  %4088 = vpow2.f32 %v2112_v58  ;;  %v4079_v37 = vpop.eup %4078  ;;  %v1986_v16 = vmul.f32 1.442695, %v1806_v42  ;;  %vm1675_vm9 = vcmp.gt.f32.partialorder %v5226_v44, 0.0 }
 0x1f1   : > { %v3553_v62 = vpack.c.bf16 %v2314_v11, %v2314_v11  ;;  %v2378_v22 = vsel %vm1738_vm8, %v5214_v26, %v3358_v2  ;;  %v1331_v24 = vpop.f32.mrb[108].mxu0  ;;  %v1587_v30 = vpop.f32.mrb[108].mxu1  ;;  %v3295_v15 = vadd.f32 -1.0, %v4079_v37  ;;  %v2114_v29 = vmul.f32 1.442695, %v1870_v56 }
 0x1f2   : > { %v4081_v25 = vpop.eup %4080  ;;  %v3617_v5 = vpack.c.bf16 %v2378_v22, %v2378_v22  ;;  %v1333_v20 = vpop.f32.mrb[109].mxu0  ;;  %vm1739_vm10 = vcmp.gt.f32.partialorder %v5230_v4, 0.0  ;;  %4090 = vpow2.f32 %v1986_v16  ;;  %v1807_v53 = vmin.f32 %v5290_v27, 0.0 }
 0x1f3   : > { %v1589_v8 = vpop.f32.mrb[109].mxu1  ;;  %2955 = vst.msk [vmem:[%s4439_s5 + $0xc0] sm:$0xf] %vm2906_vm0, %v3553_v62  ;;  %v3359_v26 = vadd.f32 -1.0, %v4081_v25  ;;  %v1334_v41 = vpop.f32.mrb[110].mxu0  ;;  %v2315_v35 = vsel %vm1675_vm9, %v5226_v44, %v3295_v15  ;;  %4092 = vpow2.f32 %v2114_v29  ;;  %v1871_v14 = vmin.f32 %v5294_v46, 0.0 }
 0x1f4   : > { %v1590_v36 = vpop.f32.mrb[110].mxu1  ;;  %v4083_v33 = vpop.eup %4082  ;;  %3019 = vst.msk [vmem:[%s4439_s5 + $0x1c0] sm:$0xf] %vm2906_vm0, %v3617_v5  ;;  %v5306_v38 = vadd.f32 %v5135_v1, %v1331_v24  ;;  %v3554_v28 = vpack.c.bf16 %v2315_v35, %v2315_v35  ;;  %v1988_v21 = vmul.f32 1.442695, %v1807_v53  ;;  %vm1676_vm11 = vcmp.gt.f32.partialorder %v5242_v19, 0.0 }
 0x1f5   : > { %v1336_v18 = vpop.f32.mrb[111].mxu0  ;;  %v1592_v23 = vpop.f32.mrb[111].mxu1  ;;  %v2379_v55 = vsel %vm1739_vm10, %v5230_v4, %v3359_v26  ;;  %v3296_v9 = vadd.f32 -1.0, %v4083_v33  ;;  %v2116_v10 = vmul.f32 1.442695, %v1871_v14  ;;  %v5315_v13 = vadd.f32 %v5135_v1, %v1587_v30 }
 0x1f6   : > { %v3618_v32 = vpack.c.bf16 %v2379_v55, %v2379_v55  ;;  %v1808_v44 = vmin.f32 %v5306_v38, 0.0  ;;  %v4085_v34 = vpop.eup %4084  ;;  %2956 = vst.msk [vmem:[%s4439_s5 + $0xc4] sm:$0xf] %vm2906_vm0, %v3554_v28  ;;  %4094 = vpow2.f32 %v1988_v21  ;;  %v5318_v4 = vadd.f32 %v5135_v1, %v1334_v41 }
 0x1f7   : > { %v2316_v57 = vsel %vm1676_vm11, %v5242_v19, %v3296_v9  ;;  %v4087_v51 = vpop.eup %4086  ;;  %v3360_v40 = vadd.f32 -1.0, %v4085_v34  ;;  %4096 = vpow2.f32 %v2116_v10  ;;  %vm1740_vm12 = vcmp.gt.f32.partialorder %v5251_v0, 0.0 }
 0x1f8   : > { %3020 = vst.msk [vmem:[%s4439_s5 + $0x1c4] sm:$0xf] %vm2906_vm0, %v3618_v32  ;;  %v3555_v61 = vpack.c.bf16 %v2316_v57, %v2316_v57  ;;  %v1990_v12 = vmul.f32 1.442695, %v1808_v44  ;;  %vm1677_vm13 = vcmp.gt.f32.partialorder %v5254_v50, 0.0  ;;  %v3297_v19 = vadd.f32 -1.0, %v4087_v51 }
 0x1f9   : > { %v1872_v17 = vmin.f32 %v5315_v13, 0.0  ;;  %v1339_v54 = vpop.f32.mrb[112].mxu0  ;;  %v1595_v60 = vpop.f32.mrb[112].mxu1  ;;  %v2380_v45 = vsel %vm1740_vm12, %v5251_v0, %v3360_v40  ;;  %v1809_v39 = vmin.f32 %v5318_v4, 0.0  ;;  %v5330_v31 = vadd.f32 %v5135_v1, %v1590_v36 }
 0x1fa   : > { %v4089_v3 = vpop.eup %4088  ;;  %2957 = vst.msk [vmem:[%s4439_s5 + $0xc8] sm:$0xf] %vm2906_vm0, %v3555_v61  ;;  %4098 = vpow2.f32 %v1990_v12  ;;  %v1341_v43 = vpop.f32.mrb[113].mxu0  ;;  %v3619_v47 = vpack.c.bf16 %v2380_v45, %v2380_v45  ;;  %v2317_v7 = vsel %vm1677_vm13, %v5254_v50, %v3297_v19  ;;  %vm1741_vm14 = vcmp.gt.f32.partialorder %v5266_v49, 0.0 }
 0x1fb   : > { %v1597_v59 = vpop.f32.mrb[113].mxu1  ;;  %v3361_v63 = vadd.f32 -1.0, %v4089_v3  ;;  %v2118_v6 = vmul.f32 1.442695, %v1872_v17  ;;  %v1342_v58 = vpop.f32.mrb[114].mxu0  ;;  %v3556_v42 = vpack.c.bf16 %v2317_v7, %v2317_v7  ;;  %v1873_v11 = vmin.f32 %v5330_v31, 0.0 }
 0x1fc   : > { %v1598_v2 = vpop.f32.mrb[114].mxu1  ;;  %v1992_v0 = vmul.f32 1.442695, %v1809_v39  ;;  %v1344_v56 = vpop.f32.mrb[115].mxu0  ;;  %3021 = vst.msk [vmem:[%s4439_s5 + $0x1c8] sm:$0xf] %vm2906_vm0, %v3619_v47  ;;  %v5339_v50 = vadd.f32 %v5135_v1, %v1339_v54  ;;  %v5342_v16 = vadd.f32 %v5135_v1, %v1595_v60  ;;  %v5354_v8 = vadd.f32 %v5135_v1, %v1342_v58 }
 0x1fd   : > { %v1600_v37 = vpop.f32.mrb[115].mxu1  ;;  %v4091_v62 = vpop.eup %4090  ;;  %v2381_v22 = vsel %vm1741_vm14, %v5266_v49, %v3361_v63  ;;  %4100 = vpow2.f32 %v2118_v6  ;;  %2958 = vst.msk [vmem:[%s4439_s5 + $0xcc] sm:$0xf] %vm2906_vm0, %v3556_v42  ;;  %v2120_v5 = vmul.f32 1.442695, %v1873_v11  ;;  %vm1678_vm15 = vcmp.gt.f32.partialorder %v5275_v52, 0.0 }
 0x1fe   : > { %v4093_v24 = vpop.eup %4092  ;;  %v3620_v30 = vpack.c.bf16 %v2381_v22, %v2381_v22  ;;  %v3298_v25 = vadd.f32 -1.0, %v4091_v62  ;;  %4102 = vpow2.f32 %v1992_v0  ;;  %vm1742_vm1 = vcmp.gt.f32.partialorder %v5278_v48, 0.0 }
 0x1ff   : > { %v3362_v15 = vadd.f32 -1.0, %v4093_v24  ;;  %v1810_v49 = vmin.f32 %v5339_v50, 0.0  ;;  %4104 = vpow2.f32 %v2120_v5  ;;  %v1874_v20 = vmin.f32 %v5342_v16, 0.0 }
 0x200   : > { %3022 = vst.msk [vmem:[%s4439_s5 + $0x1cc] sm:$0xf] %vm2906_vm0, %v3620_v30  ;;  %v2318_v29 = vsel %vm1678_vm15, %v5275_v52, %v3298_v25  ;;  %v4095_v26 = vpop.eup %4094  ;;  %v5358_v33 = vadd.f32 %v5135_v1, %v1598_v2  ;;  %vm1679_vm2 = vcmp.gt.f32.partialorder %v5290_v27, 0.0  ;;  %vm1743_vm3 = vcmp.gt.f32.partialorder %v5294_v46, 0.0 }
 0x201   : > { %v3557_v53 = vpack.c.bf16 %v2318_v29, %v2318_v29  ;;  %v2382_v41 = vsel %vm1742_vm1, %v5278_v48, %v3362_v15  ;;  %v1994_v36 = vmul.f32 1.442695, %v1810_v49  ;;  %v1347_v35 = vpop.f32.mrb[116].mxu0  ;;  %v1603_v14 = vpop.f32.mrb[116].mxu1  ;;  %v3299_v23 = vadd.f32 -1.0, %v4095_v26 }
 0x202   : > { %v4097_v18 = vpop.eup %4096  ;;  %v3621_v52 = vpack.c.bf16 %v2382_v41, %v2382_v41  ;;  %v2122_v28 = vmul.f32 1.442695, %v1874_v20  ;;  %v1349_v55 = vpop.f32.mrb[117].mxu0  ;;  %v1811_v21 = vmin.f32 %v5354_v8, 0.0  ;;  %v1875_v57 = vmin.f32 %v5358_v33, 0.0 }
 0x203   : > { %v1605_v9 = vpop.f32.mrb[117].mxu1  ;;  %2959 = vst.msk [vmem:[%s4439_s5 + $0xd0] sm:$0xf] %vm2906_vm0, %v3557_v53  ;;  %v3363_v48 = vadd.f32 -1.0, %v4097_v18  ;;  %4106 = vpow2.f32 %v1994_v36  ;;  %v1350_v32 = vpop.f32.mrb[118].mxu0  ;;  %v2319_v34 = vsel %vm1679_vm2, %v5290_v27, %v3299_v23  ;;  %v5370_v51 = vadd.f32 %v5135_v1, %v1347_v35 }
 0x204   : > { %v1606_v10 = vpop.f32.mrb[118].mxu1  ;;  %v4099_v44 = vpop.eup %4098  ;;  %3023 = vst.msk [vmem:[%s4439_s5 + $0x1d0] sm:$0xf] %vm2906_vm0, %v3621_v52  ;;  %4108 = vpow2.f32 %v2122_v28  ;;  %v3558_v12 = vpack.c.bf16 %v2319_v34, %v2319_v34  ;;  %v1996_v54 = vmul.f32 1.442695, %v1811_v21  ;;  %vm1680_vm4 = vcmp.gt.f32.partialorder %v5306_v38, 0.0 }
 0x205   : > { %v1352_v61 = vpop.f32.mrb[119].mxu0  ;;  %v1608_v40 = vpop.f32.mrb[119].mxu1  ;;  %v2383_v19 = vsel %vm1743_vm3, %v5294_v46, %v3363_v48  ;;  %v3300_v17 = vadd.f32 -1.0, %v4099_v44  ;;  %v2124_v3 = vmul.f32 1.442695, %v1875_v57  ;;  %v1812_v27 = vmin.f32 %v5370_v51, 0.0 }
 0x206   : > { %v3622_v60 = vpack.c.bf16 %v2383_v19, %v2383_v19  ;;  %2960 = vst.msk [vmem:[%s4439_s5 + $0xd4] sm:$0xf] %vm2906_vm0, %v3558_v12  ;;  %4110 = vpow2.f32 %v1996_v54  ;;  %v5379_v43 = vadd.f32 %v5135_v1, %v1603_v14  ;;  %v5382_v46 = vadd.f32 %v5135_v1, %v1350_v32 }
 0x207   : > { %v4101_v45 = vpop.eup %4100  ;;  %v2320_v39 = vsel %vm1680_vm4, %v5306_v38, %v3300_v17  ;;  %4112 = vpow2.f32 %v2124_v3  ;;  %v1998_v63 = vmul.f32 1.442695, %v1812_v27  ;;  %vm1744_vm5 = vcmp.gt.f32.partialorder %v5315_v13, 0.0 }
 0x208   : > { %v4103_v59 = vpop.eup %4102  ;;  %3024 = vst.msk [vmem:[%s4439_s5 + $0x1d4] sm:$0xf] %vm2906_vm0, %v3622_v60  ;;  %v3559_v47 = vpack.c.bf16 %v2320_v39, %v2320_v39  ;;  %v3364_v7 = vadd.f32 -1.0, %v4101_v45  ;;  %vm1681_vm6 = vcmp.gt.f32.partialorder %v5318_v4, 0.0  ;;  %v1876_v6 = vmin.f32 %v5379_v43, 0.0 }
 0x209   : > { %v3301_v38 = vadd.f32 -1.0, %v4103_v59  ;;  %v1355_v58 = vpop.f32.mrb[120].mxu0  ;;  %v1611_v2 = vpop.f32.mrb[120].mxu1  ;;  %4114 = vpow2.f32 %v1998_v63  ;;  %v1813_v11 = vmin.f32 %v5382_v46, 0.0  ;;  %v5394_v56 = vadd.f32 %v5135_v1, %v1606_v10 }
 0x20a   : > { %v4105_v42 = vpop.eup %4104  ;;  %2961 = vst.msk [vmem:[%s4439_s5 + $0xd8] sm:$0xf] %vm2906_vm0, %v3559_v47  ;;  %v2384_v0 = vsel %vm1744_vm5, %v5315_v13, %v3364_v7  ;;  %v1357_v37 = vpop.f32.mrb[121].mxu0  ;;  %v2126_v25 = vmul.f32 1.442695, %v1876_v6  ;;  %vm1745_vm7 = vcmp.gt.f32.partialorder %v5330_v31, 0.0  ;;  %v5406_v36 = vadd.f32 %v5135_v1, %v1611_v2 }
 0x20b   : > { %v1613_v62 = vpop.f32.mrb[121].mxu1  ;;  %v3623_v22 = vpack.c.bf16 %v2384_v0, %v2384_v0  ;;  %v2321_v24 = vsel %vm1681_vm6, %v5318_v4, %v3301_v38  ;;  %v3365_v30 = vadd.f32 -1.0, %v4105_v42  ;;  %v1358_v5 = vpop.f32.mrb[122].mxu0  ;;  %v2000_v13 = vmul.f32 1.442695, %v1813_v11 }
 0x20c   : > { %v1614_v15 = vpop.f32.mrb[122].mxu1  ;;  %v3560_v49 = vpack.c.bf16 %v2321_v24, %v2321_v24  ;;  %v1877_v29 = vmin.f32 %v5394_v56, 0.0  ;;  %v1360_v20 = vpop.f32.mrb[123].mxu0  ;;  %4116 = vpow2.f32 %v2126_v25  ;;  %v5403_v4 = vadd.f32 %v5135_v1, %v1355_v58 }
 0x20d   : > { %v1616_v26 = vpop.f32.mrb[123].mxu1  ;;  %v4107_v53 = vpop.eup %4106  ;;  %3025 = vst.msk [vmem:[%s4439_s5 + $0x1d8] sm:$0xf] %vm2906_vm0, %v3623_v22  ;;  %v2385_v41 = vsel %vm1745_vm7, %v5330_v31, %v3365_v30  ;;  %4118 = vpow2.f32 %v2000_v13  ;;  %vm1682_vm8 = vcmp.gt.f32.partialorder %v5339_v50, 0.0  ;;  %vm1746_vm9 = vcmp.gt.f32.partialorder %v5342_v16, 0.0 }
 0x20e   : > { %v4109_v35 = vpop.eup %4108  ;;  %2962 = vst.msk [vmem:[%s4439_s5 + $0xdc] sm:$0xf] %vm2906_vm0, %v3560_v49  ;;  %v3624_v14 = vpack.c.bf16 %v2385_v41, %v2385_v41  ;;  %v3302_v18 = vadd.f32 -1.0, %v4107_v53  ;;  %v2128_v52 = vmul.f32 1.442695, %v1877_v29  ;;  %v1814_v31 = vmin.f32 %v5403_v4, 0.0 }
 0x20f   : > { %v3366_v23 = vadd.f32 -1.0, %v4109_v35  ;;  %v1878_v55 = vmin.f32 %v5406_v36, 0.0  ;;  %v5418_v9 = vadd.f32 %v5135_v1, %v1358_v5  ;;  %v5422_v44 = vadd.f32 %v5135_v1, %v1614_v15 }
 0x210   : > { %3026 = vst.msk [vmem:[%s4439_s5 + $0x1dc] sm:$0xf] %vm2906_vm0, %v3624_v14  ;;  %v2322_v28 = vsel %vm1682_vm8, %v5339_v50, %v3302_v18  ;;  %4120 = vpow2.f32 %v2128_v52  ;;  %v4111_v48 = vpop.eup %4110  ;;  %v2002_v10 = vmul.f32 1.442695, %v1814_v31  ;;  %vm1683_vm10 = vcmp.gt.f32.partialorder %v5354_v8, 0.0 }
 0x211   : > { %v3561_v21 = vpack.c.bf16 %v2322_v28, %v2322_v28  ;;  %v2386_v32 = vsel %vm1746_vm9, %v5342_v16, %v3366_v23  ;;  %v1363_v34 = vpop.f32.mrb[124].mxu0  ;;  %v1619_v57 = vpop.f32.mrb[124].mxu1  ;;  %v3303_v40 = vadd.f32 -1.0, %v4111_v48  ;;  %v2130_v12 = vmul.f32 1.442695, %v1878_v55 }
 0x212   : > { %v4113_v61 = vpop.eup %4112  ;;  %v3625_v50 = vpack.c.bf16 %v2386_v32, %v2386_v32  ;;  %v1365_v19 = vpop.f32.mrb[125].mxu0  ;;  %vm1747_vm11 = vcmp.gt.f32.partialorder %v5358_v33, 0.0  ;;  %4122 = vpow2.f32 %v2002_v10  ;;  %v1815_v54 = vmin.f32 %v5418_v9, 0.0 }
 0x213   : > { %v1621_v17 = vpop.f32.mrb[125].mxu1  ;;  %2963 = vst.msk [vmem:[%s4439_s5 + $0xe0] sm:$0xf] %vm2906_vm0, %v3561_v21  ;;  %v3367_v16 = vadd.f32 -1.0, %v4113_v61  ;;  %v1366_v60 = vpop.f32.mrb[126].mxu0  ;;  %v2323_v45 = vsel %vm1683_vm10, %v5354_v8, %v3303_v40  ;;  %4124 = vpow2.f32 %v2130_v12  ;;  %v1879_v39 = vmin.f32 %v5422_v44, 0.0 }
 0x214   : > { %v1622_v3 = vpop.f32.mrb[126].mxu1  ;;  %v4115_v27 = vpop.eup %4114  ;;  %3027 = vst.msk [vmem:[%s4439_s5 + $0x1e0] sm:$0xf] %vm2906_vm0, %v3625_v50  ;;  %v5434_v59 = vadd.f32 %v5135_v1, %v1363_v34  ;;  %v3562_v63 = vpack.c.bf16 %v2323_v45, %v2323_v45  ;;  %v2004_v58 = vmul.f32 1.442695, %v1815_v54  ;;  %vm1684_vm12 = vcmp.gt.f32.partialorder %v5370_v51, 0.0 }
 0x215   : > { %v1368_v47 = vpop.f32.mrb[127].mxu0  ;;  %v1624_v7 = vpop.f32.mrb[127].mxu1  ;;  %v2387_v38 = vsel %vm1747_vm11, %v5358_v33, %v3367_v16  ;;  %v3304_v6 = vadd.f32 -1.0, %v4115_v27  ;;  %v2132_v42 = vmul.f32 1.442695, %v1879_v39  ;;  %v5443_v37 = vadd.f32 %v5135_v1, %v1619_v57 }
 0x216   : > { %v3626_v2 = vpack.c.bf16 %v2387_v38, %v2387_v38  ;;  %v1816_v8 = vmin.f32 %v5434_v59, 0.0  ;;  %v4117_v0 = vpop.eup %4116  ;;  %2964 = vst.msk [vmem:[%s4439_s5 + $0xe4] sm:$0xf] %vm2906_vm0, %v3562_v63  ;;  %4126 = vpow2.f32 %v2004_v58  ;;  %v5446_v33 = vadd.f32 %v5135_v1, %v1366_v60 }
 0x217   : > { %v2324_v11 = vsel %vm1684_vm12, %v5370_v51, %v3304_v6  ;;  %v4119_v62 = vpop.eup %4118  ;;  %v3368_v24 = vadd.f32 -1.0, %v4117_v0  ;;  %4128 = vpow2.f32 %v2132_v42  ;;  %vm1748_vm13 = vcmp.gt.f32.partialorder %v5379_v43, 0.0 }
 0x218   : > { %3028 = vst.msk [vmem:[%s4439_s5 + $0x1e4] sm:$0xf] %vm2906_vm0, %v3626_v2  ;;  %v3563_v22 = vpack.c.bf16 %v2324_v11, %v2324_v11  ;;  %v2006_v30 = vmul.f32 1.442695, %v1816_v8  ;;  %vm1685_vm14 = vcmp.gt.f32.partialorder %v5382_v46, 0.0  ;;  %v3305_v25 = vadd.f32 -1.0, %v4119_v62 }
 0x219   : > { %v1880_v51 = vmin.f32 %v5443_v37, 0.0  ;;  %v2388_v15 = vsel %vm1748_vm13, %v5379_v43, %v3368_v24  ;;  %v1817_v49 = vmin.f32 %v5446_v33, 0.0  ;;  %v5458_v13 = vadd.f32 %v5135_v1, %v1622_v3 }
 0x21a   : > { %v4121_v5 = vpop.eup %4120  ;;  %2965 = vst.msk [vmem:[%s4439_s5 + $0xe8] sm:$0xf] %vm2906_vm0, %v3563_v22  ;;  %4130 = vpow2.f32 %v2006_v30  ;;  %v3627_v29 = vpack.c.bf16 %v2388_v15, %v2388_v15  ;;  %v2325_v20 = vsel %vm1685_vm14, %v5382_v46, %v3305_v25  ;;  %vm1749_vm15 = vcmp.gt.f32.partialorder %v5394_v56, 0.0 }
 0x21b   : > { %v3369_v26 = vadd.f32 -1.0, %v4121_v5  ;;  %v2134_v53 = vmul.f32 1.442695, %v1880_v51  ;;  %v3564_v41 = vpack.c.bf16 %v2325_v20, %v2325_v20  ;;  %v2008_v35 = vmul.f32 1.442695, %v1817_v49 }
 0x21c   : > { %v1881_v14 = vmin.f32 %v5458_v13, 0.0  ;;  %v4123_v43 = vpop.eup %4122  ;;  %3029 = vst.msk [vmem:[%s4439_s5 + $0x1e8] sm:$0xf] %vm2906_vm0, %v3627_v29  ;;  %vm1686_vm1 = vcmp.gt.f32.partialorder %v5403_v4, 0.0  ;;  %vm1750_vm2 = vcmp.gt.f32.partialorder %v5406_v36, 0.0  ;;  %vm1687_vm3 = vcmp.gt.f32.partialorder %v5418_v9, 0.0 }
 0x21d   : > { %v2389_v18 = vsel %vm1749_vm15, %v5394_v56, %v3369_v26  ;;  %4132 = vpow2.f32 %v2134_v53  ;;  %v4125_v1 = vpop.eup %4124  ;;  %2966 = vst.msk [vmem:[%s4439_s5 + $0xec] sm:$0xf] %vm2906_vm0, %v3564_v41  ;;  %v3306_v46 = vadd.f32 -1.0, %v4123_v43  ;;  %vm1751_vm4 = vcmp.gt.f32.partialorder %v5422_v44, 0.0 }
 0x21e   : > { %v3628_v52 = vpack.c.bf16 %v2389_v18, %v2389_v18  ;;  %4134 = vpow2.f32 %v2008_v35  ;;  %v2136_v23 = vmul.f32 1.442695, %v1881_v14  ;;  %v3370_v31 = vadd.f32 -1.0, %v4125_v1 }
 0x21f   : > { %v2326_v28 = vsel %vm1686_vm1, %v5403_v4, %v3306_v46  ;;  %vm1688_vm5 = vcmp.gt.f32.partialorder %v5434_v59, 0.0  ;;  %vm1752_vm6 = vcmp.gt.f32.partialorder %v5443_v37, 0.0  ;;  %vm1689_vm7 = vcmp.gt.f32.partialorder %v5446_v33, 0.0 }
 0x220   : > { %3030 = vst.msk [vmem:[%s4439_s5 + $0x1ec] sm:$0xf] %vm2906_vm0, %v3628_v52  ;;  %4136 = vpow2.f32 %v2136_v23  ;;  %v4127_v56 = vpop.eup %4126  ;;  %v3565_v55 = vpack.c.bf16 %v2326_v28, %v2326_v28  ;;  %v2390_v48 = vsel %vm1750_vm2, %v5406_v36, %v3370_v31  ;;  %vm1753_vm8 = vcmp.gt.f32.partialorder %v5458_v13, 0.0 }
 0x221   : > { %v4129_v21 = vpop.eup %4128  ;;  %v3629_v32 = vpack.c.bf16 %v2390_v48, %v2390_v48  ;;  %v3307_v10 = vadd.f32 -1.0, %v4127_v56 }
 0x222   : > { %2967 = vst.msk [vmem:[%s4439_s5 + $0xf0] sm:$0xf] %vm2906_vm0, %v3565_v55  ;;  %v3371_v34 = vadd.f32 -1.0, %v4129_v21 }
 0x223   : > { %3031 = vst.msk [vmem:[%s4439_s5 + $0x1f0] sm:$0xf] %vm2906_vm0, %v3629_v32  ;;  %v2327_v4 = vsel %vm1687_vm3, %v5418_v9, %v3307_v10 }
 0x224   : > { %v4131_v57 = vpop.eup %4130  ;;  %v3566_v61 = vpack.c.bf16 %v2327_v4, %v2327_v4  ;;  %v2391_v36 = vsel %vm1751_vm4, %v5422_v44, %v3371_v34 }
 0x225   : > { %v3308_v50 = vadd.f32 -1.0, %v4131_v57  ;;  %v3630_v40 = vpack.c.bf16 %v2391_v36, %v2391_v36 }
 0x226   : > { %2968 = vst.msk [vmem:[%s4439_s5 + $0xf4] sm:$0xf] %vm2906_vm0, %v3566_v61 }
 0x227   : > { %v4133_v12 = vpop.eup %4132  ;;  %v2328_v19 = vsel %vm1688_vm5, %v5434_v59, %v3308_v50  ;;  %3032 = vst.msk [vmem:[%s4439_s5 + $0x1f4] sm:$0xf] %vm2906_vm0, %v3630_v40 }
 0x228   : > { %v4135_v17 = vpop.eup %4134  ;;  %v3567_v9 = vpack.c.bf16 %v2328_v19, %v2328_v19  ;;  %v3372_v16 = vadd.f32 -1.0, %v4133_v12 }
 0x229   : > { %v3309_v44 = vadd.f32 -1.0, %v4135_v17 }
 0x22a   : > { %v4137_v54 = vpop.eup %4136  ;;  %2969 = vst.msk [vmem:[%s4439_s5 + $0xf8] sm:$0xf] %vm2906_vm0, %v3567_v9  ;;  %v2392_v60 = vsel %vm1752_vm6, %v5443_v37, %v3372_v16 }
 0x22b   : > { %v3631_v3 = vpack.c.bf16 %v2392_v60, %v2392_v60  ;;  %v2329_v27 = vsel %vm1689_vm7, %v5446_v33, %v3309_v44  ;;  %v3373_v45 = vadd.f32 -1.0, %v4137_v54 }
 0x22c   : > { %v3568_v39 = vpack.c.bf16 %v2329_v27, %v2329_v27 }
 0x22d   : > { %3033 = vst.msk [vmem:[%s4439_s5 + $0x1f8] sm:$0xf] %vm2906_vm0, %v3631_v3  ;;  %v2393_v59 = vsel %vm1753_vm8, %v5458_v13, %v3373_v45 }
 0x22e   : > { %2970 = vst.msk [vmem:[%s4439_s5 + $0xfc] sm:$0xf] %vm2906_vm0, %v3568_v39  ;;  %v3632_v47 = vpack.c.bf16 %v2393_v59, %v2393_v59 }
 0x230   : > { %3034 = vst.msk [vmem:[%s4439_s5 + $0x1fc] sm:$0xf] %vm2906_vm0, %v3632_v47 }
 0x231 PF: > { %s13_s12 = sadd.s32 1, %s4146_s12  }
 0x232   : > { %p10_p4 = scmp.ge.s32.totalorder %s13_s12, 20  }
 0x234   :  { %12 = sbr.rel (!%p10_p4) target bundleno = 1 (0x1), region = 62 }

// kernel: forward.9
= control target key start
LH: loop header
LB: loop body
LE: loop exit
PB: predicated region body
PF: predicated region fallthrough
CT: control target
= control target key end

     0   :  { %s2148_s6 = smov 0   ;;  %s4093_s0 = inlined_call_operand.vmem [shape: bf16[64,3,32,96], index: 0, kind: input, shape index: {}]   ;;  %s4094_s1 = inlined_call_operand.vmem [shape: bf16[64,32,32], index: 1, kind: output, shape index: {}]  }
   0x1 LB: > { %s2104_s7 = sadd.s32 4294967295, %s2134_s6   ;;  %p2108_p0 = scmp.ge.s32.totalorder %s2134_s6, 1  ;;  %s2134_s6 = sphi %s2148_s6, %s11_s6  }
   0x2   : > { %p89_p1 = scmp.lt.s32.totalorder %s2134_s6, 3 }
   0x4   : > { %p90_p2 = pnand %p2108_p0, %p89_p1 }
   0x6   : > { %93 = sbr.rel (%p90_p2) target bundleno = 652 (0x28c), region = 24 }
   0xd   : > { %s2109_s8 = sshll.u32 %s2104_s7, 5  ;;  %s2136_s13 = smov 96   ;;  %vm1917_vm0 = vcmask 257024  }
   0xe   : > { %p112_p3 = scmp.lt.s32.totalorder %s2109_s8, 63  ;;  %s2137_s14 = smov 64  }
  0x10   : > { %s4703_s8 = smov (!%p112_p3, %s2109_s8), 63 }
  0x11   : > { %s2117_s9 = smul.u32 48, %s4703_s8  ;;  %s2116_s15 = sshll.u32 %s4703_s8, 4 }
  0x12   : > { %s3440_s18 = scalar_lea.vmem %s4094_s1, %s2116_s15 }
  0x13   : > { %s2162_s12 = scalar_lea.vmem %s4093_s0, %s2117_s9 }
  0x14   : > { %v127_v0 = vld [vmem:[%s2162_s12 + $0x8] sm:$0xf]  ;;  %v131_v1 = vld [vmem:[%s2162_s12 + $0x18] sm:$0xf]  ;;  %v125_v4 = vld [vmem:[%s2162_s12] sm:$0xf] }
  0x15   : > { %v135_v2 = vld [vmem:[%s2162_s12 + $0x28] sm:$0xf]  ;;  %v511_v3 = vmax.bf16 %v131_v1, %v127_v0  ;;  %v129_v5 = vld [vmem:[%s2162_s12 + $0x10] sm:$0xf]  ;;  %v133_v6 = vld [vmem:[%s2162_s12 + $0x20] sm:$0xf] }
  0x16   : > { %v509_v7 = vmax.bf16 %v129_v5, %v125_v4  ;;  %v128_v8 = vld [vmem:[%s2162_s12 + $0xc] sm:$0xf]  ;;  %v132_v9 = vld [vmem:[%s2162_s12 + $0x1c] sm:$0xf]  ;;  %v126_v13 = vld [vmem:[%s2162_s12 + $0x4] sm:$0xf] }
  0x17   : > { %v136_v10 = vld [vmem:[%s2162_s12 + $0x2c] sm:$0xf]  ;;  %v2173_v11 = vmax.bf16 %v511_v3, %v135_v2  ;;  %v512_v12 = vmax.bf16 %v132_v9, %v128_v8  ;;  %v130_v14 = vld [vmem:[%s2162_s12 + $0x14] sm:$0xf]  ;;  %v134_v15 = vld [vmem:[%s2162_s12 + $0x24] sm:$0xf] }
  0x18   : > { %v2178_v16 = vmax.bf16 %v509_v7, %v133_v6  ;;  %v510_v17 = vmax.bf16 %v130_v14, %v126_v13  ;;  %v138_v18 = vld [vmem:[%s2162_s12 + $0x34] sm:$0xf]  ;;  %v142_v19 = vld [vmem:[%s2162_s12 + $0x44] sm:$0xf]  ;;  %v137_v22 = vld [vmem:[%s2162_s12 + $0x30] sm:$0xf] }
  0x19   : > { %897 = vrot.lane.b32.xlu1 %v2173_v11, %s2136_s13  ;;  %v2184_v20 = vmax.bf16 %v512_v12, %v136_v10  ;;  %v514_v21 = vmax.bf16 %v142_v19, %v138_v18  ;;  %v141_v23 = vld [vmem:[%s2162_s12 + $0x40] sm:$0xf]  ;;  %v146_v25 = vld [vmem:[%s2162_s12 + $0x54] sm:$0xf]  ;;  %v140_v27 = vld [vmem:[%s2162_s12 + $0x3c] sm:$0xf] }
  0x1a   : > { %893 = vrot.lane.b32.xlu0 %v2178_v16, %s2136_s13  ;;  %v2190_v24 = vmax.bf16 %v510_v17, %v134_v15  ;;  %v513_v26 = vmax.bf16 %v141_v23, %v137_v22  ;;  %v144_v28 = vld [vmem:[%s2162_s12 + $0x4c] sm:$0xf]  ;;  %v145_v29 = vld [vmem:[%s2162_s12 + $0x50] sm:$0xf]  ;;  %v139_v30 = vld [vmem:[%s2162_s12 + $0x38] sm:$0xf] }
  0x1b   : > { %v143_v31 = vld [vmem:[%s2162_s12 + $0x48] sm:$0xf]  ;;  %v2200_v32 = vmax.bf16 %v514_v21, %v146_v25  ;;  %v516_v33 = vmax.bf16 %v144_v28, %v140_v27  ;;  %v148_v35 = vld [vmem:[%s2162_s12 + $0x5c] sm:$0xf]  ;;  %v150_v37 = vld [vmem:[%s2162_s12 + $0x64] sm:$0xf] }
  0x1c   : > { %v2204_v34 = vmax.bf16 %v513_v26, %v145_v29  ;;  %v515_v36 = vmax.bf16 %v143_v31, %v139_v30  ;;  %v154_v38 = vld [vmem:[%s2162_s12 + $0x74] sm:$0xf]  ;;  %v147_v39 = vld [vmem:[%s2162_s12 + $0x58] sm:$0xf]  ;;  %v149_v40 = vld [vmem:[%s2162_s12 + $0x60] sm:$0xf] }
  0x1d   : > { %899 = vrot.lane.b32.xlu1 %v2184_v20, %s2136_s13  ;;  %v153_v41 = vld [vmem:[%s2162_s12 + $0x70] sm:$0xf]  ;;  %v2214_v42 = vmax.bf16 %v516_v33, %v148_v35  ;;  %v518_v43 = vmax.bf16 %v154_v38, %v150_v37  ;;  %v158_v45 = vld [vmem:[%s2162_s12 + $0x84] sm:$0xf]  ;;  %v152_v47 = vld [vmem:[%s2162_s12 + $0x6c] sm:$0xf] }
  0x1e   : > { %895 = vrot.lane.b32.xlu0 %v2190_v24, %s2136_s13  ;;  %v2218_v44 = vmax.bf16 %v515_v36, %v147_v39  ;;  %v517_v46 = vmax.bf16 %v153_v41, %v149_v40  ;;  %v156_v48 = vld [vmem:[%s2162_s12 + $0x7c] sm:$0xf]  ;;  %v157_v49 = vld [vmem:[%s2162_s12 + $0x80] sm:$0xf]  ;;  %v151_v50 = vld [vmem:[%s2162_s12 + $0x68] sm:$0xf] }
  0x1f   : > { %v155_v51 = vld [vmem:[%s2162_s12 + $0x78] sm:$0xf]  ;;  %v2228_v52 = vmax.bf16 %v518_v43, %v158_v45  ;;  %v520_v53 = vmax.bf16 %v156_v48, %v152_v47  ;;  %v160_v55 = vld [vmem:[%s2162_s12 + $0x8c] sm:$0xf]  ;;  %v162_v57 = vld [vmem:[%s2162_s12 + $0x94] sm:$0xf] }
  0x20   : > { %v2232_v54 = vmax.bf16 %v517_v46, %v157_v49  ;;  %v519_v56 = vmax.bf16 %v155_v51, %v151_v50  ;;  %v166_v58 = vld [vmem:[%s2162_s12 + $0xa4] sm:$0xf]  ;;  %v159_v59 = vld [vmem:[%s2162_s12 + $0x88] sm:$0xf]  ;;  %v161_v60 = vld [vmem:[%s2162_s12 + $0x90] sm:$0xf] }
  0x21   : > { %903 = vrot.lane.b32.xlu1 %v2200_v32, %s2136_s13  ;;  %v165_v61 = vld [vmem:[%s2162_s12 + $0xa0] sm:$0xf]  ;;  %v2242_v62 = vmax.bf16 %v520_v53, %v160_v55  ;;  %v522_v63 = vmax.bf16 %v166_v58, %v162_v57  ;;  %v170_v1 = vld [vmem:[%s2162_s12 + $0xb4] sm:$0xf]  ;;  %v164_v3 = vld [vmem:[%s2162_s12 + $0x9c] sm:$0xf] }
  0x22   : > { %901 = vrot.lane.b32.xlu0 %v2204_v34, %s2136_s13  ;;  %v2246_v0 = vmax.bf16 %v519_v56, %v159_v59  ;;  %v521_v2 = vmax.bf16 %v165_v61, %v161_v60  ;;  %v168_v4 = vld [vmem:[%s2162_s12 + $0xac] sm:$0xf]  ;;  %v169_v5 = vld [vmem:[%s2162_s12 + $0xb0] sm:$0xf]  ;;  %v163_v6 = vld [vmem:[%s2162_s12 + $0x98] sm:$0xf] }
  0x23   : > { %v167_v7 = vld [vmem:[%s2162_s12 + $0xa8] sm:$0xf]  ;;  %v2256_v8 = vmax.bf16 %v522_v63, %v170_v1  ;;  %v524_v9 = vmax.bf16 %v168_v4, %v164_v3  ;;  %v172_v12 = vld [vmem:[%s2162_s12 + $0xbc] sm:$0xf]  ;;  %v174_v14 = vld [vmem:[%s2162_s12 + $0xc4] sm:$0xf] }
  0x24   : > { %v2260_v10 = vmax.bf16 %v521_v2, %v169_v5  ;;  %v523_v13 = vmax.bf16 %v167_v7, %v163_v6  ;;  %v178_v15 = vld [vmem:[%s2162_s12 + $0xd4] sm:$0xf]  ;;  %v171_v17 = vld [vmem:[%s2162_s12 + $0xb8] sm:$0xf]  ;;  %v173_v18 = vld [vmem:[%s2162_s12 + $0xc0] sm:$0xf] }
  0x25   : > { %907 = vrot.lane.b32.xlu1 %v2214_v42, %s2136_s13  ;;  %v177_v19 = vld [vmem:[%s2162_s12 + $0xd0] sm:$0xf]  ;;  %v2270_v21 = vmax.bf16 %v524_v9, %v172_v12  ;;  %v526_v22 = vmax.bf16 %v178_v15, %v174_v14  ;;  %v182_v25 = vld [vmem:[%s2162_s12 + $0xe4] sm:$0xf]  ;;  %v176_v27 = vld [vmem:[%s2162_s12 + $0xcc] sm:$0xf] }
  0x26   : > { %905 = vrot.lane.b32.xlu0 %v2218_v44, %s2136_s13  ;;  %v2274_v23 = vmax.bf16 %v523_v13, %v171_v17  ;;  %v525_v26 = vmax.bf16 %v177_v19, %v173_v18  ;;  %v180_v28 = vld [vmem:[%s2162_s12 + $0xdc] sm:$0xf]  ;;  %v181_v29 = vld [vmem:[%s2162_s12 + $0xe0] sm:$0xf]  ;;  %v175_v30 = vld [vmem:[%s2162_s12 + $0xc8] sm:$0xf] }
  0x27   : > { %v179_v31 = vld [vmem:[%s2162_s12 + $0xd8] sm:$0xf]  ;;  %v2284_v33 = vmax.bf16 %v526_v22, %v182_v25  ;;  %v528_v35 = vmax.bf16 %v180_v28, %v176_v27  ;;  %v184_v37 = vld [vmem:[%s2162_s12 + $0xec] sm:$0xf]  ;;  %v186_v39 = vld [vmem:[%s2162_s12 + $0xf4] sm:$0xf] }
  0x28   : > { %v2288_v36 = vmax.bf16 %v525_v26, %v181_v29  ;;  %v527_v38 = vmax.bf16 %v179_v31, %v175_v30  ;;  %v190_v40 = vld [vmem:[%s2162_s12 + $0x104] sm:$0xf]  ;;  %v183_v41 = vld [vmem:[%s2162_s12 + $0xe8] sm:$0xf]  ;;  %v185_v43 = vld [vmem:[%s2162_s12 + $0xf0] sm:$0xf] }
  0x29   : > { %911 = vrot.lane.b32.xlu1 %v2228_v52, %s2136_s13  ;;  %v189_v45 = vld [vmem:[%s2162_s12 + $0x100] sm:$0xf]  ;;  %v2298_v46 = vmax.bf16 %v528_v35, %v184_v37  ;;  %v530_v47 = vmax.bf16 %v190_v40, %v186_v39  ;;  %v194_v49 = vld [vmem:[%s2162_s12 + $0x114] sm:$0xf]  ;;  %v188_v51 = vld [vmem:[%s2162_s12 + $0xfc] sm:$0xf] }
  0x2a   : > { %909 = vrot.lane.b32.xlu0 %v2232_v54, %s2136_s13  ;;  %v2302_v48 = vmax.bf16 %v527_v38, %v183_v41  ;;  %v529_v50 = vmax.bf16 %v189_v45, %v185_v43  ;;  %v192_v53 = vld [vmem:[%s2162_s12 + $0x10c] sm:$0xf]  ;;  %v193_v55 = vld [vmem:[%s2162_s12 + $0x110] sm:$0xf]  ;;  %v187_v56 = vld [vmem:[%s2162_s12 + $0xf8] sm:$0xf] }
  0x2b   : > { %v191_v57 = vld [vmem:[%s2162_s12 + $0x108] sm:$0xf]  ;;  %v2312_v58 = vmax.bf16 %v530_v47, %v194_v49  ;;  %v532_v59 = vmax.bf16 %v192_v53, %v188_v51  ;;  %v196_v61 = vld [vmem:[%s2162_s12 + $0x11c] sm:$0xf]  ;;  %v198_v1 = vld [vmem:[%s2162_s12 + $0x124] sm:$0xf] }
  0x2c   : > { %v2316_v60 = vmax.bf16 %v529_v50, %v193_v55  ;;  %v531_v63 = vmax.bf16 %v191_v57, %v187_v56  ;;  %v202_v2 = vld [vmem:[%s2162_s12 + $0x134] sm:$0xf]  ;;  %v195_v3 = vld [vmem:[%s2162_s12 + $0x118] sm:$0xf]  ;;  %v197_v4 = vld [vmem:[%s2162_s12 + $0x120] sm:$0xf] }
  0x2d   : > { %915 = vrot.lane.b32.xlu1 %v2242_v62, %s2136_s13  ;;  %v201_v5 = vld [vmem:[%s2162_s12 + $0x130] sm:$0xf]  ;;  %v2326_v6 = vmax.bf16 %v532_v59, %v196_v61  ;;  %v534_v7 = vmax.bf16 %v202_v2, %v198_v1  ;;  %v206_v12 = vld [vmem:[%s2162_s12 + $0x144] sm:$0xf]  ;;  %v200_v14 = vld [vmem:[%s2162_s12 + $0x12c] sm:$0xf] }
  0x2e   : > { %913 = vrot.lane.b32.xlu0 %v2246_v0, %s2136_s13  ;;  %v2330_v9 = vmax.bf16 %v531_v63, %v195_v3  ;;  %v533_v13 = vmax.bf16 %v201_v5, %v197_v4  ;;  %v204_v15 = vld [vmem:[%s2162_s12 + $0x13c] sm:$0xf]  ;;  %v205_v17 = vld [vmem:[%s2162_s12 + $0x140] sm:$0xf]  ;;  %v199_v18 = vld [vmem:[%s2162_s12 + $0x128] sm:$0xf] }
  0x2f   : > { %v203_v19 = vld [vmem:[%s2162_s12 + $0x138] sm:$0xf]  ;;  %v2340_v22 = vmax.bf16 %v534_v7, %v206_v12  ;;  %v536_v25 = vmax.bf16 %v204_v15, %v200_v14  ;;  %v208_v27 = vld [vmem:[%s2162_s12 + $0x14c] sm:$0xf]  ;;  %v210_v29 = vld [vmem:[%s2162_s12 + $0x154] sm:$0xf] }
  0x30   : > { %v2344_v26 = vmax.bf16 %v533_v13, %v205_v17  ;;  %v535_v28 = vmax.bf16 %v203_v19, %v199_v18  ;;  %v214_v30 = vld [vmem:[%s2162_s12 + $0x164] sm:$0xf]  ;;  %v207_v31 = vld [vmem:[%s2162_s12 + $0x148] sm:$0xf]  ;;  %v209_v35 = vld [vmem:[%s2162_s12 + $0x150] sm:$0xf] }
  0x31   : > { %919 = vrot.lane.b32.xlu1 %v2256_v8, %s2136_s13  ;;  %v213_v37 = vld [vmem:[%s2162_s12 + $0x160] sm:$0xf]  ;;  %v2354_v38 = vmax.bf16 %v536_v25, %v208_v27  ;;  %v538_v39 = vmax.bf16 %v214_v30, %v210_v29  ;;  %v218_v41 = vld [vmem:[%s2162_s12 + $0x174] sm:$0xf]  ;;  %v212_v45 = vld [vmem:[%s2162_s12 + $0x15c] sm:$0xf] }
  0x32   : > { %917 = vrot.lane.b32.xlu0 %v2260_v10, %s2136_s13  ;;  %v2358_v40 = vmax.bf16 %v535_v28, %v207_v31  ;;  %v537_v43 = vmax.bf16 %v213_v37, %v209_v35  ;;  %v216_v47 = vld [vmem:[%s2162_s12 + $0x16c] sm:$0xf]  ;;  %v217_v49 = vld [vmem:[%s2162_s12 + $0x170] sm:$0xf]  ;;  %v211_v50 = vld [vmem:[%s2162_s12 + $0x158] sm:$0xf] }
  0x33   : > { %v215_v51 = vld [vmem:[%s2162_s12 + $0x168] sm:$0xf]  ;;  %v2368_v53 = vmax.bf16 %v538_v39, %v218_v41  ;;  %v540_v55 = vmax.bf16 %v216_v47, %v212_v45  ;;  %v220_v57 = vld [vmem:[%s2162_s12 + $0x17c] sm:$0xf]  ;;  %v222_v61 = vld [vmem:[%s2162_s12 + $0x184] sm:$0xf] }
  0x34   : > { %v2372_v56 = vmax.bf16 %v537_v43, %v217_v49  ;;  %v539_v59 = vmax.bf16 %v215_v51, %v211_v50  ;;  %v226_v63 = vld [vmem:[%s2162_s12 + $0x194] sm:$0xf]  ;;  %v219_v1 = vld [vmem:[%s2162_s12 + $0x178] sm:$0xf]  ;;  %v221_v2 = vld [vmem:[%s2162_s12 + $0x180] sm:$0xf] }
  0x35   : > { %923 = vrot.lane.b32.xlu1 %v2270_v21, %s2136_s13  ;;  %v225_v3 = vld [vmem:[%s2162_s12 + $0x190] sm:$0xf]  ;;  %v2382_v4 = vmax.bf16 %v540_v55, %v220_v57  ;;  %v542_v5 = vmax.bf16 %v226_v63, %v222_v61  ;;  %v230_v12 = vld [vmem:[%s2162_s12 + $0x1a4] sm:$0xf]  ;;  %v224_v14 = vld [vmem:[%s2162_s12 + $0x18c] sm:$0xf] }
  0x36   : > { %921 = vrot.lane.b32.xlu0 %v2274_v23, %s2136_s13  ;;  %v2386_v7 = vmax.bf16 %v539_v59, %v219_v1  ;;  %v541_v13 = vmax.bf16 %v225_v3, %v221_v2  ;;  %v228_v15 = vld [vmem:[%s2162_s12 + $0x19c] sm:$0xf]  ;;  %v229_v17 = vld [vmem:[%s2162_s12 + $0x1a0] sm:$0xf]  ;;  %v223_v18 = vld [vmem:[%s2162_s12 + $0x188] sm:$0xf] }
  0x37   : > { %v227_v19 = vld [vmem:[%s2162_s12 + $0x198] sm:$0xf]  ;;  %v2396_v25 = vmax.bf16 %v542_v5, %v230_v12  ;;  %v544_v27 = vmax.bf16 %v228_v15, %v224_v14  ;;  %v232_v29 = vld [vmem:[%s2162_s12 + $0x1ac] sm:$0xf]  ;;  %v234_v31 = vld [vmem:[%s2162_s12 + $0x1b4] sm:$0xf] }
  0x38   : > { %v2400_v28 = vmax.bf16 %v541_v13, %v229_v17  ;;  %v543_v30 = vmax.bf16 %v227_v19, %v223_v18  ;;  %v238_v35 = vld [vmem:[%s2162_s12 + $0x1c4] sm:$0xf]  ;;  %v231_v37 = vld [vmem:[%s2162_s12 + $0x1a8] sm:$0xf]  ;;  %v233_v39 = vld [vmem:[%s2162_s12 + $0x1b0] sm:$0xf] }
  0x39   : > { %927 = vrot.lane.b32.xlu1 %v2284_v33, %s2136_s13  ;;  %v237_v41 = vld [vmem:[%s2162_s12 + $0x1c0] sm:$0xf]  ;;  %v2410_v43 = vmax.bf16 %v544_v27, %v232_v29  ;;  %v546_v45 = vmax.bf16 %v238_v35, %v234_v31  ;;  %v242_v49 = vld [vmem:[%s2162_s12 + $0x1d4] sm:$0xf]  ;;  %v236_v51 = vld [vmem:[%s2162_s12 + $0x1bc] sm:$0xf] }
  0x3a   : > { %925 = vrot.lane.b32.xlu0 %v2288_v36, %s2136_s13  ;;  %v2414_v47 = vmax.bf16 %v543_v30, %v231_v37  ;;  %v545_v50 = vmax.bf16 %v237_v41, %v233_v39  ;;  %v240_v55 = vld [vmem:[%s2162_s12 + $0x1cc] sm:$0xf]  ;;  %v241_v57 = vld [vmem:[%s2162_s12 + $0x1d0] sm:$0xf]  ;;  %v235_v59 = vld [vmem:[%s2162_s12 + $0x1b8] sm:$0xf] }
  0x3b   : > { %v239_v61 = vld [vmem:[%s2162_s12 + $0x1c8] sm:$0xf]  ;;  %v2424_v63 = vmax.bf16 %v546_v45, %v242_v49  ;;  %v548_v1 = vmax.bf16 %v240_v55, %v236_v51  ;;  %v244_v3 = vld [vmem:[%s2162_s12 + $0x1dc] sm:$0xf]  ;;  %v246_v12 = vld [vmem:[%s2162_s12 + $0x1e4] sm:$0xf] }
  0x3c   : > { %v2428_v2 = vmax.bf16 %v545_v50, %v241_v57  ;;  %v547_v5 = vmax.bf16 %v239_v61, %v235_v59  ;;  %v250_v13 = vld [vmem:[%s2162_s12 + $0x1f4] sm:$0xf]  ;;  %v243_v14 = vld [vmem:[%s2162_s12 + $0x1d8] sm:$0xf]  ;;  %v245_v15 = vld [vmem:[%s2162_s12 + $0x1e0] sm:$0xf] }
  0x3d   : > { %931 = vrot.lane.b32.xlu1 %v2298_v46, %s2136_s13  ;;  %v249_v17 = vld [vmem:[%s2162_s12 + $0x1f0] sm:$0xf]  ;;  %v2438_v18 = vmax.bf16 %v548_v1, %v244_v3  ;;  %v550_v19 = vmax.bf16 %v250_v13, %v246_v12  ;;  %v254_v29 = vld [vmem:[%s2162_s12 + $0x204] sm:$0xf]  ;;  %v248_v31 = vld [vmem:[%s2162_s12 + $0x1ec] sm:$0xf] }
  0x3e   : > { %929 = vrot.lane.b32.xlu0 %v2302_v48, %s2136_s13  ;;  %v2442_v27 = vmax.bf16 %v547_v5, %v243_v14  ;;  %v549_v30 = vmax.bf16 %v249_v17, %v245_v15  ;;  %v252_v35 = vld [vmem:[%s2162_s12 + $0x1fc] sm:$0xf]  ;;  %v253_v37 = vld [vmem:[%s2162_s12 + $0x200] sm:$0xf]  ;;  %v247_v39 = vld [vmem:[%s2162_s12 + $0x1e8] sm:$0xf] }
  0x3f   : > { %v251_v41 = vld [vmem:[%s2162_s12 + $0x1f8] sm:$0xf]  ;;  %v2452_v45 = vmax.bf16 %v550_v19, %v254_v29  ;;  %v552_v49 = vmax.bf16 %v252_v35, %v248_v31  ;;  %v256_v51 = vld [vmem:[%s2162_s12 + $0x20c] sm:$0xf]  ;;  %v258_v57 = vld [vmem:[%s2162_s12 + $0x214] sm:$0xf] }
  0x40   : > { %v2456_v50 = vmax.bf16 %v549_v30, %v253_v37  ;;  %v551_v55 = vmax.bf16 %v251_v41, %v247_v39  ;;  %v262_v59 = vld [vmem:[%s2162_s12 + $0x224] sm:$0xf]  ;;  %v255_v61 = vld [vmem:[%s2162_s12 + $0x208] sm:$0xf]  ;;  %v257_v1 = vld [vmem:[%s2162_s12 + $0x210] sm:$0xf] }
  0x41   : > { %935 = vrot.lane.b32.xlu1 %v2312_v58, %s2136_s13  ;;  %v261_v3 = vld [vmem:[%s2162_s12 + $0x220] sm:$0xf]  ;;  %v2466_v5 = vmax.bf16 %v552_v49, %v256_v51  ;;  %v554_v12 = vmax.bf16 %v262_v59, %v258_v57  ;;  %v266_v14 = vld [vmem:[%s2162_s12 + $0x234] sm:$0xf]  ;;  %v260_v17 = vld [vmem:[%s2162_s12 + $0x21c] sm:$0xf] }
  0x42   : > { %933 = vrot.lane.b32.xlu0 %v2316_v60, %s2136_s13  ;;  %v2470_v13 = vmax.bf16 %v551_v55, %v255_v61  ;;  %v553_v15 = vmax.bf16 %v261_v3, %v257_v1  ;;  %v264_v19 = vld [vmem:[%s2162_s12 + $0x22c] sm:$0xf]  ;;  %v265_v29 = vld [vmem:[%s2162_s12 + $0x230] sm:$0xf]  ;;  %v259_v30 = vld [vmem:[%s2162_s12 + $0x218] sm:$0xf] }
  0x43   : > { %v263_v31 = vld [vmem:[%s2162_s12 + $0x228] sm:$0xf]  ;;  %v2480_v35 = vmax.bf16 %v554_v12, %v266_v14  ;;  %v556_v37 = vmax.bf16 %v264_v19, %v260_v17  ;;  %v268_v41 = vld [vmem:[%s2162_s12 + $0x23c] sm:$0xf]  ;;  %v270_v51 = vld [vmem:[%s2162_s12 + $0x244] sm:$0xf] }
  0x44   : > { %4265 = vst [vmem:[#allocation2_spill] sm:$0xff] %v2470_v13  ;;  %v2484_v39 = vmax.bf16 %v553_v15, %v265_v29  ;;  %v555_v49 = vmax.bf16 %v263_v31, %v259_v30  ;;  %v274_v55 = vld [vmem:[%s2162_s12 + $0x254] sm:$0xf]  ;;  %v267_v57 = vld [vmem:[%s2162_s12 + $0x238] sm:$0xf] }
  0x45   : > { %939 = vrot.lane.b32.xlu1 %v2326_v6, %s2136_s13  ;;  %4266 = vst [vmem:[#allocation3_spill] sm:$0xff] %v2480_v35  ;;  %v269_v59 = vld [vmem:[%s2162_s12 + $0x240] sm:$0xf]  ;;  %v273_v61 = vld [vmem:[%s2162_s12 + $0x250] sm:$0xf]  ;;  %v2494_v1 = vmax.bf16 %v556_v37, %v268_v41  ;;  %v558_v3 = vmax.bf16 %v274_v55, %v270_v51 }
  0x46   : > { %937 = vrot.lane.b32.xlu0 %v2330_v9, %s2136_s13  ;;  %4267 = vst [vmem:[#allocation4_spill] sm:$0xff] %v2484_v39  ;;  %v2498_v12 = vmax.bf16 %v555_v49, %v267_v57  ;;  %v278_v14 = vld [vmem:[%s2162_s12 + $0x264] sm:$0xf]  ;;  %v557_v15 = vmax.bf16 %v273_v61, %v269_v59  ;;  %v272_v17 = vld [vmem:[%s2162_s12 + $0x24c] sm:$0xf] }
  0x47   : > { %4268 = vst [vmem:[#allocation5_spill] sm:$0xff] %v2494_v1  ;;  %v276_v19 = vld [vmem:[%s2162_s12 + $0x25c] sm:$0xf]  ;;  %v277_v29 = vld [vmem:[%s2162_s12 + $0x260] sm:$0xf]  ;;  %v2508_v37 = vmax.bf16 %v558_v3, %v278_v14 }
  0x48   : > { %4269 = vst [vmem:[#allocation6_spill] sm:$0xff] %v2498_v12  ;;  %v271_v30 = vld [vmem:[%s2162_s12 + $0x248] sm:$0xf]  ;;  %v275_v31 = vld [vmem:[%s2162_s12 + $0x258] sm:$0xf]  ;;  %v560_v41 = vmax.bf16 %v276_v19, %v272_v17  ;;  %v2512_v49 = vmax.bf16 %v557_v15, %v277_v29 }
  0x49   : > { %943 = vrot.lane.b32.xlu1 %v2340_v22, %s2136_s13  ;;  %4270 = vst [vmem:[#allocation7_spill] sm:$0xff] %v2508_v37  ;;  %v280_v51 = vld [vmem:[%s2162_s12 + $0x26c] sm:$0xf]  ;;  %v559_v55 = vmax.bf16 %v275_v31, %v271_v30  ;;  %v282_v57 = vld [vmem:[%s2162_s12 + $0x274] sm:$0xf] }
  0x4a   : > { %941 = vrot.lane.b32.xlu0 %v2344_v26, %s2136_s13  ;;  %4271 = vst [vmem:[#allocation8_spill] sm:$0xff] %v2512_v49  ;;  %v286_v59 = vld [vmem:[%s2162_s12 + $0x284] sm:$0xf]  ;;  %v279_v61 = vld [vmem:[%s2162_s12 + $0x268] sm:$0xf]  ;;  %v2522_v14 = vmax.bf16 %v560_v41, %v280_v51 }
  0x4b   : > { %v285_v3 = vld [vmem:[%s2162_s12 + $0x280] sm:$0xf]  ;;  %v562_v17 = vmax.bf16 %v286_v59, %v282_v57  ;;  %v2526_v15 = vmax.bf16 %v559_v55, %v279_v61  ;;  %v290_v19 = vld [vmem:[%s2162_s12 + $0x294] sm:$0xf]  ;;  %v284_v30 = vld [vmem:[%s2162_s12 + $0x27c] sm:$0xf] }
  0x4c   : > { %4272 = vst [vmem:[#allocation9_spill] sm:$0xff] %v2522_v14  ;;  %v288_v31 = vld [vmem:[%s2162_s12 + $0x28c] sm:$0xf]  ;;  %v287_v41 = vld [vmem:[%s2162_s12 + $0x288] sm:$0xf] }
  0x4d   : > { %947 = vrot.lane.b32.xlu1 %v2354_v38, %s2136_s13  ;;  %4273 = vst [vmem:[#allocation10_spill] sm:$0xff] %v2526_v15  ;;  %v2536_v51 = vmax.bf16 %v562_v17, %v290_v19  ;;  %v564_v57 = vmax.bf16 %v288_v31, %v284_v30  ;;  %v294_v61 = vld [vmem:[%s2162_s12 + $0x2a4] sm:$0xf]  ;;  %v297_v17 = vld [vmem:[%s2162_s12 + $0x2b0] sm:$0xf] }
  0x4e   : > { %945 = vrot.lane.b32.xlu0 %v2358_v40, %s2136_s13  ;;  %v296_v31 = vld [vmem:[%s2162_s12 + $0x2ac] sm:$0xf] }
  0x4f   : > { %4274 = vst [vmem:[#allocation11_spill] sm:$0xff] %v2536_v51 }
  0x51   : > { %951 = vrot.lane.b32.xlu1 %v2368_v53, %s2136_s13 }
  0x52   : > { %949 = vrot.lane.b32.xlu0 %v2372_v56, %s2136_s13 }
  0x55   : > { %955 = vrot.lane.b32.xlu1 %v2382_v4, %s2136_s13 }
  0x56   : > { %953 = vrot.lane.b32.xlu0 %v2386_v7, %s2136_s13 }
  0x59   : > { %959 = vrot.lane.b32.xlu1 %v2396_v25, %s2136_s13 }
  0x5a   : > { %957 = vrot.lane.b32.xlu0 %v2400_v28, %s2136_s13 }
  0x5d   : > { %963 = vrot.lane.b32.xlu1 %v2410_v43, %s2136_s13 }
  0x5e   : > { %961 = vrot.lane.b32.xlu0 %v2414_v47, %s2136_s13 }
  0x61   : > { %967 = vrot.lane.b32.xlu1 %v2424_v63, %s2136_s13 }
  0x62   : > { %965 = vrot.lane.b32.xlu0 %v2428_v2, %s2136_s13 }
  0x65   : > { %971 = vrot.lane.b32.xlu1 %v2438_v18, %s2136_s13 }
  0x66   : > { %969 = vrot.lane.b32.xlu0 %v2442_v27, %s2136_s13 }
  0x69   : > { %975 = vrot.lane.b32.xlu1 %v2452_v45, %s2136_s13 }
  0x6a   : > { %973 = vrot.lane.b32.xlu0 %v2456_v50, %s2136_s13 }
  0x6d   : > { %979 = vrot.lane.b32.xlu1 %v2466_v5, %s2136_s13 }
  0x6e   : > { %977 = vrot.lane.b32.xlu0 %v2470_v13, %s2136_s13  ;;  %v503_v13 = vld [vmem:[%s2162_s12 + $0x5e8] sm:$0xf] }
  0x71   : > { %983 = vrot.lane.b32.xlu1 %v2480_v35, %s2136_s13  ;;  %v499_v35 = vld [vmem:[%s2162_s12 + $0x5d8] sm:$0xf] }
  0x72   : > { %981 = vrot.lane.b32.xlu0 %v2484_v39, %s2136_s13 }
  0x75   : > { %987 = vrot.lane.b32.xlu1 %v2494_v1, %s2136_s13  ;;  %v281_v1 = vld [vmem:[%s2162_s12 + $0x270] sm:$0xf] }
  0x76   : > { %985 = vrot.lane.b32.xlu0 %v2498_v12, %s2136_s13  ;;  %v561_v29 = vmax.bf16 %v285_v3, %v281_v1  ;;  %v289_v12 = vld [vmem:[%s2162_s12 + $0x290] sm:$0xf]  ;;  %v292_v1 = vld [vmem:[%s2162_s12 + $0x29c] sm:$0xf]  ;;  %v298_v3 = vld [vmem:[%s2162_s12 + $0x2b4] sm:$0xf] }
  0x77   : > { %v2550_v19 = vmax.bf16 %v564_v57, %v292_v1  ;;  %v566_v30 = vmax.bf16 %v298_v3, %v294_v61  ;;  %v299_v57 = vld [vmem:[%s2162_s12 + $0x2b8] sm:$0xf]  ;;  %v306_v3 = vld [vmem:[%s2162_s12 + $0x2d4] sm:$0xf] }
  0x78   : > { %v2540_v55 = vmax.bf16 %v561_v29, %v289_v12 }
  0x79   : > { %991 = vrot.lane.b32.xlu1 %v2508_v37, %s2136_s13  ;;  %v283_v37 = vld [vmem:[%s2162_s12 + $0x278] sm:$0xf]  ;;  %4276 = vst [vmem:[#allocation13_spill] sm:$0xff] %v2550_v19 }
  0x7a   : > { %989 = vrot.lane.b32.xlu0 %v2512_v49, %s2136_s13  ;;  %4275 = vst [vmem:[#allocation12_spill] sm:$0xff] %v2540_v55  ;;  %v563_v59 = vmax.bf16 %v287_v41, %v283_v37  ;;  %v291_v49 = vld [vmem:[%s2162_s12 + $0x298] sm:$0xf]  ;;  %v302_v37 = vld [vmem:[%s2162_s12 + $0x2c4] sm:$0xf] }
  0x7b   : > { %v300_v41 = vld [vmem:[%s2162_s12 + $0x2bc] sm:$0xf]  ;;  %v2564_v1 = vmax.bf16 %v566_v30, %v302_v37  ;;  %v309_v30 = vld [vmem:[%s2162_s12 + $0x2e0] sm:$0xf] }
  0x7c   : > { %v2554_v12 = vmax.bf16 %v563_v59, %v291_v49  ;;  %v568_v61 = vmax.bf16 %v300_v41, %v296_v31  ;;  %v308_v41 = vld [vmem:[%s2162_s12 + $0x2dc] sm:$0xf] }
  0x7d   : > { %995 = vrot.lane.b32.xlu1 %v2522_v14, %s2136_s13  ;;  %v293_v14 = vld [vmem:[%s2162_s12 + $0x2a0] sm:$0xf]  ;;  %4278 = vst [vmem:[#allocation15_spill] sm:$0xff] %v2564_v1 }
  0x7e   : > { %993 = vrot.lane.b32.xlu0 %v2526_v15, %s2136_s13  ;;  %4277 = vst [vmem:[#allocation14_spill] sm:$0xff] %v2554_v12  ;;  %v565_v29 = vmax.bf16 %v297_v17, %v293_v14  ;;  %v301_v15 = vld [vmem:[%s2162_s12 + $0x2c0] sm:$0xf]  ;;  %v304_v14 = vld [vmem:[%s2162_s12 + $0x2cc] sm:$0xf] }
  0x7f   : > { %v310_v17 = vld [vmem:[%s2162_s12 + $0x2e4] sm:$0xf]  ;;  %v2578_v37 = vmax.bf16 %v568_v61, %v304_v14  ;;  %v307_v61 = vld [vmem:[%s2162_s12 + $0x2d8] sm:$0xf]  ;;  %v311_v14 = vld [vmem:[%s2162_s12 + $0x2e8] sm:$0xf] }
  0x80   : > { %v2568_v49 = vmax.bf16 %v565_v29, %v301_v15  ;;  %v570_v31 = vmax.bf16 %v310_v17, %v306_v3  ;;  %v316_v17 = vld [vmem:[%s2162_s12 + $0x2fc] sm:$0xf] }
  0x81   : > { %999 = vrot.lane.b32.xlu1 %v2536_v51, %s2136_s13  ;;  %v295_v51 = vld [vmem:[%s2162_s12 + $0x2a8] sm:$0xf]  ;;  %4280 = vst [vmem:[#allocation17_spill] sm:$0xff] %v2578_v37 }
  0x82   : > { %997 = vrot.lane.b32.xlu0 %v2540_v55, %s2136_s13  ;;  %4279 = vst [vmem:[#allocation16_spill] sm:$0xff] %v2568_v49  ;;  %v567_v59 = vmax.bf16 %v299_v57, %v295_v51  ;;  %v303_v55 = vld [vmem:[%s2162_s12 + $0x2c8] sm:$0xf]  ;;  %v314_v51 = vld [vmem:[%s2162_s12 + $0x2f4] sm:$0xf] }
  0x83   : > { %v312_v57 = vld [vmem:[%s2162_s12 + $0x2ec] sm:$0xf] }
  0x84   : > { %v2582_v15 = vmax.bf16 %v567_v59, %v303_v55  ;;  %v2596_v55 = vmax.bf16 %v570_v31, %v314_v51  ;;  %v572_v59 = vmax.bf16 %v312_v57, %v308_v41  ;;  %v317_v31 = vld [vmem:[%s2162_s12 + $0x300] sm:$0xf]  ;;  %v321_v51 = vld [vmem:[%s2162_s12 + $0x310] sm:$0xf] }
  0x85   : > { %1003 = vrot.lane.b32.xlu1 %v2550_v19, %s2136_s13  ;;  %v305_v19 = vld [vmem:[%s2162_s12 + $0x2d0] sm:$0xf] }
  0x86   : > { %1001 = vrot.lane.b32.xlu0 %v2554_v12, %s2136_s13  ;;  %4281 = vst [vmem:[#allocation18_spill] sm:$0xff] %v2582_v15  ;;  %v569_v29 = vmax.bf16 %v309_v30, %v305_v19  ;;  %4284 = vst [vmem:[#allocation21_spill] sm:$0xff] %v2596_v55  ;;  %v571_v30 = vmax.bf16 %v311_v14, %v307_v61  ;;  %v326_v61 = vld [vmem:[%s2162_s12 + $0x324] sm:$0xf]  ;;  %v573_v14 = vmax.bf16 %v321_v51, %v317_v31  ;;  %v328_v31 = vld [vmem:[%s2162_s12 + $0x32c] sm:$0xf] }
  0x89   : > { %1007 = vrot.lane.b32.xlu1 %v2564_v1, %s2136_s13  ;;  %v313_v1 = vld [vmem:[%s2162_s12 + $0x2f0] sm:$0xf] }
  0x8a   : > { %1005 = vrot.lane.b32.xlu0 %v2568_v49, %s2136_s13  ;;  %v2600_v19 = vmax.bf16 %v569_v29, %v313_v1  ;;  %v322_v49 = vld [vmem:[%s2162_s12 + $0x314] sm:$0xf]  ;;  %v2614_v1 = vmax.bf16 %v572_v59, %v316_v17  ;;  %v319_v59 = vld [vmem:[%s2162_s12 + $0x308] sm:$0xf] }
  0x8b   : > { %v2587_v12 = vpop.permute.xlu1 %897 }
  0x8c   : > { %4282 = vst [vmem:[#allocation19_spill] sm:$0xff] %v2587_v12  ;;  %v2592_v3 = vpop.permute.xlu0 %893  ;;  %4285 = vst [vmem:[#allocation22_spill] sm:$0xff] %v2600_v19  ;;  %v318_v12 = vld [vmem:[%s2162_s12 + $0x304] sm:$0xf] }
  0x8d   : > { %4283 = vst [vmem:[#allocation20_spill] sm:$0xff] %v2592_v3  ;;  %1011 = vrot.lane.b32.xlu1 %v2578_v37, %s2136_s13  ;;  %v315_v37 = vld [vmem:[%s2162_s12 + $0x2f8] sm:$0xf]  ;;  %4288 = vst [vmem:[#allocation25_spill] sm:$0xff] %v2614_v1  ;;  %v574_v29 = vmax.bf16 %v322_v49, %v318_v12 }
  0x8e   : > { %1009 = vrot.lane.b32.xlu0 %v2582_v15, %s2136_s13  ;;  %v2618_v57 = vmax.bf16 %v571_v30, %v315_v37  ;;  %v320_v15 = vld [vmem:[%s2162_s12 + $0x30c] sm:$0xf]  ;;  %v323_v12 = vld [vmem:[%s2162_s12 + $0x318] sm:$0xf] }
  0x8f   : > { %v2605_v3 = vpop.permute.xlu1 %899  ;;  %v2632_v37 = vmax.bf16 %v574_v29, %v326_v61  ;;  %v575_v51 = vmax.bf16 %v323_v12, %v319_v59  ;;  %v329_v29 = vld [vmem:[%s2162_s12 + $0x330] sm:$0xf]  ;;  %v338_v59 = vld [vmem:[%s2162_s12 + $0x354] sm:$0xf] }
  0x90   : > { %4286 = vst [vmem:[#allocation23_spill] sm:$0xff] %v2605_v3  ;;  %v2610_v41 = vpop.permute.xlu0 %895  ;;  %4289 = vst [vmem:[#allocation26_spill] sm:$0xff] %v2618_v57  ;;  %v324_v3 = vld [vmem:[%s2162_s12 + $0x31c] sm:$0xf] }
  0x91   : > { %4287 = vst [vmem:[#allocation24_spill] sm:$0xff] %v2610_v41  ;;  %1015 = vrot.lane.b32.xlu1 %v2596_v55, %s2136_s13  ;;  %v325_v55 = vld [vmem:[%s2162_s12 + $0x320] sm:$0xf]  ;;  %4292 = vst [vmem:[#allocation29_spill] sm:$0xff] %v2632_v37  ;;  %v576_v17 = vmax.bf16 %v324_v3, %v320_v15 }
  0x92   : > { %1013 = vrot.lane.b32.xlu0 %v2600_v19, %s2136_s13  ;;  %v2636_v30 = vmax.bf16 %v573_v14, %v325_v55  ;;  %v330_v19 = vld [vmem:[%s2162_s12 + $0x334] sm:$0xf]  ;;  %v333_v15 = vld [vmem:[%s2162_s12 + $0x340] sm:$0xf] }
  0x93   : > { %v2623_v41 = vpop.permute.xlu1 %903  ;;  %v2650_v55 = vmax.bf16 %v576_v17, %v328_v31  ;;  %v577_v12 = vmax.bf16 %v333_v15, %v329_v29  ;;  %v331_v17 = vld [vmem:[%s2162_s12 + $0x338] sm:$0xf]  ;;  %v340_v29 = vld [vmem:[%s2162_s12 + $0x35c] sm:$0xf] }
  0x94   : > { %4290 = vst [vmem:[#allocation27_spill] sm:$0xff] %v2623_v41  ;;  %v2628_v49 = vpop.permute.xlu0 %901  ;;  %4293 = vst [vmem:[#allocation30_spill] sm:$0xff] %v2636_v30  ;;  %v334_v41 = vld [vmem:[%s2162_s12 + $0x344] sm:$0xf] }
  0x95   : > { %4291 = vst [vmem:[#allocation28_spill] sm:$0xff] %v2628_v49  ;;  %1019 = vrot.lane.b32.xlu1 %v2614_v1, %s2136_s13  ;;  %v327_v1 = vld [vmem:[%s2162_s12 + $0x328] sm:$0xf]  ;;  %4296 = vst [vmem:[#allocation33_spill] sm:$0xff] %v2650_v55  ;;  %v578_v61 = vmax.bf16 %v334_v41, %v330_v19 }
  0x96   : > { %1017 = vrot.lane.b32.xlu0 %v2618_v57, %s2136_s13  ;;  %v2654_v14 = vmax.bf16 %v575_v51, %v327_v1  ;;  %v332_v57 = vld [vmem:[%s2162_s12 + $0x33c] sm:$0xf]  ;;  %v335_v19 = vld [vmem:[%s2162_s12 + $0x348] sm:$0xf] }
  0x97   : > { %v2641_v49 = vpop.permute.xlu1 %907  ;;  %v2668_v1 = vmax.bf16 %v578_v61, %v338_v59  ;;  %v579_v15 = vmax.bf16 %v335_v19, %v331_v17  ;;  %v341_v61 = vld [vmem:[%s2162_s12 + $0x360] sm:$0xf]  ;;  %v350_v17 = vld [vmem:[%s2162_s12 + $0x384] sm:$0xf] }
  0x98   : > { %4294 = vst [vmem:[#allocation31_spill] sm:$0xff] %v2641_v49  ;;  %v2646_v3 = vpop.permute.xlu0 %905  ;;  %4297 = vst [vmem:[#allocation34_spill] sm:$0xff] %v2654_v14  ;;  %v336_v49 = vld [vmem:[%s2162_s12 + $0x34c] sm:$0xf] }
  0x99   : > { %4295 = vst [vmem:[#allocation32_spill] sm:$0xff] %v2646_v3  ;;  %1023 = vrot.lane.b32.xlu1 %v2632_v37, %s2136_s13  ;;  %v337_v37 = vld [vmem:[%s2162_s12 + $0x350] sm:$0xf]  ;;  %4300 = vst [vmem:[#allocation37_spill] sm:$0xff] %v2668_v1  ;;  %v580_v31 = vmax.bf16 %v336_v49, %v332_v57 }
  0x9a   : > { %1021 = vrot.lane.b32.xlu0 %v2636_v30, %s2136_s13  ;;  %v2672_v51 = vmax.bf16 %v577_v12, %v337_v37  ;;  %v342_v30 = vld [vmem:[%s2162_s12 + $0x364] sm:$0xf]  ;;  %v345_v57 = vld [vmem:[%s2162_s12 + $0x370] sm:$0xf] }
  0x9b   : > { %v2659_v3 = vpop.permute.xlu1 %911  ;;  %v2686_v37 = vmax.bf16 %v580_v31, %v340_v29  ;;  %v581_v19 = vmax.bf16 %v345_v57, %v341_v61  ;;  %v343_v31 = vld [vmem:[%s2162_s12 + $0x368] sm:$0xf]  ;;  %v352_v61 = vld [vmem:[%s2162_s12 + $0x38c] sm:$0xf] }
  0x9c   : > { %4298 = vst [vmem:[#allocation35_spill] sm:$0xff] %v2659_v3  ;;  %v2664_v41 = vpop.permute.xlu0 %909  ;;  %4301 = vst [vmem:[#allocation38_spill] sm:$0xff] %v2672_v51  ;;  %v346_v3 = vld [vmem:[%s2162_s12 + $0x374] sm:$0xf] }
  0x9d   : > { %4299 = vst [vmem:[#allocation36_spill] sm:$0xff] %v2664_v41  ;;  %1027 = vrot.lane.b32.xlu1 %v2650_v55, %s2136_s13  ;;  %v339_v55 = vld [vmem:[%s2162_s12 + $0x358] sm:$0xf]  ;;  %4304 = vst [vmem:[#allocation41_spill] sm:$0xff] %v2686_v37  ;;  %v582_v59 = vmax.bf16 %v346_v3, %v342_v30 }
  0x9e   : > { %1025 = vrot.lane.b32.xlu0 %v2654_v14, %s2136_s13  ;;  %v2690_v12 = vmax.bf16 %v579_v15, %v339_v55  ;;  %v344_v14 = vld [vmem:[%s2162_s12 + $0x36c] sm:$0xf]  ;;  %v347_v30 = vld [vmem:[%s2162_s12 + $0x378] sm:$0xf] }
  0x9f   : > { %v2677_v41 = vpop.permute.xlu1 %915  ;;  %v2704_v55 = vmax.bf16 %v582_v59, %v350_v17  ;;  %v583_v57 = vmax.bf16 %v347_v30, %v343_v31  ;;  %v353_v59 = vld [vmem:[%s2162_s12 + $0x390] sm:$0xf]  ;;  %v362_v31 = vld [vmem:[%s2162_s12 + $0x3b4] sm:$0xf] }
  0xa0   : > { %4302 = vst [vmem:[#allocation39_spill] sm:$0xff] %v2677_v41  ;;  %v2682_v49 = vpop.permute.xlu0 %913  ;;  %4305 = vst [vmem:[#allocation42_spill] sm:$0xff] %v2690_v12  ;;  %v348_v41 = vld [vmem:[%s2162_s12 + $0x37c] sm:$0xf] }
  0xa1   : > { %4303 = vst [vmem:[#allocation40_spill] sm:$0xff] %v2682_v49  ;;  %1031 = vrot.lane.b32.xlu1 %v2668_v1, %s2136_s13  ;;  %v349_v1 = vld [vmem:[%s2162_s12 + $0x380] sm:$0xf]  ;;  %4308 = vst [vmem:[#allocation45_spill] sm:$0xff] %v2704_v55  ;;  %v584_v29 = vmax.bf16 %v348_v41, %v344_v14 }
  0xa2   : > { %1029 = vrot.lane.b32.xlu0 %v2672_v51, %s2136_s13  ;;  %v2708_v15 = vmax.bf16 %v581_v19, %v349_v1  ;;  %v354_v51 = vld [vmem:[%s2162_s12 + $0x394] sm:$0xf]  ;;  %v357_v14 = vld [vmem:[%s2162_s12 + $0x3a0] sm:$0xf] }
  0xa3   : > { %v2695_v49 = vpop.permute.xlu1 %919  ;;  %v2722_v1 = vmax.bf16 %v584_v29, %v352_v61  ;;  %v585_v30 = vmax.bf16 %v357_v14, %v353_v59  ;;  %v355_v29 = vld [vmem:[%s2162_s12 + $0x398] sm:$0xf]  ;;  %v364_v59 = vld [vmem:[%s2162_s12 + $0x3bc] sm:$0xf] }
  0xa4   : > { %4306 = vst [vmem:[#allocation43_spill] sm:$0xff] %v2695_v49  ;;  %v2700_v3 = vpop.permute.xlu0 %917  ;;  %4309 = vst [vmem:[#allocation46_spill] sm:$0xff] %v2708_v15  ;;  %v358_v49 = vld [vmem:[%s2162_s12 + $0x3a4] sm:$0xf] }
  0xa5   : > { %4307 = vst [vmem:[#allocation44_spill] sm:$0xff] %v2700_v3  ;;  %1035 = vrot.lane.b32.xlu1 %v2686_v37, %s2136_s13  ;;  %v351_v37 = vld [vmem:[%s2162_s12 + $0x388] sm:$0xf]  ;;  %4312 = vst [vmem:[#allocation49_spill] sm:$0xff] %v2722_v1  ;;  %v586_v17 = vmax.bf16 %v358_v49, %v354_v51 }
  0xa6   : > { %1033 = vrot.lane.b32.xlu0 %v2690_v12, %s2136_s13  ;;  %v2726_v19 = vmax.bf16 %v583_v57, %v351_v37  ;;  %v356_v12 = vld [vmem:[%s2162_s12 + $0x39c] sm:$0xf]  ;;  %v359_v51 = vld [vmem:[%s2162_s12 + $0x3a8] sm:$0xf] }
  0xa7   : > { %v2713_v3 = vpop.permute.xlu1 %923  ;;  %v2740_v37 = vmax.bf16 %v586_v17, %v362_v31  ;;  %v587_v14 = vmax.bf16 %v359_v51, %v355_v29  ;;  %v365_v17 = vld [vmem:[%s2162_s12 + $0x3c0] sm:$0xf]  ;;  %v374_v29 = vld [vmem:[%s2162_s12 + $0x3e4] sm:$0xf] }
  0xa8   : > { %4310 = vst [vmem:[#allocation47_spill] sm:$0xff] %v2713_v3  ;;  %v2718_v41 = vpop.permute.xlu0 %921  ;;  %4313 = vst [vmem:[#allocation50_spill] sm:$0xff] %v2726_v19  ;;  %v360_v3 = vld [vmem:[%s2162_s12 + $0x3ac] sm:$0xf] }
  0xa9   : > { %4311 = vst [vmem:[#allocation48_spill] sm:$0xff] %v2718_v41  ;;  %1039 = vrot.lane.b32.xlu1 %v2704_v55, %s2136_s13  ;;  %v361_v55 = vld [vmem:[%s2162_s12 + $0x3b0] sm:$0xf]  ;;  %4316 = vst [vmem:[#allocation53_spill] sm:$0xff] %v2740_v37  ;;  %v588_v61 = vmax.bf16 %v360_v3, %v356_v12 }
  0xaa   : > { %1037 = vrot.lane.b32.xlu0 %v2708_v15, %s2136_s13  ;;  %v2744_v57 = vmax.bf16 %v585_v30, %v361_v55  ;;  %v366_v15 = vld [vmem:[%s2162_s12 + $0x3c4] sm:$0xf]  ;;  %v369_v12 = vld [vmem:[%s2162_s12 + $0x3d0] sm:$0xf] }
  0xab   : > { %v2731_v41 = vpop.permute.xlu1 %927  ;;  %v2758_v55 = vmax.bf16 %v588_v61, %v364_v59  ;;  %v589_v51 = vmax.bf16 %v369_v12, %v365_v17  ;;  %v367_v61 = vld [vmem:[%s2162_s12 + $0x3c8] sm:$0xf]  ;;  %v376_v17 = vld [vmem:[%s2162_s12 + $0x3ec] sm:$0xf] }
  0xac   : > { %4314 = vst [vmem:[#allocation51_spill] sm:$0xff] %v2731_v41  ;;  %v2736_v49 = vpop.permute.xlu0 %925  ;;  %4317 = vst [vmem:[#allocation54_spill] sm:$0xff] %v2744_v57  ;;  %v370_v41 = vld [vmem:[%s2162_s12 + $0x3d4] sm:$0xf] }
  0xad   : > { %4315 = vst [vmem:[#allocation52_spill] sm:$0xff] %v2736_v49  ;;  %1043 = vrot.lane.b32.xlu1 %v2722_v1, %s2136_s13  ;;  %v363_v1 = vld [vmem:[%s2162_s12 + $0x3b8] sm:$0xf]  ;;  %4320 = vst [vmem:[#allocation57_spill] sm:$0xff] %v2758_v55  ;;  %v590_v31 = vmax.bf16 %v370_v41, %v366_v15 }
  0xae   : > { %1041 = vrot.lane.b32.xlu0 %v2726_v19, %s2136_s13  ;;  %v2762_v30 = vmax.bf16 %v587_v14, %v363_v1  ;;  %v368_v19 = vld [vmem:[%s2162_s12 + $0x3cc] sm:$0xf]  ;;  %v371_v15 = vld [vmem:[%s2162_s12 + $0x3d8] sm:$0xf] }
  0xaf   : > { %v2749_v49 = vpop.permute.xlu1 %931  ;;  %v2776_v1 = vmax.bf16 %v590_v31, %v374_v29  ;;  %v591_v12 = vmax.bf16 %v371_v15, %v367_v61  ;;  %v377_v31 = vld [vmem:[%s2162_s12 + $0x3f0] sm:$0xf]  ;;  %v386_v61 = vld [vmem:[%s2162_s12 + $0x414] sm:$0xf] }
  0xb0   : > { %4318 = vst [vmem:[#allocation55_spill] sm:$0xff] %v2749_v49  ;;  %v2754_v3 = vpop.permute.xlu0 %929  ;;  %4321 = vst [vmem:[#allocation58_spill] sm:$0xff] %v2762_v30  ;;  %v372_v49 = vld [vmem:[%s2162_s12 + $0x3dc] sm:$0xf] }
  0xb1   : > { %4319 = vst [vmem:[#allocation56_spill] sm:$0xff] %v2754_v3  ;;  %1047 = vrot.lane.b32.xlu1 %v2740_v37, %s2136_s13  ;;  %v373_v37 = vld [vmem:[%s2162_s12 + $0x3e0] sm:$0xf]  ;;  %4324 = vst [vmem:[#allocation61_spill] sm:$0xff] %v2776_v1  ;;  %v592_v59 = vmax.bf16 %v372_v49, %v368_v19 }
  0xb2   : > { %1045 = vrot.lane.b32.xlu0 %v2744_v57, %s2136_s13  ;;  %v2780_v14 = vmax.bf16 %v589_v51, %v373_v37  ;;  %v378_v57 = vld [vmem:[%s2162_s12 + $0x3f4] sm:$0xf]  ;;  %v381_v19 = vld [vmem:[%s2162_s12 + $0x400] sm:$0xf] }
  0xb3   : > { %v2767_v3 = vpop.permute.xlu1 %935  ;;  %v2794_v37 = vmax.bf16 %v592_v59, %v376_v17  ;;  %v593_v15 = vmax.bf16 %v381_v19, %v377_v31  ;;  %v379_v59 = vld [vmem:[%s2162_s12 + $0x3f8] sm:$0xf]  ;;  %v388_v31 = vld [vmem:[%s2162_s12 + $0x41c] sm:$0xf] }
  0xb4   : > { %4322 = vst [vmem:[#allocation59_spill] sm:$0xff] %v2767_v3  ;;  %v2772_v41 = vpop.permute.xlu0 %933  ;;  %4325 = vst [vmem:[#allocation62_spill] sm:$0xff] %v2780_v14  ;;  %v382_v3 = vld [vmem:[%s2162_s12 + $0x404] sm:$0xf] }
  0xb5   : > { %4323 = vst [vmem:[#allocation60_spill] sm:$0xff] %v2772_v41  ;;  %1051 = vrot.lane.b32.xlu1 %v2758_v55, %s2136_s13  ;;  %v375_v55 = vld [vmem:[%s2162_s12 + $0x3e8] sm:$0xf]  ;;  %4328 = vst [vmem:[#allocation65_spill] sm:$0xff] %v2794_v37  ;;  %v594_v29 = vmax.bf16 %v382_v3, %v378_v57 }
  0xb6   : > { %1049 = vrot.lane.b32.xlu0 %v2762_v30, %s2136_s13  ;;  %v2798_v51 = vmax.bf16 %v591_v12, %v375_v55  ;;  %v380_v30 = vld [vmem:[%s2162_s12 + $0x3fc] sm:$0xf]  ;;  %v383_v57 = vld [vmem:[%s2162_s12 + $0x408] sm:$0xf] }
  0xb7   : > { %v2785_v41 = vpop.permute.xlu1 %939  ;;  %v2812_v55 = vmax.bf16 %v594_v29, %v386_v61  ;;  %v595_v19 = vmax.bf16 %v383_v57, %v379_v59  ;;  %v389_v29 = vld [vmem:[%s2162_s12 + $0x420] sm:$0xf]  ;;  %v398_v59 = vld [vmem:[%s2162_s12 + $0x444] sm:$0xf] }
  0xb8   : > { %4326 = vst [vmem:[#allocation63_spill] sm:$0xff] %v2785_v41  ;;  %v2790_v49 = vpop.permute.xlu0 %937  ;;  %4329 = vst [vmem:[#allocation66_spill] sm:$0xff] %v2798_v51  ;;  %v384_v41 = vld [vmem:[%s2162_s12 + $0x40c] sm:$0xf] }
  0xb9   : > { %4327 = vst [vmem:[#allocation64_spill] sm:$0xff] %v2790_v49  ;;  %1055 = vrot.lane.b32.xlu1 %v2776_v1, %s2136_s13  ;;  %v385_v1 = vld [vmem:[%s2162_s12 + $0x410] sm:$0xf]  ;;  %4332 = vst [vmem:[#allocation69_spill] sm:$0xff] %v2812_v55  ;;  %v596_v17 = vmax.bf16 %v384_v41, %v380_v30 }
  0xba   : > { %1053 = vrot.lane.b32.xlu0 %v2780_v14, %s2136_s13  ;;  %v2816_v12 = vmax.bf16 %v593_v15, %v385_v1  ;;  %v390_v14 = vld [vmem:[%s2162_s12 + $0x424] sm:$0xf]  ;;  %v393_v30 = vld [vmem:[%s2162_s12 + $0x430] sm:$0xf] }
  0xbb   : > { %v2803_v49 = vpop.permute.xlu1 %943  ;;  %v2830_v1 = vmax.bf16 %v596_v17, %v388_v31  ;;  %v597_v57 = vmax.bf16 %v393_v30, %v389_v29  ;;  %v391_v17 = vld [vmem:[%s2162_s12 + $0x428] sm:$0xf]  ;;  %v400_v29 = vld [vmem:[%s2162_s12 + $0x44c] sm:$0xf] }
  0xbc   : > { %4330 = vst [vmem:[#allocation67_spill] sm:$0xff] %v2803_v49  ;;  %v2808_v3 = vpop.permute.xlu0 %941  ;;  %4333 = vst [vmem:[#allocation70_spill] sm:$0xff] %v2816_v12  ;;  %v394_v49 = vld [vmem:[%s2162_s12 + $0x434] sm:$0xf] }
  0xbd   : > { %4331 = vst [vmem:[#allocation68_spill] sm:$0xff] %v2808_v3  ;;  %1059 = vrot.lane.b32.xlu1 %v2794_v37, %s2136_s13  ;;  %v387_v37 = vld [vmem:[%s2162_s12 + $0x418] sm:$0xf]  ;;  %4336 = vst [vmem:[#allocation73_spill] sm:$0xff] %v2830_v1  ;;  %v598_v61 = vmax.bf16 %v394_v49, %v390_v14 }
  0xbe   : > { %1057 = vrot.lane.b32.xlu0 %v2798_v51, %s2136_s13  ;;  %v2834_v15 = vmax.bf16 %v595_v19, %v387_v37  ;;  %v392_v51 = vld [vmem:[%s2162_s12 + $0x42c] sm:$0xf]  ;;  %v395_v14 = vld [vmem:[%s2162_s12 + $0x438] sm:$0xf] }
  0xbf   : > { %v2821_v3 = vpop.permute.xlu1 %947  ;;  %v2848_v37 = vmax.bf16 %v598_v61, %v398_v59  ;;  %v599_v30 = vmax.bf16 %v395_v14, %v391_v17  ;;  %v401_v61 = vld [vmem:[%s2162_s12 + $0x450] sm:$0xf]  ;;  %v410_v17 = vld [vmem:[%s2162_s12 + $0x474] sm:$0xf] }
  0xc0   : > { %4334 = vst [vmem:[#allocation71_spill] sm:$0xff] %v2821_v3  ;;  %v2826_v41 = vpop.permute.xlu0 %945  ;;  %4337 = vst [vmem:[#allocation74_spill] sm:$0xff] %v2834_v15  ;;  %v396_v3 = vld [vmem:[%s2162_s12 + $0x43c] sm:$0xf] }
  0xc1   : > { %4335 = vst [vmem:[#allocation72_spill] sm:$0xff] %v2826_v41  ;;  %1063 = vrot.lane.b32.xlu1 %v2812_v55, %s2136_s13  ;;  %v397_v55 = vld [vmem:[%s2162_s12 + $0x440] sm:$0xf]  ;;  %4340 = vst [vmem:[#allocation77_spill] sm:$0xff] %v2848_v37  ;;  %v600_v31 = vmax.bf16 %v396_v3, %v392_v51 }
  0xc2   : > { %1061 = vrot.lane.b32.xlu0 %v2816_v12, %s2136_s13  ;;  %v2852_v19 = vmax.bf16 %v597_v57, %v397_v55  ;;  %v402_v12 = vld [vmem:[%s2162_s12 + $0x454] sm:$0xf]  ;;  %v405_v51 = vld [vmem:[%s2162_s12 + $0x460] sm:$0xf] }
  0xc3   : > { %v2839_v41 = vpop.permute.xlu1 %951  ;;  %v2866_v55 = vmax.bf16 %v600_v31, %v400_v29  ;;  %v601_v14 = vmax.bf16 %v405_v51, %v401_v61  ;;  %v403_v31 = vld [vmem:[%s2162_s12 + $0x458] sm:$0xf]  ;;  %v412_v61 = vld [vmem:[%s2162_s12 + $0x47c] sm:$0xf] }
  0xc4   : > { %4338 = vst [vmem:[#allocation75_spill] sm:$0xff] %v2839_v41  ;;  %v2844_v49 = vpop.permute.xlu0 %949  ;;  %4341 = vst [vmem:[#allocation78_spill] sm:$0xff] %v2852_v19  ;;  %v406_v41 = vld [vmem:[%s2162_s12 + $0x464] sm:$0xf] }
  0xc5   : > { %4339 = vst [vmem:[#allocation76_spill] sm:$0xff] %v2844_v49  ;;  %1067 = vrot.lane.b32.xlu1 %v2830_v1, %s2136_s13  ;;  %v399_v1 = vld [vmem:[%s2162_s12 + $0x448] sm:$0xf]  ;;  %4344 = vst [vmem:[#allocation81_spill] sm:$0xff] %v2866_v55  ;;  %v602_v59 = vmax.bf16 %v406_v41, %v402_v12 }
  0xc6   : > { %1065 = vrot.lane.b32.xlu0 %v2834_v15, %s2136_s13  ;;  %v2870_v57 = vmax.bf16 %v599_v30, %v399_v1  ;;  %v404_v15 = vld [vmem:[%s2162_s12 + $0x45c] sm:$0xf]  ;;  %v407_v12 = vld [vmem:[%s2162_s12 + $0x468] sm:$0xf] }
  0xc7   : > { %v2857_v49 = vpop.permute.xlu1 %955  ;;  %v2884_v1 = vmax.bf16 %v602_v59, %v410_v17  ;;  %v603_v51 = vmax.bf16 %v407_v12, %v403_v31  ;;  %v413_v59 = vld [vmem:[%s2162_s12 + $0x480] sm:$0xf]  ;;  %v422_v31 = vld [vmem:[%s2162_s12 + $0x4a4] sm:$0xf] }
  0xc8   : > { %4342 = vst [vmem:[#allocation79_spill] sm:$0xff] %v2857_v49  ;;  %v2862_v3 = vpop.permute.xlu0 %953  ;;  %4345 = vst [vmem:[#allocation82_spill] sm:$0xff] %v2870_v57  ;;  %v408_v49 = vld [vmem:[%s2162_s12 + $0x46c] sm:$0xf] }
  0xc9   : > { %4343 = vst [vmem:[#allocation80_spill] sm:$0xff] %v2862_v3  ;;  %1071 = vrot.lane.b32.xlu1 %v2848_v37, %s2136_s13  ;;  %v409_v37 = vld [vmem:[%s2162_s12 + $0x470] sm:$0xf]  ;;  %4348 = vst [vmem:[#allocation85_spill] sm:$0xff] %v2884_v1  ;;  %v604_v29 = vmax.bf16 %v408_v49, %v404_v15 }
  0xca   : > { %1069 = vrot.lane.b32.xlu0 %v2852_v19, %s2136_s13  ;;  %v2888_v30 = vmax.bf16 %v601_v14, %v409_v37  ;;  %v414_v19 = vld [vmem:[%s2162_s12 + $0x484] sm:$0xf]  ;;  %v417_v15 = vld [vmem:[%s2162_s12 + $0x490] sm:$0xf] }
  0xcb   : > { %v2875_v3 = vpop.permute.xlu1 %959  ;;  %v2902_v37 = vmax.bf16 %v604_v29, %v412_v61  ;;  %v605_v12 = vmax.bf16 %v417_v15, %v413_v59  ;;  %v415_v29 = vld [vmem:[%s2162_s12 + $0x488] sm:$0xf]  ;;  %v424_v59 = vld [vmem:[%s2162_s12 + $0x4ac] sm:$0xf] }
  0xcc   : > { %4346 = vst [vmem:[#allocation83_spill] sm:$0xff] %v2875_v3  ;;  %v2880_v41 = vpop.permute.xlu0 %957  ;;  %4349 = vst [vmem:[#allocation86_spill] sm:$0xff] %v2888_v30  ;;  %v418_v3 = vld [vmem:[%s2162_s12 + $0x494] sm:$0xf] }
  0xcd   : > { %4347 = vst [vmem:[#allocation84_spill] sm:$0xff] %v2880_v41  ;;  %1075 = vrot.lane.b32.xlu1 %v2866_v55, %s2136_s13  ;;  %v411_v55 = vld [vmem:[%s2162_s12 + $0x478] sm:$0xf]  ;;  %4352 = vst [vmem:[#allocation89_spill] sm:$0xff] %v2902_v37  ;;  %v606_v17 = vmax.bf16 %v418_v3, %v414_v19 }
  0xce   : > { %1073 = vrot.lane.b32.xlu0 %v2870_v57, %s2136_s13  ;;  %v2906_v14 = vmax.bf16 %v603_v51, %v411_v55  ;;  %v416_v57 = vld [vmem:[%s2162_s12 + $0x48c] sm:$0xf]  ;;  %v419_v19 = vld [vmem:[%s2162_s12 + $0x498] sm:$0xf] }
  0xcf   : > { %v2893_v41 = vpop.permute.xlu1 %963  ;;  %v2920_v55 = vmax.bf16 %v606_v17, %v422_v31  ;;  %v607_v15 = vmax.bf16 %v419_v19, %v415_v29  ;;  %v425_v17 = vld [vmem:[%s2162_s12 + $0x4b0] sm:$0xf]  ;;  %v434_v29 = vld [vmem:[%s2162_s12 + $0x4d4] sm:$0xf] }
  0xd0   : > { %4350 = vst [vmem:[#allocation87_spill] sm:$0xff] %v2893_v41  ;;  %v2898_v49 = vpop.permute.xlu0 %961  ;;  %4353 = vst [vmem:[#allocation90_spill] sm:$0xff] %v2906_v14  ;;  %v420_v41 = vld [vmem:[%s2162_s12 + $0x49c] sm:$0xf] }
  0xd1   : > { %4351 = vst [vmem:[#allocation88_spill] sm:$0xff] %v2898_v49  ;;  %1079 = vrot.lane.b32.xlu1 %v2884_v1, %s2136_s13  ;;  %v421_v1 = vld [vmem:[%s2162_s12 + $0x4a0] sm:$0xf]  ;;  %4356 = vst [vmem:[#allocation93_spill] sm:$0xff] %v2920_v55  ;;  %v608_v61 = vmax.bf16 %v420_v41, %v416_v57 }
  0xd2   : > { %1077 = vrot.lane.b32.xlu0 %v2888_v30, %s2136_s13  ;;  %v2924_v51 = vmax.bf16 %v605_v12, %v421_v1  ;;  %v426_v30 = vld [vmem:[%s2162_s12 + $0x4b4] sm:$0xf]  ;;  %v429_v57 = vld [vmem:[%s2162_s12 + $0x4c0] sm:$0xf] }
  0xd3   : > { %v2911_v49 = vpop.permute.xlu1 %967  ;;  %v2938_v1 = vmax.bf16 %v608_v61, %v424_v59  ;;  %v609_v19 = vmax.bf16 %v429_v57, %v425_v17  ;;  %v427_v61 = vld [vmem:[%s2162_s12 + $0x4b8] sm:$0xf]  ;;  %v436_v17 = vld [vmem:[%s2162_s12 + $0x4dc] sm:$0xf] }
  0xd4   : > { %4354 = vst [vmem:[#allocation91_spill] sm:$0xff] %v2911_v49  ;;  %v2916_v3 = vpop.permute.xlu0 %965  ;;  %4357 = vst [vmem:[#allocation94_spill] sm:$0xff] %v2924_v51  ;;  %v430_v49 = vld [vmem:[%s2162_s12 + $0x4c4] sm:$0xf] }
  0xd5   : > { %4355 = vst [vmem:[#allocation92_spill] sm:$0xff] %v2916_v3  ;;  %1083 = vrot.lane.b32.xlu1 %v2902_v37, %s2136_s13  ;;  %v423_v37 = vld [vmem:[%s2162_s12 + $0x4a8] sm:$0xf]  ;;  %4360 = vst [vmem:[#allocation97_spill] sm:$0xff] %v2938_v1  ;;  %v610_v31 = vmax.bf16 %v430_v49, %v426_v30 }
  0xd6   : > { %1081 = vrot.lane.b32.xlu0 %v2906_v14, %s2136_s13  ;;  %v2942_v12 = vmax.bf16 %v607_v15, %v423_v37  ;;  %v428_v14 = vld [vmem:[%s2162_s12 + $0x4bc] sm:$0xf]  ;;  %v431_v30 = vld [vmem:[%s2162_s12 + $0x4c8] sm:$0xf] }
  0xd7   : > { %v2929_v3 = vpop.permute.xlu1 %971  ;;  %v2956_v37 = vmax.bf16 %v610_v31, %v434_v29  ;;  %v611_v57 = vmax.bf16 %v431_v30, %v427_v61  ;;  %v437_v31 = vld [vmem:[%s2162_s12 + $0x4e0] sm:$0xf]  ;;  %v446_v61 = vld [vmem:[%s2162_s12 + $0x504] sm:$0xf] }
  0xd8   : > { %4358 = vst [vmem:[#allocation95_spill] sm:$0xff] %v2929_v3  ;;  %v2934_v41 = vpop.permute.xlu0 %969  ;;  %4361 = vst [vmem:[#allocation98_spill] sm:$0xff] %v2942_v12  ;;  %v432_v3 = vld [vmem:[%s2162_s12 + $0x4cc] sm:$0xf] }
  0xd9   : > { %4359 = vst [vmem:[#allocation96_spill] sm:$0xff] %v2934_v41  ;;  %1087 = vrot.lane.b32.xlu1 %v2920_v55, %s2136_s13  ;;  %v433_v55 = vld [vmem:[%s2162_s12 + $0x4d0] sm:$0xf]  ;;  %4364 = vst [vmem:[#allocation101_spill] sm:$0xff] %v2956_v37  ;;  %v612_v59 = vmax.bf16 %v432_v3, %v428_v14 }
  0xda   : > { %1085 = vrot.lane.b32.xlu0 %v2924_v51, %s2136_s13  ;;  %v2960_v15 = vmax.bf16 %v609_v19, %v433_v55  ;;  %v438_v51 = vld [vmem:[%s2162_s12 + $0x4e4] sm:$0xf]  ;;  %v441_v14 = vld [vmem:[%s2162_s12 + $0x4f0] sm:$0xf] }
  0xdb   : > { %v2947_v41 = vpop.permute.xlu1 %975  ;;  %v2974_v55 = vmax.bf16 %v612_v59, %v436_v17  ;;  %v613_v30 = vmax.bf16 %v441_v14, %v437_v31  ;;  %v439_v59 = vld [vmem:[%s2162_s12 + $0x4e8] sm:$0xf]  ;;  %v448_v31 = vld [vmem:[%s2162_s12 + $0x50c] sm:$0xf] }
  0xdc   : > { %4362 = vst [vmem:[#allocation99_spill] sm:$0xff] %v2947_v41  ;;  %v2952_v49 = vpop.permute.xlu0 %973  ;;  %4365 = vst [vmem:[#allocation102_spill] sm:$0xff] %v2960_v15  ;;  %v442_v41 = vld [vmem:[%s2162_s12 + $0x4f4] sm:$0xf] }
  0xdd   : > { %4363 = vst [vmem:[#allocation100_spill] sm:$0xff] %v2952_v49  ;;  %1091 = vrot.lane.b32.xlu1 %v2938_v1, %s2136_s13  ;;  %v435_v1 = vld [vmem:[%s2162_s12 + $0x4d8] sm:$0xf]  ;;  %4368 = vst [vmem:[#allocation105_spill] sm:$0xff] %v2974_v55  ;;  %v614_v29 = vmax.bf16 %v442_v41, %v438_v51 }
  0xde   : > { %1089 = vrot.lane.b32.xlu0 %v2942_v12, %s2136_s13  ;;  %v2978_v19 = vmax.bf16 %v611_v57, %v435_v1  ;;  %v440_v12 = vld [vmem:[%s2162_s12 + $0x4ec] sm:$0xf]  ;;  %v443_v51 = vld [vmem:[%s2162_s12 + $0x4f8] sm:$0xf] }
  0xdf   : > { %v2965_v49 = vpop.permute.xlu1 %979  ;;  %v2992_v1 = vmax.bf16 %v614_v29, %v446_v61  ;;  %v615_v14 = vmax.bf16 %v443_v51, %v439_v59  ;;  %v449_v29 = vld [vmem:[%s2162_s12 + $0x510] sm:$0xf]  ;;  %v458_v59 = vld [vmem:[%s2162_s12 + $0x534] sm:$0xf] }
  0xe0   : > { %4366 = vst [vmem:[#allocation103_spill] sm:$0xff] %v2965_v49  ;;  %v2970_v3 = vpop.permute.xlu0 %977  ;;  %4369 = vst [vmem:[#allocation106_spill] sm:$0xff] %v2978_v19  ;;  %v444_v49 = vld [vmem:[%s2162_s12 + $0x4fc] sm:$0xf] }
  0xe1   : > { %4367 = vst [vmem:[#allocation104_spill] sm:$0xff] %v2970_v3  ;;  %1095 = vrot.lane.b32.xlu1 %v2956_v37, %s2136_s13  ;;  %v445_v37 = vld [vmem:[%s2162_s12 + $0x500] sm:$0xf]  ;;  %4372 = vst [vmem:[#allocation109_spill] sm:$0xff] %v2992_v1  ;;  %v616_v17 = vmax.bf16 %v444_v49, %v440_v12 }
  0xe2   : > { %1093 = vrot.lane.b32.xlu0 %v2960_v15, %s2136_s13  ;;  %v2996_v57 = vmax.bf16 %v613_v30, %v445_v37  ;;  %v450_v15 = vld [vmem:[%s2162_s12 + $0x514] sm:$0xf]  ;;  %v453_v12 = vld [vmem:[%s2162_s12 + $0x520] sm:$0xf] }
  0xe3   : > { %v2983_v3 = vpop.permute.xlu1 %983  ;;  %v3010_v37 = vmax.bf16 %v616_v17, %v448_v31  ;;  %v617_v51 = vmax.bf16 %v453_v12, %v449_v29  ;;  %v451_v17 = vld [vmem:[%s2162_s12 + $0x518] sm:$0xf]  ;;  %v460_v29 = vld [vmem:[%s2162_s12 + $0x53c] sm:$0xf] }
  0xe4   : > { %4370 = vst [vmem:[#allocation107_spill] sm:$0xff] %v2983_v3  ;;  %v2988_v41 = vpop.permute.xlu0 %981  ;;  %4373 = vst [vmem:[#allocation110_spill] sm:$0xff] %v2996_v57  ;;  %v454_v3 = vld [vmem:[%s2162_s12 + $0x524] sm:$0xf] }
  0xe5   : > { %4371 = vst [vmem:[#allocation108_spill] sm:$0xff] %v2988_v41  ;;  %1099 = vrot.lane.b32.xlu1 %v2974_v55, %s2136_s13  ;;  %v447_v55 = vld [vmem:[%s2162_s12 + $0x508] sm:$0xf]  ;;  %4376 = vst [vmem:[#allocation113_spill] sm:$0xff] %v3010_v37  ;;  %v618_v61 = vmax.bf16 %v454_v3, %v450_v15 }
  0xe6   : > { %1097 = vrot.lane.b32.xlu0 %v2978_v19, %s2136_s13  ;;  %v3014_v30 = vmax.bf16 %v615_v14, %v447_v55  ;;  %v452_v19 = vld [vmem:[%s2162_s12 + $0x51c] sm:$0xf]  ;;  %v455_v15 = vld [vmem:[%s2162_s12 + $0x528] sm:$0xf] }
  0xe7   : > { %v3001_v41 = vpop.permute.xlu1 %987  ;;  %v3028_v55 = vmax.bf16 %v618_v61, %v458_v59  ;;  %v619_v12 = vmax.bf16 %v455_v15, %v451_v17  ;;  %v461_v61 = vld [vmem:[%s2162_s12 + $0x540] sm:$0xf]  ;;  %v470_v17 = vld [vmem:[%s2162_s12 + $0x564] sm:$0xf] }
  0xe8   : > { %4374 = vst [vmem:[#allocation111_spill] sm:$0xff] %v3001_v41  ;;  %v3006_v49 = vpop.permute.xlu0 %985  ;;  %4377 = vst [vmem:[#allocation114_spill] sm:$0xff] %v3014_v30  ;;  %v456_v41 = vld [vmem:[%s2162_s12 + $0x52c] sm:$0xf] }
  0xe9   : > { %4375 = vst [vmem:[#allocation112_spill] sm:$0xff] %v3006_v49  ;;  %1103 = vrot.lane.b32.xlu1 %v2992_v1, %s2136_s13  ;;  %v457_v1 = vld [vmem:[%s2162_s12 + $0x530] sm:$0xf]  ;;  %4380 = vst [vmem:[#allocation117_spill] sm:$0xff] %v3028_v55  ;;  %v620_v31 = vmax.bf16 %v456_v41, %v452_v19 }
  0xea   : > { %1101 = vrot.lane.b32.xlu0 %v2996_v57, %s2136_s13  ;;  %v3032_v14 = vmax.bf16 %v617_v51, %v457_v1  ;;  %v462_v57 = vld [vmem:[%s2162_s12 + $0x544] sm:$0xf]  ;;  %v465_v19 = vld [vmem:[%s2162_s12 + $0x550] sm:$0xf] }
  0xeb   : > { %v3019_v49 = vpop.permute.xlu1 %991  ;;  %v3046_v1 = vmax.bf16 %v620_v31, %v460_v29  ;;  %v621_v15 = vmax.bf16 %v465_v19, %v461_v61  ;;  %v463_v31 = vld [vmem:[%s2162_s12 + $0x548] sm:$0xf]  ;;  %v472_v61 = vld [vmem:[%s2162_s12 + $0x56c] sm:$0xf] }
  0xec   : > { %4378 = vst [vmem:[#allocation115_spill] sm:$0xff] %v3019_v49  ;;  %v3024_v3 = vpop.permute.xlu0 %989  ;;  %4381 = vst [vmem:[#allocation118_spill] sm:$0xff] %v3032_v14  ;;  %v466_v49 = vld [vmem:[%s2162_s12 + $0x554] sm:$0xf] }
  0xed   : > { %4379 = vst [vmem:[#allocation116_spill] sm:$0xff] %v3024_v3  ;;  %1107 = vrot.lane.b32.xlu1 %v3010_v37, %s2136_s13  ;;  %v459_v37 = vld [vmem:[%s2162_s12 + $0x538] sm:$0xf]  ;;  %4384 = vst [vmem:[#allocation121_spill] sm:$0xff] %v3046_v1  ;;  %v622_v59 = vmax.bf16 %v466_v49, %v462_v57 }
  0xee   : > { %1105 = vrot.lane.b32.xlu0 %v3014_v30, %s2136_s13  ;;  %v3050_v51 = vmax.bf16 %v619_v12, %v459_v37  ;;  %v464_v30 = vld [vmem:[%s2162_s12 + $0x54c] sm:$0xf]  ;;  %v467_v57 = vld [vmem:[%s2162_s12 + $0x558] sm:$0xf] }
  0xef   : > { %v3037_v3 = vpop.permute.xlu1 %995  ;;  %v3064_v37 = vmax.bf16 %v622_v59, %v470_v17  ;;  %v623_v19 = vmax.bf16 %v467_v57, %v463_v31  ;;  %v473_v59 = vld [vmem:[%s2162_s12 + $0x570] sm:$0xf]  ;;  %v482_v31 = vld [vmem:[%s2162_s12 + $0x594] sm:$0xf] }
  0xf0   : > { %4382 = vst [vmem:[#allocation119_spill] sm:$0xff] %v3037_v3  ;;  %v3042_v41 = vpop.permute.xlu0 %993  ;;  %4385 = vst [vmem:[#allocation122_spill] sm:$0xff] %v3050_v51  ;;  %v468_v3 = vld [vmem:[%s2162_s12 + $0x55c] sm:$0xf] }
  0xf1   : > { %4383 = vst [vmem:[#allocation120_spill] sm:$0xff] %v3042_v41  ;;  %1111 = vrot.lane.b32.xlu1 %v3028_v55, %s2136_s13  ;;  %v469_v55 = vld [vmem:[%s2162_s12 + $0x560] sm:$0xf]  ;;  %4388 = vst [vmem:[#allocation125_spill] sm:$0xff] %v3064_v37  ;;  %v624_v29 = vmax.bf16 %v468_v3, %v464_v30 }
  0xf2   : > { %1109 = vrot.lane.b32.xlu0 %v3032_v14, %s2136_s13  ;;  %v3068_v12 = vmax.bf16 %v621_v15, %v469_v55  ;;  %v474_v14 = vld [vmem:[%s2162_s12 + $0x574] sm:$0xf]  ;;  %v477_v30 = vld [vmem:[%s2162_s12 + $0x580] sm:$0xf] }
  0xf3   : > { %v3055_v41 = vpop.permute.xlu1 %999  ;;  %v3082_v55 = vmax.bf16 %v624_v29, %v472_v61  ;;  %v625_v57 = vmax.bf16 %v477_v30, %v473_v59  ;;  %v475_v29 = vld [vmem:[%s2162_s12 + $0x578] sm:$0xf]  ;;  %v484_v59 = vld [vmem:[%s2162_s12 + $0x59c] sm:$0xf] }
  0xf4   : > { %4386 = vst [vmem:[#allocation123_spill] sm:$0xff] %v3055_v41  ;;  %v3060_v49 = vpop.permute.xlu0 %997  ;;  %4389 = vst [vmem:[#allocation126_spill] sm:$0xff] %v3068_v12  ;;  %v478_v41 = vld [vmem:[%s2162_s12 + $0x584] sm:$0xf] }
  0xf5   : > { %4387 = vst [vmem:[#allocation124_spill] sm:$0xff] %v3060_v49  ;;  %1115 = vrot.lane.b32.xlu1 %v3046_v1, %s2136_s13  ;;  %v471_v1 = vld [vmem:[%s2162_s12 + $0x568] sm:$0xf]  ;;  %4392 = vst [vmem:[#allocation129_spill] sm:$0xff] %v3082_v55  ;;  %v626_v17 = vmax.bf16 %v478_v41, %v474_v14 }
  0xf6   : > { %1113 = vrot.lane.b32.xlu0 %v3050_v51, %s2136_s13  ;;  %v3086_v15 = vmax.bf16 %v623_v19, %v471_v1  ;;  %v476_v51 = vld [vmem:[%s2162_s12 + $0x57c] sm:$0xf]  ;;  %v479_v14 = vld [vmem:[%s2162_s12 + $0x588] sm:$0xf] }
  0xf7   : > { %v3073_v49 = vpop.permute.xlu1 %1003  ;;  %v3100_v1 = vmax.bf16 %v626_v17, %v482_v31  ;;  %v627_v30 = vmax.bf16 %v479_v14, %v475_v29  ;;  %v485_v17 = vld [vmem:[%s2162_s12 + $0x5a0] sm:$0xf]  ;;  %v494_v29 = vld [vmem:[%s2162_s12 + $0x5c4] sm:$0xf] }
  0xf8   : > { %4390 = vst [vmem:[#allocation127_spill] sm:$0xff] %v3073_v49  ;;  %v3078_v3 = vpop.permute.xlu0 %1001  ;;  %4393 = vst [vmem:[#allocation130_spill] sm:$0xff] %v3086_v15  ;;  %v480_v49 = vld [vmem:[%s2162_s12 + $0x58c] sm:$0xf] }
  0xf9   : > { %4391 = vst [vmem:[#allocation128_spill] sm:$0xff] %v3078_v3  ;;  %1119 = vrot.lane.b32.xlu1 %v3064_v37, %s2136_s13  ;;  %v481_v37 = vld [vmem:[%s2162_s12 + $0x590] sm:$0xf]  ;;  %4396 = vst [vmem:[#allocation133_spill] sm:$0xff] %v3100_v1  ;;  %v628_v61 = vmax.bf16 %v480_v49, %v476_v51 }
  0xfa   : > { %1117 = vrot.lane.b32.xlu0 %v3068_v12, %s2136_s13  ;;  %v3104_v19 = vmax.bf16 %v625_v57, %v481_v37  ;;  %v486_v12 = vld [vmem:[%s2162_s12 + $0x5a4] sm:$0xf]  ;;  %v489_v51 = vld [vmem:[%s2162_s12 + $0x5b0] sm:$0xf] }
  0xfb   : > { %v3091_v3 = vpop.permute.xlu1 %1007  ;;  %v3118_v37 = vmax.bf16 %v628_v61, %v484_v59  ;;  %v629_v14 = vmax.bf16 %v489_v51, %v485_v17  ;;  %v487_v61 = vld [vmem:[%s2162_s12 + $0x5a8] sm:$0xf]  ;;  %v496_v17 = vld [vmem:[%s2162_s12 + $0x5cc] sm:$0xf] }
  0xfc   : > { %4394 = vst [vmem:[#allocation131_spill] sm:$0xff] %v3091_v3  ;;  %v3096_v41 = vpop.permute.xlu0 %1005  ;;  %4397 = vst [vmem:[#allocation134_spill] sm:$0xff] %v3104_v19  ;;  %v490_v3 = vld [vmem:[%s2162_s12 + $0x5b4] sm:$0xf] }
  0xfd   : > { %4395 = vst [vmem:[#allocation132_spill] sm:$0xff] %v3096_v41  ;;  %1123 = vrot.lane.b32.xlu1 %v3082_v55, %s2136_s13  ;;  %v483_v55 = vld [vmem:[%s2162_s12 + $0x598] sm:$0xf]  ;;  %4400 = vst [vmem:[#allocation137_spill] sm:$0xff] %v3118_v37  ;;  %v630_v31 = vmax.bf16 %v490_v3, %v486_v12 }
  0xfe   : > { %1121 = vrot.lane.b32.xlu0 %v3086_v15, %s2136_s13  ;;  %v3122_v57 = vmax.bf16 %v627_v30, %v483_v55  ;;  %v488_v15 = vld [vmem:[%s2162_s12 + $0x5ac] sm:$0xf]  ;;  %v491_v12 = vld [vmem:[%s2162_s12 + $0x5b8] sm:$0xf] }
  0xff   : > { %v3109_v41 = vpop.permute.xlu1 %1011  ;;  %v3136_v55 = vmax.bf16 %v630_v31, %v494_v29  ;;  %v631_v51 = vmax.bf16 %v491_v12, %v487_v61  ;;  %v497_v31 = vld [vmem:[%s2162_s12 + $0x5d0] sm:$0xf]  ;;  %v506_v61 = vld [vmem:[%s2162_s12 + $0x5f4] sm:$0xf] }
 0x100   : > { %4398 = vst [vmem:[#allocation135_spill] sm:$0xff] %v3109_v41  ;;  %v3114_v49 = vpop.permute.xlu0 %1009  ;;  %4401 = vst [vmem:[#allocation138_spill] sm:$0xff] %v3122_v57  ;;  %v492_v41 = vld [vmem:[%s2162_s12 + $0x5bc] sm:$0xf] }
 0x101   : > { %4399 = vst [vmem:[#allocation136_spill] sm:$0xff] %v3114_v49  ;;  %1127 = vrot.lane.b32.xlu1 %v3100_v1, %s2136_s13  ;;  %v493_v1 = vld [vmem:[%s2162_s12 + $0x5c0] sm:$0xf]  ;;  %4404 = vst [vmem:[#allocation141_spill] sm:$0xff] %v3136_v55  ;;  %v632_v59 = vmax.bf16 %v492_v41, %v488_v15 }
 0x102   : > { %1125 = vrot.lane.b32.xlu0 %v3104_v19, %s2136_s13  ;;  %v3140_v30 = vmax.bf16 %v629_v14, %v493_v1  ;;  %v498_v19 = vld [vmem:[%s2162_s12 + $0x5d4] sm:$0xf]  ;;  %v501_v15 = vld [vmem:[%s2162_s12 + $0x5e0] sm:$0xf] }
 0x103   : > { %v3127_v49 = vpop.permute.xlu1 %1015  ;;  %v3154_v1 = vmax.bf16 %v632_v59, %v496_v17  ;;  %v633_v12 = vmax.bf16 %v501_v15, %v497_v31  ;;  %v508_v59 = vld [vmem:[%s2162_s12 + $0x5fc] sm:$0xf]  ;;  %v635_v17 = vmax.bf16 %v503_v13, %v499_v35  ;;  %v507_v31 = vld [vmem:[%s2162_s12 + $0x5f8] sm:$0xf] }
 0x104   : > { %4402 = vst [vmem:[#allocation139_spill] sm:$0xff] %v3127_v49  ;;  %v3132_v3 = vpop.permute.xlu0 %1013  ;;  %4405 = vst [vmem:[#allocation142_spill] sm:$0xff] %v3140_v30  ;;  %v502_v49 = vld [vmem:[%s2162_s12 + $0x5e4] sm:$0xf] }
 0x105   : > { %4403 = vst [vmem:[#allocation140_spill] sm:$0xff] %v3132_v3  ;;  %1131 = vrot.lane.b32.xlu1 %v3118_v37, %s2136_s13  ;;  %v495_v37 = vld [vmem:[%s2162_s12 + $0x5c8] sm:$0xf]  ;;  %4408 = vst [vmem:[#allocation145_spill] sm:$0xff] %v3154_v1  ;;  %v634_v29 = vmax.bf16 %v502_v49, %v498_v19 }
 0x106   : > { %1129 = vrot.lane.b32.xlu0 %v3122_v57, %s2136_s13  ;;  %v3158_v14 = vmax.bf16 %v631_v51, %v495_v37  ;;  %v500_v57 = vld [vmem:[%s2162_s12 + $0x5dc] sm:$0xf] }
 0x107   : > { %v3145_v3 = vpop.permute.xlu1 %1019  ;;  %v3172_v19 = vmax.bf16 %v634_v29, %v506_v61 }
 0x108   : > { %4406 = vst [vmem:[#allocation143_spill] sm:$0xff] %v3145_v3  ;;  %v3150_v41 = vpop.permute.xlu0 %1017  ;;  %4409 = vst [vmem:[#allocation146_spill] sm:$0xff] %v3158_v14  ;;  %v504_v3 = vld [vmem:[%s2162_s12 + $0x5ec] sm:$0xf] }
 0x109   : > { %4407 = vst [vmem:[#allocation144_spill] sm:$0xff] %v3150_v41  ;;  %1135 = vrot.lane.b32.xlu1 %v3136_v55, %s2136_s13  ;;  %v505_v41 = vld [vmem:[%s2162_s12 + $0x5f0] sm:$0xf]  ;;  %4412 = vst [vmem:[#allocation149_spill] sm:$0xff] %v3172_v19  ;;  %v636_v49 = vmax.bf16 %v504_v3, %v500_v57  ;;  %v3190_v57 = vmax.bf16 %v635_v17, %v507_v31 }
 0x10a   : > { %1133 = vrot.lane.b32.xlu0 %v3140_v30, %s2136_s13  ;;  %v3176_v37 = vmax.bf16 %v633_v12, %v505_v41 }
 0x10b   : > { %v3163_v39 = vpop.permute.xlu1 %1023  ;;  %4417 = vst [vmem:[#allocation154_spill] sm:$0xff] %v3190_v57 }
 0x10c   : > { %4410 = vst [vmem:[#allocation147_spill] sm:$0xff] %v3163_v39  ;;  %v3168_v55 = vpop.permute.xlu0 %1021  ;;  %4413 = vst [vmem:[#allocation150_spill] sm:$0xff] %v3176_v37 }
 0x10d   : > { %4411 = vst [vmem:[#allocation148_spill] sm:$0xff] %v3168_v55  ;;  %1139 = vrot.lane.b32.xlu1 %v3154_v1, %s2136_s13  ;;  %v3186_v55 = vmax.bf16 %v636_v49, %v508_v59  ;;  %v4492_v1 = vld [vmem:[#allocation24_spill] sm:$0xff] }
 0x10e   : > { %1137 = vrot.lane.b32.xlu0 %v3158_v14, %s2136_s13  ;;  %v4488_v14 = vld [vmem:[#allocation14_spill] sm:$0xff]  ;;  %v1278_v30 = vmax.bf16 %v4492_v1, %v2190_v24  ;;  %v4496_v1 = vld [vmem:[#allocation23_spill] sm:$0xff] }
 0x10f   : > { %v3179_v51 = vpop.permute.xlu1 %1027  ;;  %4416 = vst [vmem:[#allocation153_spill] sm:$0xff] %v3186_v55 }
 0x110   : > { %4414 = vst [vmem:[#allocation151_spill] sm:$0xff] %v3179_v51  ;;  %v3182_v15 = vpop.permute.xlu0 %1025 }
 0x111   : > { %4415 = vst [vmem:[#allocation152_spill] sm:$0xff] %v3182_v15  ;;  %1143 = vrot.lane.b32.xlu1 %v3172_v19, %s2136_s13  ;;  %v4484_v19 = vld [vmem:[#allocation12_spill] sm:$0xff] }
 0x112   : > { %1141 = vrot.lane.b32.xlu0 %v3176_v37, %s2136_s13  ;;  %v4480_v37 = vld [vmem:[#allocation10_spill] sm:$0xff] }
 0x113   : > { %v3192_v3 = vpop.permute.xlu1 %1031 }
 0x114   : > { %4418 = vst [vmem:[#allocation155_spill] sm:$0xff] %v3192_v3  ;;  %v3194_v41 = vpop.permute.xlu0 %1029  ;;  %v4483_v3 = vld [vmem:[#allocation11_spill] sm:$0xff] }
 0x115   : > { %4419 = vst [vmem:[#allocation156_spill] sm:$0xff] %v3194_v41  ;;  %1147 = vrot.lane.b32.xlu1 %v3186_v55, %s2136_s13  ;;  %v4476_v55 = vld [vmem:[#allocation8_spill] sm:$0xff]  ;;  %v4479_v41 = vld [vmem:[#allocation9_spill] sm:$0xff] }
 0x116   : > { %1145 = vrot.lane.b32.xlu0 %v3190_v57, %s2136_s13  ;;  %v4472_v57 = vld [vmem:[#allocation6_spill] sm:$0xff] }
 0x117   : > { %v3200_v13 = vpop.permute.xlu1 %1035 }
 0x118   : > { %4420 = vst [vmem:[#allocation157_spill] sm:$0xff] %v3200_v13  ;;  %v3202_v35 = vpop.permute.xlu0 %1033 }
 0x119   : > { %4421 = vst [vmem:[#allocation158_spill] sm:$0xff] %v3202_v35  ;;  %1407 = vrot.lane.b32.xlu1 %v2190_v24, %s2137_s14  ;;  %v4495_v24 = vld [vmem:[#allocation17_spill] sm:$0xff] }
 0x11a   : > { %1405 = vrot.lane.b32.xlu0 %v2178_v16, %s2137_s14 }
 0x11b   : > { %v3208_v29 = vpop.permute.xlu1 %1039 }
 0x11c   : > { %4422 = vst [vmem:[#allocation159_spill] sm:$0xff] %v3208_v29  ;;  %v3210_v61 = vpop.permute.xlu0 %1037  ;;  %v4468_v29 = vld [vmem:[#allocation4_spill] sm:$0xff] }
 0x11d   : > { %4423 = vst [vmem:[#allocation160_spill] sm:$0xff] %v3210_v61  ;;  %1411 = vrot.lane.b32.xlu1 %v2184_v20, %s2137_s14 }
 0x11e   : > { %1409 = vrot.lane.b32.xlu0 %v2173_v11, %s2137_s14 }
 0x11f   : > { %v3216_v12 = vpop.permute.xlu1 %1043 }
 0x120   : > { %4424 = vst [vmem:[#allocation161_spill] sm:$0xff] %v3216_v12  ;;  %v3218_v49 = vpop.permute.xlu0 %1041 }
 0x121   : > { %4425 = vst [vmem:[#allocation162_spill] sm:$0xff] %v3218_v49  ;;  %1415 = vrot.lane.b32.xlu1 %v2200_v32, %s2137_s14 }
 0x122   : > { %1413 = vrot.lane.b32.xlu0 %v2204_v34, %s2137_s14 }
 0x123   : > { %v3224_v59 = vpop.permute.xlu1 %1047 }
 0x124   : > { %4426 = vst [vmem:[#allocation163_spill] sm:$0xff] %v3224_v59  ;;  %v3226_v17 = vpop.permute.xlu0 %1045 }
 0x125   : > { %4427 = vst [vmem:[#allocation164_spill] sm:$0xff] %v3226_v17  ;;  %1419 = vrot.lane.b32.xlu1 %v2214_v42, %s2137_s14 }
 0x126   : > { %1417 = vrot.lane.b32.xlu0 %v2218_v44, %s2137_s14 }
 0x127   : > { %v3232_v31 = vpop.permute.xlu1 %1051 }
 0x128   : > { %4428 = vst [vmem:[#allocation165_spill] sm:$0xff] %v3232_v31  ;;  %v3234_v12 = vpop.permute.xlu0 %1049 }
 0x129   : > { %4429 = vst [vmem:[#allocation166_spill] sm:$0xff] %v3234_v12  ;;  %1423 = vrot.lane.b32.xlu1 %v2228_v52, %s2137_s14 }
 0x12a   : > { %1421 = vrot.lane.b32.xlu0 %v2232_v54, %s2137_s14 }
 0x12b   : > { %v3240_v49 = vpop.permute.xlu1 %1055 }
 0x12c   : > { %4430 = vst [vmem:[#allocation167_spill] sm:$0xff] %v3240_v49  ;;  %v3242_v59 = vpop.permute.xlu0 %1053 }
 0x12d   : > { %4431 = vst [vmem:[#allocation168_spill] sm:$0xff] %v3242_v59  ;;  %1427 = vrot.lane.b32.xlu1 %v2242_v62, %s2137_s14 }
 0x12e   : > { %1425 = vrot.lane.b32.xlu0 %v2246_v0, %s2137_s14 }
 0x12f   : > { %v3248_v17 = vpop.permute.xlu1 %1059 }
 0x130   : > { %4432 = vst [vmem:[#allocation169_spill] sm:$0xff] %v3248_v17  ;;  %v3250_v31 = vpop.permute.xlu0 %1057 }
 0x131   : > { %4433 = vst [vmem:[#allocation170_spill] sm:$0xff] %v3250_v31  ;;  %1431 = vrot.lane.b32.xlu1 %v2256_v8, %s2137_s14 }
 0x132   : > { %1429 = vrot.lane.b32.xlu0 %v2260_v10, %s2137_s14 }
 0x133   : > { %v3256_v12 = vpop.permute.xlu1 %1063 }
 0x134   : > { %4434 = vst [vmem:[#allocation171_spill] sm:$0xff] %v3256_v12  ;;  %v3258_v49 = vpop.permute.xlu0 %1061 }
 0x135   : > { %4435 = vst [vmem:[#allocation172_spill] sm:$0xff] %v3258_v49  ;;  %1435 = vrot.lane.b32.xlu1 %v2270_v21, %s2137_s14 }
 0x136   : > { %1433 = vrot.lane.b32.xlu0 %v2274_v23, %s2137_s14 }
 0x137   : > { %v3264_v59 = vpop.permute.xlu1 %1067 }
 0x138   : > { %4436 = vst [vmem:[#allocation173_spill] sm:$0xff] %v3264_v59  ;;  %v3266_v17 = vpop.permute.xlu0 %1065 }
 0x139   : > { %4437 = vst [vmem:[#allocation174_spill] sm:$0xff] %v3266_v17  ;;  %1439 = vrot.lane.b32.xlu1 %v2284_v33, %s2137_s14 }
 0x13a   : > { %1437 = vrot.lane.b32.xlu0 %v2288_v36, %s2137_s14 }
 0x13b   : > { %v3272_v31 = vpop.permute.xlu1 %1071 }
 0x13c   : > { %4438 = vst [vmem:[#allocation175_spill] sm:$0xff] %v3272_v31  ;;  %v3274_v12 = vpop.permute.xlu0 %1069 }
 0x13d   : > { %4439 = vst [vmem:[#allocation176_spill] sm:$0xff] %v3274_v12  ;;  %1443 = vrot.lane.b32.xlu1 %v2298_v46, %s2137_s14 }
 0x13e   : > { %1441 = vrot.lane.b32.xlu0 %v2302_v48, %s2137_s14 }
 0x13f   : > { %v3280_v49 = vpop.permute.xlu1 %1075 }
 0x140   : > { %4440 = vst [vmem:[#allocation177_spill] sm:$0xff] %v3280_v49  ;;  %v3282_v59 = vpop.permute.xlu0 %1073 }
 0x141   : > { %4441 = vst [vmem:[#allocation178_spill] sm:$0xff] %v3282_v59  ;;  %1447 = vrot.lane.b32.xlu1 %v2312_v58, %s2137_s14 }
 0x142   : > { %1445 = vrot.lane.b32.xlu0 %v2316_v60, %s2137_s14 }
 0x143   : > { %v3288_v17 = vpop.permute.xlu1 %1079 }
 0x144   : > { %4442 = vst [vmem:[#allocation179_spill] sm:$0xff] %v3288_v17  ;;  %v3290_v31 = vpop.permute.xlu0 %1077 }
 0x145   : > { %4443 = vst [vmem:[#allocation180_spill] sm:$0xff] %v3290_v31  ;;  %1451 = vrot.lane.b32.xlu1 %v2326_v6, %s2137_s14 }
 0x146   : > { %1449 = vrot.lane.b32.xlu0 %v2330_v9, %s2137_s14 }
 0x147   : > { %v3296_v12 = vpop.permute.xlu1 %1083 }
 0x148   : > { %4444 = vst [vmem:[#allocation181_spill] sm:$0xff] %v3296_v12  ;;  %v3298_v49 = vpop.permute.xlu0 %1081 }
 0x149   : > { %4445 = vst [vmem:[#allocation182_spill] sm:$0xff] %v3298_v49  ;;  %1455 = vrot.lane.b32.xlu1 %v2340_v22, %s2137_s14 }
 0x14a   : > { %1453 = vrot.lane.b32.xlu0 %v2344_v26, %s2137_s14 }
 0x14b   : > { %v3304_v59 = vpop.permute.xlu1 %1087 }
 0x14c   : > { %4446 = vst [vmem:[#allocation183_spill] sm:$0xff] %v3304_v59  ;;  %v3306_v17 = vpop.permute.xlu0 %1085 }
 0x14d   : > { %4447 = vst [vmem:[#allocation184_spill] sm:$0xff] %v3306_v17  ;;  %1459 = vrot.lane.b32.xlu1 %v2354_v38, %s2137_s14 }
 0x14e   : > { %1457 = vrot.lane.b32.xlu0 %v2358_v40, %s2137_s14 }
 0x14f   : > { %v3312_v31 = vpop.permute.xlu1 %1091 }
 0x150   : > { %4448 = vst [vmem:[#allocation185_spill] sm:$0xff] %v3312_v31  ;;  %v3314_v12 = vpop.permute.xlu0 %1089 }
 0x151   : > { %4449 = vst [vmem:[#allocation186_spill] sm:$0xff] %v3314_v12  ;;  %1463 = vrot.lane.b32.xlu1 %v2368_v53, %s2137_s14 }
 0x152   : > { %1461 = vrot.lane.b32.xlu0 %v2372_v56, %s2137_s14 }
 0x153   : > { %v3320_v49 = vpop.permute.xlu1 %1095 }
 0x154   : > { %4450 = vst [vmem:[#allocation187_spill] sm:$0xff] %v3320_v49  ;;  %v3322_v59 = vpop.permute.xlu0 %1093 }
 0x155   : > { %4451 = vst [vmem:[#allocation188_spill] sm:$0xff] %v3322_v59  ;;  %1467 = vrot.lane.b32.xlu1 %v2382_v4, %s2137_s14 }
 0x156   : > { %1465 = vrot.lane.b32.xlu0 %v2386_v7, %s2137_s14 }
 0x157   : > { %v3328_v17 = vpop.permute.xlu1 %1099 }
 0x158   : > { %4452 = vst [vmem:[#allocation189_spill] sm:$0xff] %v3328_v17  ;;  %v3330_v31 = vpop.permute.xlu0 %1097 }
 0x159   : > { %4453 = vst [vmem:[#allocation190_spill] sm:$0xff] %v3330_v31  ;;  %1471 = vrot.lane.b32.xlu1 %v2396_v25, %s2137_s14 }
 0x15a   : > { %1469 = vrot.lane.b32.xlu0 %v2400_v28, %s2137_s14 }
 0x15b   : > { %v3336_v12 = vpop.permute.xlu1 %1103 }
 0x15c   : > { %4454 = vst [vmem:[#allocation191_spill] sm:$0xff] %v3336_v12  ;;  %v3338_v49 = vpop.permute.xlu0 %1101 }
 0x15d   : > { %4455 = vst [vmem:[#allocation192_spill] sm:$0xff] %v3338_v49  ;;  %1475 = vrot.lane.b32.xlu1 %v2410_v43, %s2137_s14 }
 0x15e   : > { %1473 = vrot.lane.b32.xlu0 %v2414_v47, %s2137_s14 }
 0x15f   : > { %v3344_v59 = vpop.permute.xlu1 %1107 }
 0x160   : > { %4456 = vst [vmem:[#allocation193_spill] sm:$0xff] %v3344_v59  ;;  %v3346_v17 = vpop.permute.xlu0 %1105 }
 0x161   : > { %4457 = vst [vmem:[#allocation194_spill] sm:$0xff] %v3346_v17  ;;  %1479 = vrot.lane.b32.xlu1 %v2424_v63, %s2137_s14 }
 0x162   : > { %1477 = vrot.lane.b32.xlu0 %v2428_v2, %s2137_s14 }
 0x163   : > { %v3352_v31 = vpop.permute.xlu1 %1111 }
 0x164   : > { %4458 = vst [vmem:[#allocation195_spill] sm:$0xff] %v3352_v31  ;;  %v3354_v12 = vpop.permute.xlu0 %1109 }
 0x165   : > { %4459 = vst [vmem:[#allocation196_spill] sm:$0xff] %v3354_v12  ;;  %1483 = vrot.lane.b32.xlu1 %v2438_v18, %s2137_s14  ;;  %v4464_v12 = vld [vmem:[#allocation2_spill] sm:$0xff] }
 0x166   : > { %1481 = vrot.lane.b32.xlu0 %v2442_v27, %s2137_s14 }
 0x167   : > { %v3360_v49 = vpop.permute.xlu1 %1115 }
 0x168   : > { %4460 = vst [vmem:[#allocation197_spill] sm:$0xff] %v3360_v49  ;;  %v3362_v59 = vpop.permute.xlu0 %1113 }
 0x169   : > { %4461 = vst [vmem:[#allocation198_spill] sm:$0xff] %v3362_v59  ;;  %1487 = vrot.lane.b32.xlu1 %v2452_v45, %s2137_s14  ;;  %v4467_v59 = vld [vmem:[#allocation3_spill] sm:$0xff] }
 0x16a   : > { %1485 = vrot.lane.b32.xlu0 %v2456_v50, %s2137_s14 }
 0x16b   : > { %v3368_v17 = vpop.permute.xlu1 %1119 }
 0x16c   : > { %4462 = vst [vmem:[#allocation199_spill] sm:$0xff] %v3368_v17  ;;  %v3370_v31 = vpop.permute.xlu0 %1117 }
 0x16d   : > { %4463 = vst [vmem:[#allocation200_spill] sm:$0xff] %v3370_v31  ;;  %1491 = vrot.lane.b32.xlu1 %v2466_v5, %s2137_s14  ;;  %v4471_v31 = vld [vmem:[#allocation5_spill] sm:$0xff] }
 0x16e   : > { %1489 = vrot.lane.b32.xlu0 %v4464_v12, %s2137_s14 }
 0x16f   : > { %v3376_v61 = vpop.permute.xlu1 %1123 }
 0x170   : > { %4465 = vst [vmem:[#allocation2_spill] sm:$0xff] %v3376_v61  ;;  %v3378_v49 = vpop.permute.xlu0 %1121 }
 0x171   : > { %4466 = vst [vmem:[#allocation201_spill] sm:$0xff] %v3378_v49  ;;  %1495 = vrot.lane.b32.xlu1 %v4467_v59, %s2137_s14  ;;  %v4475_v49 = vld [vmem:[#allocation7_spill] sm:$0xff] }
 0x172   : > { %1493 = vrot.lane.b32.xlu0 %v4468_v29, %s2137_s14 }
 0x173   : > { %v3384_v35 = vpop.permute.xlu1 %1127 }
 0x174   : > { %4469 = vst [vmem:[#allocation3_spill] sm:$0xff] %v3384_v35  ;;  %v3386_v17 = vpop.permute.xlu0 %1125 }
 0x175   : > { %4470 = vst [vmem:[#allocation4_spill] sm:$0xff] %v3386_v17  ;;  %1499 = vrot.lane.b32.xlu1 %v4471_v31, %s2137_s14 }
 0x176   : > { %1497 = vrot.lane.b32.xlu0 %v4472_v57, %s2137_s14 }
 0x177   : > { %v3392_v13 = vpop.permute.xlu1 %1131 }
 0x178   : > { %4473 = vst [vmem:[#allocation5_spill] sm:$0xff] %v3392_v13  ;;  %v3394_v61 = vpop.permute.xlu0 %1129 }
 0x179   : > { %4474 = vst [vmem:[#allocation6_spill] sm:$0xff] %v3394_v61  ;;  %1503 = vrot.lane.b32.xlu1 %v4475_v49, %s2137_s14 }
 0x17a   : > { %1501 = vrot.lane.b32.xlu0 %v4476_v55, %s2137_s14 }
 0x17b   : > { %v3400_v35 = vpop.permute.xlu1 %1135 }
 0x17c   : > { %4477 = vst [vmem:[#allocation7_spill] sm:$0xff] %v3400_v35  ;;  %v3402_v17 = vpop.permute.xlu0 %1133 }
 0x17d   : > { %4478 = vst [vmem:[#allocation8_spill] sm:$0xff] %v3402_v17  ;;  %1507 = vrot.lane.b32.xlu1 %v4479_v41, %s2137_s14  ;;  %v4487_v17 = vld [vmem:[#allocation13_spill] sm:$0xff] }
 0x17e   : > { %1505 = vrot.lane.b32.xlu0 %v4480_v37, %s2137_s14 }
 0x17f   : > { %v3408_v13 = vpop.permute.xlu1 %1139 }
 0x180   : > { %4481 = vst [vmem:[#allocation9_spill] sm:$0xff] %v3408_v13  ;;  %v3410_v61 = vpop.permute.xlu0 %1137 }
 0x181   : > { %4482 = vst [vmem:[#allocation10_spill] sm:$0xff] %v3410_v61  ;;  %1511 = vrot.lane.b32.xlu1 %v4483_v3, %s2137_s14  ;;  %v4491_v61 = vld [vmem:[#allocation15_spill] sm:$0xff] }
 0x182   : > { %1509 = vrot.lane.b32.xlu0 %v4484_v19, %s2137_s14 }
 0x183   : > { %v3416_v15 = vpop.permute.xlu1 %1143 }
 0x184   : > { %4485 = vst [vmem:[#allocation11_spill] sm:$0xff] %v3416_v15  ;;  %v3418_v35 = vpop.permute.xlu0 %1141  ;;  %v4493_v15 = vld [vmem:[#allocation16_spill] sm:$0xff] }
 0x185   : > { %4486 = vst [vmem:[#allocation12_spill] sm:$0xff] %v3418_v35  ;;  %1515 = vrot.lane.b32.xlu1 %v4487_v17, %s2137_s14  ;;  %v4494_v35 = vld [vmem:[#allocation20_spill] sm:$0xff] }
 0x186   : > { %1513 = vrot.lane.b32.xlu0 %v4488_v14, %s2137_s14  ;;  %v1277_v39 = vmax.bf16 %v4494_v35, %v2178_v16  ;;  %v1280_v16 = vmax.bf16 %v4496_v1, %v2184_v20  ;;  %v4497_v35 = vld [vmem:[#allocation18_spill] sm:$0xff]  ;;  %v4500_v20 = vld [vmem:[#allocation27_spill] sm:$0xff] }
 0x187   : > { %v3424_v51 = vpop.permute.xlu1 %1147  ;;  %v4501_v1 = vld [vmem:[#allocation22_spill] sm:$0xff] }
 0x188   : > { %4489 = vst [vmem:[#allocation202_spill] sm:$0xff] %v3424_v51  ;;  %v3426_v13 = vpop.permute.xlu0 %1145 }
 0x189   : > { %4490 = vst [vmem:[#allocation203_spill] sm:$0xff] %v3426_v13  ;;  %1519 = vrot.lane.b32.xlu1 %v4491_v61, %s2137_s14 }
 0x18a   : > { %1517 = vrot.lane.b32.xlu0 %v4493_v15, %s2137_s14  ;;  %v4498_v15 = vld [vmem:[#allocation19_spill] sm:$0xff] }
 0x18b   : > { %v1408_v13 = vpop.permute.xlu1 %1407  ;;  %v1279_v17 = vmax.bf16 %v4498_v15, %v2173_v11  ;;  %v4502_v11 = vld [vmem:[#allocation28_spill] sm:$0xff] }
 0x18c   : > { %v1790_v51 = vmax.bf16 %v1408_v13, %v1278_v30  ;;  %v1406_v61 = vpop.permute.xlu0 %1405 }
 0x18d   : > { %v1789_v14 = vmax.bf16 %v1406_v61, %v1277_v39  ;;  %1523 = vrot.lane.b32.xlu1 %v4495_v24, %s2137_s14  ;;  %v4499_v24 = vld [vmem:[#allocation21_spill] sm:$0xff] }
 0x18e   : > { %1919 = vst.msk [vmem:[%s3440_s18 + $0x4] sm:$0xf] %vm1917_vm0, %v1790_v51  ;;  %1521 = vrot.lane.b32.xlu0 %v4497_v35, %s2137_s14  ;;  %v1282_v51 = vmax.bf16 %v4500_v20, %v2200_v32  ;;  %v4504_v32 = vld [vmem:[#allocation31_spill] sm:$0xff]  ;;  %v4505_v20 = vld [vmem:[#allocation26_spill] sm:$0xff] }
 0x18f   : > { %1918 = vst.msk [vmem:[%s3440_s18] sm:$0xf] %vm1917_vm0, %v1789_v14  ;;  %v1412_v30 = vpop.permute.xlu1 %1411  ;;  %v1281_v14 = vmax.bf16 %v4502_v11, %v2204_v34  ;;  %v4506_v34 = vld [vmem:[#allocation32_spill] sm:$0xff] }
 0x190   : > { %v1792_v39 = vmax.bf16 %v1412_v30, %v1280_v16  ;;  %v1410_v13 = vpop.permute.xlu0 %1409 }
 0x191   : > { %v1791_v61 = vmax.bf16 %v1410_v13, %v1279_v17  ;;  %1527 = vrot.lane.b32.xlu1 %v4499_v24, %s2137_s14  ;;  %v4503_v13 = vld [vmem:[#allocation25_spill] sm:$0xff] }
 0x192   : > { %1921 = vst.msk [vmem:[%s3440_s18 + $0xc] sm:$0xf] %vm1917_vm0, %v1792_v39  ;;  %1525 = vrot.lane.b32.xlu0 %v4501_v1, %s2137_s14  ;;  %v1284_v39 = vmax.bf16 %v4504_v32, %v2214_v42  ;;  %v4508_v42 = vld [vmem:[#allocation35_spill] sm:$0xff]  ;;  %v4509_v32 = vld [vmem:[#allocation30_spill] sm:$0xff] }
 0x193   : > { %1920 = vst.msk [vmem:[%s3440_s18 + $0x8] sm:$0xf] %vm1917_vm0, %v1791_v61  ;;  %v1416_v15 = vpop.permute.xlu1 %1415  ;;  %v1283_v61 = vmax.bf16 %v4506_v34, %v2218_v44  ;;  %v4510_v44 = vld [vmem:[#allocation36_spill] sm:$0xff] }
 0x194   : > { %v1794_v17 = vmax.bf16 %v1416_v15, %v1282_v51  ;;  %v1414_v16 = vpop.permute.xlu0 %1413 }
 0x195   : > { %v1793_v30 = vmax.bf16 %v1414_v16, %v1281_v14  ;;  %1531 = vrot.lane.b32.xlu1 %v4503_v13, %s2137_s14  ;;  %v4507_v16 = vld [vmem:[#allocation29_spill] sm:$0xff] }
 0x196   : > { %1923 = vst.msk [vmem:[%s3440_s18 + $0x14] sm:$0xf] %vm1917_vm0, %v1794_v17  ;;  %1529 = vrot.lane.b32.xlu0 %v4505_v20, %s2137_s14  ;;  %v1286_v17 = vmax.bf16 %v4508_v42, %v2228_v52  ;;  %v4512_v52 = vld [vmem:[#allocation39_spill] sm:$0xff]  ;;  %v4513_v42 = vld [vmem:[#allocation34_spill] sm:$0xff] }
 0x197   : > { %1922 = vst.msk [vmem:[%s3440_s18 + $0x10] sm:$0xf] %vm1917_vm0, %v1793_v30  ;;  %v1420_v51 = vpop.permute.xlu1 %1419  ;;  %v1285_v30 = vmax.bf16 %v4510_v44, %v2232_v54  ;;  %v4514_v54 = vld [vmem:[#allocation40_spill] sm:$0xff] }
 0x198   : > { %v1796_v11 = vmax.bf16 %v1420_v51, %v1284_v39  ;;  %v1418_v14 = vpop.permute.xlu0 %1417 }
 0x199   : > { %v1795_v15 = vmax.bf16 %v1418_v14, %v1283_v61  ;;  %1535 = vrot.lane.b32.xlu1 %v4507_v16, %s2137_s14  ;;  %v4511_v14 = vld [vmem:[#allocation33_spill] sm:$0xff] }
 0x19a   : > { %1925 = vst.msk [vmem:[%s3440_s18 + $0x1c] sm:$0xf] %vm1917_vm0, %v1796_v11  ;;  %1533 = vrot.lane.b32.xlu0 %v4509_v32, %s2137_s14  ;;  %v1288_v11 = vmax.bf16 %v4512_v52, %v2242_v62  ;;  %v4516_v62 = vld [vmem:[#allocation43_spill] sm:$0xff]  ;;  %v4517_v52 = vld [vmem:[#allocation38_spill] sm:$0xff] }
 0x19b   : > { %1924 = vst.msk [vmem:[%s3440_s18 + $0x18] sm:$0xf] %vm1917_vm0, %v1795_v15  ;;  %v1424_v39 = vpop.permute.xlu1 %1423  ;;  %v1287_v15 = vmax.bf16 %v4514_v54, %v2246_v0  ;;  %v4518_v0 = vld [vmem:[#allocation44_spill] sm:$0xff] }
 0x19c   : > { %v1798_v34 = vmax.bf16 %v1424_v39, %v1286_v17  ;;  %v1422_v61 = vpop.permute.xlu0 %1421 }
 0x19d   : > { %v1797_v51 = vmax.bf16 %v1422_v61, %v1285_v30  ;;  %1539 = vrot.lane.b32.xlu1 %v4511_v14, %s2137_s14  ;;  %v4515_v61 = vld [vmem:[#allocation37_spill] sm:$0xff] }
 0x19e   : > { %1927 = vst.msk [vmem:[%s3440_s18 + $0x24] sm:$0xf] %vm1917_vm0, %v1798_v34  ;;  %1537 = vrot.lane.b32.xlu0 %v4513_v42, %s2137_s14  ;;  %v1290_v34 = vmax.bf16 %v4516_v62, %v2256_v8  ;;  %v4520_v8 = vld [vmem:[#allocation47_spill] sm:$0xff]  ;;  %v4521_v62 = vld [vmem:[#allocation42_spill] sm:$0xff] }
 0x19f   : > { %1926 = vst.msk [vmem:[%s3440_s18 + $0x20] sm:$0xf] %vm1917_vm0, %v1797_v51  ;;  %v1428_v17 = vpop.permute.xlu1 %1427  ;;  %v1289_v51 = vmax.bf16 %v4518_v0, %v2260_v10  ;;  %v4522_v10 = vld [vmem:[#allocation48_spill] sm:$0xff] }
 0x1a0   : > { %v1800_v44 = vmax.bf16 %v1428_v17, %v1288_v11  ;;  %v1426_v30 = vpop.permute.xlu0 %1425 }
 0x1a1   : > { %v1799_v39 = vmax.bf16 %v1426_v30, %v1287_v15  ;;  %1543 = vrot.lane.b32.xlu1 %v4515_v61, %s2137_s14  ;;  %v4519_v30 = vld [vmem:[#allocation41_spill] sm:$0xff] }
 0x1a2   : > { %1929 = vst.msk [vmem:[%s3440_s18 + $0x2c] sm:$0xf] %vm1917_vm0, %v1800_v44  ;;  %1541 = vrot.lane.b32.xlu0 %v4517_v52, %s2137_s14  ;;  %v1292_v44 = vmax.bf16 %v4520_v8, %v2270_v21  ;;  %v4524_v21 = vld [vmem:[#allocation51_spill] sm:$0xff]  ;;  %v4525_v8 = vld [vmem:[#allocation46_spill] sm:$0xff] }
 0x1a3   : > { %1928 = vst.msk [vmem:[%s3440_s18 + $0x28] sm:$0xf] %vm1917_vm0, %v1799_v39  ;;  %v1432_v11 = vpop.permute.xlu1 %1431  ;;  %v1291_v39 = vmax.bf16 %v4522_v10, %v2274_v23  ;;  %v4526_v23 = vld [vmem:[#allocation52_spill] sm:$0xff] }
 0x1a4   : > { %v1802_v54 = vmax.bf16 %v1432_v11, %v1290_v34  ;;  %v1430_v15 = vpop.permute.xlu0 %1429 }
 0x1a5   : > { %v1801_v17 = vmax.bf16 %v1430_v15, %v1289_v51  ;;  %1547 = vrot.lane.b32.xlu1 %v4519_v30, %s2137_s14  ;;  %v4523_v15 = vld [vmem:[#allocation45_spill] sm:$0xff] }
 0x1a6   : > { %1931 = vst.msk [vmem:[%s3440_s18 + $0x34] sm:$0xf] %vm1917_vm0, %v1802_v54  ;;  %1545 = vrot.lane.b32.xlu0 %v4521_v62, %s2137_s14  ;;  %v1294_v54 = vmax.bf16 %v4524_v21, %v2284_v33  ;;  %v4528_v33 = vld [vmem:[#allocation55_spill] sm:$0xff]  ;;  %v4529_v21 = vld [vmem:[#allocation50_spill] sm:$0xff] }
 0x1a7   : > { %1930 = vst.msk [vmem:[%s3440_s18 + $0x30] sm:$0xf] %vm1917_vm0, %v1801_v17  ;;  %v1436_v34 = vpop.permute.xlu1 %1435  ;;  %v1293_v17 = vmax.bf16 %v4526_v23, %v2288_v36  ;;  %v4530_v36 = vld [vmem:[#allocation56_spill] sm:$0xff] }
 0x1a8   : > { %v1804_v0 = vmax.bf16 %v1436_v34, %v1292_v44  ;;  %v1434_v51 = vpop.permute.xlu0 %1433 }
 0x1a9   : > { %v1803_v11 = vmax.bf16 %v1434_v51, %v1291_v39  ;;  %1551 = vrot.lane.b32.xlu1 %v4523_v15, %s2137_s14  ;;  %v4527_v51 = vld [vmem:[#allocation49_spill] sm:$0xff] }
 0x1aa   : > { %1933 = vst.msk [vmem:[%s3440_s18 + $0x3c] sm:$0xf] %vm1917_vm0, %v1804_v0  ;;  %1549 = vrot.lane.b32.xlu0 %v4525_v8, %s2137_s14  ;;  %v1296_v0 = vmax.bf16 %v4528_v33, %v2298_v46  ;;  %v4532_v46 = vld [vmem:[#allocation59_spill] sm:$0xff]  ;;  %v4533_v33 = vld [vmem:[#allocation54_spill] sm:$0xff] }
 0x1ab   : > { %1932 = vst.msk [vmem:[%s3440_s18 + $0x38] sm:$0xf] %vm1917_vm0, %v1803_v11  ;;  %v1440_v44 = vpop.permute.xlu1 %1439  ;;  %v1295_v11 = vmax.bf16 %v4530_v36, %v2302_v48  ;;  %v4534_v48 = vld [vmem:[#allocation60_spill] sm:$0xff] }
 0x1ac   : > { %v1806_v10 = vmax.bf16 %v1440_v44, %v1294_v54  ;;  %v1438_v39 = vpop.permute.xlu0 %1437 }
 0x1ad   : > { %v1805_v34 = vmax.bf16 %v1438_v39, %v1293_v17  ;;  %1555 = vrot.lane.b32.xlu1 %v4527_v51, %s2137_s14  ;;  %v4531_v39 = vld [vmem:[#allocation53_spill] sm:$0xff] }
 0x1ae   : > { %1935 = vst.msk [vmem:[%s3440_s18 + $0x44] sm:$0xf] %vm1917_vm0, %v1806_v10  ;;  %1553 = vrot.lane.b32.xlu0 %v4529_v21, %s2137_s14  ;;  %v1298_v10 = vmax.bf16 %v4532_v46, %v2312_v58  ;;  %v4536_v58 = vld [vmem:[#allocation63_spill] sm:$0xff]  ;;  %v4537_v46 = vld [vmem:[#allocation58_spill] sm:$0xff] }
 0x1af   : > { %1934 = vst.msk [vmem:[%s3440_s18 + $0x40] sm:$0xf] %vm1917_vm0, %v1805_v34  ;;  %v1444_v54 = vpop.permute.xlu1 %1443  ;;  %v1297_v34 = vmax.bf16 %v4534_v48, %v2316_v60  ;;  %v4538_v60 = vld [vmem:[#allocation64_spill] sm:$0xff] }
 0x1b0   : > { %v1808_v23 = vmax.bf16 %v1444_v54, %v1296_v0  ;;  %v1442_v17 = vpop.permute.xlu0 %1441 }
 0x1b1   : > { %v1807_v44 = vmax.bf16 %v1442_v17, %v1295_v11  ;;  %1559 = vrot.lane.b32.xlu1 %v4531_v39, %s2137_s14  ;;  %v4535_v17 = vld [vmem:[#allocation57_spill] sm:$0xff] }
 0x1b2   : > { %1937 = vst.msk [vmem:[%s3440_s18 + $0x4c] sm:$0xf] %vm1917_vm0, %v1808_v23  ;;  %1557 = vrot.lane.b32.xlu0 %v4533_v33, %s2137_s14  ;;  %v1300_v23 = vmax.bf16 %v4536_v58, %v2326_v6  ;;  %v4540_v6 = vld [vmem:[#allocation67_spill] sm:$0xff]  ;;  %v4541_v58 = vld [vmem:[#allocation62_spill] sm:$0xff] }
 0x1b3   : > { %1936 = vst.msk [vmem:[%s3440_s18 + $0x48] sm:$0xf] %vm1917_vm0, %v1807_v44  ;;  %v1448_v0 = vpop.permute.xlu1 %1447  ;;  %v1299_v44 = vmax.bf16 %v4538_v60, %v2330_v9  ;;  %v4542_v9 = vld [vmem:[#allocation68_spill] sm:$0xff] }
 0x1b4   : > { %v1810_v36 = vmax.bf16 %v1448_v0, %v1298_v10  ;;  %v1446_v11 = vpop.permute.xlu0 %1445 }
 0x1b5   : > { %v1809_v54 = vmax.bf16 %v1446_v11, %v1297_v34  ;;  %1563 = vrot.lane.b32.xlu1 %v4535_v17, %s2137_s14  ;;  %v4539_v11 = vld [vmem:[#allocation61_spill] sm:$0xff] }
 0x1b6   : > { %1939 = vst.msk [vmem:[%s3440_s18 + $0x54] sm:$0xf] %vm1917_vm0, %v1810_v36  ;;  %1561 = vrot.lane.b32.xlu0 %v4537_v46, %s2137_s14  ;;  %v1302_v36 = vmax.bf16 %v4540_v6, %v2340_v22  ;;  %v4544_v22 = vld [vmem:[#allocation71_spill] sm:$0xff]  ;;  %v4545_v6 = vld [vmem:[#allocation66_spill] sm:$0xff] }
 0x1b7   : > { %1938 = vst.msk [vmem:[%s3440_s18 + $0x50] sm:$0xf] %vm1917_vm0, %v1809_v54  ;;  %v1452_v10 = vpop.permute.xlu1 %1451  ;;  %v1301_v54 = vmax.bf16 %v4542_v9, %v2344_v26  ;;  %v4546_v26 = vld [vmem:[#allocation72_spill] sm:$0xff] }
 0x1b8   : > { %v1812_v48 = vmax.bf16 %v1452_v10, %v1300_v23  ;;  %v1450_v34 = vpop.permute.xlu0 %1449 }
 0x1b9   : > { %v1811_v0 = vmax.bf16 %v1450_v34, %v1299_v44  ;;  %1567 = vrot.lane.b32.xlu1 %v4539_v11, %s2137_s14  ;;  %v4543_v34 = vld [vmem:[#allocation65_spill] sm:$0xff] }
 0x1ba   : > { %1941 = vst.msk [vmem:[%s3440_s18 + $0x5c] sm:$0xf] %vm1917_vm0, %v1812_v48  ;;  %1565 = vrot.lane.b32.xlu0 %v4541_v58, %s2137_s14  ;;  %v1304_v48 = vmax.bf16 %v4544_v22, %v2354_v38  ;;  %v4548_v38 = vld [vmem:[#allocation75_spill] sm:$0xff]  ;;  %v4549_v22 = vld [vmem:[#allocation70_spill] sm:$0xff] }
 0x1bb   : > { %1940 = vst.msk [vmem:[%s3440_s18 + $0x58] sm:$0xf] %vm1917_vm0, %v1811_v0  ;;  %v1456_v23 = vpop.permute.xlu1 %1455  ;;  %v1303_v0 = vmax.bf16 %v4546_v26, %v2358_v40  ;;  %v4550_v40 = vld [vmem:[#allocation76_spill] sm:$0xff] }
 0x1bc   : > { %v1814_v60 = vmax.bf16 %v1456_v23, %v1302_v36  ;;  %v1454_v44 = vpop.permute.xlu0 %1453 }
 0x1bd   : > { %v1813_v10 = vmax.bf16 %v1454_v44, %v1301_v54  ;;  %1571 = vrot.lane.b32.xlu1 %v4543_v34, %s2137_s14  ;;  %v4547_v44 = vld [vmem:[#allocation69_spill] sm:$0xff] }
 0x1be   : > { %1943 = vst.msk [vmem:[%s3440_s18 + $0x64] sm:$0xf] %vm1917_vm0, %v1814_v60  ;;  %1569 = vrot.lane.b32.xlu0 %v4545_v6, %s2137_s14  ;;  %v1306_v60 = vmax.bf16 %v4548_v38, %v2368_v53  ;;  %v4552_v53 = vld [vmem:[#allocation79_spill] sm:$0xff]  ;;  %v4553_v38 = vld [vmem:[#allocation74_spill] sm:$0xff] }
 0x1bf   : > { %1942 = vst.msk [vmem:[%s3440_s18 + $0x60] sm:$0xf] %vm1917_vm0, %v1813_v10  ;;  %v1460_v36 = vpop.permute.xlu1 %1459  ;;  %v1305_v10 = vmax.bf16 %v4550_v40, %v2372_v56  ;;  %v4554_v56 = vld [vmem:[#allocation80_spill] sm:$0xff] }
 0x1c0   : > { %v1816_v9 = vmax.bf16 %v1460_v36, %v1304_v48  ;;  %v1458_v54 = vpop.permute.xlu0 %1457 }
 0x1c1   : > { %v1815_v23 = vmax.bf16 %v1458_v54, %v1303_v0  ;;  %1575 = vrot.lane.b32.xlu1 %v4547_v44, %s2137_s14  ;;  %v4551_v54 = vld [vmem:[#allocation73_spill] sm:$0xff] }
 0x1c2   : > { %1945 = vst.msk [vmem:[%s3440_s18 + $0x6c] sm:$0xf] %vm1917_vm0, %v1816_v9  ;;  %1573 = vrot.lane.b32.xlu0 %v4549_v22, %s2137_s14  ;;  %v1308_v9 = vmax.bf16 %v4552_v53, %v2382_v4  ;;  %v4556_v4 = vld [vmem:[#allocation83_spill] sm:$0xff]  ;;  %v4557_v53 = vld [vmem:[#allocation78_spill] sm:$0xff] }
 0x1c3   : > { %1944 = vst.msk [vmem:[%s3440_s18 + $0x68] sm:$0xf] %vm1917_vm0, %v1815_v23  ;;  %v1464_v48 = vpop.permute.xlu1 %1463  ;;  %v1307_v23 = vmax.bf16 %v4554_v56, %v2386_v7  ;;  %v4558_v7 = vld [vmem:[#allocation84_spill] sm:$0xff] }
 0x1c4   : > { %v1818_v26 = vmax.bf16 %v1464_v48, %v1306_v60  ;;  %v1462_v0 = vpop.permute.xlu0 %1461 }
 0x1c5   : > { %v1817_v36 = vmax.bf16 %v1462_v0, %v1305_v10  ;;  %1579 = vrot.lane.b32.xlu1 %v4551_v54, %s2137_s14  ;;  %v4555_v0 = vld [vmem:[#allocation77_spill] sm:$0xff] }
 0x1c6   : > { %1947 = vst.msk [vmem:[%s3440_s18 + $0x74] sm:$0xf] %vm1917_vm0, %v1818_v26  ;;  %1577 = vrot.lane.b32.xlu0 %v4553_v38, %s2137_s14  ;;  %v1310_v26 = vmax.bf16 %v4556_v4, %v2396_v25  ;;  %v4560_v25 = vld [vmem:[#allocation87_spill] sm:$0xff]  ;;  %v4561_v4 = vld [vmem:[#allocation82_spill] sm:$0xff] }
 0x1c7   : > { %1946 = vst.msk [vmem:[%s3440_s18 + $0x70] sm:$0xf] %vm1917_vm0, %v1817_v36  ;;  %v1468_v60 = vpop.permute.xlu1 %1467  ;;  %v1309_v36 = vmax.bf16 %v4558_v7, %v2400_v28  ;;  %v4562_v28 = vld [vmem:[#allocation88_spill] sm:$0xff] }
 0x1c8   : > { %v1820_v40 = vmax.bf16 %v1468_v60, %v1308_v9  ;;  %v1466_v10 = vpop.permute.xlu0 %1465 }
 0x1c9   : > { %v1819_v48 = vmax.bf16 %v1466_v10, %v1307_v23  ;;  %1583 = vrot.lane.b32.xlu1 %v4555_v0, %s2137_s14  ;;  %v4559_v10 = vld [vmem:[#allocation81_spill] sm:$0xff] }
 0x1ca   : > { %1949 = vst.msk [vmem:[%s3440_s18 + $0x7c] sm:$0xf] %vm1917_vm0, %v1820_v40  ;;  %1581 = vrot.lane.b32.xlu0 %v4557_v53, %s2137_s14  ;;  %v1312_v40 = vmax.bf16 %v4560_v25, %v2410_v43  ;;  %v4564_v43 = vld [vmem:[#allocation91_spill] sm:$0xff]  ;;  %v4565_v25 = vld [vmem:[#allocation86_spill] sm:$0xff] }
 0x1cb   : > { %1948 = vst.msk [vmem:[%s3440_s18 + $0x78] sm:$0xf] %vm1917_vm0, %v1819_v48  ;;  %v1472_v9 = vpop.permute.xlu1 %1471  ;;  %v1311_v48 = vmax.bf16 %v4562_v28, %v2414_v47  ;;  %v4566_v47 = vld [vmem:[#allocation92_spill] sm:$0xff] }
 0x1cc   : > { %v1822_v56 = vmax.bf16 %v1472_v9, %v1310_v26  ;;  %v1470_v23 = vpop.permute.xlu0 %1469 }
 0x1cd   : > { %v1821_v60 = vmax.bf16 %v1470_v23, %v1309_v36  ;;  %1587 = vrot.lane.b32.xlu1 %v4559_v10, %s2137_s14  ;;  %v4563_v23 = vld [vmem:[#allocation85_spill] sm:$0xff] }
 0x1ce   : > { %1951 = vst.msk [vmem:[%s3440_s18 + $0x84] sm:$0xf] %vm1917_vm0, %v1822_v56  ;;  %1585 = vrot.lane.b32.xlu0 %v4561_v4, %s2137_s14  ;;  %v1314_v56 = vmax.bf16 %v4564_v43, %v2424_v63  ;;  %v4568_v63 = vld [vmem:[#allocation95_spill] sm:$0xff]  ;;  %v4569_v43 = vld [vmem:[#allocation90_spill] sm:$0xff] }
 0x1cf   : > { %1950 = vst.msk [vmem:[%s3440_s18 + $0x80] sm:$0xf] %vm1917_vm0, %v1821_v60  ;;  %v1476_v26 = vpop.permute.xlu1 %1475  ;;  %v1313_v60 = vmax.bf16 %v4566_v47, %v2428_v2  ;;  %v4570_v2 = vld [vmem:[#allocation96_spill] sm:$0xff] }
 0x1d0   : > { %v1824_v7 = vmax.bf16 %v1476_v26, %v1312_v40  ;;  %v1474_v36 = vpop.permute.xlu0 %1473 }
 0x1d1   : > { %v1823_v9 = vmax.bf16 %v1474_v36, %v1311_v48  ;;  %1591 = vrot.lane.b32.xlu1 %v4563_v23, %s2137_s14  ;;  %v4567_v36 = vld [vmem:[#allocation89_spill] sm:$0xff] }
 0x1d2   : > { %1953 = vst.msk [vmem:[%s3440_s18 + $0x8c] sm:$0xf] %vm1917_vm0, %v1824_v7  ;;  %1589 = vrot.lane.b32.xlu0 %v4565_v25, %s2137_s14  ;;  %v1316_v7 = vmax.bf16 %v4568_v63, %v2438_v18  ;;  %v4572_v18 = vld [vmem:[#allocation99_spill] sm:$0xff]  ;;  %v4573_v63 = vld [vmem:[#allocation94_spill] sm:$0xff] }
 0x1d3   : > { %1952 = vst.msk [vmem:[%s3440_s18 + $0x88] sm:$0xf] %vm1917_vm0, %v1823_v9  ;;  %v1480_v40 = vpop.permute.xlu1 %1479  ;;  %v1315_v9 = vmax.bf16 %v4570_v2, %v2442_v27  ;;  %v4574_v27 = vld [vmem:[#allocation100_spill] sm:$0xff] }
 0x1d4   : > { %v1826_v28 = vmax.bf16 %v1480_v40, %v1314_v56  ;;  %v1478_v48 = vpop.permute.xlu0 %1477 }
 0x1d5   : > { %v1825_v26 = vmax.bf16 %v1478_v48, %v1313_v60  ;;  %1595 = vrot.lane.b32.xlu1 %v4567_v36, %s2137_s14  ;;  %v4571_v48 = vld [vmem:[#allocation93_spill] sm:$0xff] }
 0x1d6   : > { %1955 = vst.msk [vmem:[%s3440_s18 + $0x94] sm:$0xf] %vm1917_vm0, %v1826_v28  ;;  %1593 = vrot.lane.b32.xlu0 %v4569_v43, %s2137_s14  ;;  %v1318_v28 = vmax.bf16 %v4572_v18, %v2452_v45  ;;  %v4576_v45 = vld [vmem:[#allocation103_spill] sm:$0xff]  ;;  %v4577_v18 = vld [vmem:[#allocation98_spill] sm:$0xff] }
 0x1d7   : > { %1954 = vst.msk [vmem:[%s3440_s18 + $0x90] sm:$0xf] %vm1917_vm0, %v1825_v26  ;;  %v1484_v56 = vpop.permute.xlu1 %1483  ;;  %v1317_v26 = vmax.bf16 %v4574_v27, %v2456_v50  ;;  %v4578_v50 = vld [vmem:[#allocation104_spill] sm:$0xff] }
 0x1d8   : > { %v1828_v47 = vmax.bf16 %v1484_v56, %v1316_v7  ;;  %v1482_v60 = vpop.permute.xlu0 %1481 }
 0x1d9   : > { %v1827_v40 = vmax.bf16 %v1482_v60, %v1315_v9  ;;  %1599 = vrot.lane.b32.xlu1 %v4571_v48, %s2137_s14  ;;  %v4575_v60 = vld [vmem:[#allocation97_spill] sm:$0xff] }
 0x1da   : > { %1957 = vst.msk [vmem:[%s3440_s18 + $0x9c] sm:$0xf] %vm1917_vm0, %v1828_v47  ;;  %1597 = vrot.lane.b32.xlu0 %v4573_v63, %s2137_s14  ;;  %v1320_v47 = vmax.bf16 %v4576_v45, %v2466_v5  ;;  %v4580_v5 = vld [vmem:[#allocation107_spill] sm:$0xff]  ;;  %v4581_v45 = vld [vmem:[#allocation102_spill] sm:$0xff] }
 0x1db   : > { %1956 = vst.msk [vmem:[%s3440_s18 + $0x98] sm:$0xf] %vm1917_vm0, %v1827_v40  ;;  %v1488_v7 = vpop.permute.xlu1 %1487  ;;  %v1319_v40 = vmax.bf16 %v4578_v50, %v4464_v12  ;;  %v4582_v12 = vld [vmem:[#allocation108_spill] sm:$0xff] }
 0x1dc   : > { %v1830_v2 = vmax.bf16 %v1488_v7, %v1318_v28  ;;  %v1486_v9 = vpop.permute.xlu0 %1485 }
 0x1dd   : > { %v1829_v56 = vmax.bf16 %v1486_v9, %v1317_v26  ;;  %1603 = vrot.lane.b32.xlu1 %v4575_v60, %s2137_s14  ;;  %v4579_v9 = vld [vmem:[#allocation101_spill] sm:$0xff] }
 0x1de   : > { %1959 = vst.msk [vmem:[%s3440_s18 + $0xa4] sm:$0xf] %vm1917_vm0, %v1830_v2  ;;  %1601 = vrot.lane.b32.xlu0 %v4577_v18, %s2137_s14  ;;  %v1322_v2 = vmax.bf16 %v4580_v5, %v4467_v59  ;;  %v4584_v59 = vld [vmem:[#allocation111_spill] sm:$0xff]  ;;  %v4585_v5 = vld [vmem:[#allocation106_spill] sm:$0xff] }
 0x1df   : > { %1958 = vst.msk [vmem:[%s3440_s18 + $0xa0] sm:$0xf] %vm1917_vm0, %v1829_v56  ;;  %v1492_v28 = vpop.permute.xlu1 %1491  ;;  %v1321_v56 = vmax.bf16 %v4582_v12, %v4468_v29  ;;  %v4586_v29 = vld [vmem:[#allocation112_spill] sm:$0xff] }
 0x1e0   : > { %v1832_v27 = vmax.bf16 %v1492_v28, %v1320_v47  ;;  %v1490_v26 = vpop.permute.xlu0 %1489 }
 0x1e1   : > { %v1831_v7 = vmax.bf16 %v1490_v26, %v1319_v40  ;;  %1607 = vrot.lane.b32.xlu1 %v4579_v9, %s2137_s14  ;;  %v4583_v26 = vld [vmem:[#allocation105_spill] sm:$0xff] }
 0x1e2   : > { %1961 = vst.msk [vmem:[%s3440_s18 + $0xac] sm:$0xf] %vm1917_vm0, %v1832_v27  ;;  %1605 = vrot.lane.b32.xlu0 %v4581_v45, %s2137_s14  ;;  %v1324_v27 = vmax.bf16 %v4584_v59, %v4471_v31  ;;  %v4588_v31 = vld [vmem:[#allocation115_spill] sm:$0xff]  ;;  %v4589_v59 = vld [vmem:[#allocation110_spill] sm:$0xff] }
 0x1e3   : > { %1960 = vst.msk [vmem:[%s3440_s18 + $0xa8] sm:$0xf] %vm1917_vm0, %v1831_v7  ;;  %v1496_v47 = vpop.permute.xlu1 %1495  ;;  %v1323_v7 = vmax.bf16 %v4586_v29, %v4472_v57  ;;  %v4590_v57 = vld [vmem:[#allocation116_spill] sm:$0xff] }
 0x1e4   : > { %v1834_v50 = vmax.bf16 %v1496_v47, %v1322_v2  ;;  %v1494_v40 = vpop.permute.xlu0 %1493 }
 0x1e5   : > { %v1833_v28 = vmax.bf16 %v1494_v40, %v1321_v56  ;;  %1611 = vrot.lane.b32.xlu1 %v4583_v26, %s2137_s14  ;;  %v4587_v40 = vld [vmem:[#allocation109_spill] sm:$0xff] }
 0x1e6   : > { %1963 = vst.msk [vmem:[%s3440_s18 + $0xb4] sm:$0xf] %vm1917_vm0, %v1834_v50  ;;  %1609 = vrot.lane.b32.xlu0 %v4585_v5, %s2137_s14  ;;  %v1326_v50 = vmax.bf16 %v4588_v31, %v4475_v49  ;;  %v4592_v49 = vld [vmem:[#allocation119_spill] sm:$0xff]  ;;  %v4593_v31 = vld [vmem:[#allocation114_spill] sm:$0xff] }
 0x1e7   : > { %1962 = vst.msk [vmem:[%s3440_s18 + $0xb0] sm:$0xf] %vm1917_vm0, %v1833_v28  ;;  %v1500_v2 = vpop.permute.xlu1 %1499  ;;  %v1325_v28 = vmax.bf16 %v4590_v57, %v4476_v55  ;;  %v4594_v55 = vld [vmem:[#allocation120_spill] sm:$0xff] }
 0x1e8   : > { %v1836_v12 = vmax.bf16 %v1500_v2, %v1324_v27  ;;  %v1498_v56 = vpop.permute.xlu0 %1497 }
 0x1e9   : > { %v1835_v47 = vmax.bf16 %v1498_v56, %v1323_v7  ;;  %1615 = vrot.lane.b32.xlu1 %v4587_v40, %s2137_s14  ;;  %v4591_v56 = vld [vmem:[#allocation113_spill] sm:$0xff] }
 0x1ea   : > { %1965 = vst.msk [vmem:[%s3440_s18 + $0xbc] sm:$0xf] %vm1917_vm0, %v1836_v12  ;;  %1613 = vrot.lane.b32.xlu0 %v4589_v59, %s2137_s14  ;;  %v1328_v12 = vmax.bf16 %v4592_v49, %v4479_v41  ;;  %v4596_v41 = vld [vmem:[#allocation123_spill] sm:$0xff]  ;;  %v4597_v49 = vld [vmem:[#allocation118_spill] sm:$0xff] }
 0x1eb   : > { %1964 = vst.msk [vmem:[%s3440_s18 + $0xb8] sm:$0xf] %vm1917_vm0, %v1835_v47  ;;  %v1504_v27 = vpop.permute.xlu1 %1503  ;;  %v1327_v47 = vmax.bf16 %v4594_v55, %v4480_v37  ;;  %v4598_v37 = vld [vmem:[#allocation124_spill] sm:$0xff] }
 0x1ec   : > { %v1838_v29 = vmax.bf16 %v1504_v27, %v1326_v50  ;;  %v1502_v7 = vpop.permute.xlu0 %1501 }
 0x1ed   : > { %v1837_v2 = vmax.bf16 %v1502_v7, %v1325_v28  ;;  %1619 = vrot.lane.b32.xlu1 %v4591_v56, %s2137_s14  ;;  %v4595_v7 = vld [vmem:[#allocation117_spill] sm:$0xff] }
 0x1ee   : > { %1967 = vst.msk [vmem:[%s3440_s18 + $0xc4] sm:$0xf] %vm1917_vm0, %v1838_v29  ;;  %1617 = vrot.lane.b32.xlu0 %v4593_v31, %s2137_s14  ;;  %v1330_v29 = vmax.bf16 %v4596_v41, %v4483_v3  ;;  %v4600_v3 = vld [vmem:[#allocation13_spill] sm:$0xff]  ;;  %v4601_v41 = vld [vmem:[#allocation127_spill] sm:$0xff] }
 0x1ef   : > { %1966 = vst.msk [vmem:[%s3440_s18 + $0xc0] sm:$0xf] %vm1917_vm0, %v1837_v2  ;;  %v1508_v50 = vpop.permute.xlu1 %1507  ;;  %v1329_v2 = vmax.bf16 %v4598_v37, %v4484_v19  ;;  %v4603_v19 = vld [vmem:[#allocation14_spill] sm:$0xff]  ;;  %v4604_v37 = vld [vmem:[#allocation128_spill] sm:$0xff] }
 0x1f0   : > { %v1840_v57 = vmax.bf16 %v1508_v50, %v1328_v12  ;;  %v1506_v28 = vpop.permute.xlu0 %1505 }
 0x1f1   : > { %v1839_v27 = vmax.bf16 %v1506_v28, %v1327_v47  ;;  %1623 = vrot.lane.b32.xlu1 %v4595_v7, %s2137_s14  ;;  %v4599_v28 = vld [vmem:[#allocation121_spill] sm:$0xff] }
 0x1f2   : > { %1969 = vst.msk [vmem:[%s3440_s18 + $0xcc] sm:$0xf] %vm1917_vm0, %v1840_v57  ;;  %1621 = vrot.lane.b32.xlu0 %v4597_v49, %s2137_s14  ;;  %v1332_v57 = vmax.bf16 %v4601_v41, %v4600_v3  ;;  %v4602_v49 = vld [vmem:[#allocation122_spill] sm:$0xff]  ;;  %v4606_v3 = vld [vmem:[#allocation15_spill] sm:$0xff] }
 0x1f3   : > { %1968 = vst.msk [vmem:[%s3440_s18 + $0xc8] sm:$0xf] %vm1917_vm0, %v1839_v27  ;;  %v1512_v12 = vpop.permute.xlu1 %1511  ;;  %v1331_v27 = vmax.bf16 %v4604_v37, %v4603_v19  ;;  %v4607_v41 = vld [vmem:[#allocation131_spill] sm:$0xff]  ;;  %v4609_v19 = vld [vmem:[#allocation16_spill] sm:$0xff] }
 0x1f4   : > { %v1842_v55 = vmax.bf16 %v1512_v12, %v1330_v29  ;;  %v1510_v47 = vpop.permute.xlu0 %1509  ;;  %v4610_v37 = vld [vmem:[#allocation132_spill] sm:$0xff] }
 0x1f5   : > { %v1841_v50 = vmax.bf16 %v1510_v47, %v1329_v2  ;;  %1627 = vrot.lane.b32.xlu1 %v4599_v28, %s2137_s14  ;;  %v4605_v28 = vld [vmem:[#allocation125_spill] sm:$0xff] }
 0x1f6   : > { %1971 = vst.msk [vmem:[%s3440_s18 + $0xd4] sm:$0xf] %vm1917_vm0, %v1842_v55  ;;  %1625 = vrot.lane.b32.xlu0 %v4602_v49, %s2137_s14  ;;  %v1334_v55 = vmax.bf16 %v4607_v41, %v4606_v3  ;;  %v4608_v49 = vld [vmem:[#allocation126_spill] sm:$0xff]  ;;  %v4612_v3 = vld [vmem:[#allocation17_spill] sm:$0xff]  ;;  %v4613_v41 = vld [vmem:[#allocation135_spill] sm:$0xff] }
 0x1f7   : > { %1970 = vst.msk [vmem:[%s3440_s18 + $0xd0] sm:$0xf] %vm1917_vm0, %v1841_v50  ;;  %v1516_v29 = vpop.permute.xlu1 %1515  ;;  %v1333_v50 = vmax.bf16 %v4610_v37, %v4609_v19  ;;  %v4615_v19 = vld [vmem:[#allocation136_spill] sm:$0xff] }
 0x1f8   : > { %v1844_v2 = vmax.bf16 %v1516_v29, %v1332_v57  ;;  %v1514_v12 = vpop.permute.xlu0 %1513 }
 0x1f9   : > { %v1843_v47 = vmax.bf16 %v1514_v12, %v1331_v27  ;;  %1631 = vrot.lane.b32.xlu1 %v4605_v28, %s2137_s14  ;;  %v4611_v28 = vld [vmem:[#allocation129_spill] sm:$0xff] }
 0x1fa   : > { %1973 = vst.msk [vmem:[%s3440_s18 + $0xdc] sm:$0xf] %vm1917_vm0, %v1844_v2  ;;  %1629 = vrot.lane.b32.xlu0 %v4608_v49, %s2137_s14  ;;  %v1336_v2 = vmax.bf16 %v4613_v41, %v4612_v3  ;;  %v4614_v49 = vld [vmem:[#allocation130_spill] sm:$0xff]  ;;  %v4617_v3 = vld [vmem:[#allocation139_spill] sm:$0xff] }
 0x1fb   : > { %1972 = vst.msk [vmem:[%s3440_s18 + $0xd8] sm:$0xf] %vm1917_vm0, %v1843_v47  ;;  %v1520_v57 = vpop.permute.xlu1 %1519  ;;  %v1335_v47 = vmax.bf16 %v4615_v19, %v4497_v35  ;;  %v4618_v41 = vld [vmem:[#allocation134_spill] sm:$0xff]  ;;  %v4619_v35 = vld [vmem:[#allocation140_spill] sm:$0xff] }
 0x1fc   : > { %v1846_v27 = vmax.bf16 %v1520_v57, %v1334_v55  ;;  %v1518_v29 = vpop.permute.xlu0 %1517 }
 0x1fd   : > { %v1845_v12 = vmax.bf16 %v1518_v29, %v1333_v50  ;;  %1635 = vrot.lane.b32.xlu1 %v4611_v28, %s2137_s14  ;;  %v4616_v29 = vld [vmem:[#allocation133_spill] sm:$0xff] }
 0x1fe   : > { %1975 = vst.msk [vmem:[%s3440_s18 + $0xe4] sm:$0xf] %vm1917_vm0, %v1846_v27  ;;  %1633 = vrot.lane.b32.xlu0 %v4614_v49, %s2137_s14  ;;  %v1338_v27 = vmax.bf16 %v4617_v3, %v4499_v24  ;;  %v4621_v24 = vld [vmem:[#allocation143_spill] sm:$0xff]  ;;  %v4622_v3 = vld [vmem:[#allocation138_spill] sm:$0xff] }
 0x1ff   : > { %1974 = vst.msk [vmem:[%s3440_s18 + $0xe0] sm:$0xf] %vm1917_vm0, %v1845_v12  ;;  %v1524_v55 = vpop.permute.xlu1 %1523  ;;  %v1337_v12 = vmax.bf16 %v4619_v35, %v4501_v1  ;;  %v4623_v1 = vld [vmem:[#allocation144_spill] sm:$0xff] }
 0x200   : > { %v1848_v37 = vmax.bf16 %v1524_v55, %v1336_v2  ;;  %v1522_v50 = vpop.permute.xlu0 %1521 }
 0x201   : > { %v1847_v57 = vmax.bf16 %v1522_v50, %v1335_v47  ;;  %1639 = vrot.lane.b32.xlu1 %v4616_v29, %s2137_s14  ;;  %v4620_v50 = vld [vmem:[#allocation137_spill] sm:$0xff] }
 0x202   : > { %1977 = vst.msk [vmem:[%s3440_s18 + $0xec] sm:$0xf] %vm1917_vm0, %v1848_v37  ;;  %1637 = vrot.lane.b32.xlu0 %v4618_v41, %s2137_s14  ;;  %v1340_v37 = vmax.bf16 %v4621_v24, %v4503_v13  ;;  %v4625_v13 = vld [vmem:[#allocation147_spill] sm:$0xff]  ;;  %v4626_v24 = vld [vmem:[#allocation142_spill] sm:$0xff] }
 0x203   : > { %1976 = vst.msk [vmem:[%s3440_s18 + $0xe8] sm:$0xf] %vm1917_vm0, %v1847_v57  ;;  %v1528_v2 = vpop.permute.xlu1 %1527  ;;  %v1339_v57 = vmax.bf16 %v4623_v1, %v4505_v20  ;;  %v4627_v20 = vld [vmem:[#allocation148_spill] sm:$0xff] }
 0x204   : > { %v1850_v19 = vmax.bf16 %v1528_v2, %v1338_v27  ;;  %v1526_v47 = vpop.permute.xlu0 %1525 }
 0x205   : > { %v1849_v55 = vmax.bf16 %v1526_v47, %v1337_v12  ;;  %1643 = vrot.lane.b32.xlu1 %v4620_v50, %s2137_s14  ;;  %v4624_v47 = vld [vmem:[#allocation141_spill] sm:$0xff] }
 0x206   : > { %1979 = vst.msk [vmem:[%s3440_s18 + $0xf4] sm:$0xf] %vm1917_vm0, %v1850_v19  ;;  %1641 = vrot.lane.b32.xlu0 %v4622_v3, %s2137_s14  ;;  %v1342_v19 = vmax.bf16 %v4625_v13, %v4507_v16  ;;  %v4629_v16 = vld [vmem:[#allocation151_spill] sm:$0xff]  ;;  %v4630_v13 = vld [vmem:[#allocation146_spill] sm:$0xff] }
 0x207   : > { %1978 = vst.msk [vmem:[%s3440_s18 + $0xf0] sm:$0xf] %vm1917_vm0, %v1849_v55  ;;  %v1532_v27 = vpop.permute.xlu1 %1531  ;;  %v1341_v55 = vmax.bf16 %v4627_v20, %v4509_v32  ;;  %v4631_v32 = vld [vmem:[#allocation152_spill] sm:$0xff] }
 0x208   : > { %v1852_v35 = vmax.bf16 %v1532_v27, %v1340_v37  ;;  %v1530_v12 = vpop.permute.xlu0 %1529 }
 0x209   : > { %v1851_v2 = vmax.bf16 %v1530_v12, %v1339_v57  ;;  %1647 = vrot.lane.b32.xlu1 %v4624_v47, %s2137_s14  ;;  %v4628_v12 = vld [vmem:[#allocation145_spill] sm:$0xff] }
 0x20a   : > { %1981 = vst.msk [vmem:[%s3440_s18 + $0xfc] sm:$0xf] %vm1917_vm0, %v1852_v35  ;;  %1645 = vrot.lane.b32.xlu0 %v4626_v24, %s2137_s14  ;;  %v1344_v35 = vmax.bf16 %v4629_v16, %v4511_v14  ;;  %v4633_v14 = vld [vmem:[#allocation155_spill] sm:$0xff]  ;;  %v4634_v16 = vld [vmem:[#allocation150_spill] sm:$0xff] }
 0x20b   : > { %1980 = vst.msk [vmem:[%s3440_s18 + $0xf8] sm:$0xf] %vm1917_vm0, %v1851_v2  ;;  %v1536_v37 = vpop.permute.xlu1 %1535  ;;  %v1343_v2 = vmax.bf16 %v4631_v32, %v4513_v42  ;;  %v4635_v42 = vld [vmem:[#allocation156_spill] sm:$0xff] }
 0x20c   : > { %v1854_v1 = vmax.bf16 %v1536_v37, %v1342_v19  ;;  %v1534_v57 = vpop.permute.xlu0 %1533 }
 0x20d   : > { %v1853_v27 = vmax.bf16 %v1534_v57, %v1341_v55  ;;  %1651 = vrot.lane.b32.xlu1 %v4628_v12, %s2137_s14  ;;  %v4632_v57 = vld [vmem:[#allocation149_spill] sm:$0xff] }
 0x20e   : > { %1983 = vst.msk [vmem:[%s3440_s18 + $0x104] sm:$0xf] %vm1917_vm0, %v1854_v1  ;;  %1649 = vrot.lane.b32.xlu0 %v4630_v13, %s2137_s14  ;;  %v1346_v1 = vmax.bf16 %v4633_v14, %v4515_v61  ;;  %v4637_v61 = vld [vmem:[#allocation157_spill] sm:$0xff]  ;;  %v4638_v14 = vld [vmem:[#allocation154_spill] sm:$0xff] }
 0x20f   : > { %1982 = vst.msk [vmem:[%s3440_s18 + $0x100] sm:$0xf] %vm1917_vm0, %v1853_v27  ;;  %v1540_v19 = vpop.permute.xlu1 %1539  ;;  %v1345_v27 = vmax.bf16 %v4635_v42, %v4517_v52  ;;  %v4639_v52 = vld [vmem:[#allocation158_spill] sm:$0xff] }
 0x210   : > { %v1856_v20 = vmax.bf16 %v1540_v19, %v1344_v35  ;;  %v1538_v55 = vpop.permute.xlu0 %1537 }
 0x211   : > { %v1855_v37 = vmax.bf16 %v1538_v55, %v1343_v2  ;;  %1655 = vrot.lane.b32.xlu1 %v4632_v57, %s2137_s14  ;;  %v4636_v55 = vld [vmem:[#allocation153_spill] sm:$0xff] }
 0x212   : > { %1985 = vst.msk [vmem:[%s3440_s18 + $0x10c] sm:$0xf] %vm1917_vm0, %v1856_v20  ;;  %1653 = vrot.lane.b32.xlu0 %v4634_v16, %s2137_s14  ;;  %v1348_v20 = vmax.bf16 %v4637_v61, %v4519_v30  ;;  %v4641_v30 = vld [vmem:[#allocation160_spill] sm:$0xff] }
 0x213   : > { %1984 = vst.msk [vmem:[%s3440_s18 + $0x108] sm:$0xf] %vm1917_vm0, %v1855_v37  ;;  %v1544_v35 = vpop.permute.xlu1 %1543  ;;  %v1347_v37 = vmax.bf16 %v4639_v52, %v4521_v62 }
 0x214   : > { %v1858_v32 = vmax.bf16 %v1544_v35, %v1346_v1  ;;  %v1542_v2 = vpop.permute.xlu0 %1541 }
 0x215   : > { %v1857_v19 = vmax.bf16 %v1542_v2, %v1345_v27  ;;  %1659 = vrot.lane.b32.xlu1 %v4636_v55, %s2137_s14  ;;  %v4640_v2 = vld [vmem:[#allocation159_spill] sm:$0xff] }
 0x216   : > { %1987 = vst.msk [vmem:[%s3440_s18 + $0x114] sm:$0xf] %vm1917_vm0, %v1858_v32  ;;  %1657 = vrot.lane.b32.xlu0 %v4638_v14, %s2137_s14  ;;  %v1350_v55 = vmax.bf16 %v4640_v2, %v4523_v15  ;;  %v1349_v32 = vmax.bf16 %v4641_v30, %v4525_v8  ;;  %v4643_v15 = vld [vmem:[#allocation162_spill] sm:$0xff] }
 0x217   : > { %1986 = vst.msk [vmem:[%s3440_s18 + $0x110] sm:$0xf] %vm1917_vm0, %v1857_v19  ;;  %v1548_v1 = vpop.permute.xlu1 %1547 }
 0x218   : > { %v1860_v42 = vmax.bf16 %v1548_v1, %v1348_v20  ;;  %v1546_v27 = vpop.permute.xlu0 %1545  ;;  %v4642_v20 = vld [vmem:[#allocation161_spill] sm:$0xff] }
 0x219   : > { %v1859_v35 = vmax.bf16 %v1546_v27, %v1347_v37  ;;  %v1352_v1 = vmax.bf16 %v4642_v20, %v4527_v51  ;;  %v1351_v37 = vmax.bf16 %v4643_v15, %v4529_v21  ;;  %v4645_v51 = vld [vmem:[#allocation164_spill] sm:$0xff] }
 0x21a   : > { %1989 = vst.msk [vmem:[%s3440_s18 + $0x11c] sm:$0xf] %vm1917_vm0, %v1860_v42  ;;  %v1353_v30 = vmax.bf16 %v4645_v51, %v4533_v33  ;;  %v4650_v51 = vld [vmem:[#allocation169_spill] sm:$0xff] }
 0x21b   : > { %1988 = vst.msk [vmem:[%s3440_s18 + $0x118] sm:$0xf] %vm1917_vm0, %v1859_v35  ;;  %v1552_v62 = vpop.permute.xlu1 %1551 }
 0x21c   : > { %v1862_v61 = vmax.bf16 %v1552_v62, %v1350_v55  ;;  %v1550_v19 = vpop.permute.xlu0 %1549  ;;  %v4644_v55 = vld [vmem:[#allocation163_spill] sm:$0xff] }
 0x21d   : > { %v1861_v52 = vmax.bf16 %v1550_v19, %v1349_v32  ;;  %v1354_v2 = vmax.bf16 %v4644_v55, %v4531_v39  ;;  %v4646_v19 = vld [vmem:[#allocation165_spill] sm:$0xff]  ;;  %v4647_v39 = vld [vmem:[#allocation166_spill] sm:$0xff] }
 0x21e   : > { %1991 = vst.msk [vmem:[%s3440_s18 + $0x124] sm:$0xf] %vm1917_vm0, %v1862_v61  ;;  %v1355_v20 = vmax.bf16 %v4647_v39, %v4537_v46 }
 0x21f   : > { %1990 = vst.msk [vmem:[%s3440_s18 + $0x120] sm:$0xf] %vm1917_vm0, %v1861_v52  ;;  %v1556_v8 = vpop.permute.xlu1 %1555  ;;  %v1356_v52 = vmax.bf16 %v4646_v19, %v4535_v17  ;;  %v4649_v17 = vld [vmem:[#allocation168_spill] sm:$0xff]  ;;  %v4652_v19 = vld [vmem:[#allocation171_spill] sm:$0xff] }
 0x220   : > { %v1864_v42 = vmax.bf16 %v1556_v8, %v1352_v1  ;;  %v1554_v27 = vpop.permute.xlu0 %1553  ;;  %v4648_v8 = vld [vmem:[#allocation167_spill] sm:$0xff] }
 0x221   : > { %v1863_v35 = vmax.bf16 %v1554_v27, %v1351_v37  ;;  %v1357_v27 = vmax.bf16 %v4649_v17, %v4541_v58 }
 0x222   : > { %1993 = vst.msk [vmem:[%s3440_s18 + $0x12c] sm:$0xf] %vm1917_vm0, %v1864_v42  ;;  %v1358_v42 = vmax.bf16 %v4648_v8, %v4539_v11  ;;  %v4651_v11 = vld [vmem:[#allocation170_spill] sm:$0xff] }
 0x223   : > { %1992 = vst.msk [vmem:[%s3440_s18 + $0x128] sm:$0xf] %vm1917_vm0, %v1863_v35  ;;  %v1560_v21 = vpop.permute.xlu1 %1559 }
 0x224   : > { %v1866_v32 = vmax.bf16 %v1560_v21, %v1354_v2  ;;  %v1558_v62 = vpop.permute.xlu0 %1557  ;;  %v1359_v21 = vmax.bf16 %v4651_v11, %v4545_v6  ;;  %v4658_v11 = vld [vmem:[#allocation177_spill] sm:$0xff] }
 0x225   : > { %v1865_v61 = vmax.bf16 %v1558_v62, %v1353_v30  ;;  %v1360_v30 = vmax.bf16 %v4650_v51, %v4543_v34  ;;  %v4653_v34 = vld [vmem:[#allocation172_spill] sm:$0xff] }
 0x226   : > { %1995 = vst.msk [vmem:[%s3440_s18 + $0x134] sm:$0xf] %vm1917_vm0, %v1866_v32  ;;  %v1361_v39 = vmax.bf16 %v4653_v34, %v4549_v22 }
 0x227   : > { %1994 = vst.msk [vmem:[%s3440_s18 + $0x130] sm:$0xf] %vm1917_vm0, %v1865_v61  ;;  %v1564_v33 = vpop.permute.xlu1 %1563 }
 0x228   : > { %v1868_v1 = vmax.bf16 %v1564_v33, %v1356_v52  ;;  %v1562_v15 = vpop.permute.xlu0 %1561  ;;  %v1362_v52 = vmax.bf16 %v4652_v19, %v4547_v44  ;;  %v4655_v44 = vld [vmem:[#allocation174_spill] sm:$0xff]  ;;  %v4660_v19 = vld [vmem:[#allocation179_spill] sm:$0xff] }
 0x229   : > { %v1867_v37 = vmax.bf16 %v1562_v15, %v1355_v20  ;;  %v4654_v15 = vld [vmem:[#allocation173_spill] sm:$0xff]  ;;  %v1363_v8 = vmax.bf16 %v4655_v44, %v4553_v38 }
 0x22a   : > { %1997 = vst.msk [vmem:[%s3440_s18 + $0x13c] sm:$0xf] %vm1917_vm0, %v1868_v1 }
 0x22b   : > { %1996 = vst.msk [vmem:[%s3440_s18 + $0x138] sm:$0xf] %vm1917_vm0, %v1867_v37  ;;  %v1568_v46 = vpop.permute.xlu1 %1567  ;;  %v1364_v37 = vmax.bf16 %v4654_v15, %v4551_v54  ;;  %v4657_v54 = vld [vmem:[#allocation176_spill] sm:$0xff] }
 0x22c   : > { %v1870_v35 = vmax.bf16 %v1568_v46, %v1358_v42  ;;  %v1566_v55 = vpop.permute.xlu0 %1565  ;;  %v4656_v46 = vld [vmem:[#allocation175_spill] sm:$0xff] }
 0x22d   : > { %v1869_v2 = vmax.bf16 %v1566_v55, %v1357_v27  ;;  %v1365_v55 = vmax.bf16 %v4657_v54, %v4557_v53  ;;  %v4666_v54 = vld [vmem:[#allocation185_spill] sm:$0xff] }
 0x22e   : > { %1999 = vst.msk [vmem:[%s3440_s18 + $0x144] sm:$0xf] %vm1917_vm0, %v1870_v35  ;;  %v1366_v35 = vmax.bf16 %v4656_v46, %v4555_v0  ;;  %v4659_v0 = vld [vmem:[#allocation178_spill] sm:$0xff] }
 0x22f   : > { %1998 = vst.msk [vmem:[%s3440_s18 + $0x140] sm:$0xf] %vm1917_vm0, %v1869_v2  ;;  %v1572_v58 = vpop.permute.xlu1 %1571 }
 0x230   : > { %v1872_v32 = vmax.bf16 %v1572_v58, %v1360_v30  ;;  %v1570_v62 = vpop.permute.xlu0 %1569  ;;  %v1367_v58 = vmax.bf16 %v4659_v0, %v4561_v4 }
 0x231   : > { %v1871_v61 = vmax.bf16 %v1570_v62, %v1359_v21  ;;  %v1368_v21 = vmax.bf16 %v4658_v11, %v4559_v10  ;;  %v4661_v10 = vld [vmem:[#allocation180_spill] sm:$0xff]  ;;  %v4668_v11 = vld [vmem:[#allocation187_spill] sm:$0xff] }
 0x232   : > { %2001 = vst.msk [vmem:[%s3440_s18 + $0x14c] sm:$0xf] %vm1917_vm0, %v1872_v32  ;;  %v1369_v34 = vmax.bf16 %v4661_v10, %v4565_v25 }
 0x233   : > { %2000 = vst.msk [vmem:[%s3440_s18 + $0x148] sm:$0xf] %vm1917_vm0, %v1871_v61  ;;  %v1576_v6 = vpop.permute.xlu1 %1575 }
 0x234   : > { %v1874_v20 = vmax.bf16 %v1576_v6, %v1362_v52  ;;  %v1574_v33 = vpop.permute.xlu0 %1573  ;;  %v1370_v52 = vmax.bf16 %v4660_v19, %v4563_v23  ;;  %v4663_v23 = vld [vmem:[#allocation182_spill] sm:$0xff] }
 0x235   : > { %v1873_v1 = vmax.bf16 %v1574_v33, %v1361_v39  ;;  %v4662_v33 = vld [vmem:[#allocation181_spill] sm:$0xff]  ;;  %v1371_v15 = vmax.bf16 %v4663_v23, %v4569_v43 }
 0x236   : > { %2003 = vst.msk [vmem:[%s3440_s18 + $0x154] sm:$0xf] %vm1917_vm0, %v1874_v20  ;;  %v4674_v23 = vld [vmem:[#allocation193_spill] sm:$0xff] }
 0x237   : > { %2002 = vst.msk [vmem:[%s3440_s18 + $0x150] sm:$0xf] %vm1917_vm0, %v1873_v1  ;;  %v1580_v22 = vpop.permute.xlu1 %1579  ;;  %v1372_v1 = vmax.bf16 %v4662_v33, %v4567_v36  ;;  %v4665_v36 = vld [vmem:[#allocation184_spill] sm:$0xff] }
 0x238   : > { %v1876_v42 = vmax.bf16 %v1580_v22, %v1364_v37  ;;  %v1578_v17 = vpop.permute.xlu0 %1577  ;;  %v4664_v22 = vld [vmem:[#allocation183_spill] sm:$0xff] }
 0x239   : > { %v1875_v27 = vmax.bf16 %v1578_v17, %v1363_v8  ;;  %v1373_v17 = vmax.bf16 %v4665_v36, %v4573_v63  ;;  %v4677_v36 = vld [vmem:[#allocation118_spill] sm:$0xff] }
 0x23a   : > { %2005 = vst.msk [vmem:[%s3440_s18 + $0x15c] sm:$0xf] %vm1917_vm0, %v1876_v42  ;;  %v1374_v42 = vmax.bf16 %v4664_v22, %v4571_v48  ;;  %v4667_v48 = vld [vmem:[#allocation186_spill] sm:$0xff]  ;;  %v4676_v22 = vld [vmem:[#allocation195_spill] sm:$0xff] }
 0x23b   : > { %2004 = vst.msk [vmem:[%s3440_s18 + $0x158] sm:$0xf] %vm1917_vm0, %v1875_v27  ;;  %v1584_v38 = vpop.permute.xlu1 %1583 }
 0x23c   : > { %v1878_v2 = vmax.bf16 %v1584_v38, %v1366_v35  ;;  %v1582_v51 = vpop.permute.xlu0 %1581  ;;  %v1375_v38 = vmax.bf16 %v4667_v48, %v4577_v18  ;;  %v4681_v48 = vld [vmem:[#allocation122_spill] sm:$0xff] }
 0x23d   : > { %v1877_v30 = vmax.bf16 %v1582_v51, %v1365_v55  ;;  %v1376_v55 = vmax.bf16 %v4666_v54, %v4575_v60  ;;  %v4669_v60 = vld [vmem:[#allocation188_spill] sm:$0xff]  ;;  %v4680_v54 = vld [vmem:[#allocation197_spill] sm:$0xff] }
 0x23e   : > { %2007 = vst.msk [vmem:[%s3440_s18 + $0x164] sm:$0xf] %vm1917_vm0, %v1878_v2  ;;  %v1377_v0 = vmax.bf16 %v4669_v60, %v4581_v45 }
 0x23f   : > { %2006 = vst.msk [vmem:[%s3440_s18 + $0x160] sm:$0xf] %vm1917_vm0, %v1877_v30  ;;  %v1588_v53 = vpop.permute.xlu1 %1587 }
 0x240   : > { %v1880_v32 = vmax.bf16 %v1588_v53, %v1368_v21  ;;  %v1586_v62 = vpop.permute.xlu0 %1585  ;;  %v1378_v21 = vmax.bf16 %v4668_v11, %v4579_v9  ;;  %v4671_v9 = vld [vmem:[#allocation190_spill] sm:$0xff]  ;;  %v4683_v11 = vld [vmem:[#allocation125_spill] sm:$0xff] }
 0x241   : > { %v1879_v61 = vmax.bf16 %v1586_v62, %v1367_v58  ;;  %v4670_v62 = vld [vmem:[#allocation189_spill] sm:$0xff]  ;;  %v1379_v19 = vmax.bf16 %v4671_v9, %v4585_v5  ;;  %v4687_v9 = vld [vmem:[#allocation2_spill] sm:$0xff] }
 0x242   : > { %2009 = vst.msk [vmem:[%s3440_s18 + $0x16c] sm:$0xf] %vm1917_vm0, %v1880_v32 }
 0x243   : > { %2008 = vst.msk [vmem:[%s3440_s18 + $0x168] sm:$0xf] %vm1917_vm0, %v1879_v61  ;;  %v1592_v4 = vpop.permute.xlu1 %1591  ;;  %v1380_v61 = vmax.bf16 %v4670_v62, %v4583_v26  ;;  %v4673_v26 = vld [vmem:[#allocation192_spill] sm:$0xff] }
 0x244   : > { %v1882_v39 = vmax.bf16 %v1592_v4, %v1370_v52  ;;  %v1590_v6 = vpop.permute.xlu0 %1589  ;;  %v4672_v4 = vld [vmem:[#allocation191_spill] sm:$0xff] }
 0x245   : > { %v1881_v20 = vmax.bf16 %v1590_v6, %v1369_v34  ;;  %v1381_v6 = vmax.bf16 %v4673_v26, %v4589_v59  ;;  %v4689_v26 = vld [vmem:[#allocation3_spill] sm:$0xff] }
 0x246   : > { %2011 = vst.msk [vmem:[%s3440_s18 + $0x174] sm:$0xf] %vm1917_vm0, %v1882_v39  ;;  %v1382_v39 = vmax.bf16 %v4672_v4, %v4587_v40  ;;  %v4675_v40 = vld [vmem:[#allocation194_spill] sm:$0xff] }
 0x247   : > { %2010 = vst.msk [vmem:[%s3440_s18 + $0x170] sm:$0xf] %vm1917_vm0, %v1881_v20  ;;  %v1596_v25 = vpop.permute.xlu1 %1595 }
 0x248   : > { %v1884_v37 = vmax.bf16 %v1596_v25, %v1372_v1  ;;  %v1594_v44 = vpop.permute.xlu0 %1593  ;;  %v1383_v25 = vmax.bf16 %v4675_v40, %v4593_v31 }
 0x249   : > { %v1883_v8 = vmax.bf16 %v1594_v44, %v1371_v15  ;;  %v1384_v15 = vmax.bf16 %v4674_v23, %v4591_v56  ;;  %v4678_v56 = vld [vmem:[#allocation196_spill] sm:$0xff]  ;;  %v4691_v23 = vld [vmem:[#allocation5_spill] sm:$0xff] }
 0x24a   : > { %2013 = vst.msk [vmem:[%s3440_s18 + $0x17c] sm:$0xf] %vm1917_vm0, %v1884_v37 }
 0x24b   : > { %2012 = vst.msk [vmem:[%s3440_s18 + $0x178] sm:$0xf] %vm1917_vm0, %v1883_v8  ;;  %v1600_v43 = vpop.permute.xlu1 %1599 }
 0x24c   : > { %v1886_v27 = vmax.bf16 %v1600_v43, %v1374_v42  ;;  %v1598_v46 = vpop.permute.xlu0 %1597  ;;  %v1386_v42 = vmax.bf16 %v4676_v22, %v4595_v7  ;;  %v4682_v7 = vld [vmem:[#allocation198_spill] sm:$0xff] }
 0x24d   : > { %v1885_v35 = vmax.bf16 %v1598_v46, %v1373_v17  ;;  %v1385_v17 = vmax.bf16 %v4678_v56, %v4677_v36 }
 0x24e   : > { %2015 = vst.msk [vmem:[%s3440_s18 + $0x184] sm:$0xf] %vm1917_vm0, %v1886_v27 }
 0x24f   : > { %2014 = vst.msk [vmem:[%s3440_s18 + $0x180] sm:$0xf] %vm1917_vm0, %v1885_v35  ;;  %v1604_v63 = vpop.permute.xlu1 %1603  ;;  %v4679_v35 = vld [vmem:[#allocation121_spill] sm:$0xff] }
 0x250   : > { %v1888_v2 = vmax.bf16 %v1604_v63, %v1376_v55  ;;  %v1602_v51 = vpop.permute.xlu0 %1601  ;;  %v1388_v55 = vmax.bf16 %v4680_v54, %v4679_v35  ;;  %v4697_v54 = vld [vmem:[#allocation11_spill] sm:$0xff] }
 0x251   : > { %v1887_v30 = vmax.bf16 %v1602_v51, %v1375_v38  ;;  %v1387_v38 = vmax.bf16 %v4682_v7, %v4681_v48 }
 0x252   : > { %2017 = vst.msk [vmem:[%s3440_s18 + $0x18c] sm:$0xf] %vm1917_vm0, %v1888_v2 }
 0x253   : > { %2016 = vst.msk [vmem:[%s3440_s18 + $0x188] sm:$0xf] %vm1917_vm0, %v1887_v30  ;;  %v1608_v18 = vpop.permute.xlu1 %1607 }
 0x254   : > { %v1890_v58 = vmax.bf16 %v1608_v18, %v1378_v21  ;;  %v1606_v53 = vpop.permute.xlu0 %1605  ;;  %v4684_v21 = vld [vmem:[#allocation199_spill] sm:$0xff]  ;;  %v4686_v18 = vld [vmem:[#allocation200_spill] sm:$0xff] }
 0x255   : > { %v1889_v32 = vmax.bf16 %v1606_v53, %v1377_v0  ;;  %v1390_v60 = vmax.bf16 %v4684_v21, %v4683_v11  ;;  %v4685_v0 = vld [vmem:[#allocation126_spill] sm:$0xff] }
 0x256   : > { %2019 = vst.msk [vmem:[%s3440_s18 + $0x194] sm:$0xf] %vm1917_vm0, %v1890_v58  ;;  %v1389_v58 = vmax.bf16 %v4686_v18, %v4685_v0 }
 0x257   : > { %2018 = vst.msk [vmem:[%s3440_s18 + $0x190] sm:$0xf] %vm1917_vm0, %v1889_v32  ;;  %v1612_v45 = vpop.permute.xlu1 %1611 }
 0x258   : > { %v1892_v52 = vmax.bf16 %v1612_v45, %v1380_v61  ;;  %v1610_v10 = vpop.permute.xlu0 %1609  ;;  %v4688_v45 = vld [vmem:[#allocation201_spill] sm:$0xff] }
 0x259   : > { %v1891_v34 = vmax.bf16 %v1610_v10, %v1379_v19  ;;  %v1392_v19 = vmax.bf16 %v4687_v9, %v4611_v28  ;;  %v4690_v28 = vld [vmem:[#allocation4_spill] sm:$0xff] }
 0x25a   : > { %2021 = vst.msk [vmem:[%s3440_s18 + $0x19c] sm:$0xf] %vm1917_vm0, %v1892_v52  ;;  %v1391_v52 = vmax.bf16 %v4688_v45, %v4614_v49 }
 0x25b   : > { %2020 = vst.msk [vmem:[%s3440_s18 + $0x198] sm:$0xf] %vm1917_vm0, %v1891_v34  ;;  %v1616_v5 = vpop.permute.xlu1 %1615 }
 0x25c   : > { %v1894_v20 = vmax.bf16 %v1616_v5, %v1382_v39  ;;  %v1614_v33 = vpop.permute.xlu0 %1613  ;;  %v1393_v5 = vmax.bf16 %v4690_v28, %v4618_v41 }
 0x25d   : > { %v1893_v1 = vmax.bf16 %v1614_v33, %v1381_v6  ;;  %v1394_v6 = vmax.bf16 %v4689_v26, %v4616_v29  ;;  %v4692_v29 = vld [vmem:[#allocation6_spill] sm:$0xff] }
 0x25e   : > { %2023 = vst.msk [vmem:[%s3440_s18 + $0x1a4] sm:$0xf] %vm1917_vm0, %v1894_v20  ;;  %v1395_v40 = vmax.bf16 %v4692_v29, %v4622_v3 }
 0x25f   : > { %2022 = vst.msk [vmem:[%s3440_s18 + $0x1a0] sm:$0xf] %vm1917_vm0, %v1893_v1  ;;  %v1620_v59 = vpop.permute.xlu1 %1619 }
 0x260   : > { %v1896_v37 = vmax.bf16 %v1620_v59, %v1384_v15  ;;  %v1618_v44 = vpop.permute.xlu0 %1617  ;;  %v1396_v15 = vmax.bf16 %v4691_v23, %v4620_v50  ;;  %v4694_v50 = vld [vmem:[#allocation8_spill] sm:$0xff] }
 0x261   : > { %v1895_v8 = vmax.bf16 %v1618_v44, %v1383_v25  ;;  %v4693_v44 = vld [vmem:[#allocation7_spill] sm:$0xff]  ;;  %v1397_v22 = vmax.bf16 %v4694_v50, %v4626_v24 }
 0x262   : > { %2025 = vst.msk [vmem:[%s3440_s18 + $0x1ac] sm:$0xf] %vm1917_vm0, %v1896_v37 }
 0x263   : > { %2024 = vst.msk [vmem:[%s3440_s18 + $0x1a8] sm:$0xf] %vm1917_vm0, %v1895_v8  ;;  %v1624_v31 = vpop.permute.xlu1 %1623  ;;  %v1398_v8 = vmax.bf16 %v4693_v44, %v4624_v47  ;;  %v4696_v47 = vld [vmem:[#allocation10_spill] sm:$0xff] }
 0x264   : > { %v1898_v43 = vmax.bf16 %v1624_v31, %v1386_v42  ;;  %v1622_v27 = vpop.permute.xlu0 %1621 }
 0x265   : > { %v1897_v46 = vmax.bf16 %v1622_v27, %v1385_v17  ;;  %v4695_v17 = vld [vmem:[#allocation9_spill] sm:$0xff] }
 0x266   : > { %2027 = vst.msk [vmem:[%s3440_s18 + $0x1b4] sm:$0xf] %vm1917_vm0, %v1898_v43  ;;  %v1400_v31 = vmax.bf16 %v4695_v17, %v4628_v12  ;;  %v1399_v43 = vmax.bf16 %v4696_v47, %v4630_v13  ;;  %v4698_v12 = vld [vmem:[#allocation12_spill] sm:$0xff] }
 0x267   : > { %2026 = vst.msk [vmem:[%s3440_s18 + $0x1b0] sm:$0xf] %vm1917_vm0, %v1897_v46  ;;  %v1628_v63 = vpop.permute.xlu1 %1627  ;;  %v1401_v48 = vmax.bf16 %v4698_v12, %v4634_v16 }
 0x268   : > { %v1900_v2 = vmax.bf16 %v1628_v63, %v1388_v55  ;;  %v1626_v51 = vpop.permute.xlu0 %1625  ;;  %v1402_v55 = vmax.bf16 %v4697_v54, %v4632_v57  ;;  %v4701_v57 = vld [vmem:[#allocation203_spill] sm:$0xff] }
 0x269   : > { %v1899_v30 = vmax.bf16 %v1626_v51, %v1387_v38  ;;  %v4700_v51 = vld [vmem:[#allocation202_spill] sm:$0xff]  ;;  %v1403_v11 = vmax.bf16 %v4701_v57, %v4638_v14 }
 0x26a   : > { %2029 = vst.msk [vmem:[%s3440_s18 + $0x1bc] sm:$0xf] %vm1917_vm0, %v1900_v2  ;;  %v4699_v2 = vld [vmem:[#allocation153_spill] sm:$0xff] }
 0x26b   : > { %2028 = vst.msk [vmem:[%s3440_s18 + $0x1b8] sm:$0xf] %vm1917_vm0, %v1899_v30  ;;  %v1632_v53 = vpop.permute.xlu1 %1631  ;;  %v1404_v30 = vmax.bf16 %v4700_v51, %v4699_v2 }
 0x26c   : > { %v1902_v32 = vmax.bf16 %v1632_v53, %v1390_v60  ;;  %v1630_v62 = vpop.permute.xlu0 %1629 }
 0x26d   : > { %v1901_v61 = vmax.bf16 %v1630_v62, %v1389_v58 }
 0x26e   : > { %2031 = vst.msk [vmem:[%s3440_s18 + $0x1c4] sm:$0xf] %vm1917_vm0, %v1902_v32 }
 0x26f   : > { %2030 = vst.msk [vmem:[%s3440_s18 + $0x1c0] sm:$0xf] %vm1917_vm0, %v1901_v61  ;;  %v1636_v10 = vpop.permute.xlu1 %1635 }
 0x270   : > { %v1904_v34 = vmax.bf16 %v1636_v10, %v1392_v19  ;;  %v1634_v4 = vpop.permute.xlu0 %1633 }
 0x271   : > { %v1903_v39 = vmax.bf16 %v1634_v4, %v1391_v52 }
 0x272   : > { %2033 = vst.msk [vmem:[%s3440_s18 + $0x1cc] sm:$0xf] %vm1917_vm0, %v1904_v34 }
 0x273   : > { %2032 = vst.msk [vmem:[%s3440_s18 + $0x1c8] sm:$0xf] %vm1917_vm0, %v1903_v39  ;;  %v1640_v49 = vpop.permute.xlu1 %1639 }
 0x274   : > { %v1906_v20 = vmax.bf16 %v1640_v49, %v1394_v6  ;;  %v1638_v33 = vpop.permute.xlu0 %1637 }
 0x275   : > { %v1905_v1 = vmax.bf16 %v1638_v33, %v1393_v5 }
 0x276   : > { %2035 = vst.msk [vmem:[%s3440_s18 + $0x1d4] sm:$0xf] %vm1917_vm0, %v1906_v20 }
 0x277   : > { %2034 = vst.msk [vmem:[%s3440_s18 + $0x1d0] sm:$0xf] %vm1917_vm0, %v1905_v1  ;;  %v1644_v41 = vpop.permute.xlu1 %1643 }
 0x278   : > { %v1908_v25 = vmax.bf16 %v1644_v41, %v1396_v15  ;;  %v1642_v59 = vpop.permute.xlu0 %1641 }
 0x279   : > { %v1907_v37 = vmax.bf16 %v1642_v59, %v1395_v40 }
 0x27a   : > { %2037 = vst.msk [vmem:[%s3440_s18 + $0x1dc] sm:$0xf] %vm1917_vm0, %v1908_v25 }
 0x27b   : > { %2036 = vst.msk [vmem:[%s3440_s18 + $0x1d8] sm:$0xf] %vm1917_vm0, %v1907_v37  ;;  %v1648_v3 = vpop.permute.xlu1 %1647 }
 0x27c   : > { %v1910_v42 = vmax.bf16 %v1648_v3, %v1398_v8  ;;  %v1646_v36 = vpop.permute.xlu0 %1645 }
 0x27d   : > { %v1909_v56 = vmax.bf16 %v1646_v36, %v1397_v22 }
 0x27e   : > { %2039 = vst.msk [vmem:[%s3440_s18 + $0x1e4] sm:$0xf] %vm1917_vm0, %v1910_v42 }
 0x27f   : > { %2038 = vst.msk [vmem:[%s3440_s18 + $0x1e0] sm:$0xf] %vm1917_vm0, %v1909_v56  ;;  %v1652_v24 = vpop.permute.xlu1 %1651 }
 0x280   : > { %v1912_v27 = vmax.bf16 %v1652_v24, %v1400_v31  ;;  %v1650_v46 = vpop.permute.xlu0 %1649 }
 0x281   : > { %v1911_v35 = vmax.bf16 %v1650_v46, %v1399_v43 }
 0x282   : > { %2041 = vst.msk [vmem:[%s3440_s18 + $0x1ec] sm:$0xf] %vm1917_vm0, %v1912_v27 }
 0x283   : > { %2040 = vst.msk [vmem:[%s3440_s18 + $0x1e8] sm:$0xf] %vm1917_vm0, %v1911_v35  ;;  %v1656_v13 = vpop.permute.xlu1 %1655 }
 0x284   : > { %v1914_v7 = vmax.bf16 %v1656_v13, %v1402_v55  ;;  %v1654_v38 = vpop.permute.xlu0 %1653 }
 0x285   : > { %v1913_v63 = vmax.bf16 %v1654_v38, %v1401_v48 }
 0x286   : > { %2043 = vst.msk [vmem:[%s3440_s18 + $0x1f4] sm:$0xf] %vm1917_vm0, %v1914_v7 }
 0x287   : > { %2042 = vst.msk [vmem:[%s3440_s18 + $0x1f0] sm:$0xf] %vm1917_vm0, %v1913_v63  ;;  %v1660_v21 = vpop.permute.xlu1 %1659 }
 0x288   : > { %v1916_v60 = vmax.bf16 %v1660_v21, %v1404_v30  ;;  %v1658_v0 = vpop.permute.xlu0 %1657 }
 0x289   : > { %v1915_v16 = vmax.bf16 %v1658_v0, %v1403_v11 }
 0x28a   : > { %2045 = vst.msk [vmem:[%s3440_s18 + $0x1fc] sm:$0xf] %vm1917_vm0, %v1916_v60 }
 0x28b   : > { %2044 = vst.msk [vmem:[%s3440_s18 + $0x1f8] sm:$0xf] %vm1917_vm0, %v1915_v16 }
 0x28c PF: > { %s11_s6 = sadd.s32 1, %s2134_s6  }
 0x28d   : > { %p8_p4 = scmp.ge.s32.totalorder %s11_s6, 4  }
 0x28f   :  { %10 = sbr.rel (!%p8_p4) target bundleno = 1 (0x1), region = 54 }

// kernel: forward.10
= control target key start
LH: loop header
LB: loop body
LE: loop exit
PB: predicated region body
PF: predicated region fallthrough
CT: control target
= control target key end

     0   :  { %s2118_s12 = smov 0   ;;  %s2521_s0 = inlined_call_operand.vmem [shape: bf16[480,512], index: 0, kind: input, shape index: {}]   ;;  %s2522_s1 = inlined_call_operand.vmem [shape: bf16[512,64], index: 1, kind: input, shape index: {}]   ;;  %s2523_s2 = inlined_call_operand.vmem [shape: f32[1,64], index: 2, kind: input, shape index: {}]   ;;  %s2524_s3 = inlined_call_operand.vmem [shape: bf16[480,64], index: 3, kind: output, shape index: {}]  }
   0x1 LB: > { %s1494_s13 = sadd.s32 4294967295, %s2096_s12   ;;  %p1498_p0 = scmp.ge.s32.totalorder %s2096_s12, 1  ;;  %s2096_s12 = sphi %s2118_s12, %s13_s12  }
   0x2   : > { %p139_p1 = scmp.lt.s32.totalorder %s2096_s12, 3 }
   0x4   : > { %p140_p2 = pnand %p1498_p0, %p139_p1 }
   0x5   : > { %v1908_v0 = vld [vmem:[%s2522_s1 + $0x40] sm:$0xff] (!%p140_p2)   ;;  %v1912_v4 = vld [vmem:[%s2522_s1 + $0x48] sm:$0xff] (!%p140_p2)   ;;  %v1916_v8 = vld [vmem:[%s2522_s1 + $0x50] sm:$0xff] (!%p140_p2)   ;;  %s164_s19 = smul.u32 (!%p140_p2), 30, %s1494_s13  ;;  %vm1407_vm1 = vcmask (!%p140_p2), 519168  }
   0x6   : > { %143 = sbr.rel (%p140_p2) target bundleno = 393 (0x189), region = 32  ;;  %v1909_v1 = vld [vmem:[%s2522_s1 + $0xc0] sm:$0xff] (!%p140_p2)   ;;  %1688 = vmatprep.subr.bf16.mxu0 (!%p140_p2), %v1908_v0  ;;  %v1913_v5 = vld [vmem:[%s2522_s1 + $0xc8] sm:$0xff] (!%p140_p2)   ;;  %v1917_v9 = vld [vmem:[%s2522_s1 + $0xd0] sm:$0xff] (!%p140_p2)  }
   0x7   : > { %v1910_v2 = vld [vmem:[%s2522_s1] sm:$0xff] (!%p140_p2)   ;;  %1794 = vmatprep.subr.bf16.mxu1 (!%p140_p2), %v1909_v1  ;;  %v1914_v6 = vld [vmem:[%s2522_s1 + $0x8] sm:$0xff] (!%p140_p2)   ;;  %v1918_v10 = vld [vmem:[%s2522_s1 + $0x10] sm:$0xff] (!%p140_p2)   ;;  %p165_p3 = scmp.lt.s32.totalorder (!%p140_p2), %s164_s19, 59 }
   0x8   : > { %v1911_v3 = vld [vmem:[%s2522_s1 + $0x80] sm:$0xff] (!%p140_p2)   ;;  %1689 = vmatpush3.bf16.msra.mxu0 (!%p140_p2), %v1910_v2  ;;  %v1915_v7 = vld [vmem:[%s2522_s1 + $0x88] sm:$0xff] (!%p140_p2)   ;;  %v1919_v11 = vld [vmem:[%s2522_s1 + $0x90] sm:$0xff] (!%p140_p2)  }
   0x9   : > { %1795 = vmatpush3.bf16.msra.mxu1 (!%p140_p2), %v1911_v3  ;;  %1690 = vmatprep.subr.bf16.mxu0 (!%p140_p2), %v1912_v4  ;;  %v1920_v12 = vld [vmem:[%s2522_s1 + $0x58] sm:$0xff] (!%p140_p2)   ;;  %v1924_v16 = vld [vmem:[%s2522_s1 + $0x60] sm:$0xff] (!%p140_p2)   ;;  %v1928_v20 = vld [vmem:[%s2522_s1 + $0x68] sm:$0xff] (!%p140_p2)  }
   0xa   : > { %1796 = vmatprep.subr.bf16.mxu1 (!%p140_p2), %v1913_v5  ;;  %v1921_v13 = vld [vmem:[%s2522_s1 + $0xd8] sm:$0xff] (!%p140_p2)   ;;  %v1925_v17 = vld [vmem:[%s2522_s1 + $0xe0] sm:$0xff] (!%p140_p2)   ;;  %v1929_v21 = vld [vmem:[%s2522_s1 + $0xe8] sm:$0xff] (!%p140_p2)  }
   0xb   : > { %v1922_v14 = vld [vmem:[%s2522_s1 + $0x18] sm:$0xff] (!%p140_p2)   ;;  %v1926_v18 = vld [vmem:[%s2522_s1 + $0x20] sm:$0xff] (!%p140_p2)   ;;  %v1930_v22 = vld [vmem:[%s2522_s1 + $0x28] sm:$0xff] (!%p140_p2)  }
   0xc   : > { %1691 = vmatpush3.bf16.msra.mxu0 (!%p140_p2), %v1914_v6  ;;  %v1923_v15 = vld [vmem:[%s2522_s1 + $0x98] sm:$0xff] (!%p140_p2)   ;;  %v1927_v19 = vld [vmem:[%s2522_s1 + $0xa0] sm:$0xff] (!%p140_p2)   ;;  %v1931_v23 = vld [vmem:[%s2522_s1 + $0xa8] sm:$0xff] (!%p140_p2)  }
   0xd   : > { %1797 = vmatpush3.bf16.msra.mxu1 %v1915_v7  ;;  %1692 = vmatprep.subr.bf16.mxu0 %v1916_v8  ;;  %s2526_s19 = smov (!%p165_p3, %s164_s19), 59  ;;  %v1932_v24 = vld [vmem:[%s2522_s1 + $0x70] sm:$0xff]   ;;  %v1936_v28 = vld [vmem:[%s2522_s1 + $0x78] sm:$0xff]  }
   0xe   : > { %1798 = vmatprep.subr.bf16.mxu1 %v1917_v9  ;;  %v1933_v25 = vld [vmem:[%s2522_s1 + $0xf0] sm:$0xff]   ;;  %s1657_s18 = sshll.u32 %s2526_s19, 4  ;;  %v1937_v29 = vld [vmem:[%s2522_s1 + $0xf8] sm:$0xff]   ;;  %s1501_s7 = sshll.u32 %s2526_s19, 2 }
   0xf   : > { %v1934_v26 = vld [vmem:[%s2522_s1 + $0x30] sm:$0xff]   ;;  %s2224_s13 = scalar_lea.vmem %s2521_s0, %s1657_s18  ;;  %v1938_v30 = vld [vmem:[%s2522_s1 + $0x38] sm:$0xff]   ;;  %s2321_s10 = scalar_lea.vmem %s2524_s3, %s1501_s7 }
  0x10   : > { %1693 = vmatpush3.bf16.msra.mxu0 %v1918_v10  ;;  %v1935_v27 = vld [vmem:[%s2522_s1 + $0xb0] sm:$0xff]   ;;  %v1939_v31 = vld [vmem:[%s2522_s1 + $0xb8] sm:$0xff]  }
  0x11   : > { %1799 = vmatpush3.bf16.msra.mxu1 %v1919_v11  ;;  %1694 = vmatprep.subr.bf16.mxu0 %v1920_v12  ;;  %v1940_v32 = vld [vmem:[%s2224_s13] ss:$16 sps:$4 sm:$0xff]   ;;  %v1942_v33 = vld [vmem:[%s2224_s13 + $0x4] ss:$16 sps:$4 sm:$0xff]   ;;  %v1943_v34 = vld [vmem:[%s2224_s13 + $0x8] ss:$16 sps:$4 sm:$0xff]  }
  0x12   : > { %1800 = vmatprep.subr.bf16.mxu1 %v1921_v13  ;;  %v1945_v35 = vld [vmem:[%s2224_s13 + $0xc] ss:$16 sps:$4 sm:$0xff]   ;;  %833 = vmatprep.mubr.bf16.mxu0 %v1942_v33  ;;  %v1946_v36 = vld [vmem:[%s2224_s13 + $0x24] ss:$16 sps:$4 sm:$0xff]   ;;  %v1950_v38 = vld [vmem:[%s2224_s13 + $0x20] ss:$16 sps:$4 sm:$0xff]  }
  0x13   : > { %986 = vmatprep.mubr.bf16.mxu1 %v1945_v35  ;;  %v1948_v37 = vld [vmem:[%s2224_s13 + $0x2c] ss:$16 sps:$4 sm:$0xff]   ;;  %v1951_v39 = vld [vmem:[%s2224_s13 + $0x28] ss:$16 sps:$4 sm:$0xff]   ;;  %v1952_v40 = vld [vmem:[%s2224_s13 + $0x44] ss:$16 sps:$4 sm:$0xff]  }
  0x14   : > { %1695 = vmatpush3.bf16.msra.mxu0 %v1922_v14  ;;  %v1954_v41 = vld [vmem:[%s2224_s13 + $0x4c] ss:$16 sps:$4 sm:$0xff]   ;;  %v1956_v42 = vld [vmem:[%s2224_s13 + $0x40] ss:$16 sps:$4 sm:$0xff]   ;;  %v1957_v43 = vld [vmem:[%s2224_s13 + $0x48] ss:$16 sps:$4 sm:$0xff]  }
  0x15   : > { %1801 = vmatpush3.bf16.msra.mxu1 %v1923_v15  ;;  %1696 = vmatprep.subr.bf16.mxu0 %v1924_v16  ;;  %v1958_v44 = vld [vmem:[%s2224_s13 + $0x64] ss:$16 sps:$4 sm:$0xff]   ;;  %v1960_v45 = vld [vmem:[%s2224_s13 + $0x6c] ss:$16 sps:$4 sm:$0xff]   ;;  %v1962_v46 = vld [vmem:[%s2224_s13 + $0x60] ss:$16 sps:$4 sm:$0xff]  }
  0x16   : > { %1802 = vmatprep.subr.bf16.mxu1 %v1925_v17  ;;  %v1963_v47 = vld [vmem:[%s2224_s13 + $0x68] ss:$16 sps:$4 sm:$0xff]   ;;  %v1964_v48 = vld [vmem:[%s2224_s13 + $0x84] ss:$16 sps:$4 sm:$0xff]   ;;  %v1966_v49 = vld [vmem:[%s2224_s13 + $0x8c] ss:$16 sps:$4 sm:$0xff]  }
  0x17   : > { %v1968_v50 = vld [vmem:[%s2224_s13 + $0x80] ss:$16 sps:$4 sm:$0xff]   ;;  %v1969_v51 = vld [vmem:[%s2224_s13 + $0x88] ss:$16 sps:$4 sm:$0xff]   ;;  %v1970_v52 = vld [vmem:[%s2224_s13 + $0xa4] ss:$16 sps:$4 sm:$0xff]  }
  0x18   : > { %1697 = vmatpush3.bf16.msra.mxu0 %v1926_v18  ;;  %v1972_v53 = vld [vmem:[%s2224_s13 + $0xac] ss:$16 sps:$4 sm:$0xff]   ;;  %v1974_v54 = vld [vmem:[%s2224_s13 + $0xa0] ss:$16 sps:$4 sm:$0xff]   ;;  %v1975_v55 = vld [vmem:[%s2224_s13 + $0xa8] ss:$16 sps:$4 sm:$0xff]  }
  0x19   : > { %1803 = vmatpush3.bf16.msra.mxu1 %v1927_v19  ;;  %1698 = vmatprep.subr.bf16.mxu0 %v1928_v20  ;;  %v1976_v56 = vld [vmem:[%s2224_s13 + $0xc4] ss:$16 sps:$4 sm:$0xff]   ;;  %v1978_v57 = vld [vmem:[%s2224_s13 + $0xcc] ss:$16 sps:$4 sm:$0xff]   ;;  %v1980_v58 = vld [vmem:[%s2224_s13 + $0xc0] ss:$16 sps:$4 sm:$0xff]  }
  0x1a   : > { %1804 = vmatprep.subr.bf16.mxu1 %v1929_v21  ;;  %v1981_v59 = vld [vmem:[%s2224_s13 + $0xc8] ss:$16 sps:$4 sm:$0xff]   ;;  %v1982_v60 = vld [vmem:[%s2224_s13 + $0xe4] ss:$16 sps:$4 sm:$0xff]   ;;  %v1984_v61 = vld [vmem:[%s2224_s13 + $0xec] ss:$16 sps:$4 sm:$0xff]  }
  0x1b   : > { %v1986_v62 = vld [vmem:[%s2224_s13 + $0xe0] ss:$16 sps:$4 sm:$0xff]   ;;  %v1987_v63 = vld [vmem:[%s2224_s13 + $0xe8] ss:$16 sps:$4 sm:$0xff]   ;;  %v1988_v0 = vld [vmem:[%s2224_s13 + $0x104] ss:$16 sps:$4 sm:$0xff]  }
  0x1c   : > { %1699 = vmatpush3.bf16.msra.mxu0 %v1930_v22  ;;  %v1990_v1 = vld [vmem:[%s2224_s13 + $0x10c] ss:$16 sps:$4 sm:$0xff]   ;;  %v1992_v2 = vld [vmem:[%s2224_s13 + $0x100] ss:$16 sps:$4 sm:$0xff]   ;;  %v1993_v3 = vld [vmem:[%s2224_s13 + $0x108] ss:$16 sps:$4 sm:$0xff]  }
  0x1d   : > { %1805 = vmatpush3.bf16.msra.mxu1 %v1931_v23  ;;  %1700 = vmatprep.subr.bf16.mxu0 %v1932_v24  ;;  %v1994_v4 = vld [vmem:[%s2224_s13 + $0x124] ss:$16 sps:$4 sm:$0xff]   ;;  %v1996_v5 = vld [vmem:[%s2224_s13 + $0x12c] ss:$16 sps:$4 sm:$0xff]   ;;  %v1998_v6 = vld [vmem:[%s2224_s13 + $0x120] ss:$16 sps:$4 sm:$0xff]  }
  0x1e   : > { %1806 = vmatprep.subr.bf16.mxu1 %v1933_v25  ;;  %v1999_v7 = vld [vmem:[%s2224_s13 + $0x128] ss:$16 sps:$4 sm:$0xff]   ;;  %v2000_v8 = vld [vmem:[%s2224_s13 + $0x144] ss:$16 sps:$4 sm:$0xff]   ;;  %v2002_v9 = vld [vmem:[%s2224_s13 + $0x14c] ss:$16 sps:$4 sm:$0xff]  }
  0x1f   : > { %v2004_v10 = vld [vmem:[%s2224_s13 + $0x140] ss:$16 sps:$4 sm:$0xff]   ;;  %v2005_v11 = vld [vmem:[%s2224_s13 + $0x148] ss:$16 sps:$4 sm:$0xff]   ;;  %v2006_v12 = vld [vmem:[%s2224_s13 + $0x164] ss:$16 sps:$4 sm:$0xff]  }
  0x20   : > { %1701 = vmatpush3.bf16.msra.mxu0 %v1934_v26  ;;  %v2008_v13 = vld [vmem:[%s2224_s13 + $0x16c] ss:$16 sps:$4 sm:$0xff]   ;;  %v2010_v14 = vld [vmem:[%s2224_s13 + $0x160] ss:$16 sps:$4 sm:$0xff]   ;;  %v2011_v15 = vld [vmem:[%s2224_s13 + $0x168] ss:$16 sps:$4 sm:$0xff]  }
  0x21   : > { %1807 = vmatpush3.bf16.msra.mxu1 %v1935_v27  ;;  %1702 = vmatprep.subr.bf16.mxu0 %v1936_v28  ;;  %v2012_v16 = vld [vmem:[%s2224_s13 + $0x184] ss:$16 sps:$4 sm:$0xff]   ;;  %v2014_v17 = vld [vmem:[%s2224_s13 + $0x18c] ss:$16 sps:$4 sm:$0xff]   ;;  %v2016_v18 = vld [vmem:[%s2224_s13 + $0x180] ss:$16 sps:$4 sm:$0xff]  }
  0x22   : > { %1808 = vmatprep.subr.bf16.mxu1 %v1937_v29  ;;  %v2017_v19 = vld [vmem:[%s2224_s13 + $0x188] ss:$16 sps:$4 sm:$0xff]   ;;  %v2018_v20 = vld [vmem:[%s2224_s13 + $0x1a4] ss:$16 sps:$4 sm:$0xff]   ;;  %v2020_v21 = vld [vmem:[%s2224_s13 + $0x1ac] ss:$16 sps:$4 sm:$0xff]  }
  0x23   : > { %v2022_v22 = vld [vmem:[%s2224_s13 + $0x1a0] ss:$16 sps:$4 sm:$0xff]   ;;  %v2023_v23 = vld [vmem:[%s2224_s13 + $0x1a8] ss:$16 sps:$4 sm:$0xff]   ;;  %v2024_v24 = vld [vmem:[%s2224_s13 + $0x1c4] ss:$16 sps:$4 sm:$0xff]  }
  0x24   : > { %1703 = vmatpush3.bf16.msra.mxu0 %v1938_v30  ;;  %v2026_v25 = vld [vmem:[%s2224_s13 + $0x1cc] ss:$16 sps:$4 sm:$0xff]   ;;  %v2028_v26 = vld [vmem:[%s2224_s13 + $0x1c0] ss:$16 sps:$4 sm:$0xff]   ;;  %v2029_v27 = vld [vmem:[%s2224_s13 + $0x1c8] ss:$16 sps:$4 sm:$0xff]  }
  0x25   : > { %1809 = vmatpush3.bf16.msra.mxu1 %v1939_v31  ;;  %v2295_v30 = vld [vmem:[%s2523_s2] ss:$0 sm:$0xff] }
  0x27   : > { %834 = vmatmul.mubr.bf16.vlgmr.msra.gmra.mrb[0].mxu0 %v1940_v32 }
  0x28   : > { %987 = vmatmul.mubr.bf16.vlgmr.msra.gmra.mrb[0].mxu1 %v1943_v34  ;;  %841 = vmatprep.mubr.bf16.mxu0 %v1946_v36 }
  0x29   : > { %994 = vmatprep.mubr.bf16.mxu1 %v1948_v37 }
  0x2f   : > { %842 = vmatmul.mubr.bf16.gmra.mrb[4].mxu0 %v1950_v38 }
  0x30   : > { %995 = vmatmul.mubr.bf16.gmra.mrb[4].mxu1 %v1951_v39  ;;  %849 = vmatprep.mubr.bf16.mxu0 %v1952_v40 }
  0x31   : > { %1002 = vmatprep.mubr.bf16.mxu1 %v1954_v41 }
  0x37   : > { %850 = vmatmul.mubr.bf16.gmra.mrb[8].mxu0 %v1956_v42 }
  0x38   : > { %1003 = vmatmul.mubr.bf16.gmra.mrb[8].mxu1 %v1957_v43  ;;  %857 = vmatprep.mubr.bf16.mxu0 %v1958_v44 }
  0x39   : > { %1010 = vmatprep.mubr.bf16.mxu1 %v1960_v45 }
  0x3f   : > { %858 = vmatmul.mubr.bf16.gmra.mrb[12].mxu0 %v1962_v46 }
  0x40   : > { %1011 = vmatmul.mubr.bf16.gmra.mrb[12].mxu1 %v1963_v47  ;;  %865 = vmatprep.mubr.bf16.mxu0 %v1964_v48 }
  0x41   : > { %1018 = vmatprep.mubr.bf16.mxu1 %v1966_v49 }
  0x47   : > { %866 = vmatmul.mubr.bf16.gmra.mrb[16].mxu0 %v1968_v50 }
  0x48   : > { %1019 = vmatmul.mubr.bf16.gmra.mrb[16].mxu1 %v1969_v51  ;;  %873 = vmatprep.mubr.bf16.mxu0 %v1970_v52 }
  0x49   : > { %1026 = vmatprep.mubr.bf16.mxu1 %v1972_v53 }
  0x4f   : > { %874 = vmatmul.mubr.bf16.gmra.mrb[20].mxu0 %v1974_v54 }
  0x50   : > { %1027 = vmatmul.mubr.bf16.gmra.mrb[20].mxu1 %v1975_v55  ;;  %881 = vmatprep.mubr.bf16.mxu0 %v1976_v56 }
  0x51   : > { %1034 = vmatprep.mubr.bf16.mxu1 %v1978_v57 }
  0x57   : > { %882 = vmatmul.mubr.bf16.gmra.mrb[24].mxu0 %v1980_v58 }
  0x58   : > { %1035 = vmatmul.mubr.bf16.gmra.mrb[24].mxu1 %v1981_v59  ;;  %889 = vmatprep.mubr.bf16.mxu0 %v1982_v60 }
  0x59   : > { %1042 = vmatprep.mubr.bf16.mxu1 %v1984_v61 }
  0x5f   : > { %890 = vmatmul.mubr.bf16.gmra.mrb[28].mxu0 %v1986_v62 }
  0x60   : > { %1043 = vmatmul.mubr.bf16.gmra.mrb[28].mxu1 %v1987_v63  ;;  %897 = vmatprep.mubr.bf16.mxu0 %v1988_v0 }
  0x61   : > { %1050 = vmatprep.mubr.bf16.mxu1 %v1990_v1 }
  0x67   : > { %898 = vmatmul.mubr.bf16.gmra.mrb[32].mxu0 %v1992_v2 }
  0x68   : > { %1051 = vmatmul.mubr.bf16.gmra.mrb[32].mxu1 %v1993_v3  ;;  %905 = vmatprep.mubr.bf16.mxu0 %v1994_v4 }
  0x69   : > { %1058 = vmatprep.mubr.bf16.mxu1 %v1996_v5 }
  0x6f   : > { %906 = vmatmul.mubr.bf16.gmra.mrb[36].mxu0 %v1998_v6 }
  0x70   : > { %1059 = vmatmul.mubr.bf16.gmra.mrb[36].mxu1 %v1999_v7  ;;  %913 = vmatprep.mubr.bf16.mxu0 %v2000_v8 }
  0x71   : > { %1066 = vmatprep.mubr.bf16.mxu1 %v2002_v9 }
  0x77   : > { %914 = vmatmul.mubr.bf16.gmra.mrb[40].mxu0 %v2004_v10 }
  0x78   : > { %1067 = vmatmul.mubr.bf16.gmra.mrb[40].mxu1 %v2005_v11  ;;  %921 = vmatprep.mubr.bf16.mxu0 %v2006_v12 }
  0x79   : > { %1074 = vmatprep.mubr.bf16.mxu1 %v2008_v13 }
  0x7f   : > { %922 = vmatmul.mubr.bf16.gmra.mrb[44].mxu0 %v2010_v14 }
  0x80   : > { %1075 = vmatmul.mubr.bf16.gmra.mrb[44].mxu1 %v2011_v15  ;;  %929 = vmatprep.mubr.bf16.mxu0 %v2012_v16 }
  0x81   : > { %1082 = vmatprep.mubr.bf16.mxu1 %v2014_v17 }
  0x87   : > { %930 = vmatmul.mubr.bf16.gmra.mrb[48].mxu0 %v2016_v18 }
  0x88   : > { %1083 = vmatmul.mubr.bf16.gmra.mrb[48].mxu1 %v2017_v19  ;;  %937 = vmatprep.mubr.bf16.mxu0 %v2018_v20 }
  0x89   : > { %1090 = vmatprep.mubr.bf16.mxu1 %v2020_v21 }
  0x8f   : > { %938 = vmatmul.mubr.bf16.gmra.mrb[52].mxu0 %v2022_v22 }
  0x90   : > { %1091 = vmatmul.mubr.bf16.gmra.mrb[52].mxu1 %v2023_v23  ;;  %945 = vmatprep.mubr.bf16.mxu0 %v2024_v24 }
  0x91   : > { %1098 = vmatprep.mubr.bf16.mxu1 %v2026_v25 }
  0x97   : > { %946 = vmatmul.mubr.bf16.gmra.mrb[56].mxu0 %v2028_v26 }
  0x98   : > { %1099 = vmatmul.mubr.bf16.gmra.mrb[56].mxu1 %v2029_v27 }
  0xfa   : > { %v1704_v28 = vpop.f32.mrb[0].mxu0 }
  0xfb   : > { %v1810_v29 = vpop.f32.mrb[0].mxu1  ;;  %v1705_v31 = vpop.f32.mrb[1].mxu0 }
  0xfc   : > { %v1706_v32 = vadd.f32 %v1705_v31, %v1704_v28  ;;  %v1811_v33 = vpop.f32.mrb[1].mxu1  ;;  %v1707_v34 = vpop.f32.mrb[2].mxu0 }
  0xfd   : > { %v1812_v35 = vadd.f32 %v1811_v33, %v1810_v29  ;;  %v1813_v36 = vpop.f32.mrb[2].mxu1  ;;  %v1708_v37 = vpop.f32.mrb[3].mxu0 }
  0xfe   : > { %v836_v38 = vadd.f32 %v1706_v32, %v2295_v30  ;;  %v1709_v39 = vadd.f32 %v1708_v37, %v1707_v34  ;;  %v1814_v40 = vpop.f32.mrb[3].mxu1 }
  0xff   : > { %v1815_v41 = vadd.f32 %v1814_v40, %v1813_v36 }
 0x100   : > { %v989_v42 = vadd.f32 %v1812_v35, %v836_v38  ;;  %v839_v43 = vadd.f32 %v1709_v39, %v2295_v30 }
 0x102   : > { %v1137_v44 = vmin.f32 %v989_v42, 0.0  ;;  %v2299_v45 = vadd.f32 %v1815_v41, %v839_v43  ;;  %v1710_v46 = vpop.f32.mrb[4].mxu0  ;;  %vm1107_vm0 = vcmp.gt.f32.partialorder %v989_v42, 0.0 }
 0x103   : > { %v1816_v47 = vpop.f32.mrb[4].mxu1  ;;  %v1711_v48 = vpop.f32.mrb[5].mxu0 }
 0x104   : > { %v1167_v49 = vmul.f32 1.442695, %v1137_v44  ;;  %v1138_v50 = vmin.f32 %v2299_v45, 0.0  ;;  %v1712_v51 = vadd.f32 %v1711_v48, %v1710_v46  ;;  %v1817_v52 = vpop.f32.mrb[5].mxu1  ;;  %v1713_v53 = vpop.f32.mrb[6].mxu0  ;;  %vm1108_vm2 = vcmp.gt.f32.partialorder %v2299_v45, 0.0 }
 0x105   : > { %v1818_v54 = vadd.f32 %v1817_v52, %v1816_v47  ;;  %v1819_v55 = vpop.f32.mrb[6].mxu1  ;;  %v1714_v56 = vpop.f32.mrb[7].mxu0 }
 0x106   : > { %2030 = vpow2.f32 %v1167_v49  ;;  %v1169_v57 = vmul.f32 1.442695, %v1138_v50  ;;  %v844_v58 = vadd.f32 %v1712_v51, %v2295_v30  ;;  %v1715_v59 = vadd.f32 %v1714_v56, %v1713_v53  ;;  %v1820_v60 = vpop.f32.mrb[7].mxu1 }
 0x107   : > { %v1821_v61 = vadd.f32 %v1820_v60, %v1819_v55 }
 0x108   : > { %2032 = vpow2.f32 %v1169_v57  ;;  %v2303_v62 = vadd.f32 %v1818_v54, %v844_v58  ;;  %v847_v63 = vadd.f32 %v1715_v59, %v2295_v30 }
 0x10a   : > { %v1139_v0 = vmin.f32 %v2303_v62, 0.0  ;;  %v2307_v1 = vadd.f32 %v1821_v61, %v847_v63  ;;  %v1716_v2 = vpop.f32.mrb[8].mxu0  ;;  %vm1109_vm3 = vcmp.gt.f32.partialorder %v2303_v62, 0.0 }
 0x10b   : > { %v1822_v3 = vpop.f32.mrb[8].mxu1  ;;  %v1717_v4 = vpop.f32.mrb[9].mxu0 }
 0x10c   : > { %v1171_v5 = vmul.f32 1.442695, %v1139_v0  ;;  %v1140_v6 = vmin.f32 %v2307_v1, 0.0  ;;  %v1718_v7 = vadd.f32 %v1717_v4, %v1716_v2  ;;  %v1823_v8 = vpop.f32.mrb[9].mxu1  ;;  %v1719_v9 = vpop.f32.mrb[10].mxu0  ;;  %vm1110_vm4 = vcmp.gt.f32.partialorder %v2307_v1, 0.0 }
 0x10d   : > { %v1824_v10 = vadd.f32 %v1823_v8, %v1822_v3  ;;  %v1825_v11 = vpop.f32.mrb[10].mxu1  ;;  %v1720_v12 = vpop.f32.mrb[11].mxu0 }
 0x10e   : > { %2034 = vpow2.f32 %v1171_v5  ;;  %v1173_v13 = vmul.f32 1.442695, %v1140_v6  ;;  %v852_v14 = vadd.f32 %v1718_v7, %v2295_v30  ;;  %v1721_v15 = vadd.f32 %v1720_v12, %v1719_v9  ;;  %v1826_v16 = vpop.f32.mrb[11].mxu1 }
 0x10f   : > { %v1827_v17 = vadd.f32 %v1826_v16, %v1825_v11 }
 0x110   : > { %v2031_v18 = vpop.eup %2030  ;;  %2036 = vpow2.f32 %v1173_v13  ;;  %v2312_v19 = vadd.f32 %v1824_v10, %v852_v14  ;;  %v855_v20 = vadd.f32 %v1721_v15, %v2295_v30 }
 0x111   : > { %v1595_v21 = vadd.f32 -1.0, %v2031_v18 }
 0x112   : > { %v2033_v22 = vpop.eup %2032  ;;  %v1141_v23 = vmin.f32 %v2312_v19, 0.0  ;;  %v2316_v24 = vadd.f32 %v1827_v17, %v855_v20  ;;  %v1722_v25 = vpop.f32.mrb[12].mxu0  ;;  %vm1111_vm5 = vcmp.gt.f32.partialorder %v2312_v19, 0.0 }
 0x113   : > { %v1257_v26 = vsel %vm1107_vm0, %v989_v42, %v1595_v21  ;;  %v1596_v27 = vadd.f32 -1.0, %v2033_v22  ;;  %v1828_v28 = vpop.f32.mrb[12].mxu1  ;;  %v1723_v29 = vpop.f32.mrb[13].mxu0 }
 0x114   : > { %v1658_v31 = vpack.c.bf16 %v1257_v26, %v1257_v26  ;;  %v1175_v32 = vmul.f32 1.442695, %v1141_v23  ;;  %v1142_v33 = vmin.f32 %v2316_v24, 0.0  ;;  %v1829_v34 = vpop.f32.mrb[13].mxu1  ;;  %v1725_v35 = vpop.f32.mrb[14].mxu0  ;;  %v1724_v37 = vadd.f32 %v1723_v29, %v1722_v25 }
 0x115   : > { %v1258_v36 = vsel %vm1108_vm2, %v2299_v45, %v1596_v27  ;;  %v1830_v38 = vadd.f32 %v1829_v34, %v1828_v28  ;;  %v1831_v39 = vpop.f32.mrb[14].mxu1  ;;  %v1726_v40 = vpop.f32.mrb[15].mxu0  ;;  %vm1112_vm6 = vcmp.gt.f32.partialorder %v2316_v24, 0.0 }
 0x116   : > { %1408 = vst.msk [vmem:[%s2321_s10] sm:$0xf] %vm1407_vm1, %v1658_v31  ;;  %v1659_v41 = vpack.c.bf16 %v1258_v36, %v1258_v36  ;;  %2038 = vpow2.f32 %v1175_v32  ;;  %v1177_v42 = vmul.f32 1.442695, %v1142_v33  ;;  %v1727_v43 = vadd.f32 %v1726_v40, %v1725_v35  ;;  %v1832_v44 = vpop.f32.mrb[15].mxu1 }
 0x117   : > { %v860_v46 = vadd.f32 %v1724_v37, %v2295_v30  ;;  %v1833_v47 = vadd.f32 %v1832_v44, %v1831_v39 }
 0x118   : > { %v2035_v48 = vpop.eup %2034  ;;  %1409 = vst.msk [vmem:[%s2321_s10 + $0x4] sm:$0xf] %vm1407_vm1, %v1659_v41  ;;  %2040 = vpow2.f32 %v1177_v42  ;;  %v863_v45 = vadd.f32 %v1727_v43, %v2295_v30 }
 0x119   : > { %v1597_v49 = vadd.f32 -1.0, %v2035_v48  ;;  %v2332_v50 = vadd.f32 %v1830_v38, %v860_v46 }
 0x11a   : > { %v2037_v51 = vpop.eup %2036  ;;  %v2335_v52 = vadd.f32 %v1833_v47, %v863_v45  ;;  %v1728_v53 = vpop.f32.mrb[16].mxu0 }
 0x11b   : > { %v1259_v54 = vsel %vm1109_vm3, %v2303_v62, %v1597_v49  ;;  %v1598_v55 = vadd.f32 -1.0, %v2037_v51  ;;  %v1143_v56 = vmin.f32 %v2332_v50, 0.0  ;;  %v1834_v57 = vpop.f32.mrb[16].mxu1  ;;  %v1729_v58 = vpop.f32.mrb[17].mxu0  ;;  %vm1113_vm7 = vcmp.gt.f32.partialorder %v2332_v50, 0.0 }
 0x11c   : > { %v1660_v59 = vpack.c.bf16 %v1259_v54, %v1259_v54  ;;  %v1144_v60 = vmin.f32 %v2335_v52, 0.0  ;;  %v1730_v61 = vadd.f32 %v1729_v58, %v1728_v53  ;;  %v1835_v63 = vpop.f32.mrb[17].mxu1  ;;  %v1731_v0 = vpop.f32.mrb[18].mxu0  ;;  %vm1114_vm8 = vcmp.gt.f32.partialorder %v2335_v52, 0.0 }
 0x11d   : > { %v1260_v2 = vsel %vm1110_vm4, %v2307_v1, %v1598_v55  ;;  %v1179_v3 = vmul.f32 1.442695, %v1143_v56  ;;  %v1836_v4 = vadd.f32 %v1835_v63, %v1834_v57  ;;  %v1837_v62 = vpop.f32.mrb[18].mxu1  ;;  %v1732_v5 = vpop.f32.mrb[19].mxu0 }
 0x11e   : > { %1410 = vst.msk [vmem:[%s2321_s10 + $0x8] sm:$0xf] %vm1407_vm1, %v1660_v59  ;;  %v1661_v6 = vpack.c.bf16 %v1260_v2, %v1260_v2  ;;  %v1181_v7 = vmul.f32 1.442695, %v1144_v60  ;;  %v868_v8 = vadd.f32 %v1730_v61, %v2295_v30  ;;  %v1733_v9 = vadd.f32 %v1732_v5, %v1731_v0  ;;  %v1838_v10 = vpop.f32.mrb[19].mxu1 }
 0x11f   : > { %2042 = vpow2.f32 %v1179_v3  ;;  %v1839_v11 = vadd.f32 %v1838_v10, %v1837_v62 }
 0x120   : > { %v2039_v12 = vpop.eup %2038  ;;  %1411 = vst.msk [vmem:[%s2321_s10 + $0xc] sm:$0xf] %vm1407_vm1, %v1661_v6  ;;  %2044 = vpow2.f32 %v1181_v7  ;;  %v2347_v13 = vadd.f32 %v1836_v4, %v868_v8  ;;  %v871_v1 = vadd.f32 %v1733_v9, %v2295_v30 }
 0x121   : > { %v1599_v14 = vadd.f32 -1.0, %v2039_v12 }
 0x122   : > { %v2041_v15 = vpop.eup %2040  ;;  %v1145_v16 = vmin.f32 %v2347_v13, 0.0  ;;  %v2352_v17 = vadd.f32 %v1839_v11, %v871_v1  ;;  %v1734_v18 = vpop.f32.mrb[20].mxu0  ;;  %vm1115_vm9 = vcmp.gt.f32.partialorder %v2347_v13, 0.0 }
 0x123   : > { %v1261_v20 = vsel %vm1111_vm5, %v2312_v19, %v1599_v14  ;;  %v1600_v21 = vadd.f32 -1.0, %v2041_v15  ;;  %v1840_v22 = vpop.f32.mrb[20].mxu1  ;;  %v1735_v23 = vpop.f32.mrb[21].mxu0 }
 0x124   : > { %v1662_v25 = vpack.c.bf16 %v1261_v20, %v1261_v20  ;;  %v1183_v26 = vmul.f32 1.442695, %v1145_v16  ;;  %v1146_v27 = vmin.f32 %v2352_v17, 0.0  ;;  %v1841_v28 = vpop.f32.mrb[21].mxu1  ;;  %v1737_v29 = vpop.f32.mrb[22].mxu0  ;;  %v1736_v32 = vadd.f32 %v1735_v23, %v1734_v18 }
 0x125   : > { %v1262_v31 = vsel %vm1112_vm6, %v2316_v24, %v1600_v21  ;;  %v1842_v33 = vadd.f32 %v1841_v28, %v1840_v22  ;;  %v1843_v34 = vpop.f32.mrb[22].mxu1  ;;  %v1738_v35 = vpop.f32.mrb[23].mxu0  ;;  %vm1116_vm10 = vcmp.gt.f32.partialorder %v2352_v17, 0.0 }
 0x126   : > { %1412 = vst.msk [vmem:[%s2321_s10 + $0x10] sm:$0xf] %vm1407_vm1, %v1662_v25  ;;  %v1663_v19 = vpack.c.bf16 %v1262_v31, %v1262_v31  ;;  %2046 = vpow2.f32 %v1183_v26  ;;  %v1185_v36 = vmul.f32 1.442695, %v1146_v27  ;;  %v1739_v37 = vadd.f32 %v1738_v35, %v1737_v29  ;;  %v1844_v38 = vpop.f32.mrb[23].mxu1 }
 0x127   : > { %v876_v39 = vadd.f32 %v1736_v32, %v2295_v30  ;;  %v1845_v40 = vadd.f32 %v1844_v38, %v1843_v34 }
 0x128   : > { %1413 = vst.msk [vmem:[%s2321_s10 + $0x14] sm:$0xf] %vm1407_vm1, %v1663_v19  ;;  %2048 = vpow2.f32 %v1185_v36  ;;  %v879_v41 = vadd.f32 %v1739_v37, %v2295_v30 }
 0x129   : > { %v2043_v24 = vpop.eup %2042  ;;  %v2364_v42 = vadd.f32 %v1842_v33, %v876_v39 }
 0x12a   : > { %v2045_v43 = vpop.eup %2044  ;;  %v1601_v44 = vadd.f32 -1.0, %v2043_v24  ;;  %v2366_v46 = vadd.f32 %v1845_v40, %v879_v41  ;;  %v1740_v47 = vpop.f32.mrb[24].mxu0 }
 0x12b   : > { %v1602_v48 = vadd.f32 -1.0, %v2045_v43  ;;  %v1147_v45 = vmin.f32 %v2364_v42, 0.0  ;;  %v1846_v49 = vpop.f32.mrb[24].mxu1  ;;  %v1741_v51 = vpop.f32.mrb[25].mxu0  ;;  %vm1117_vm11 = vcmp.gt.f32.partialorder %v2364_v42, 0.0 }
 0x12c   : > { %v1263_v53 = vsel %vm1113_vm7, %v2332_v50, %v1601_v44  ;;  %v1148_v54 = vmin.f32 %v2366_v46, 0.0  ;;  %v1742_v55 = vadd.f32 %v1741_v51, %v1740_v47  ;;  %v1847_v56 = vpop.f32.mrb[25].mxu1  ;;  %v1743_v57 = vpop.f32.mrb[26].mxu0  ;;  %vm1118_vm12 = vcmp.gt.f32.partialorder %v2366_v46, 0.0 }
 0x12d   : > { %v1664_v58 = vpack.c.bf16 %v1263_v53, %v1263_v53  ;;  %v1264_v59 = vsel %vm1114_vm8, %v2335_v52, %v1602_v48  ;;  %v1187_v60 = vmul.f32 1.442695, %v1147_v45  ;;  %v1848_v61 = vadd.f32 %v1847_v56, %v1846_v49  ;;  %v1849_v63 = vpop.f32.mrb[26].mxu1  ;;  %v1744_v0 = vpop.f32.mrb[27].mxu0 }
 0x12e   : > { %v1665_v2 = vpack.c.bf16 %v1264_v59, %v1264_v59  ;;  %v1189_v3 = vmul.f32 1.442695, %v1148_v54  ;;  %v884_v50 = vadd.f32 %v1742_v55, %v2295_v30  ;;  %v1745_v4 = vadd.f32 %v1744_v0, %v1743_v57  ;;  %v1850_v62 = vpop.f32.mrb[27].mxu1 }
 0x12f   : > { %1414 = vst.msk [vmem:[%s2321_s10 + $0x18] sm:$0xf] %vm1407_vm1, %v1664_v58  ;;  %2050 = vpow2.f32 %v1187_v60  ;;  %v1851_v5 = vadd.f32 %v1850_v62, %v1849_v63 }
 0x130   : > { %v2047_v6 = vpop.eup %2046  ;;  %1415 = vst.msk [vmem:[%s2321_s10 + $0x1c] sm:$0xf] %vm1407_vm1, %v1665_v2  ;;  %2052 = vpow2.f32 %v1189_v3  ;;  %v2379_v7 = vadd.f32 %v1848_v61, %v884_v50  ;;  %v887_v52 = vadd.f32 %v1745_v4, %v2295_v30 }
 0x131   : > { %v1603_v8 = vadd.f32 -1.0, %v2047_v6 }
 0x132   : > { %v2049_v9 = vpop.eup %2048  ;;  %v1149_v10 = vmin.f32 %v2379_v7, 0.0  ;;  %v2384_v11 = vadd.f32 %v1851_v5, %v887_v52  ;;  %v1746_v12 = vpop.f32.mrb[28].mxu0  ;;  %vm1119_vm13 = vcmp.gt.f32.partialorder %v2379_v7, 0.0 }
 0x133   : > { %v1265_v1 = vsel %vm1115_vm9, %v2347_v13, %v1603_v8  ;;  %v1604_v14 = vadd.f32 -1.0, %v2049_v9  ;;  %v1852_v15 = vpop.f32.mrb[28].mxu1  ;;  %v1747_v16 = vpop.f32.mrb[29].mxu0 }
 0x134   : > { %v1666_v18 = vpack.c.bf16 %v1265_v1, %v1265_v1  ;;  %v1191_v20 = vmul.f32 1.442695, %v1149_v10  ;;  %v1150_v21 = vmin.f32 %v2384_v11, 0.0  ;;  %v1853_v22 = vpop.f32.mrb[29].mxu1  ;;  %v1749_v23 = vpop.f32.mrb[30].mxu0  ;;  %v1748_v26 = vadd.f32 %v1747_v16, %v1746_v12 }
 0x135   : > { %v1266_v25 = vsel %vm1116_vm10, %v2352_v17, %v1604_v14  ;;  %v1854_v27 = vadd.f32 %v1853_v22, %v1852_v15  ;;  %v1855_v28 = vpop.f32.mrb[30].mxu1  ;;  %v1750_v29 = vpop.f32.mrb[31].mxu0  ;;  %vm1120_vm14 = vcmp.gt.f32.partialorder %v2384_v11, 0.0 }
 0x136   : > { %1416 = vst.msk [vmem:[%s2321_s10 + $0x20] sm:$0xf] %vm1407_vm1, %v1666_v18  ;;  %v1667_v13 = vpack.c.bf16 %v1266_v25, %v1266_v25  ;;  %2054 = vpow2.f32 %v1191_v20  ;;  %v1193_v31 = vmul.f32 1.442695, %v1150_v21  ;;  %v1751_v32 = vadd.f32 %v1750_v29, %v1749_v23  ;;  %v1856_v33 = vpop.f32.mrb[31].mxu1 }
 0x137   : > { %v892_v34 = vadd.f32 %v1748_v26, %v2295_v30  ;;  %v1857_v35 = vadd.f32 %v1856_v33, %v1855_v28 }
 0x138   : > { %1417 = vst.msk [vmem:[%s2321_s10 + $0x24] sm:$0xf] %vm1407_vm1, %v1667_v13  ;;  %2056 = vpow2.f32 %v1193_v31  ;;  %v895_v19 = vadd.f32 %v1751_v32, %v2295_v30 }
 0x139   : > { %v2051_v17 = vpop.eup %2050  ;;  %v2396_v36 = vadd.f32 %v1854_v27, %v892_v34 }
 0x13a   : > { %v2053_v37 = vpop.eup %2052  ;;  %v1605_v38 = vadd.f32 -1.0, %v2051_v17  ;;  %v2398_v39 = vadd.f32 %v1857_v35, %v895_v19  ;;  %v1752_v40 = vpop.f32.mrb[32].mxu0 }
 0x13b   : > { %v1606_v41 = vadd.f32 -1.0, %v2053_v37  ;;  %v1151_v24 = vmin.f32 %v2396_v36, 0.0  ;;  %v1858_v43 = vpop.f32.mrb[32].mxu1  ;;  %v1753_v44 = vpop.f32.mrb[33].mxu0  ;;  %vm1121_vm15 = vcmp.gt.f32.partialorder %v2396_v36, 0.0 }
 0x13c   : > { %v1267_v47 = vsel %vm1117_vm11, %v2364_v42, %v1605_v38  ;;  %v1152_v48 = vmin.f32 %v2398_v39, 0.0  ;;  %v1754_v45 = vadd.f32 %v1753_v44, %v1752_v40  ;;  %v1859_v49 = vpop.f32.mrb[33].mxu1  ;;  %v1755_v51 = vpop.f32.mrb[34].mxu0  ;;  %vm1122_vm0 = vcmp.gt.f32.partialorder %v2398_v39, 0.0 }
 0x13d   : > { %v1668_v53 = vpack.c.bf16 %v1267_v47, %v1267_v47  ;;  %v1268_v54 = vsel %vm1118_vm12, %v2366_v46, %v1606_v41  ;;  %v1195_v55 = vmul.f32 1.442695, %v1151_v24  ;;  %v1860_v56 = vadd.f32 %v1859_v49, %v1858_v43  ;;  %v1861_v57 = vpop.f32.mrb[34].mxu1  ;;  %v1756_v58 = vpop.f32.mrb[35].mxu0 }
 0x13e   : > { %v1669_v59 = vpack.c.bf16 %v1268_v54, %v1268_v54  ;;  %v1197_v60 = vmul.f32 1.442695, %v1152_v48  ;;  %v900_v42 = vadd.f32 %v1754_v45, %v2295_v30  ;;  %v1757_v61 = vadd.f32 %v1756_v58, %v1755_v51  ;;  %v1862_v63 = vpop.f32.mrb[35].mxu1 }
 0x13f   : > { %1418 = vst.msk [vmem:[%s2321_s10 + $0x28] sm:$0xf] %vm1407_vm1, %v1668_v53  ;;  %2058 = vpow2.f32 %v1195_v55  ;;  %v1863_v0 = vadd.f32 %v1862_v63, %v1861_v57 }
 0x140   : > { %v2055_v2 = vpop.eup %2054  ;;  %1419 = vst.msk [vmem:[%s2321_s10 + $0x2c] sm:$0xf] %vm1407_vm1, %v1669_v59  ;;  %2060 = vpow2.f32 %v1197_v60  ;;  %v2411_v3 = vadd.f32 %v1860_v56, %v900_v42  ;;  %v903_v46 = vadd.f32 %v1757_v61, %v2295_v30 }
 0x141   : > { %v1607_v50 = vadd.f32 -1.0, %v2055_v2 }
 0x142   : > { %v2057_v4 = vpop.eup %2056  ;;  %v1153_v62 = vmin.f32 %v2411_v3, 0.0  ;;  %v2416_v5 = vadd.f32 %v1863_v0, %v903_v46  ;;  %v1758_v6 = vpop.f32.mrb[36].mxu0  ;;  %vm1123_vm2 = vcmp.gt.f32.partialorder %v2411_v3, 0.0 }
 0x143   : > { %v1269_v52 = vsel %vm1119_vm13, %v2379_v7, %v1607_v50  ;;  %v1608_v8 = vadd.f32 -1.0, %v2057_v4  ;;  %v1864_v9 = vpop.f32.mrb[36].mxu1  ;;  %v1759_v10 = vpop.f32.mrb[37].mxu0 }
 0x144   : > { %v1670_v12 = vpack.c.bf16 %v1269_v52, %v1269_v52  ;;  %v1199_v1 = vmul.f32 1.442695, %v1153_v62  ;;  %v1154_v14 = vmin.f32 %v2416_v5, 0.0  ;;  %v1865_v15 = vpop.f32.mrb[37].mxu1  ;;  %v1761_v16 = vpop.f32.mrb[38].mxu0  ;;  %v1760_v20 = vadd.f32 %v1759_v10, %v1758_v6 }
 0x145   : > { %v1270_v18 = vsel %vm1120_vm14, %v2384_v11, %v1608_v8  ;;  %v1866_v21 = vadd.f32 %v1865_v15, %v1864_v9  ;;  %v1867_v22 = vpop.f32.mrb[38].mxu1  ;;  %v1762_v23 = vpop.f32.mrb[39].mxu0  ;;  %vm1124_vm3 = vcmp.gt.f32.partialorder %v2416_v5, 0.0 }
 0x146   : > { %1420 = vst.msk [vmem:[%s2321_s10 + $0x30] sm:$0xf] %vm1407_vm1, %v1670_v12  ;;  %v1671_v7 = vpack.c.bf16 %v1270_v18, %v1270_v18  ;;  %2062 = vpow2.f32 %v1199_v1  ;;  %v1201_v25 = vmul.f32 1.442695, %v1154_v14  ;;  %v1763_v26 = vadd.f32 %v1762_v23, %v1761_v16  ;;  %v1868_v27 = vpop.f32.mrb[39].mxu1 }
 0x147   : > { %v908_v28 = vadd.f32 %v1760_v20, %v2295_v30  ;;  %v1869_v29 = vadd.f32 %v1868_v27, %v1867_v22 }
 0x148   : > { %1421 = vst.msk [vmem:[%s2321_s10 + $0x34] sm:$0xf] %vm1407_vm1, %v1671_v7  ;;  %2064 = vpow2.f32 %v1201_v25  ;;  %v911_v13 = vadd.f32 %v1763_v26, %v2295_v30 }
 0x149   : > { %v2059_v11 = vpop.eup %2058  ;;  %v2428_v31 = vadd.f32 %v1866_v21, %v908_v28 }
 0x14a   : > { %v2061_v32 = vpop.eup %2060  ;;  %v1609_v33 = vadd.f32 -1.0, %v2059_v11  ;;  %v2430_v34 = vadd.f32 %v1869_v29, %v911_v13  ;;  %v1764_v35 = vpop.f32.mrb[40].mxu0 }
 0x14b   : > { %v1610_v19 = vadd.f32 -1.0, %v2061_v32  ;;  %v1155_v17 = vmin.f32 %v2428_v31, 0.0  ;;  %v1870_v37 = vpop.f32.mrb[40].mxu1  ;;  %v1765_v38 = vpop.f32.mrb[41].mxu0  ;;  %vm1125_vm4 = vcmp.gt.f32.partialorder %v2428_v31, 0.0 }
 0x14c   : > { %v1271_v40 = vsel %vm1121_vm15, %v2396_v36, %v1609_v33  ;;  %v1156_v41 = vmin.f32 %v2430_v34, 0.0  ;;  %v1766_v24 = vadd.f32 %v1765_v38, %v1764_v35  ;;  %v1871_v43 = vpop.f32.mrb[41].mxu1  ;;  %v1767_v44 = vpop.f32.mrb[42].mxu0  ;;  %vm1126_vm5 = vcmp.gt.f32.partialorder %v2430_v34, 0.0 }
 0x14d   : > { %v1672_v47 = vpack.c.bf16 %v1271_v40, %v1271_v40  ;;  %v1272_v48 = vsel %vm1122_vm0, %v2398_v39, %v1610_v19  ;;  %v1203_v45 = vmul.f32 1.442695, %v1155_v17  ;;  %v1872_v49 = vadd.f32 %v1871_v43, %v1870_v37  ;;  %v1873_v51 = vpop.f32.mrb[42].mxu1  ;;  %v1768_v53 = vpop.f32.mrb[43].mxu0 }
 0x14e   : > { %v1673_v54 = vpack.c.bf16 %v1272_v48, %v1272_v48  ;;  %v1205_v55 = vmul.f32 1.442695, %v1156_v41  ;;  %v916_v36 = vadd.f32 %v1766_v24, %v2295_v30  ;;  %v1769_v56 = vadd.f32 %v1768_v53, %v1767_v44  ;;  %v1874_v57 = vpop.f32.mrb[43].mxu1 }
 0x14f   : > { %1422 = vst.msk [vmem:[%s2321_s10 + $0x38] sm:$0xf] %vm1407_vm1, %v1672_v47  ;;  %2066 = vpow2.f32 %v1203_v45  ;;  %v1875_v58 = vadd.f32 %v1874_v57, %v1873_v51 }
 0x150   : > { %v2063_v59 = vpop.eup %2062  ;;  %1423 = vst.msk [vmem:[%s2321_s10 + $0x3c] sm:$0xf] %vm1407_vm1, %v1673_v54  ;;  %2068 = vpow2.f32 %v1205_v55  ;;  %v2443_v60 = vadd.f32 %v1872_v49, %v916_v36  ;;  %v919_v39 = vadd.f32 %v1769_v56, %v2295_v30 }
 0x151   : > { %v1611_v42 = vadd.f32 -1.0, %v2063_v59 }
 0x152   : > { %v2065_v61 = vpop.eup %2064  ;;  %v1157_v63 = vmin.f32 %v2443_v60, 0.0  ;;  %v2448_v0 = vadd.f32 %v1875_v58, %v919_v39  ;;  %v1770_v2 = vpop.f32.mrb[44].mxu0  ;;  %vm1127_vm6 = vcmp.gt.f32.partialorder %v2443_v60, 0.0 }
 0x153   : > { %v1273_v46 = vsel %vm1123_vm2, %v2411_v3, %v1611_v42  ;;  %v1612_v50 = vadd.f32 -1.0, %v2065_v61  ;;  %v1876_v4 = vpop.f32.mrb[44].mxu1  ;;  %v1771_v62 = vpop.f32.mrb[45].mxu0 }
 0x154   : > { %v1674_v6 = vpack.c.bf16 %v1273_v46, %v1273_v46  ;;  %v1207_v52 = vmul.f32 1.442695, %v1157_v63  ;;  %v1158_v8 = vmin.f32 %v2448_v0, 0.0  ;;  %v1877_v9 = vpop.f32.mrb[45].mxu1  ;;  %v1773_v10 = vpop.f32.mrb[46].mxu0  ;;  %v1772_v1 = vadd.f32 %v1771_v62, %v1770_v2 }
 0x155   : > { %v1274_v12 = vsel %vm1124_vm3, %v2416_v5, %v1612_v50  ;;  %v1878_v14 = vadd.f32 %v1877_v9, %v1876_v4  ;;  %v1879_v15 = vpop.f32.mrb[46].mxu1  ;;  %v1774_v16 = vpop.f32.mrb[47].mxu0  ;;  %vm1128_vm7 = vcmp.gt.f32.partialorder %v2448_v0, 0.0 }
 0x156   : > { %1424 = vst.msk [vmem:[%s2321_s10 + $0x40] sm:$0xf] %vm1407_vm1, %v1674_v6  ;;  %v1675_v3 = vpack.c.bf16 %v1274_v12, %v1274_v12  ;;  %2070 = vpow2.f32 %v1207_v52  ;;  %v1209_v18 = vmul.f32 1.442695, %v1158_v8  ;;  %v1775_v20 = vadd.f32 %v1774_v16, %v1773_v10  ;;  %v1880_v21 = vpop.f32.mrb[47].mxu1 }
 0x157   : > { %v924_v22 = vadd.f32 %v1772_v1, %v2295_v30  ;;  %v1881_v23 = vadd.f32 %v1880_v21, %v1879_v15 }
 0x158   : > { %1425 = vst.msk [vmem:[%s2321_s10 + $0x44] sm:$0xf] %vm1407_vm1, %v1675_v3  ;;  %2072 = vpow2.f32 %v1209_v18  ;;  %v927_v7 = vadd.f32 %v1775_v20, %v2295_v30 }
 0x159   : > { %v2067_v5 = vpop.eup %2066  ;;  %v2460_v25 = vadd.f32 %v1878_v14, %v924_v22 }
 0x15a   : > { %v2069_v26 = vpop.eup %2068  ;;  %v1613_v27 = vadd.f32 -1.0, %v2067_v5  ;;  %v2462_v28 = vadd.f32 %v1881_v23, %v927_v7  ;;  %v1776_v29 = vpop.f32.mrb[48].mxu0 }
 0x15b   : > { %v1614_v13 = vadd.f32 -1.0, %v2069_v26  ;;  %v1159_v11 = vmin.f32 %v2460_v25, 0.0  ;;  %v1882_v32 = vpop.f32.mrb[48].mxu1  ;;  %v1777_v33 = vpop.f32.mrb[49].mxu0  ;;  %vm1129_vm8 = vcmp.gt.f32.partialorder %v2460_v25, 0.0 }
 0x15c   : > { %v1275_v35 = vsel %vm1125_vm4, %v2428_v31, %v1613_v27  ;;  %v1160_v19 = vmin.f32 %v2462_v28, 0.0  ;;  %v1778_v17 = vadd.f32 %v1777_v33, %v1776_v29  ;;  %v1883_v37 = vpop.f32.mrb[49].mxu1  ;;  %v1779_v38 = vpop.f32.mrb[50].mxu0  ;;  %vm1130_vm9 = vcmp.gt.f32.partialorder %v2462_v28, 0.0 }
 0x15d   : > { %v1676_v40 = vpack.c.bf16 %v1275_v35, %v1275_v35  ;;  %v1276_v41 = vsel %vm1126_vm5, %v2430_v34, %v1614_v13  ;;  %v1211_v24 = vmul.f32 1.442695, %v1159_v11  ;;  %v1884_v43 = vadd.f32 %v1883_v37, %v1882_v32  ;;  %v1885_v44 = vpop.f32.mrb[50].mxu1  ;;  %v1780_v47 = vpop.f32.mrb[51].mxu0 }
 0x15e   : > { %v1677_v48 = vpack.c.bf16 %v1276_v41, %v1276_v41  ;;  %v1213_v45 = vmul.f32 1.442695, %v1160_v19  ;;  %v932_v31 = vadd.f32 %v1778_v17, %v2295_v30  ;;  %v1781_v49 = vadd.f32 %v1780_v47, %v1779_v38  ;;  %v1886_v51 = vpop.f32.mrb[51].mxu1 }
 0x15f   : > { %1426 = vst.msk [vmem:[%s2321_s10 + $0x48] sm:$0xf] %vm1407_vm1, %v1676_v40  ;;  %2074 = vpow2.f32 %v1211_v24  ;;  %v1887_v53 = vadd.f32 %v1886_v51, %v1885_v44 }
 0x160   : > { %v2071_v54 = vpop.eup %2070  ;;  %1427 = vst.msk [vmem:[%s2321_s10 + $0x4c] sm:$0xf] %vm1407_vm1, %v1677_v48  ;;  %2076 = vpow2.f32 %v1213_v45  ;;  %v2475_v55 = vadd.f32 %v1884_v43, %v932_v31  ;;  %v935_v34 = vadd.f32 %v1781_v49, %v2295_v30 }
 0x161   : > { %v1615_v36 = vadd.f32 -1.0, %v2071_v54 }
 0x162   : > { %v2073_v56 = vpop.eup %2072  ;;  %v1161_v57 = vmin.f32 %v2475_v55, 0.0  ;;  %v2480_v58 = vadd.f32 %v1887_v53, %v935_v34  ;;  %v1782_v59 = vpop.f32.mrb[52].mxu0  ;;  %vm1131_vm10 = vcmp.gt.f32.partialorder %v2475_v55, 0.0 }
 0x163   : > { %v1277_v39 = vsel %vm1127_vm6, %v2443_v60, %v1615_v36  ;;  %v1616_v42 = vadd.f32 -1.0, %v2073_v56  ;;  %v1888_v61 = vpop.f32.mrb[52].mxu1  ;;  %v1783_v63 = vpop.f32.mrb[53].mxu0 }
 0x164   : > { %v1678_v2 = vpack.c.bf16 %v1277_v39, %v1277_v39  ;;  %v1215_v46 = vmul.f32 1.442695, %v1161_v57  ;;  %v1162_v50 = vmin.f32 %v2480_v58, 0.0  ;;  %v1889_v4 = vpop.f32.mrb[53].mxu1  ;;  %v1785_v62 = vpop.f32.mrb[54].mxu0  ;;  %v1784_v52 = vadd.f32 %v1783_v63, %v1782_v59 }
 0x165   : > { %v1278_v6 = vsel %vm1128_vm7, %v2448_v0, %v1616_v42  ;;  %v1890_v8 = vadd.f32 %v1889_v4, %v1888_v61  ;;  %v1891_v9 = vpop.f32.mrb[54].mxu1  ;;  %v1786_v10 = vpop.f32.mrb[55].mxu0  ;;  %vm1132_vm11 = vcmp.gt.f32.partialorder %v2480_v58, 0.0 }
 0x166   : > { %1428 = vst.msk [vmem:[%s2321_s10 + $0x50] sm:$0xf] %vm1407_vm1, %v1678_v2  ;;  %v1679_v60 = vpack.c.bf16 %v1278_v6, %v1278_v6  ;;  %2078 = vpow2.f32 %v1215_v46  ;;  %v1217_v12 = vmul.f32 1.442695, %v1162_v50  ;;  %v1787_v1 = vadd.f32 %v1786_v10, %v1785_v62  ;;  %v1892_v14 = vpop.f32.mrb[55].mxu1 }
 0x167   : > { %v940_v15 = vadd.f32 %v1784_v52, %v2295_v30  ;;  %v1893_v16 = vadd.f32 %v1892_v14, %v1891_v9 }
 0x168   : > { %1429 = vst.msk [vmem:[%s2321_s10 + $0x54] sm:$0xf] %vm1407_vm1, %v1679_v60  ;;  %2080 = vpow2.f32 %v1217_v12  ;;  %v943_v3 = vadd.f32 %v1787_v1, %v2295_v30 }
 0x169   : > { %v2075_v0 = vpop.eup %2074  ;;  %v1093_v18 = vadd.f32 %v1890_v8, %v940_v15 }
 0x16a   : > { %v2077_v20 = vpop.eup %2076  ;;  %v1617_v21 = vadd.f32 -1.0, %v2075_v0  ;;  %v1096_v22 = vadd.f32 %v1893_v16, %v943_v3  ;;  %v1788_v23 = vpop.f32.mrb[56].mxu0 }
 0x16b   : > { %v1618_v7 = vadd.f32 -1.0, %v2077_v20  ;;  %v1163_v5 = vmin.f32 %v1093_v18, 0.0  ;;  %v1894_v26 = vpop.f32.mrb[56].mxu1  ;;  %v1789_v27 = vpop.f32.mrb[57].mxu0  ;;  %vm1133_vm12 = vcmp.gt.f32.partialorder %v1093_v18, 0.0 }
 0x16c   : > { %v1279_v29 = vsel %vm1129_vm8, %v2460_v25, %v1617_v21  ;;  %v1164_v13 = vmin.f32 %v1096_v22, 0.0  ;;  %v1790_v11 = vadd.f32 %v1789_v27, %v1788_v23  ;;  %v1895_v32 = vpop.f32.mrb[57].mxu1  ;;  %v1791_v33 = vpop.f32.mrb[58].mxu0  ;;  %vm1134_vm13 = vcmp.gt.f32.partialorder %v1096_v22, 0.0 }
 0x16d   : > { %v1680_v35 = vpack.c.bf16 %v1279_v29, %v1279_v29  ;;  %v1280_v19 = vsel %vm1130_vm9, %v2462_v28, %v1618_v7  ;;  %v1219_v17 = vmul.f32 1.442695, %v1163_v5  ;;  %v1896_v37 = vadd.f32 %v1895_v32, %v1894_v26  ;;  %v1897_v38 = vpop.f32.mrb[58].mxu1  ;;  %v1792_v40 = vpop.f32.mrb[59].mxu0 }
 0x16e   : > { %v1681_v41 = vpack.c.bf16 %v1280_v19, %v1280_v19  ;;  %v1221_v24 = vmul.f32 1.442695, %v1164_v13  ;;  %v948_v43 = vadd.f32 %v1790_v11, %v2295_v30  ;;  %v1793_v25 = vadd.f32 %v1792_v40, %v1791_v33  ;;  %v1898_v44 = vpop.f32.mrb[59].mxu1 }
 0x16f   : > { %1430 = vst.msk [vmem:[%s2321_s10 + $0x58] sm:$0xf] %vm1407_vm1, %v1680_v35  ;;  %2082 = vpow2.f32 %v1219_v17  ;;  %v1899_v47 = vadd.f32 %v1898_v44, %v1897_v38 }
 0x170   : > { %v2079_v48 = vpop.eup %2078  ;;  %1431 = vst.msk [vmem:[%s2321_s10 + $0x5c] sm:$0xf] %vm1407_vm1, %v1681_v41  ;;  %2084 = vpow2.f32 %v1221_v24  ;;  %v1101_v28 = vadd.f32 %v1896_v37, %v948_v43  ;;  %v951_v45 = vadd.f32 %v1793_v25, %v2295_v30 }
 0x171   : > { %v1619_v31 = vadd.f32 -1.0, %v2079_v48 }
 0x172   : > { %v2081_v49 = vpop.eup %2080  ;;  %v1165_v51 = vmin.f32 %v1101_v28, 0.0  ;;  %v1104_v53 = vadd.f32 %v1899_v47, %v951_v45  ;;  %vm1135_vm14 = vcmp.gt.f32.partialorder %v1101_v28, 0.0 }
 0x173   : > { %v1281_v54 = vsel %vm1131_vm10, %v2475_v55, %v1619_v31  ;;  %v1620_v34 = vadd.f32 -1.0, %v2081_v49 }
 0x174   : > { %v1682_v36 = vpack.c.bf16 %v1281_v54, %v1281_v54  ;;  %v1223_v56 = vmul.f32 1.442695, %v1165_v51  ;;  %v1166_v57 = vmin.f32 %v1104_v53, 0.0  ;;  %vm1136_vm15 = vcmp.gt.f32.partialorder %v1104_v53, 0.0 }
 0x175   : > { %v1282_v59 = vsel %vm1132_vm11, %v2480_v58, %v1620_v34 }
 0x176   : > { %1432 = vst.msk [vmem:[%s2321_s10 + $0x60] sm:$0xf] %vm1407_vm1, %v1682_v36  ;;  %v1683_v30 = vpack.c.bf16 %v1282_v59, %v1282_v59  ;;  %2086 = vpow2.f32 %v1223_v56  ;;  %v1225_v39 = vmul.f32 1.442695, %v1166_v57 }
 0x178   : > { %1433 = vst.msk [vmem:[%s2321_s10 + $0x64] sm:$0xf] %vm1407_vm1, %v1683_v30  ;;  %2088 = vpow2.f32 %v1225_v39 }
 0x179   : > { %v2083_v42 = vpop.eup %2082 }
 0x17a   : > { %v2085_v55 = vpop.eup %2084  ;;  %v1621_v61 = vadd.f32 -1.0, %v2083_v42 }
 0x17b   : > { %v1622_v63 = vadd.f32 -1.0, %v2085_v55 }
 0x17c   : > { %v1283_v2 = vsel %vm1133_vm12, %v1093_v18, %v1621_v61 }
 0x17d   : > { %v1684_v46 = vpack.c.bf16 %v1283_v2, %v1283_v2  ;;  %v1284_v58 = vsel %vm1134_vm13, %v1096_v22, %v1622_v63 }
 0x17e   : > { %v1685_v50 = vpack.c.bf16 %v1284_v58, %v1284_v58 }
 0x17f   : > { %1434 = vst.msk [vmem:[%s2321_s10 + $0x68] sm:$0xf] %vm1407_vm1, %v1684_v46 }
 0x180   : > { %v2087_v4 = vpop.eup %2086  ;;  %1435 = vst.msk [vmem:[%s2321_s10 + $0x6c] sm:$0xf] %vm1407_vm1, %v1685_v50 }
 0x181   : > { %v1623_v62 = vadd.f32 -1.0, %v2087_v4 }
 0x182   : > { %v2089_v6 = vpop.eup %2088 }
 0x183   : > { %v1285_v52 = vsel %vm1135_vm14, %v1101_v28, %v1623_v62  ;;  %v1624_v8 = vadd.f32 -1.0, %v2089_v6 }
 0x184   : > { %v1686_v9 = vpack.c.bf16 %v1285_v52, %v1285_v52 }
 0x185   : > { %v1286_v10 = vsel %vm1136_vm15, %v1104_v53, %v1624_v8 }
 0x186   : > { %1436 = vst.msk [vmem:[%s2321_s10 + $0x70] sm:$0xf] %vm1407_vm1, %v1686_v9  ;;  %v1687_v60 = vpack.c.bf16 %v1286_v10, %v1286_v10 }
 0x188   : > { %1437 = vst.msk [vmem:[%s2321_s10 + $0x74] sm:$0xf] %vm1407_vm1, %v1687_v60 }
 0x189 PF: > { %s13_s12 = sadd.s32 1, %s2096_s12  }
 0x18a   : > { %p10_p4 = scmp.ge.s32.totalorder %s13_s12, 4  }
 0x18c   :  { %12 = sbr.rel (!%p10_p4) target bundleno = 1 (0x1), region = 62 }

// kernel: forward.11
= control target key start
LH: loop header
LB: loop body
LE: loop exit
PB: predicated region body
PF: predicated region fallthrough
CT: control target
= control target key end

     0   :  { %s272_s5 = smov 64   ;;  %vm216_vm0 = vcmask 518144   ;;  %vm217_vm1 = vsmask.f32 2304  ;;  %s655_s0 = inlined_call_operand.vmem [shape: bf16[16,3,5,192], index: 0, kind: input, shape index: {}]   ;;  %s656_s1 = inlined_call_operand.vmem [shape: bf16[16,5,64], index: 1, kind: output, shape index: {}]  }
   0x1   :  { %v14_v0 = vld [vmem:[%s655_s0 + $0x30] sm:$0x77]  ;;  %v15_v1 = vld [vmem:[%s655_s0 + $0x38] sm:$0x77]  ;;  %v16_v2 = vld [vmem:[%s655_s0 + $0x40] sm:$0x77] }
   0x2   :  { %v58_v3 = vmax.bf16 %v15_v1, %v14_v0  ;;  %v8_v4 = vld [vmem:[%s655_s0] sm:$0x77]  ;;  %v9_v5 = vld [vmem:[%s655_s0 + $0x8] sm:$0x77]  ;;  %v10_v6 = vld [vmem:[%s655_s0 + $0x10] sm:$0x77] }
   0x3   :  { %v56_v7 = vmax.bf16 %v9_v5, %v8_v4  ;;  %v17_v8 = vld [vmem:[%s655_s0 + $0x48] sm:$0x77]  ;;  %v18_v9 = vld [vmem:[%s655_s0 + $0x50] sm:$0x77]  ;;  %v19_v10 = vld [vmem:[%s655_s0 + $0x58] sm:$0x77] }
   0x4   :  { %v310_v11 = vmax.bf16 %v58_v3, %v16_v2  ;;  %v59_v12 = vmax.bf16 %v18_v9, %v17_v8  ;;  %v11_v13 = vld [vmem:[%s655_s0 + $0x18] sm:$0x77]  ;;  %v12_v14 = vld [vmem:[%s655_s0 + $0x20] sm:$0x77]  ;;  %v13_v15 = vld [vmem:[%s655_s0 + $0x28] sm:$0x77] }
   0x5   :  { %v321_v16 = vmax.bf16 %v56_v7, %v10_v6  ;;  %v57_v17 = vmax.bf16 %v12_v14, %v11_v13  ;;  %v23_v18 = vld [vmem:[%s655_s0 + $0x78] sm:$0x77]  ;;  %v24_v19 = vld [vmem:[%s655_s0 + $0x80] sm:$0x77]  ;;  %v21_v23 = vld [vmem:[%s655_s0 + $0x68] sm:$0x77] }
   0x6   :  { %108 = vrot.lane.b32.xlu1 %v310_v11, %s272_s5  ;;  %v331_v20 = vmax.bf16 %v59_v12, %v19_v10  ;;  %v61_v21 = vmax.bf16 %v24_v19, %v23_v18  ;;  %v20_v22 = vld [vmem:[%s655_s0 + $0x60] sm:$0x77]  ;;  %v25_v25 = vld [vmem:[%s655_s0 + $0x88] sm:$0x77]  ;;  %v30_v28 = vld [vmem:[%s655_s0 + $0xb0] sm:$0x77] }
   0x7   :  { %104 = vrot.lane.b32.xlu0 %v321_v16, %s272_s5  ;;  %v341_v24 = vmax.bf16 %v57_v17, %v13_v15  ;;  %v60_v26 = vmax.bf16 %v21_v23, %v20_v22  ;;  %v29_v27 = vld [vmem:[%s655_s0 + $0xa8] sm:$0x77]  ;;  %v22_v29 = vld [vmem:[%s655_s0 + $0x70] sm:$0x77]  ;;  %v27_v31 = vld [vmem:[%s655_s0 + $0x98] sm:$0x77] }
   0x8   :  { %v26_v30 = vld [vmem:[%s655_s0 + $0x90] sm:$0x77]  ;;  %v363_v32 = vmax.bf16 %v61_v21, %v25_v25  ;;  %v63_v33 = vmax.bf16 %v30_v28, %v29_v27  ;;  %v31_v35 = vld [vmem:[%s655_s0 + $0xb8] sm:$0x77]  ;;  %v36_v38 = vld [vmem:[%s655_s0 + $0xe0] sm:$0x77] }
   0x9   :  { %v367_v34 = vmax.bf16 %v60_v26, %v22_v29  ;;  %v62_v36 = vmax.bf16 %v27_v31, %v26_v30  ;;  %v35_v37 = vld [vmem:[%s655_s0 + $0xd8] sm:$0x77]  ;;  %v28_v39 = vld [vmem:[%s655_s0 + $0xa0] sm:$0x77]  ;;  %v33_v41 = vld [vmem:[%s655_s0 + $0xc8] sm:$0x77] }
   0xa   :  { %110 = vrot.lane.b32.xlu1 %v331_v20, %s272_s5  ;;  %v32_v40 = vld [vmem:[%s655_s0 + $0xc0] sm:$0x77]  ;;  %v389_v42 = vmax.bf16 %v63_v33, %v31_v35  ;;  %v65_v43 = vmax.bf16 %v36_v38, %v35_v37  ;;  %v37_v45 = vld [vmem:[%s655_s0 + $0xe8] sm:$0x77]  ;;  %v42_v48 = vld [vmem:[%s655_s0 + $0x110] sm:$0x77] }
   0xb   :  { %106 = vrot.lane.b32.xlu0 %v341_v24, %s272_s5  ;;  %v393_v44 = vmax.bf16 %v62_v36, %v28_v39  ;;  %v64_v46 = vmax.bf16 %v33_v41, %v32_v40  ;;  %v41_v47 = vld [vmem:[%s655_s0 + $0x108] sm:$0x77]  ;;  %v34_v49 = vld [vmem:[%s655_s0 + $0xd0] sm:$0x77]  ;;  %v39_v51 = vld [vmem:[%s655_s0 + $0xf8] sm:$0x77] }
   0xc   :  { %v38_v50 = vld [vmem:[%s655_s0 + $0xf0] sm:$0x77]  ;;  %v415_v52 = vmax.bf16 %v65_v43, %v37_v45  ;;  %v67_v53 = vmax.bf16 %v42_v48, %v41_v47  ;;  %v43_v55 = vld [vmem:[%s655_s0 + $0x118] sm:$0x77]  ;;  %v48_v58 = vld [vmem:[%s655_s0 + $0x140] sm:$0x77] }
   0xd   :  { %v419_v54 = vmax.bf16 %v64_v46, %v34_v49  ;;  %v66_v56 = vmax.bf16 %v39_v51, %v38_v50  ;;  %v47_v57 = vld [vmem:[%s655_s0 + $0x138] sm:$0x77]  ;;  %v40_v59 = vld [vmem:[%s655_s0 + $0x100] sm:$0x77]  ;;  %v45_v61 = vld [vmem:[%s655_s0 + $0x128] sm:$0x77] }
   0xe   :  { %114 = vrot.lane.b32.xlu1 %v363_v32, %s272_s5  ;;  %v44_v60 = vld [vmem:[%s655_s0 + $0x120] sm:$0x77]  ;;  %v441_v62 = vmax.bf16 %v67_v53, %v43_v55  ;;  %v69_v63 = vmax.bf16 %v48_v58, %v47_v57  ;;  %v49_v1 = vld [vmem:[%s655_s0 + $0x148] sm:$0x77]  ;;  %v54_v4 = vld [vmem:[%s655_s0 + $0x170] sm:$0x77] }
   0xf   :  { %112 = vrot.lane.b32.xlu0 %v367_v34, %s272_s5  ;;  %v445_v0 = vmax.bf16 %v66_v56, %v40_v59  ;;  %v68_v2 = vmax.bf16 %v45_v61, %v44_v60  ;;  %v53_v3 = vld [vmem:[%s655_s0 + $0x168] sm:$0x77]  ;;  %v46_v5 = vld [vmem:[%s655_s0 + $0x130] sm:$0x77]  ;;  %v51_v7 = vld [vmem:[%s655_s0 + $0x158] sm:$0x77] }
  0x10   :  { %v50_v6 = vld [vmem:[%s655_s0 + $0x150] sm:$0x77]  ;;  %v467_v8 = vmax.bf16 %v69_v63, %v49_v1  ;;  %v71_v9 = vmax.bf16 %v54_v4, %v53_v3  ;;  %v55_v12 = vld [vmem:[%s655_s0 + $0x178] sm:$0x77]  ;;  %v52_v14 = vld [vmem:[%s655_s0 + $0x160] sm:$0x77] }
  0x11   :  { %v471_v10 = vmax.bf16 %v68_v2, %v46_v5  ;;  %v70_v13 = vmax.bf16 %v51_v7, %v50_v6  ;;  %v170_v18 = vrot.slane %v310_v11, 4  ;;  %v168_v21 = vrot.slane %v321_v16, 4  ;;  %vm494_vm2 = vmand %vm216_vm0, %vm217_vm1  ;;  %v225_v26 = vld [vmem:[%s656_s1 + $0x8] sm:$0x7]  ;;  %v219_v29 = vld [vmem:[%s656_s1] sm:$0x7] }
  0x12   :  { %118 = vrot.lane.b32.xlu1 %v389_v42, %s272_s5  ;;  %v481_v15 = vmax.bf16 %v71_v9, %v55_v12  ;;  %v171_v30 = vrot.slane %v331_v20, 4  ;;  %v169_v33 = vrot.slane %v341_v24, 4  ;;  %v228_v38 = vld [vmem:[%s656_s1 + $0xc] sm:$0x7]  ;;  %v173_v41 = vrot.slane %v363_v32, 4 }
  0x13   :  { %116 = vrot.lane.b32.xlu0 %v393_v44, %s272_s5  ;;  %v485_v17 = vmax.bf16 %v70_v13, %v52_v14  ;;  %v172_v46 = vrot.slane %v367_v34, 4  ;;  %v234_v50 = vld [vmem:[%s656_s1 + $0x14] sm:$0x7]  ;;  %v175_v55 = vrot.slane %v389_v42, 4  ;;  %v174_v58 = vrot.slane %v393_v44, 4 }
  0x14   :  { %v240_v63 = vld [vmem:[%s656_s1 + $0x1c] sm:$0x7]  ;;  %v177_v3 = vrot.slane %v415_v52, 4  ;;  %v176_v6 = vrot.slane %v419_v54, 4  ;;  %v246_v13 = vld [vmem:[%s656_s1 + $0x24] sm:$0x7] }
  0x16   :  { %122 = vrot.lane.b32.xlu1 %v415_v52, %s272_s5 }
  0x17   :  { %120 = vrot.lane.b32.xlu0 %v419_v54, %s272_s5 }
  0x1a   :  { %126 = vrot.lane.b32.xlu1 %v441_v62, %s272_s5 }
  0x1b   :  { %124 = vrot.lane.b32.xlu0 %v445_v0, %s272_s5 }
  0x1e   :  { %130 = vrot.lane.b32.xlu1 %v467_v8, %s272_s5 }
  0x1f   :  { %128 = vrot.lane.b32.xlu0 %v471_v10, %s272_s5 }
  0x22   :  { %134 = vrot.lane.b32.xlu1 %v481_v15, %s272_s5 }
  0x23   :  { %132 = vrot.lane.b32.xlu0 %v485_v17, %s272_s5 }
  0x78   :  { %v109_v19 = vpop.permute.xlu1 %108 }
  0x79   :  { %v154_v22 = vmax.bf16 %v109_v19, %v310_v11  ;;  %v105_v23 = vpop.permute.xlu0 %104  ;;  %v179_v19 = vrot.slane %v441_v62, 4 }
  0x7a   :  { %v152_v27 = vmax.bf16 %v105_v23, %v321_v16  ;;  %v178_v23 = vrot.slane %v445_v0, 4 }
  0x7b   :  { %v202_v28 = vmax.bf16 %v170_v18, %v154_v22 }
  0x7c   :  { %v200_v31 = vmax.bf16 %v168_v21, %v152_v27  ;;  %v111_v11 = vpop.permute.xlu1 %110 }
  0x7d   :  { %v226_v35 = vsel %vm494_vm2, %v202_v28, %v225_v26  ;;  %v155_v36 = vmax.bf16 %v111_v11, %v331_v20  ;;  %v107_v37 = vpop.permute.xlu0 %106  ;;  %v222_v20 = vld [vmem:[%s656_s1 + $0x4] sm:$0x7]  ;;  %v181_v11 = vrot.slane %v467_v8, 4 }
  0x7e   :  { %227 = vst [vmem:[%s656_s1 + $0x8] sm:$0x7] %v226_v35  ;;  %v220_v16 = vsel %vm494_vm2, %v200_v31, %v219_v29  ;;  %v153_v39 = vmax.bf16 %v107_v37, %v341_v24  ;;  %v252_v29 = vld [vmem:[%s656_s1 + $0x2c] sm:$0x7] }
  0x7f   :  { %221 = vst [vmem:[%s656_s1] sm:$0x7] %v220_v16  ;;  %v203_v40 = vmax.bf16 %v171_v30, %v155_v36  ;;  %v180_v36 = vrot.slane %v471_v10, 4 }
  0x80   :  { %v201_v43 = vmax.bf16 %v169_v33, %v153_v39  ;;  %v115_v45 = vpop.permute.xlu1 %114  ;;  %v258_v39 = vld [vmem:[%s656_s1 + $0x34] sm:$0x7] }
  0x81   :  { %v229_v47 = vsel %vm494_vm2, %v203_v40, %v228_v38  ;;  %v157_v24 = vmax.bf16 %v115_v45, %v363_v32  ;;  %v113_v48 = vpop.permute.xlu0 %112  ;;  %v231_v32 = vld [vmem:[%s656_s1 + $0x10] sm:$0x7] }
  0x82   :  { %230 = vst [vmem:[%s656_s1 + $0xc] sm:$0x7] %v229_v47  ;;  %v223_v49 = vsel %vm494_vm2, %v201_v43, %v222_v20  ;;  %v156_v51 = vmax.bf16 %v113_v48, %v367_v34 }
  0x83   :  { %224 = vst [vmem:[%s656_s1 + $0x4] sm:$0x7] %v223_v49  ;;  %v205_v53 = vmax.bf16 %v173_v41, %v157_v24  ;;  %v183_v41 = vrot.slane %v481_v15, 4  ;;  %v264_v49 = vld [vmem:[%s656_s1 + $0x3c] sm:$0x7] }
  0x84   :  { %v204_v56 = vmax.bf16 %v172_v46, %v156_v51  ;;  %v119_v57 = vpop.permute.xlu1 %118  ;;  %v182_v46 = vrot.slane %v485_v17, 4 }
  0x85   :  { %v235_v59 = vsel %vm494_vm2, %v205_v53, %v234_v50  ;;  %v159_v34 = vmax.bf16 %v119_v57, %v389_v42  ;;  %v117_v60 = vpop.permute.xlu0 %116  ;;  %v237_v42 = vld [vmem:[%s656_s1 + $0x18] sm:$0x7] }
  0x86   :  { %236 = vst [vmem:[%s656_s1 + $0x14] sm:$0x7] %v235_v59  ;;  %v232_v61 = vsel %vm494_vm2, %v204_v56, %v231_v32  ;;  %v158_v1 = vmax.bf16 %v117_v60, %v393_v44 }
  0x87   :  { %233 = vst [vmem:[%s656_s1 + $0x10] sm:$0x7] %v232_v61  ;;  %v207_v2 = vmax.bf16 %v175_v55, %v159_v34 }
  0x88   :  { %v206_v4 = vmax.bf16 %v174_v58, %v158_v1  ;;  %v123_v5 = vpop.permute.xlu1 %122 }
  0x89   :  { %v241_v7 = vsel %vm494_vm2, %v207_v2, %v240_v63  ;;  %v161_v44 = vmax.bf16 %v123_v5, %v415_v52  ;;  %v121_v9 = vpop.permute.xlu0 %120  ;;  %v243_v52 = vld [vmem:[%s656_s1 + $0x20] sm:$0x7] }
  0x8a   :  { %242 = vst [vmem:[%s656_s1 + $0x1c] sm:$0x7] %v241_v7  ;;  %v238_v12 = vsel %vm494_vm2, %v206_v4, %v237_v42  ;;  %v160_v14 = vmax.bf16 %v121_v9, %v419_v54 }
  0x8b   :  { %239 = vst [vmem:[%s656_s1 + $0x18] sm:$0x7] %v238_v12  ;;  %v209_v18 = vmax.bf16 %v177_v3, %v161_v44 }
  0x8c   :  { %v208_v21 = vmax.bf16 %v176_v6, %v160_v14  ;;  %v127_v22 = vpop.permute.xlu1 %126 }
  0x8d   :  { %v247_v26 = vsel %vm494_vm2, %v209_v18, %v246_v13  ;;  %v163_v54 = vmax.bf16 %v127_v22, %v441_v62  ;;  %v125_v27 = vpop.permute.xlu0 %124  ;;  %v249_v62 = vld [vmem:[%s656_s1 + $0x28] sm:$0x7] }
  0x8e   :  { %248 = vst [vmem:[%s656_s1 + $0x24] sm:$0x7] %v247_v26  ;;  %v244_v28 = vsel %vm494_vm2, %v208_v21, %v243_v52  ;;  %v162_v30 = vmax.bf16 %v125_v27, %v445_v0 }
  0x8f   :  { %245 = vst [vmem:[%s656_s1 + $0x20] sm:$0x7] %v244_v28  ;;  %v211_v31 = vmax.bf16 %v179_v19, %v163_v54 }
  0x90   :  { %v210_v33 = vmax.bf16 %v178_v23, %v162_v30  ;;  %v131_v35 = vpop.permute.xlu1 %130 }
  0x91   :  { %v253_v37 = vsel %vm494_vm2, %v211_v31, %v252_v29  ;;  %v165_v0 = vmax.bf16 %v131_v35, %v467_v8  ;;  %v129_v16 = vpop.permute.xlu0 %128  ;;  %v255_v8 = vld [vmem:[%s656_s1 + $0x30] sm:$0x7] }
  0x92   :  { %254 = vst [vmem:[%s656_s1 + $0x2c] sm:$0x7] %v253_v37  ;;  %v250_v38 = vsel %vm494_vm2, %v210_v33, %v249_v62  ;;  %v164_v40 = vmax.bf16 %v129_v16, %v471_v10 }
  0x93   :  { %251 = vst [vmem:[%s656_s1 + $0x28] sm:$0x7] %v250_v38  ;;  %v213_v20 = vmax.bf16 %v181_v11, %v165_v0 }
  0x94   :  { %v212_v43 = vmax.bf16 %v180_v36, %v164_v40  ;;  %v135_v45 = vpop.permute.xlu1 %134 }
  0x95   :  { %v259_v47 = vsel %vm494_vm2, %v213_v20, %v258_v39  ;;  %v167_v10 = vmax.bf16 %v135_v45, %v481_v15  ;;  %v133_v24 = vpop.permute.xlu0 %132  ;;  %v261_v15 = vld [vmem:[%s656_s1 + $0x38] sm:$0x7] }
  0x96   :  { %260 = vst [vmem:[%s656_s1 + $0x34] sm:$0x7] %v259_v47  ;;  %v256_v48 = vsel %vm494_vm2, %v212_v43, %v255_v8  ;;  %v166_v50 = vmax.bf16 %v133_v24, %v485_v17 }
  0x97   :  { %257 = vst [vmem:[%s656_s1 + $0x30] sm:$0x7] %v256_v48  ;;  %v215_v51 = vmax.bf16 %v183_v41, %v167_v10 }
  0x98   :  { %v214_v53 = vmax.bf16 %v182_v46, %v166_v50 }
  0x99   :  { %v265_v32 = vsel %vm494_vm2, %v215_v51, %v264_v49 }
  0x9a   :  { %266 = vst [vmem:[%s656_s1 + $0x3c] sm:$0x7] %v265_v32  ;;  %v262_v17 = vsel %vm494_vm2, %v214_v53, %v261_v15 }
  0x9b   :  { %263 = vst [vmem:[%s656_s1 + $0x38] sm:$0x7] %v262_v17 }

// kernel: forward.12
= control target key start
LH: loop header
LB: loop body
LE: loop exit
PB: predicated region body
PF: predicated region fallthrough
CT: control target
= control target key end

     0   :  { %vm372_vm0 = vcmask 523264   ;;  %vm566_vm2 = vcmask 519168   ;;  %s945_s1 = inlined_call_operand.vmem [shape: bf16[576,64], index: 1, kind: input, shape index: {}]   ;;  %s946_s0 = inlined_call_operand.vmem [shape: bf16[32,576], index: 0, kind: input, shape index: {}]   ;;  %s947_s2 = inlined_call_operand.vmem [shape: f32[1,64], index: 2, kind: input, shape index: {}]   ;;  %s948_s3 = inlined_call_operand.vmem [shape: bf16[32,64], index: 3, kind: output, shape index: {}]  }
   0x1   :  { %v710_v0 = vld [vmem:[%s945_s1 + $0x40] sm:$0xff]   ;;  %v714_v4 = vld [vmem:[%s945_s1 + $0x48] sm:$0xff]   ;;  %v718_v8 = vld [vmem:[%s945_s1 + $0x50] sm:$0xff]  }
   0x2   :  { %v711_v1 = vld [vmem:[%s945_s1] sm:$0xff]   ;;  %636 = vmatprep.subr.bf16.mxu0 %v710_v0  ;;  %v715_v5 = vld [vmem:[%s945_s1 + $0x8] sm:$0xff]   ;;  %v719_v9 = vld [vmem:[%s945_s1 + $0x10] sm:$0xff]  }
   0x3   :  { %v712_v2 = vld [vmem:[%s945_s1 + $0xc0] sm:$0xff]   ;;  %637 = vmatpush3.bf16.msra.mxu0 %v711_v1  ;;  %v716_v6 = vld [vmem:[%s945_s1 + $0xc8] sm:$0xff]   ;;  %v720_v10 = vld [vmem:[%s945_s1 + $0xd0] sm:$0xff]  }
   0x4   :  { %v713_v3 = vld [vmem:[%s945_s1 + $0x80] sm:$0xff]   ;;  %664 = vmatprep.subr.bf16.mxu1 %v712_v2  ;;  %638 = vmatprep.subr.bf16.mxu0 %v714_v4  ;;  %v717_v7 = vld [vmem:[%s945_s1 + $0x88] sm:$0xff]   ;;  %v721_v11 = vld [vmem:[%s945_s1 + $0x90] sm:$0xff]  }
   0x5   :  { %665 = vmatpush3.bf16.msra.mxu1 %v713_v3  ;;  %v722_v12 = vld [vmem:[%s945_s1 + $0x58] sm:$0xff]   ;;  %v726_v16 = vld [vmem:[%s945_s1 + $0x60] sm:$0xff]   ;;  %v730_v20 = vld [vmem:[%s945_s1 + $0x68] sm:$0xff]  }
   0x6   :  { %666 = vmatprep.subr.bf16.mxu1 %v716_v6  ;;  %v723_v13 = vld [vmem:[%s945_s1 + $0x18] sm:$0xff]   ;;  %v727_v17 = vld [vmem:[%s945_s1 + $0x20] sm:$0xff]   ;;  %v731_v21 = vld [vmem:[%s945_s1 + $0x28] sm:$0xff]  }
   0x7   :  { %639 = vmatpush3.bf16.msra.mxu0 %v715_v5  ;;  %v724_v14 = vld [vmem:[%s945_s1 + $0xd8] sm:$0xff]   ;;  %v728_v18 = vld [vmem:[%s945_s1 + $0xe0] sm:$0xff]   ;;  %v732_v22 = vld [vmem:[%s945_s1 + $0xe8] sm:$0xff]  }
   0x8   :  { %640 = vmatprep.subr.bf16.mxu0 %v718_v8  ;;  %v725_v15 = vld [vmem:[%s945_s1 + $0x98] sm:$0xff]   ;;  %v729_v19 = vld [vmem:[%s945_s1 + $0xa0] sm:$0xff]   ;;  %v733_v23 = vld [vmem:[%s945_s1 + $0xa8] sm:$0xff]  }
   0x9   :  { %667 = vmatpush3.bf16.msra.mxu1 %v717_v7  ;;  %v734_v24 = vld [vmem:[%s945_s1 + $0x70] sm:$0xff]   ;;  %v738_v28 = vld [vmem:[%s945_s1 + $0x78] sm:$0xff]   ;;  %v745_v34 = vld [vmem:[%s945_s1 + $0x100] sm:$0xff]  }
   0xa   :  { %668 = vmatprep.subr.bf16.mxu1 %v720_v10  ;;  %v735_v25 = vld [vmem:[%s945_s1 + $0x30] sm:$0xff]   ;;  %v739_v29 = vld [vmem:[%s945_s1 + $0x38] sm:$0xff]   ;;  %v748_v36 = vld [vmem:[%s946_s0 + $0xc] ss:$20 sps:$4 sm:$0xff]  }
   0xb   :  { %641 = vmatpush3.bf16.msra.mxu0 %v719_v9  ;;  %v736_v26 = vld [vmem:[%s945_s1 + $0xf0] sm:$0xff]   ;;  %v740_v30 = vld [vmem:[%s945_s1 + $0xf8] sm:$0xff]   ;;  %v749_v37 = vld [vmem:[%s945_s1 + $0x108] sm:$0xff]   ;;  %460 = vmatprep.mubr.bf16.mxu1 %v748_v36 }
   0xc   :  { %642 = vmatprep.subr.bf16.mxu0 %v722_v12  ;;  %v737_v27 = vld [vmem:[%s945_s1 + $0xb0] sm:$0xff]   ;;  %v743_v32 = vld [vmem:[%s946_s0 + $0x4] ss:$20 sps:$4 sm:$0xff]   ;;  %v746_v35 = vld [vmem:[%s946_s0 + $0x8] ss:$20 sps:$4 sm:$0xff]  }
   0xd   :  { %669 = vmatpush3.bf16.msra.mxu1 %v721_v11  ;;  %v741_v31 = vld [vmem:[%s946_s0] ss:$20 sps:$4 sm:$0xff]   ;;  %v744_v33 = vld [vmem:[%s945_s1 + $0xb8] sm:$0xff]   ;;  %411 = vmatprep.mubr.bf16.mxu0 %v743_v32  ;;  %v756_v42 = vld [vmem:[%s946_s0 + $0x30] ss:$20 sps:$4 sm:$0xff]  }
   0xe   :  { %670 = vmatprep.subr.bf16.mxu1 %v724_v14  ;;  %v750_v38 = vld [vmem:[%s946_s0 + $0x2c] ss:$20 sps:$4 sm:$0xff]   ;;  %v752_v39 = vld [vmem:[%s946_s0 + $0x28] ss:$20 sps:$4 sm:$0xff]   ;;  %v753_v40 = vld [vmem:[%s945_s1 + $0x110] sm:$0xff]  }
   0xf   :  { %643 = vmatpush3.bf16.msra.mxu0 %v723_v13  ;;  %v754_v41 = vld [vmem:[%s946_s0 + $0x34] ss:$20 sps:$4 sm:$0xff]   ;;  %v757_v43 = vld [vmem:[%s945_s1 + $0x118] sm:$0xff]   ;;  %v758_v44 = vld [vmem:[%s946_s0 + $0x10] ss:$20 sps:$4 sm:$0xff]  }
  0x10   :  { %644 = vmatprep.subr.bf16.mxu0 %v726_v16  ;;  %v759_v45 = vld [vmem:[%s946_s0 + $0x38] ss:$20 sps:$4 sm:$0xff]   ;;  %v575_v47 = vld [vmem:[%s947_s2] ss:$0 sm:$0xff] }
  0x11   :  { %671 = vmatpush3.bf16.msra.mxu1 %v725_v15 }
  0x12   :  { %672 = vmatprep.subr.bf16.mxu1 %v728_v18 }
  0x13   :  { %645 = vmatpush3.bf16.msra.mxu0 %v727_v17 }
  0x14   :  { %646 = vmatprep.subr.bf16.mxu0 %v730_v20 }
  0x15   :  { %673 = vmatpush3.bf16.msra.mxu1 %v729_v19 }
  0x16   :  { %674 = vmatprep.subr.bf16.mxu1 %v732_v22 }
  0x17   :  { %647 = vmatpush3.bf16.msra.mxu0 %v731_v21 }
  0x18   :  { %648 = vmatprep.subr.bf16.mxu0 %v734_v24 }
  0x19   :  { %675 = vmatpush3.bf16.msra.mxu1 %v733_v23 }
  0x1a   :  { %676 = vmatprep.subr.bf16.mxu1 %v736_v26 }
  0x1b   :  { %649 = vmatpush3.bf16.msra.mxu0 %v735_v25 }
  0x1c   :  { %650 = vmatprep.subr.bf16.mxu0 %v738_v28 }
  0x1d   :  { %677 = vmatpush3.bf16.msra.mxu1 %v737_v27 }
  0x1e   :  { %678 = vmatprep.subr.bf16.mxu1 %v740_v30 }
  0x1f   :  { %651 = vmatpush3.bf16.msra.mxu0 %v739_v29 }
  0x20   :  { %698 = vmatprep.subr.bf16.mxu0 %v745_v34 }
  0x21   :  { %679 = vmatpush3.bf16.msra.mxu1 %v744_v33 }
  0x22   :  { %412 = vmatmul.mubr.bf16.vlgmr.msra.gmra.mrb[0].mxu0 %v741_v31 }
  0x23   :  { %699 = vmatpush3.bf16.msra.mxu0 %v745_v34  ;;  %419 = vmatprep.mubr.bf16.mxu0 %v750_v38 }
  0x24   :  { %461 = vmatmul.mubr.bf16.vlgmr.msra.gmra.mrb[0].mxu1 %v746_v35  ;;  %700 = vmatprep.subr.bf16.mxu0 %v749_v37 }
  0x25   :  { %468 = vmatprep.mubr.bf16.mxu1 %v754_v41 }
  0x27   :  { %701 = vmatpush3.bf16.msra.mxu0 %v749_v37 }
  0x28   :  { %702 = vmatprep.subr.bf16.mxu0 %v753_v40 }
  0x2a   :  { %420 = vmatmul.mubr.bf16.gmra.mrb[4].mxu0 %v752_v39 }
  0x2b   :  { %706 = vmatprep.mubr.msk.bf16.mxu0 %vm372_vm0, %v758_v44  ;;  %703 = vmatpush3.bf16.msra.mxu0 %v753_v40 }
  0x2c   :  { %469 = vmatmul.mubr.bf16.gmra.mrb[4].mxu1 %v756_v42  ;;  %704 = vmatprep.subr.bf16.mxu0 %v757_v43 }
  0x2f   :  { %705 = vmatpush3.bf16.msra.mxu0 %v757_v43 }
  0x32   :  { %707 = vmatmul.mubr.msk.bf16.vlgmr.msra.gmra.mrb[8].mxu0 %vm372_vm0, %v759_v45 }
  0xf5   :  { %v652_v46 = vpop.f32.mrb[0].mxu0 }
  0xf6   :  { %v653_v48 = vpop.f32.mrb[1].mxu0 }
  0xf7   :  { %v654_v49 = vadd.f32 %v653_v48, %v652_v46  ;;  %v655_v50 = vpop.f32.mrb[2].mxu0  ;;  %v680_v51 = vpop.f32.mrb[0].mxu1 }
  0xf8   :  { %v656_v52 = vpop.f32.mrb[3].mxu0  ;;  %v681_v55 = vpop.f32.mrb[1].mxu1 }
  0xf9   :  { %v414_v53 = vadd.f32 %v654_v49, %v575_v47  ;;  %v657_v54 = vadd.f32 %v656_v52, %v655_v50  ;;  %v682_v56 = vadd.f32 %v681_v55, %v680_v51  ;;  %v683_v57 = vpop.f32.mrb[2].mxu1 }
  0xfa   :  { %v684_v59 = vpop.f32.mrb[3].mxu1 }
  0xfb   :  { %v417_v58 = vadd.f32 %v657_v54, %v575_v47  ;;  %v685_v60 = vadd.f32 %v684_v59, %v683_v57  ;;  %v463_v61 = vadd.f32 %v682_v56, %v414_v53 }
  0xfd   :  { %v658_v62 = vpop.f32.mrb[4].mxu0  ;;  %v466_v0 = vadd.f32 %v685_v60, %v417_v58 }
  0xfe   :  { %v659_v63 = vpop.f32.mrb[5].mxu0 }
  0xff   :  { %v660_v1 = vadd.f32 %v659_v63, %v658_v62  ;;  %v661_v2 = vpop.f32.mrb[6].mxu0  ;;  %v686_v3 = vpop.f32.mrb[4].mxu1 }
 0x100   :  { %v662_v4 = vpop.f32.mrb[7].mxu0  ;;  %v687_v7 = vpop.f32.mrb[5].mxu1 }
 0x101   :  { %v422_v5 = vadd.f32 %v660_v1, %v575_v47  ;;  %v663_v6 = vadd.f32 %v662_v4, %v661_v2  ;;  %v688_v8 = vadd.f32 %v687_v7, %v686_v3  ;;  %v689_v9 = vpop.f32.mrb[6].mxu1 }
 0x102   :  { %v690_v11 = vpop.f32.mrb[7].mxu1 }
 0x103   :  { %v425_v10 = vadd.f32 %v663_v6, %v575_v47  ;;  %v691_v12 = vadd.f32 %v690_v11, %v689_v9  ;;  %v471_v13 = vadd.f32 %v688_v8, %v422_v5 }
 0x105   :  { %v708_v14 = vpop.f32.mrb[8].mxu0  ;;  %v474_v15 = vadd.f32 %v691_v12, %v425_v10 }
 0x106   :  { %v520_v16 = vadd.f32 %v708_v14, %v471_v13  ;;  %v511_v17 = vpop.f32.mrb[9].mxu0 }
 0x107   :  { %v512_v18 = vadd.f32 %v511_v17, %v463_v61  ;;  %v709_v19 = vpop.f32.mrb[10].mxu0 }
 0x108   :  { %v532_v20 = vmin.f32 %v520_v16, 0.0  ;;  %v523_v21 = vadd.f32 %v709_v19, %v474_v15  ;;  %v514_v22 = vpop.f32.mrb[11].mxu0  ;;  %vm528_vm1 = vcmp.gt.f32.partialorder %v520_v16, 0.0 }
 0x109   :  { %v530_v23 = vmin.f32 %v512_v18, 0.0  ;;  %v515_v24 = vadd.f32 %v514_v22, %v466_v0  ;;  %vm526_vm3 = vcmp.gt.f32.partialorder %v512_v18, 0.0 }
 0x10a   :  { %v538_v25 = vmul.f32 1.442695, %v532_v20  ;;  %v533_v26 = vmin.f32 %v523_v21, 0.0  ;;  %vm529_vm4 = vcmp.gt.f32.partialorder %v523_v21, 0.0 }
 0x10b   :  { %v534_v27 = vmul.f32 1.442695, %v530_v23  ;;  %v531_v28 = vmin.f32 %v515_v24, 0.0  ;;  %vm527_vm5 = vcmp.gt.f32.partialorder %v515_v24, 0.0 }
 0x10c   :  { %760 = vpow2.f32 %v538_v25  ;;  %v540_v29 = vmul.f32 1.442695, %v533_v26 }
 0x10d   :  { %762 = vpow2.f32 %v534_v27  ;;  %v536_v30 = vmul.f32 1.442695, %v531_v28 }
 0x10e   :  { %764 = vpow2.f32 %v540_v29 }
 0x10f   :  { %766 = vpow2.f32 %v536_v30 }
 0x116   :  { %v761_v31 = vpop.eup %760 }
 0x117   :  { %v763_v32 = vpop.eup %762  ;;  %v626_v33 = vadd.f32 -1.0, %v761_v31 }
 0x118   :  { %v765_v34 = vpop.eup %764  ;;  %v624_v35 = vadd.f32 -1.0, %v763_v32 }
 0x119   :  { %v767_v36 = vpop.eup %766  ;;  %v548_v37 = vsel %vm528_vm1, %v520_v16, %v626_v33  ;;  %v627_v38 = vadd.f32 -1.0, %v765_v34 }
 0x11a   :  { %v634_v39 = vpack.c.bf16 %v548_v37, %v548_v37  ;;  %v546_v40 = vsel %vm526_vm3, %v512_v18, %v624_v35  ;;  %v625_v41 = vadd.f32 -1.0, %v767_v36 }
 0x11b   :  { %v632_v42 = vpack.c.bf16 %v546_v40, %v546_v40  ;;  %v549_v43 = vsel %vm529_vm4, %v523_v21, %v627_v38 }
 0x11c   :  { %569 = vst.msk [vmem:[%s948_s3 + $0x8] sm:$0xf] %vm566_vm2, %v634_v39  ;;  %v635_v44 = vpack.c.bf16 %v549_v43, %v549_v43  ;;  %v547_v45 = vsel %vm527_vm5, %v515_v24, %v625_v41 }
 0x11d   :  { %567 = vst.msk [vmem:[%s948_s3] sm:$0xf] %vm566_vm2, %v632_v42  ;;  %v633_v46 = vpack.c.bf16 %v547_v45, %v547_v45 }
 0x11e   :  { %570 = vst.msk [vmem:[%s948_s3 + $0xc] sm:$0xf] %vm566_vm2, %v635_v44 }
 0x11f   :  { %568 = vst.msk [vmem:[%s948_s3 + $0x4] sm:$0xf] %vm566_vm2, %v633_v46 }

// kernel: forward.13
= control target key start
LH: loop header
LB: loop body
LE: loop exit
PB: predicated region body
PF: predicated region fallthrough
CT: control target
= control target key end

     0   :  { %s144_s5 = smov 64   ;;  %vm112_vm0 = vcmask 516096   ;;  %vm113_vm1 = vsmask.f32 256  ;;  %s295_s0 = inlined_call_operand.vmem [shape: bf16[8,3,1,192], index: 0, kind: input, shape index: {}]   ;;  %s296_s1 = inlined_call_operand.vmem [shape: bf16[8,1,64], index: 1, kind: output, shape index: {}]  }
   0x1   :  { %v14_v0 = vld [vmem:[%s295_s0 + $0xc] sm:$0x3]  ;;  %v15_v1 = vld [vmem:[%s295_s0 + $0xe] sm:$0x3]  ;;  %v16_v2 = vld [vmem:[%s295_s0 + $0x10] sm:$0x3] }
   0x2   :  { %v34_v3 = vmax.bf16 %v15_v1, %v14_v0  ;;  %v8_v4 = vld [vmem:[%s295_s0] sm:$0x3]  ;;  %v9_v5 = vld [vmem:[%s295_s0 + $0x2] sm:$0x3]  ;;  %v10_v6 = vld [vmem:[%s295_s0 + $0x4] sm:$0x3] }
   0x3   :  { %v32_v7 = vmax.bf16 %v9_v5, %v8_v4  ;;  %v17_v8 = vld [vmem:[%s295_s0 + $0x12] sm:$0x3]  ;;  %v18_v9 = vld [vmem:[%s295_s0 + $0x14] sm:$0x3]  ;;  %v19_v10 = vld [vmem:[%s295_s0 + $0x16] sm:$0x3] }
   0x4   :  { %v42_v11 = vmax.bf16 %v34_v3, %v16_v2  ;;  %v35_v12 = vmax.bf16 %v18_v9, %v17_v8  ;;  %v11_v13 = vld [vmem:[%s295_s0 + $0x6] sm:$0x3]  ;;  %v12_v14 = vld [vmem:[%s295_s0 + $0x8] sm:$0x3]  ;;  %v13_v15 = vld [vmem:[%s295_s0 + $0xa] sm:$0x3] }
   0x5   :  { %v40_v16 = vmax.bf16 %v32_v7, %v10_v6  ;;  %v33_v17 = vmax.bf16 %v12_v14, %v11_v13  ;;  %v23_v18 = vld [vmem:[%s295_s0 + $0x1e] sm:$0x3]  ;;  %v24_v19 = vld [vmem:[%s295_s0 + $0x20] sm:$0x3]  ;;  %v20_v22 = vld [vmem:[%s295_s0 + $0x18] sm:$0x3] }
   0x6   :  { %60 = vrot.lane.b32.xlu1 %v42_v11, %s144_s5  ;;  %v43_v20 = vmax.bf16 %v35_v12, %v19_v10  ;;  %v37_v21 = vmax.bf16 %v24_v19, %v23_v18  ;;  %v21_v23 = vld [vmem:[%s295_s0 + $0x1a] sm:$0x3]  ;;  %v25_v25 = vld [vmem:[%s295_s0 + $0x22] sm:$0x3]  ;;  %v29_v27 = vld [vmem:[%s295_s0 + $0x2a] sm:$0x3] }
   0x7   :  { %56 = vrot.lane.b32.xlu0 %v40_v16, %s144_s5  ;;  %v41_v24 = vmax.bf16 %v33_v17, %v13_v15  ;;  %v36_v26 = vmax.bf16 %v21_v23, %v20_v22  ;;  %v30_v28 = vld [vmem:[%s295_s0 + $0x2c] sm:$0x3]  ;;  %v22_v29 = vld [vmem:[%s295_s0 + $0x1c] sm:$0x3]  ;;  %v26_v30 = vld [vmem:[%s295_s0 + $0x24] sm:$0x3] }
   0x8   :  { %v27_v31 = vld [vmem:[%s295_s0 + $0x26] sm:$0x3]  ;;  %v45_v32 = vmax.bf16 %v37_v21, %v25_v25  ;;  %v39_v33 = vmax.bf16 %v30_v28, %v29_v27  ;;  %v31_v35 = vld [vmem:[%s295_s0 + $0x2e] sm:$0x3]  ;;  %v28_v37 = vld [vmem:[%s295_s0 + $0x28] sm:$0x3] }
   0x9   :  { %v44_v34 = vmax.bf16 %v36_v26, %v22_v29  ;;  %v38_v36 = vmax.bf16 %v27_v31, %v26_v30  ;;  %v90_v40 = vrot.slane %v42_v11, 1  ;;  %v88_v42 = vrot.slane %v40_v16, 1  ;;  %vm227_vm2 = vmand %vm112_vm0, %vm113_vm1  ;;  %v121_v46 = vld [vmem:[%s296_s1 + $0x2] sm:$0x1]  ;;  %v115_v49 = vld [vmem:[%s296_s1] sm:$0x1] }
   0xa   :  { %62 = vrot.lane.b32.xlu1 %v43_v20, %s144_s5  ;;  %v47_v38 = vmax.bf16 %v39_v33, %v31_v35  ;;  %v91_v50 = vrot.slane %v43_v20, 1  ;;  %v89_v53 = vrot.slane %v41_v24, 1  ;;  %v124_v58 = vld [vmem:[%s296_s1 + $0x3] sm:$0x1]  ;;  %v118_v61 = vld [vmem:[%s296_s1 + $0x1] sm:$0x1] }
   0xb   :  { %58 = vrot.lane.b32.xlu0 %v41_v24, %s144_s5  ;;  %v46_v39 = vmax.bf16 %v38_v36, %v28_v37  ;;  %v93_v62 = vrot.slane %v45_v32, 1  ;;  %v92_v1 = vrot.slane %v44_v34, 1  ;;  %v130_v6 = vld [vmem:[%s296_s1 + $0x5] sm:$0x1]  ;;  %v127_v9 = vld [vmem:[%s296_s1 + $0x4] sm:$0x1] }
   0xc   :  { %v95_v10 = vrot.slane %v47_v38, 1  ;;  %v136_v18 = vld [vmem:[%s296_s1 + $0x7] sm:$0x1]  ;;  %v133_v21 = vld [vmem:[%s296_s1 + $0x6] sm:$0x1] }
   0xd   :  { %v94_v13 = vrot.slane %v46_v39, 1 }
   0xe   :  { %66 = vrot.lane.b32.xlu1 %v45_v32, %s144_s5 }
   0xf   :  { %64 = vrot.lane.b32.xlu0 %v44_v34, %s144_s5 }
  0x12   :  { %70 = vrot.lane.b32.xlu1 %v47_v38, %s144_s5 }
  0x13   :  { %68 = vrot.lane.b32.xlu0 %v46_v39, %s144_s5 }
  0x78   :  { %v61_v41 = vpop.permute.xlu1 %60 }
  0x79   :  { %v82_v43 = vmax.bf16 %v61_v41, %v42_v11  ;;  %v57_v44 = vpop.permute.xlu0 %56 }
  0x7a   :  { %v80_v47 = vmax.bf16 %v57_v44, %v40_v16 }
  0x7b   :  { %v106_v48 = vmax.bf16 %v90_v40, %v82_v43 }
  0x7c   :  { %v104_v51 = vmax.bf16 %v88_v42, %v80_v47  ;;  %v63_v52 = vpop.permute.xlu1 %62 }
  0x7d   :  { %v122_v54 = vsel %vm227_vm2, %v106_v48, %v121_v46  ;;  %v83_v55 = vmax.bf16 %v63_v52, %v43_v20  ;;  %v59_v56 = vpop.permute.xlu0 %58 }
  0x7e   :  { %123 = vst [vmem:[%s296_s1 + $0x2] sm:$0x1] %v122_v54  ;;  %v116_v57 = vsel %vm227_vm2, %v104_v51, %v115_v49  ;;  %v81_v59 = vmax.bf16 %v59_v56, %v41_v24 }
  0x7f   :  { %117 = vst [vmem:[%s296_s1] sm:$0x1] %v116_v57  ;;  %v107_v60 = vmax.bf16 %v91_v50, %v83_v55 }
  0x80   :  { %v105_v63 = vmax.bf16 %v89_v53, %v81_v59  ;;  %v67_v0 = vpop.permute.xlu1 %66 }
  0x81   :  { %v125_v2 = vsel %vm227_vm2, %v107_v60, %v124_v58  ;;  %v85_v3 = vmax.bf16 %v67_v0, %v45_v32  ;;  %v65_v4 = vpop.permute.xlu0 %64 }
  0x82   :  { %126 = vst [vmem:[%s296_s1 + $0x3] sm:$0x1] %v125_v2  ;;  %v119_v5 = vsel %vm227_vm2, %v105_v63, %v118_v61  ;;  %v84_v7 = vmax.bf16 %v65_v4, %v44_v34 }
  0x83   :  { %120 = vst [vmem:[%s296_s1 + $0x1] sm:$0x1] %v119_v5  ;;  %v109_v8 = vmax.bf16 %v93_v62, %v85_v3 }
  0x84   :  { %v108_v11 = vmax.bf16 %v92_v1, %v84_v7  ;;  %v71_v12 = vpop.permute.xlu1 %70 }
  0x85   :  { %v131_v14 = vsel %vm227_vm2, %v109_v8, %v130_v6  ;;  %v87_v15 = vmax.bf16 %v71_v12, %v47_v38  ;;  %v69_v16 = vpop.permute.xlu0 %68 }
  0x86   :  { %132 = vst [vmem:[%s296_s1 + $0x5] sm:$0x1] %v131_v14  ;;  %v128_v17 = vsel %vm227_vm2, %v108_v11, %v127_v9  ;;  %v86_v19 = vmax.bf16 %v69_v16, %v46_v39 }
  0x87   :  { %129 = vst [vmem:[%s296_s1 + $0x4] sm:$0x1] %v128_v17  ;;  %v111_v20 = vmax.bf16 %v95_v10, %v87_v15 }
  0x88   :  { %v110_v22 = vmax.bf16 %v94_v13, %v86_v19 }
  0x89   :  { %v137_v23 = vsel %vm227_vm2, %v111_v20, %v136_v18 }
  0x8a   :  { %138 = vst [vmem:[%s296_s1 + $0x7] sm:$0x1] %v137_v23  ;;  %v134_v24 = vsel %vm227_vm2, %v110_v22, %v133_v21 }
  0x8b   :  { %135 = vst [vmem:[%s296_s1 + $0x6] sm:$0x1] %v134_v24 }

// kernel: forward.14
= control target key start
LH: loop header
LB: loop body
LE: loop exit
PB: predicated region body
PF: predicated region fallthrough
CT: control target
= control target key end

     0   :  { %v167_v3 = vmov 0.0   ;;  %vm44_vm0 = vcmask 523264   ;;  %v34_v27 = vlaneseq  ;;  %s257_s1 = inlined_call_operand.vmem [shape: f32[64,256], index: 1, kind: input, shape index: {}]   ;;  %s258_s0 = inlined_call_operand.vmem [shape: f32[16,64], index: 0, kind: input, shape index: {}]   ;;  %s259_s2 = inlined_call_operand.vmem [shape: f32[1,256], index: 2, kind: input, shape index: {}]   ;;  %s260_s3 = inlined_call_operand.vmem [shape: f32[16,256], index: 3, kind: output, shape index: {}]  }
   0x1   :  { %v17_v0 = vld [vmem:[%s257_s1 + $0x8] sm:$0xff]  ;;  %v19_v1 = vld [vmem:[%s257_s1 + $0x18] sm:$0xff]  ;;  %v16_v2 = vld [vmem:[%s257_s1] sm:$0xff]  ;;  %115 = vmatprep.mubr.f32.mxu0 %v167_v3  ;;  %121 = vmatprep.mubr.f32.mxu1 %v167_v3 }
   0x2   :  { %v142_v4 = vpack.c.bf16 %v19_v1, %v17_v0  ;;  %v18_v5 = vld [vmem:[%s257_s1 + $0x10] sm:$0xff]  ;;  %v21_v6 = vld [vmem:[%s257_s1 + $0x28] sm:$0xff]  ;;  %v23_v7 = vld [vmem:[%s257_s1 + $0x38] sm:$0xff]  ;;  %v35_v28 = vshrl.u32 %v34_v27, 7 }
   0x3   :  { %v144_v8 = vpack.c.bf16 %v18_v5, %v16_v2  ;;  %v146_v9 = vpack.c.bf16 %v23_v7, %v21_v6  ;;  %v20_v10 = vld [vmem:[%s257_s1 + $0x20] sm:$0xff]  ;;  %v22_v11 = vld [vmem:[%s257_s1 + $0x30] sm:$0xff]  ;;  %v25_v12 = vld [vmem:[%s257_s1 + $0x48] sm:$0xff] }
   0x4   :  { %143 = vmatprep.subr.bf16.mxu0 %v142_v4  ;;  %158 = vmatprep.subr.bf16.mxu1 %v142_v4  ;;  %v27_v13 = vld [vmem:[%s257_s1 + $0x58] sm:$0xff]  ;;  %v148_v14 = vpack.c.bf16 %v22_v11, %v20_v10  ;;  %v24_v16 = vld [vmem:[%s257_s1 + $0x40] sm:$0xff]  ;;  %v26_v17 = vld [vmem:[%s257_s1 + $0x50] sm:$0xff]  ;;  %v36_v29 = vsub.s32 0, %v35_v28  ;;  %v40_v31 = vsub.s32 1, %v35_v28 }
   0x5   :  { %145 = vmatpush1.bf16.msra.mxu0 %v144_v8  ;;  %162 = vmatpush1.bf16.msra.mxu1 %v144_v8  ;;  %v150_v15 = vpack.c.bf16 %v27_v13, %v25_v12  ;;  %v29_v18 = vld [vmem:[%s257_s1 + $0x68] sm:$0xff]  ;;  %v31_v19 = vld [vmem:[%s257_s1 + $0x78] sm:$0xff]  ;;  %v152_v20 = vpack.c.bf16 %v26_v17, %v24_v16  ;;  %v28_v22 = vld [vmem:[%s257_s1 + $0x60] sm:$0xff] }
   0x6   :  { %147 = vmatprep.subr.bf16.mxu0 %v146_v9  ;;  %159 = vmatprep.subr.bf16.mxu1 %v146_v9  ;;  %v154_v21 = vpack.c.bf16 %v31_v19, %v29_v18  ;;  %v30_v23 = vld [vmem:[%s257_s1 + $0x70] sm:$0xff]  ;;  %v14_v25 = vld [vmem:[%s258_s0] sm:$0xff]  ;;  %v15_v26 = vld [vmem:[%s258_s0 + $0x8] sm:$0xff] }
   0x7   :  { %v156_v24 = vpack.c.bf16 %v30_v23, %v28_v22  ;;  %v32_v30 = vld [vmem:[%s259_s2] sm:$0x3] }
   0x8   :  { %v37_v32 = vrot.slane %v32_v30, %v36_v29  ;;  %v41_v33 = vrot.slane %v32_v30, %v40_v31 }
   0x9   :  { %149 = vmatpush1.bf16.msra.mxu0 %v148_v14  ;;  %163 = vmatpush1.bf16.msra.mxu1 %v148_v14 }
   0xa   :  { %151 = vmatprep.subr.bf16.mxu0 %v150_v15  ;;  %160 = vmatprep.subr.bf16.mxu1 %v150_v15 }
   0xd   :  { %153 = vmatpush1.bf16.msra.mxu0 %v152_v20  ;;  %164 = vmatpush1.bf16.msra.mxu1 %v152_v20 }
   0xe   :  { %155 = vmatprep.subr.bf16.mxu0 %v154_v21  ;;  %161 = vmatprep.subr.bf16.mxu1 %v154_v21 }
  0x11   :  { %157 = vmatpush1.bf16.msra.mxu0 %v156_v24  ;;  %165 = vmatpush1.bf16.msra.mxu1 %v156_v24 }
  0x14   :  { %140 = vmatmul.mubr.msk.f32.vlgmr.msra.gmra.mrb[0].mxu0 %vm44_vm0, %v14_v25  ;;  %141 = vmatmul.mubr.msk.f32.vlgmr.msra.gmra.mrb[0].mxu1 %vm44_vm0, %v15_v26 }
  0xe7   :  { %v117_v34 = vpop.f32.mrb[0].mxu0  ;;  %v123_v35 = vpop.f32.mrb[0].mxu1 }
  0xe8   :  { %v118_v36 = vadd.f32 %v117_v34, %v37_v32  ;;  %v124_v37 = vadd.f32 %v123_v35, %v37_v32  ;;  %v119_v38 = vpop.f32.mrb[1].mxu0  ;;  %v125_v39 = vpop.f32.mrb[1].mxu1 }
  0xe9   :  { %v120_v40 = vadd.f32 %v119_v38, %v41_v33  ;;  %v126_v41 = vadd.f32 %v125_v39, %v41_v33 }
  0xea   :  { %v128_v42 = vmax.f32 %v118_v36, 0.0  ;;  %v130_v43 = vmax.f32 %v124_v37, 0.0 }
  0xeb   :  { %v129_v44 = vmax.f32 %v120_v40, 0.0  ;;  %v131_v45 = vmax.f32 %v126_v41, 0.0 }
  0xec   :  { %132 = vst [vmem:[%s260_s3] sm:$0xff] %v128_v42  ;;  %134 = vst [vmem:[%s260_s3 + $0x10] sm:$0xff] %v130_v43 }
  0xed   :  { %133 = vst [vmem:[%s260_s3 + $0x8] sm:$0xff] %v129_v44  ;;  %135 = vst [vmem:[%s260_s3 + $0x18] sm:$0xff] %v131_v45 }

// kernel: forward.15
= control target key start
LH: loop header
LB: loop body
LE: loop exit
PB: predicated region body
PF: predicated region fallthrough
CT: control target
= control target key end

     0   :  { %vm151_vm3 = vcmask 261120   ;;  %s390_s1 = inlined_call_operand.vmem [shape: f32[256,32], index: 1, kind: input, shape index: {}]   ;;  %s391_s0 = inlined_call_operand.vmem [shape: f32[16,256], index: 0, kind: input, shape index: {}]   ;;  %s392_s2 = inlined_call_operand.vmem [shape: f32[1,32], index: 2, kind: input, shape index: {}]   ;;  %s393_s3 = inlined_call_operand.vmem [shape: f32[16,32], index: 3, kind: output, shape index: {}]  }
   0x1   :  { %v34_v0 = vld [vmem:[%s390_s1 + $0x80] sm:$0xff]  ;;  %v35_v1 = vld [vmem:[%s390_s1 + $0x88] sm:$0xff]  ;;  %v36_v5 = vld [vmem:[%s390_s1 + $0x90] sm:$0xff] }
   0x2   :  { %v18_v2 = vld [vmem:[%s390_s1] sm:$0xff]  ;;  %v197_v3 = vpack.c.bf16 %v35_v1, %v34_v0  ;;  %v19_v4 = vld [vmem:[%s390_s1 + $0x8] sm:$0xff]  ;;  %v37_v6 = vld [vmem:[%s390_s1 + $0x98] sm:$0xff] }
   0x3   :  { %v199_v7 = vpack.c.bf16 %v19_v4, %v18_v2  ;;  %v201_v8 = vpack.c.bf16 %v37_v6, %v36_v5  ;;  %v20_v9 = vld [vmem:[%s390_s1 + $0x10] sm:$0xff]  ;;  %v21_v10 = vld [vmem:[%s390_s1 + $0x18] sm:$0xff]  ;;  %v38_v11 = vld [vmem:[%s390_s1 + $0xa0] sm:$0xff]  ;;  %v132_v2 = vlaneseq }
   0x4   :  { %198 = vmatprep.subr.bf16.mxu0 %v197_v3  ;;  %229 = vmatprep.subr.bf16.mxu1 %v197_v3  ;;  %v39_v12 = vld [vmem:[%s390_s1 + $0xa8] sm:$0xff]  ;;  %v203_v13 = vpack.c.bf16 %v21_v10, %v20_v9  ;;  %v22_v15 = vld [vmem:[%s390_s1 + $0x20] sm:$0xff]  ;;  %v40_v17 = vld [vmem:[%s390_s1 + $0xb0] sm:$0xff] }
   0x5   :  { %200 = vmatpush3.bf16.msra.mxu0 %v199_v7  ;;  %237 = vmatpush3.bf16.msra.mxu1 %v199_v7  ;;  %v205_v14 = vpack.c.bf16 %v39_v12, %v38_v11  ;;  %v23_v16 = vld [vmem:[%s390_s1 + $0x28] sm:$0xff]  ;;  %v41_v18 = vld [vmem:[%s390_s1 + $0xb8] sm:$0xff]  ;;  %v24_v21 = vld [vmem:[%s390_s1 + $0x30] sm:$0xff]  ;;  %v133_v6 = vand.u32 127, %v132_v2 }
   0x6   :  { %202 = vmatprep.subr.bf16.mxu0 %v201_v8  ;;  %230 = vmatprep.subr.bf16.mxu1 %v201_v8  ;;  %v207_v19 = vpack.c.bf16 %v23_v16, %v22_v15  ;;  %v209_v20 = vpack.c.bf16 %v41_v18, %v40_v17  ;;  %v25_v22 = vld [vmem:[%s390_s1 + $0x38] sm:$0xff]  ;;  %v42_v23 = vld [vmem:[%s390_s1 + $0xc0] sm:$0xff]  ;;  %v43_v24 = vld [vmem:[%s390_s1 + $0xc8] sm:$0xff] }
   0x7   :  { %v15_v25 = vld [vmem:[%s391_s0 + $0x8] sm:$0xff]  ;;  %v17_v26 = vld [vmem:[%s391_s0 + $0x18] sm:$0xff]  ;;  %v211_v27 = vpack.c.bf16 %v25_v22, %v24_v21  ;;  %v213_v28 = vpack.c.bf16 %v43_v24, %v42_v23  ;;  %v26_v29 = vld [vmem:[%s390_s1 + $0x40] sm:$0xff]  ;;  %vm146_vm0 = vcmp.ge.s32.totalorder %v133_v6, 24  ;;  %vm147_vm1 = vcmp.lt.s32.totalorder %v133_v6, 28 }
   0x8   :  { %121 = vmatprep.mubr.f32.mxu0 %v15_v25  ;;  %v27_v30 = vld [vmem:[%s390_s1 + $0x48] sm:$0xff]  ;;  %v44_v31 = vld [vmem:[%s390_s1 + $0xd0] sm:$0xff]  ;;  %v45_v32 = vld [vmem:[%s390_s1 + $0xd8] sm:$0xff]  ;;  %126 = vmatprep.mubr.f32.mxu1 %v17_v26 }
   0x9   :  { %204 = vmatpush3.bf16.msra.mxu0 %v203_v13  ;;  %238 = vmatpush3.bf16.msra.mxu1 %v203_v13  ;;  %v215_v33 = vpack.c.bf16 %v27_v30, %v26_v29  ;;  %v217_v34 = vpack.c.bf16 %v45_v32, %v44_v31  ;;  %v28_v35 = vld [vmem:[%s390_s1 + $0x50] sm:$0xff]  ;;  %v29_v36 = vld [vmem:[%s390_s1 + $0x58] sm:$0xff]  ;;  %v46_v37 = vld [vmem:[%s390_s1 + $0xe0] sm:$0xff] }
   0xa   :  { %206 = vmatprep.subr.bf16.mxu0 %v205_v14  ;;  %231 = vmatprep.subr.bf16.mxu1 %v205_v14  ;;  %v47_v38 = vld [vmem:[%s390_s1 + $0xe8] sm:$0xff]  ;;  %v219_v39 = vpack.c.bf16 %v29_v36, %v28_v35  ;;  %v30_v41 = vld [vmem:[%s390_s1 + $0x60] sm:$0xff]  ;;  %v48_v43 = vld [vmem:[%s390_s1 + $0xf0] sm:$0xff] }
   0xb   :  { %v221_v40 = vpack.c.bf16 %v47_v38, %v46_v37  ;;  %v31_v42 = vld [vmem:[%s390_s1 + $0x68] sm:$0xff]  ;;  %v49_v44 = vld [vmem:[%s390_s1 + $0xf8] sm:$0xff]  ;;  %v32_v47 = vld [vmem:[%s390_s1 + $0x70] sm:$0xff] }
   0xc   :  { %v223_v45 = vpack.c.bf16 %v31_v42, %v30_v41  ;;  %v225_v46 = vpack.c.bf16 %v49_v44, %v48_v43  ;;  %v33_v48 = vld [vmem:[%s390_s1 + $0x78] sm:$0xff]  ;;  %v14_v50 = vld [vmem:[%s391_s0] sm:$0xff]  ;;  %v16_v51 = vld [vmem:[%s391_s0 + $0x10] sm:$0xff] }
   0xd   :  { %208 = vmatpush3.bf16.msra.mxu0 %v207_v19  ;;  %239 = vmatpush3.bf16.msra.mxu1 %v207_v19  ;;  %v227_v49 = vpack.c.bf16 %v33_v48, %v32_v47  ;;  %v158_v54 = vld [vmem:[%s392_s2] ss:$0 sm:$0xff]  ;;  %vm148_vm2 = vmand %vm146_vm0, %vm147_vm1 }
   0xe   :  { %210 = vmatprep.subr.bf16.mxu0 %v209_v20  ;;  %232 = vmatprep.subr.bf16.mxu1 %v209_v20 }
  0x11   :  { %212 = vmatpush3.bf16.msra.mxu0 %v211_v27  ;;  %240 = vmatpush3.bf16.msra.mxu1 %v211_v27 }
  0x12   :  { %214 = vmatprep.subr.bf16.mxu0 %v213_v28  ;;  %233 = vmatprep.subr.bf16.mxu1 %v213_v28 }
  0x15   :  { %216 = vmatpush3.bf16.msra.mxu0 %v215_v33  ;;  %241 = vmatpush3.bf16.msra.mxu1 %v215_v33 }
  0x16   :  { %218 = vmatprep.subr.bf16.mxu0 %v217_v34  ;;  %234 = vmatprep.subr.bf16.mxu1 %v217_v34 }
  0x19   :  { %220 = vmatpush3.bf16.msra.mxu0 %v219_v39  ;;  %242 = vmatpush3.bf16.msra.mxu1 %v219_v39 }
  0x1a   :  { %222 = vmatprep.subr.bf16.mxu0 %v221_v40  ;;  %235 = vmatprep.subr.bf16.mxu1 %v221_v40 }
  0x1d   :  { %224 = vmatpush3.bf16.msra.mxu0 %v223_v45  ;;  %243 = vmatpush3.bf16.msra.mxu1 %v223_v45 }
  0x1e   :  { %226 = vmatprep.subr.bf16.mxu0 %v225_v46  ;;  %236 = vmatprep.subr.bf16.mxu1 %v225_v46 }
  0x21   :  { %228 = vmatpush3.bf16.msra.mxu0 %v227_v49  ;;  %244 = vmatpush3.bf16.msra.mxu1 %v227_v49 }
  0x24   :  { %122 = vmatmul.mubr.f32.vlgmr.msra.gmra.mrb[0].mxu0 %v14_v50  ;;  %127 = vmatmul.mubr.f32.vlgmr.msra.gmra.mrb[0].mxu1 %v16_v51 }
  0xf7   :  { %v191_v52 = vpop.f32.mrb[0].mxu0  ;;  %v194_v53 = vpop.f32.mrb[0].mxu1 }
  0xf8   :  { %v192_v55 = vpop.f32.mrb[1].mxu0  ;;  %v195_v56 = vpop.f32.mrb[1].mxu1 }
  0xf9   :  { %v193_v57 = vadd.f32 %v192_v55, %v191_v52  ;;  %v196_v58 = vadd.f32 %v195_v56, %v194_v53 }
  0xfb   :  { %v124_v59 = vadd.f32 %v193_v57, %v158_v54  ;;  %v129_v60 = vadd.f32 %v196_v58, %v158_v54 }
  0xfd   :  { %v134_v61 = vsub.f32 0.0, %v124_v59  ;;  %v135_v62 = vsub.f32 0.0, %v129_v60 }
  0xff   :  { %v136_v63 = vmul.f32 1.442695, %v134_v61  ;;  %v138_v0 = vmul.f32 1.442695, %v135_v62 }
 0x101   :  { %245 = vpow2.f32 %v136_v63 }
 0x102   :  { %247 = vpow2.f32 %v138_v0 }
 0x10b   :  { %v246_v1 = vpop.eup %245 }
 0x10c   :  { %v248_v3 = vpop.eup %247  ;;  %v140_v4 = vadd.f32 1.0, %v246_v1 }
 0x10d   :  { %v141_v5 = vadd.f32 1.0, %v248_v3 }
 0x10e   :  { %249 = vrcp.f32 %v140_v4 }
 0x10f   :  { %251 = vrcp.f32 %v141_v5 }
 0x118   :  { %v250_v7 = vpop.eup %249 }
 0x119   :  { %v252_v8 = vpop.eup %251  ;;  %v149_v9 = vsel %vm148_vm2, %v250_v7, %v124_v59 }
 0x11a   :  { %152 = vst.msk [vmem:[%s393_s3] sm:$0xff] %vm151_vm3, %v149_v9  ;;  %v150_v10 = vsel %vm148_vm2, %v252_v8, %v129_v60 }
 0x11b   :  { %153 = vst.msk [vmem:[%s393_s3 + $0x8] sm:$0xff] %vm151_vm3, %v150_v10 }

</bundles_post_ra>
